<compile_context>
chip_gen: v6e
topology: v6e:2x2x1
jax: 0.10.0
libtpu: 0.0.40
codegen_flags: <defaults>
</compile_context>

<pallas_src>
import math
from functools import partial

import jax
import jax.numpy as jnp
from jax.experimental import pallas as pl
from jax.experimental.pallas import tpu as pltpu


LANE = 128
MASK_NEG = -1e9

BLOCK_KEYS = ("ln1_g", "ln1_b", "q_w", "q_b", "k_w", "k_b", "v_w", "v_b",
              "pj_w", "pj_b", "ln2_g", "ln2_b", "fc1_w", "fc1_b", "fc2_w", "fc2_b")
N_BLOCK_REFS = len(BLOCK_KEYS)


# ----------------------------------------------------------------------------
# In-kernel math helpers (operate on loaded values; everything stays 2D)
# ----------------------------------------------------------------------------
def _ln_f(x, g, b, eps):
    mean = jnp.mean(x, axis=-1, keepdims=True)
    xc = x - mean
    var = jnp.mean(xc * xc, axis=-1, keepdims=True)
    return xc * jax.lax.rsqrt(var + eps) * g + b


def _gelu_f(x):
    # TODO(synk): PyTorch nn.GELU defaults to the exact erf form; tanh approx used here.
    return 0.5 * x * (1.0 + jnp.tanh(0.7978845608028654 * (x + 0.044715 * x * x * x)))


def _softmax_rows(s):
    s = s - jnp.max(s, axis=-1, keepdims=True)
    p = jnp.exp(s)
    return p * pl.reciprocal(jnp.sum(p, axis=-1, keepdims=True), approx=True)


def _vit_block_f(x, blk, l, num_heads, eps, attn_mask):
    """Pre-norm ViT block. blk refs are stacked over layers (and layer*head)."""
    (ln1_g, ln1_b, q_w, q_b, k_w, k_b, v_w, v_b,
     pj_w, pj_b, ln2_g, ln2_b, fc1_w, fc1_b, fc2_w, fc2_b) = blk

    h_in = _ln_f(x, ln1_g[l], ln1_b[l], eps)
    dh = q_w.shape[-1]
    scale = dh ** -0.5

    attn_out = None
    for hd in range(num_heads):
        i = l * num_heads + hd
        q = jnp.dot(h_in, q_w[i], preferred_element_type=jnp.float32) + q_b[i]
        k = jnp.dot(h_in, k_w[i], preferred_element_type=jnp.float32) + k_b[i]
        v = jnp.dot(h_in, v_w[i], preferred_element_type=jnp.float32) + v_b[i]
        s = jax.lax.dot_general(q, k, (((1,), (1,)), ((), ())),
                                preferred_element_type=jnp.float32) * scale + attn_mask
        p = _softmax_rows(s)
        o_h = jnp.dot(p, v, preferred_element_type=jnp.float32)
        contrib = jnp.dot(o_h, pj_w[i], preferred_element_type=jnp.float32)
        attn_out = contrib if attn_out is None else attn_out + contrib

    x = x + attn_out + pj_b[l]

    h2 = _ln_f(x, ln2_g[l], ln2_b[l], eps)
    h2 = _gelu_f(jnp.dot(h2, fc1_w[l], preferred_element_type=jnp.float32) + fc1_b[l])
    h2 = jnp.dot(h2, fc2_w[l], preferred_element_type=jnp.float32) + fc2_b[l]
    return x + h2


# ----------------------------------------------------------------------------
# Fused stage kernels
# ----------------------------------------------------------------------------
def _encoder_kernel(*refs, depth, num_heads, eps):
    i0 = 0
    patches_ref, mask_ref, pw_ref, pb_ref, pos_ref = refs[i0:i0 + 5]; i0 += 5
    blk = refs[i0:i0 + N_BLOCK_REFS]; i0 += N_BLOCK_REFS
    ng_ref, nb_ref = refs[i0:i0 + 2]; i0 += 2
    out_ref = refs[i0]

    x = jnp.dot(patches_ref[...], pw_ref[...],
                preferred_element_type=jnp.float32) + pb_ref[...]
    x = x + pos_ref[...]
    mask = mask_ref[...]
    for l in range(depth):
        x = _vit_block_f(x, blk, l, num_heads, eps, mask)
    out_ref[...] = _ln_f(x, ng_ref[...], nb_ref[...], eps)


def _fim_vq_kernel(*refs, depth, num_heads, eps_fim, eps_q, k_high, beta, threshold):
    i0 = 0
    x_ref, mask_ref, fiw_ref, fib_ref = refs[i0:i0 + 4]; i0 += 4
    blk = refs[i0:i0 + N_BLOCK_REFS]; i0 += N_BLOCK_REFS
    fng_ref, fnb_ref, fhw_ref, fhb_ref = refs[i0:i0 + 4]; i0 += 4
    e2cw_ref, e2cb_ref, nbg_ref, nbb_ref = refs[i0:i0 + 4]; i0 += 4
    cb_ref = refs[i0]; i0 += 1
    tok_ref, logit_ref, loss_ref = refs[i0:i0 + 3]

    x = x_ref[...]
    mask = mask_ref[...]

    # --- FeatureImportanceTransformer ---
    f = jnp.dot(x, fiw_ref[...], preferred_element_type=jnp.float32) + fib_ref[...]
    for l in range(depth):
        f = _vit_block_f(f, blk, l, num_heads, eps_fim, mask)
    f = _ln_f(f, fng_ref[...], fnb_ref[...], eps_fim)
    logits = jnp.dot(f, fhw_ref[...], preferred_element_type=jnp.float32) + fhb_ref[...]
    scores = 1.0 / (1.0 + jnp.exp(-logits))                              # (M, 1)

    # --- encoder_to_channel_proj + norm_before_quantizer ---
    xp = jnp.dot(x, e2cw_ref[...], preferred_element_type=jnp.float32) + e2cb_ref[...]
    z = _ln_f(xp, nbg_ref[...], nbb_ref[...], eps_q)                      # (M, Dq)

    # --- hierarchical VQ against concat(high, low) codebook + FIM routing ---
    e = cb_ref[...]                                                       # (K, Dq)
    m_tok, dq = z.shape
    k_all = e.shape[0]
    dots = jax.lax.dot_general(z, e, (((1,), (1,)), ((), ())),
                               preferred_element_type=jnp.float32)        # (M, K)
    e_sq = jax.lax.dot_general(jnp.ones((1, dq), jnp.float32), e * e,
                               (((1,), (1,)), ((), ())),
                               preferred_element_type=jnp.float32)        # (1, K)
    d = e_sq - 2.0 * dots        # ||z||^2 dropped (constant per row, argmin-equivalent)

    iota = jax.lax.broadcasted_iota(jnp.int32, (m_tok, k_all), 1)
    in_high = (iota < k_high).astype(jnp.float32)                         # (M, K)
    big = jnp.float32(1e30)
    d_high = in_high * d + (1.0 - in_high) * big      # only high-codebook entries valid
    d_low = (1.0 - in_high) * d + in_high * big       # only low-codebook entries valid
    r = (scores > threshold).astype(jnp.float32)                          # (M, 1)
    d_sel = r * d_high + (1.0 - r) * d_low

    min_d = jnp.min(d_sel, axis=-1, keepdims=True)
    idx = jnp.min(jnp.where(d_sel <= min_d, iota, k_all), axis=-1, keepdims=True)
    onehot = (iota == idx).astype(jnp.float32)
    qz = jnp.dot(onehot, e, preferred_element_type=jnp.float32)           # (M, Dq)

    diff = z - qz
    # ||sg(z)-e||^2 + beta*||z-sg(e)||^2 -> (1+beta)*mean((z-e)^2) in forward value
    per_tok = jnp.mean(diff * diff, axis=-1, keepdims=True) * (1.0 + beta)
    wloss = scores * per_tok                                              # (M, 1)

    pad = jnp.zeros((m_tok, logit_ref.shape[-1]), jnp.float32)
    tok_ref[...] = qz
    logit_ref[...] = logits + pad      # lane-dense (M, 128) store (avoid masked vst)
    loss_ref[...] = wloss + pad


def _decoder_kernel(*refs, depth, num_heads, eps):
    i0 = 0
    tok_ref, mask_ref, cw_ref, cb_ref, pos_ref = refs[i0:i0 + 5]; i0 += 5
    blk = refs[i0:i0 + N_BLOCK_REFS]; i0 += N_BLOCK_REFS
    ng_ref, nb_ref, hw_ref, hb_ref = refs[i0:i0 + 4]; i0 += 4
    out_ref = refs[i0]

    x = jnp.dot(tok_ref[...], cw_ref[...],
                preferred_element_type=jnp.float32) + cb_ref[...]
    x = x + pos_ref[...]
    mask = mask_ref[...]
    for l in range(depth):
        x = _vit_block_f(x, blk, l, num_heads, eps, mask)
    x = _ln_f(x, ng_ref[...], nb_ref[...], eps)
    out_ref[...] = jnp.dot(x, hw_ref[...],
                           preferred_element_type=jnp.float32) + hb_ref[...]


# ----------------------------------------------------------------------------
# pallas_call wrappers (grid=(1,), full-array blocks resident in VMEM)
# ----------------------------------------------------------------------------
def _full_in_specs(arrays):
    return [pl.BlockSpec(a.shape, lambda i, nd=a.ndim: (0,) * nd) for a in arrays]


def _full_out_spec(sds):
    return pl.BlockSpec(sds.shape, lambda i, nd=len(sds.shape): (0,) * nd)


_COMPILER_PARAMS = pltpu.CompilerParams(dimension_semantics=("arbitrary",))


def encoder_stage(params, patches, attn_mask, cfg, B, N):
    M, D = B * N, cfg["enc_dim"]
    blk = params["enc_blocks"]
    inputs = ([patches, attn_mask, params["patch_w"], params["patch_b"],
               jnp.tile(params["enc_pos"], (B, 1))]
              + [blk[k] for k in BLOCK_KEYS]
              + [params["enc_norm_g"], params["enc_norm_b"]])
    out_shape = jax.ShapeDtypeStruct((M, D), jnp.float32)
    return pl.pallas_call(
        partial(_encoder_kernel, depth=cfg["enc_depth"],
                num_heads=cfg["enc_heads"], eps=1e-5),
        out_shape=out_shape,
        grid=(1,),
        in_specs=_full_in_specs(inputs),
        out_specs=_full_out_spec(out_shape),
        compiler_params=_COMPILER_PARAMS,
    )(*inputs)


def fim_vq_stage(params, x_enc, attn_mask, cfg, B, N):
    M, Dq = B * N, cfg["quantizer_dim"]
    blk = params["fim_blocks"]
    inputs = ([x_enc, attn_mask, params["fim_in_w"], params["fim_in_b"]]
              + [blk[k] for k in BLOCK_KEYS]
              + [params["fim_norm_g"], params["fim_norm_b"],
                 params["fim_head_w"], params["fim_head_b"],
                 params["e2c_w"], params["e2c_b"],
                 params["nbq_g"], params["nbq_b"],
                 params["codebook_all"]])
    out_shapes = (
        jax.ShapeDtypeStruct((M, Dq), jnp.float32),    # quantized + routed tokens
        jax.ShapeDtypeStruct((M, LANE), jnp.float32),  # FIM raw logits (lane-broadcast)
        jax.ShapeDtypeStruct((M, LANE), jnp.float32),  # FIM-weighted per-token VQ loss
    )
    return pl.pallas_call(
        partial(_fim_vq_kernel, depth=cfg["fim_depth"], num_heads=cfg["fim_heads"],
                eps_fim=1e-6, eps_q=1e-5, k_high=2 ** cfg["bits_vq_high"],
                beta=cfg["commitment"], threshold=cfg["fim_routing_threshold"]),
        out_shape=out_shapes,
        grid=(1,),
        in_specs=_full_in_specs(inputs),
        out_specs=tuple(_full_out_spec(s) for s in out_shapes),
        compiler_params=_COMPILER_PARAMS,
    )(*inputs)


def decoder_stage(params, tokens, attn_mask, cfg, B, N):
    M = B * N
    p = cfg["patch_size"]
    out_dim = p * p * cfg["in_chans"]
    blk = params["dec_blocks"]
    inputs = ([tokens, attn_mask, params["c2d_w"], params["c2d_b"],
               jnp.tile(params["dec_pos"], (B, 1))]
              + [blk[k] for k in BLOCK_KEYS]
              + [params["dec_norm_g"], params["dec_norm_b"],
                 params["dec_head_w"], params["dec_head_b"]])
    out_shape = jax.ShapeDtypeStruct((M, out_dim), jnp.float32)
    return pl.pallas_call(
        partial(_decoder_kernel, depth=cfg["dec_depth"],
                num_heads=cfg["dec_heads"], eps=1e-5),
        out_shape=out_shape,
        grid=(1,),
        in_specs=_full_in_specs(inputs),
        out_specs=_full_out_spec(out_shape),
        compiler_params=_COMPILER_PARAMS,
    )(*inputs)


# ----------------------------------------------------------------------------
# Plain-JAX glue: init, patchify, channel, unpatchify
# ----------------------------------------------------------------------------
class KeyGen:
    def __init__(self, key):
        self.key = key

    def __call__(self):
        self.key, sub = jax.random.split(self.key)
        return sub


def xavier(kg, shape):
    fan_in, fan_out = shape
    limit = math.sqrt(6.0 / (fan_in + fan_out))
    return jax.random.uniform(kg(), shape, minval=-limit, maxval=limit, dtype=jnp.float32)


def sincos_table(n_pos, dim):
    pos = jnp.arange(n_pos, dtype=jnp.float32)[:, None]
    i = jnp.arange(dim, dtype=jnp.float32)[None, :]
    angle = pos / jnp.power(10000.0, 2.0 * jnp.floor(i / 2.0) / dim)
    even = (jnp.arange(dim) % 2 == 0)[None, :]
    return jnp.where(even, jnp.sin(angle), jnp.cos(angle)).astype(jnp.float32)


def make_attn_mask(B, N):
    """Block-diagonal additive mask so tokens only attend within their own image."""
    bid = jnp.repeat(jnp.arange(B), N)
    same = bid[:, None] == bid[None, :]
    return jnp.where(same, 0.0, MASK_NEG).astype(jnp.float32)


def extract_patches(img, patch):
    """NCHW image -> (B, N, C*p*p) with per-patch flattening order (C, ph, pw)."""
    B, C, H, W = img.shape
    nh, nw = H // patch, W // patch
    x = img.reshape(B, C, nh, patch, nw, patch)
    x = x.transpose(0, 2, 4, 1, 3, 5)
    return x.reshape(B, nh * nw, C * patch * patch)


def unpatchify(px, nh, nw, patch, chans):
    """(B, N, p*p*C) -> (B, C, H, W); patch flattened as (p, p, C)."""
    B = px.shape[0]
    x = px.reshape(B, nh, nw, patch, patch, chans)
    x = x.transpose(0, 5, 1, 3, 2, 4)
    return x.reshape(B, chans, nh * patch, nw * patch)


def rayleigh_channel(x, n_var, key):
    """Rayleigh fading with perfect CSI equalisation (2x2 real rotation form)."""
    # TODO(synk): single fading coefficient shared across the batch (as before);
    # per-sample fading would need the reference Channels implementation.
    shape = x.shape
    B = shape[0]
    k1, k2, k3 = jax.random.split(key, 3)
    h_r = jax.random.normal(k1, ()) * math.sqrt(0.5)
    h_i = jax.random.normal(k2, ()) * math.sqrt(0.5)
    H = jnp.array([[h_r, -h_i], [h_i, h_r]], dtype=jnp.float32)
    tx = x.reshape(B, -1, 2) @ H
    rx = tx + jax.random.normal(k3, tx.shape, dtype=jnp.float32) * jnp.sqrt(n_var)
    rx = rx @ jnp.linalg.inv(H)
    return rx.reshape(shape)


# ----------------------------------------------------------------------------
# Parameter construction (deterministic; xavier Linear, ones/zeros LayerNorm)
# ----------------------------------------------------------------------------
CFG = dict(
    img_size=16, patch_size=4, in_chans=3,
    enc_dim=32, enc_depth=2, enc_heads=4,
    dec_dim=32, dec_depth=1, dec_heads=4,
    mlp_ratio=4.0,
    quantizer_dim=32, bits_vq_high=4, bits_vq_low=3, commitment=0.25,
    fim_dim=16, fim_depth=1, fim_heads=2,
    fim_routing_threshold=0.6,
)


def make_stacked_blocks(kg, depth, dim, hidden, heads):
    """Build ViT block params, pre-split per head, stacked over (layer [*head])."""
    dh = dim // heads
    per_layer = []
    for _ in range(depth):
        qkv_w = xavier(kg, (dim, 3 * dim))
        qkv_b = jnp.zeros((3 * dim,), jnp.float32)
        proj_w = xavier(kg, (dim, dim))
        w4 = qkv_w.reshape(dim, 3, heads, dh)          # (D, 3, H, dh)
        b4 = qkv_b.reshape(3, heads, 1, dh)            # (3, H, 1, dh)
        per_layer.append(dict(
            ln1_g=jnp.ones((1, dim), jnp.float32), ln1_b=jnp.zeros((1, dim), jnp.float32),
            q_w=jnp.transpose(w4[:, 0], (1, 0, 2)), q_b=b4[0],   # (H, D, dh), (H, 1, dh)
            k_w=jnp.transpose(w4[:, 1], (1, 0, 2)), k_b=b4[1],
            v_w=jnp.transpose(w4[:, 2], (1, 0, 2)), v_b=b4[2],
            pj_w=proj_w.reshape(heads, dh, dim),                 # (H, dh, D)
            pj_b=jnp.zeros((1, dim), jnp.float32),
            ln2_g=jnp.ones((1, dim), jnp.float32), ln2_b=jnp.zeros((1, dim), jnp.float32),
            fc1_w=xavier(kg, (dim, hidden)), fc1_b=jnp.zeros((1, hidden), jnp.float32),
            fc2_w=xavier(kg, (hidden, dim)), fc2_b=jnp.zeros((1, dim), jnp.float32),
        ))
    stacked = {}
    for k in BLOCK_KEYS:
        arr = jnp.stack([ly[k] for ly in per_layer], axis=0)     # (L, ...)
        if k in ("q_w", "q_b", "k_w", "k_b", "v_w", "v_b", "pj_w"):
            arr = arr.reshape((depth * heads,) + arr.shape[2:])  # (L*H, ...)
        stacked[k] = arr
    return stacked


def init_params(key, cfg):
    kg = KeyGen(key)
    p = cfg["patch_size"]
    nh = nw = cfg["img_size"] // p
    N = nh * nw
    D, Dq, Dd, Df = cfg["enc_dim"], cfg["quantizer_dim"], cfg["dec_dim"], cfg["fim_dim"]
    enc_hidden = int(D * cfg["mlp_ratio"])
    dec_hidden = int(Dd * cfg["mlp_ratio"])
    fim_hidden = int(Df * cfg["mlp_ratio"])

    return dict(
        # encoder
        patch_w=xavier(kg, (cfg["in_chans"] * p * p, D)),
        patch_b=jnp.zeros((1, D), jnp.float32),
        enc_pos=sincos_table(N, D),
        enc_blocks=make_stacked_blocks(kg, cfg["enc_depth"], D, enc_hidden, cfg["enc_heads"]),
        enc_norm_g=jnp.ones((1, D), jnp.float32),
        enc_norm_b=jnp.zeros((1, D), jnp.float32),
        # FIM
        fim_in_w=xavier(kg, (D, Df)),
        fim_in_b=jnp.zeros((1, Df), jnp.float32),
        fim_blocks=make_stacked_blocks(kg, cfg["fim_depth"], Df, fim_hidden, cfg["fim_heads"]),
        fim_norm_g=jnp.ones((1, Df), jnp.float32),
        fim_norm_b=jnp.zeros((1, Df), jnp.float32),
        fim_head_w=xavier(kg, (Df, 1)),
        fim_head_b=jnp.zeros((1, 1), jnp.float32),
        # projection / quantizers (high codebook rows first, then low)
        e2c_w=xavier(kg, (D, Dq)),
        e2c_b=jnp.zeros((1, Dq), jnp.float32),
        nbq_g=jnp.ones((1, Dq), jnp.float32),
        nbq_b=jnp.zeros((1, Dq), jnp.float32),
        codebook_all=jnp.concatenate([
            jax.random.normal(kg(), (2 ** cfg["bits_vq_high"], Dq), jnp.float32) * 0.1,
            jax.random.normal(kg(), (2 ** cfg["bits_vq_low"], Dq), jnp.float32) * 0.1,
        ], axis=0),
        c2d_w=xavier(kg, (Dq, Dd)),
        c2d_b=jnp.zeros((1, Dd), jnp.float32),
        # decoder
        dec_pos=sincos_table(N, Dd),
        dec_blocks=make_stacked_blocks(kg, cfg["dec_depth"], Dd, dec_hidden, cfg["dec_heads"]),
        dec_norm_g=jnp.ones((1, Dd), jnp.float32),
        dec_norm_b=jnp.zeros((1, Dd), jnp.float32),
        dec_head_w=xavier(kg, (Dd, p * p * cfg["in_chans"])),
        dec_head_b=jnp.zeros((1, p * p * cfg["in_chans"]), jnp.float32),
    )


# ----------------------------------------------------------------------------
# Forward pass (eval path: _eval=True, eval_snr_db=30, bm_pos=None -> no mask)
# ----------------------------------------------------------------------------
def forward(params, img, channel_key, cfg):
    B, C, H, W = img.shape
    p = cfg["patch_size"]
    nh, nw = H // p, W // p
    N = nh * nw
    M = B * N

    attn_mask = make_attn_mask(B, N)                                # (M, M)
    patches = extract_patches(img, p).reshape(M, -1)                # (M, C*p*p)

    # --- img_encoder (ViTEncoder_Van; bm_pos=None -> all patches visible) ---
    x_enc = encoder_stage(params, patches, attn_mask, cfg, B, N)    # (M, D)

    # --- FIM + projection + LN + hierarchical VQ + routing (fused) ---
    final_tokens, logits_pad, wloss_pad = fim_vq_stage(params, x_enc, attn_mask, cfg, B, N)
    fim_raw_logits = logits_pad[:, :1].reshape(B, N, 1)
    vq_loss = jnp.sum(wloss_pad[:, 0]) / (B * N)

    # --- channel simulator (eval: SNR = 30 dB) ---
    n_var = 10.0 ** (-30.0 / 10.0)
    tokens = final_tokens.reshape(B, N, cfg["quantizer_dim"])
    tokens_after_channel = rayleigh_channel(tokens, n_var, channel_key)

    # --- channel_to_decoder_proj + img_decoder (fused) ---
    px = decoder_stage(params, tokens_after_channel.reshape(M, -1), attn_mask, cfg, B, N)
    reconstructed_image = unpatchify(px.reshape(B, N, -1), nh, nw, p, C)

    # TODO(synk): straight-through VQ gradient and training-time SNR sampling /
    # dropout paths are not represented (forward/eval semantics only).
    # TODO(synk): optional bf16 MXU inputs (v6e/v7x) left out to keep fp32 semantics.
    return dict(
        reconstructed_image=reconstructed_image,
        vq_loss=vq_loss,
        fim_importance_scores=fim_raw_logits,
    )


# ----------------------------------------------------------------------------
if __name__ == "__main__":
    cfg = CFG
    key = jax.random.PRNGKey(0)
    params = init_params(key, cfg)
    img = jax.random.normal(jax.random.fold_in(key, 123),
                            (2, cfg["in_chans"], cfg["img_size"], cfg["img_size"]),
                            dtype=jnp.float32)

    fwd = jax.jit(partial(forward, cfg=cfg))
    out = fwd(params, img, jax.random.fold_in(key, 7))
    jax.block_until_ready(out)

    assert out["reconstructed_image"].shape == (2, 3, 16, 16)
    assert out["fim_importance_scores"].shape == (2, 16, 1)
    assert out["vq_loss"].shape == ()
    print("KERNEL_OK")
</pallas_src>

<mosaic_0001>
module attributes {stable_mosaic.version = 11 : i64} {
  func.func @_encoder_kernel(%arg0: i32, %arg1: memref<32x48xf32, #tpu.memory_space<vmem>>, %arg2: memref<32x32xf32, #tpu.memory_space<vmem>>, %arg3: memref<48x32xf32, #tpu.memory_space<vmem>>, %arg4: memref<1x32xf32, #tpu.memory_space<vmem>>, %arg5: memref<32x32xf32, #tpu.memory_space<vmem>>, %arg6: memref<2x1x32xf32, #tpu.memory_space<vmem>>, %arg7: memref<2x1x32xf32, #tpu.memory_space<vmem>>, %arg8: memref<8x32x8xf32, #tpu.memory_space<vmem>>, %arg9: memref<8x1x8xf32, #tpu.memory_space<vmem>>, %arg10: memref<8x32x8xf32, #tpu.memory_space<vmem>>, %arg11: memref<8x1x8xf32, #tpu.memory_space<vmem>>, %arg12: memref<8x32x8xf32, #tpu.memory_space<vmem>>, %arg13: memref<8x1x8xf32, #tpu.memory_space<vmem>>, %arg14: memref<8x8x32xf32, #tpu.memory_space<vmem>>, %arg15: memref<2x1x32xf32, #tpu.memory_space<vmem>>, %arg16: memref<2x1x32xf32, #tpu.memory_space<vmem>>, %arg17: memref<2x1x32xf32, #tpu.memory_space<vmem>>, %arg18: memref<2x32x128xf32, #tpu.memory_space<vmem>>, %arg19: memref<2x1x128xf32, #tpu.memory_space<vmem>>, %arg20: memref<2x128x32xf32, #tpu.memory_space<vmem>>, %arg21: memref<2x1x32xf32, #tpu.memory_space<vmem>>, %arg22: memref<1x32xf32, #tpu.memory_space<vmem>>, %arg23: memref<1x32xf32, #tpu.memory_space<vmem>>, %arg24: memref<32x32xf32, #tpu.memory_space<vmem>>) attributes {dimension_semantics = [#tpu.dimension_semantics<arbitrary>], iteration_bounds = array<i64: 1>, scalar_prefetch = 0 : i64, scratch_operands = 0 : i64, tpu.core_type = #tpu.core_type<tc>, window_params = [{pipeline_mode = #tpu.pipeline_mode<synchronous>, transform_indices = @transform_0, window_bounds = array<i64: 32, 48>}, {pipeline_mode = #tpu.pipeline_mode<synchronous>, transform_indices = @transform_1, window_bounds = array<i64: 32, 32>}, {pipeline_mode = #tpu.pipeline_mode<synchronous>, transform_indices = @transform_2, window_bounds = array<i64: 48, 32>}, {pipeline_mode = #tpu.pipeline_mode<synchronous>, transform_indices = @transform_3, window_bounds = array<i64: 1, 32>}, {pipeline_mode = #tpu.pipeline_mode<synchronous>, transform_indices = @transform_4, window_bounds = array<i64: 32, 32>}, {pipeline_mode = #tpu.pipeline_mode<synchronous>, transform_indices = @transform_5, window_bounds = array<i64: 2, 1, 32>}, {pipeline_mode = #tpu.pipeline_mode<synchronous>, transform_indices = @transform_6, window_bounds = array<i64: 2, 1, 32>}, {pipeline_mode = #tpu.pipeline_mode<synchronous>, transform_indices = @transform_7, window_bounds = array<i64: 8, 32, 8>}, {pipeline_mode = #tpu.pipeline_mode<synchronous>, transform_indices = @transform_8, window_bounds = array<i64: 8, 1, 8>}, {pipeline_mode = #tpu.pipeline_mode<synchronous>, transform_indices = @transform_9, window_bounds = array<i64: 8, 32, 8>}, {pipeline_mode = #tpu.pipeline_mode<synchronous>, transform_indices = @transform_10, window_bounds = array<i64: 8, 1, 8>}, {pipeline_mode = #tpu.pipeline_mode<synchronous>, transform_indices = @transform_11, window_bounds = array<i64: 8, 32, 8>}, {pipeline_mode = #tpu.pipeline_mode<synchronous>, transform_indices = @transform_12, window_bounds = array<i64: 8, 1, 8>}, {pipeline_mode = #tpu.pipeline_mode<synchronous>, transform_indices = @transform_13, window_bounds = array<i64: 8, 8, 32>}, {pipeline_mode = #tpu.pipeline_mode<synchronous>, transform_indices = @transform_14, window_bounds = array<i64: 2, 1, 32>}, {pipeline_mode = #tpu.pipeline_mode<synchronous>, transform_indices = @transform_15, window_bounds = array<i64: 2, 1, 32>}, {pipeline_mode = #tpu.pipeline_mode<synchronous>, transform_indices = @transform_16, window_bounds = array<i64: 2, 1, 32>}, {pipeline_mode = #tpu.pipeline_mode<synchronous>, transform_indices = @transform_17, window_bounds = array<i64: 2, 32, 128>}, {pipeline_mode = #tpu.pipeline_mode<synchronous>, transform_indices = @transform_18, window_bounds = array<i64: 2, 1, 128>}, {pipeline_mode = #tpu.pipeline_mode<synchronous>, transform_indices = @transform_19, window_bounds = array<i64: 2, 128, 32>}, {pipeline_mode = #tpu.pipeline_mode<synchronous>, transform_indices = @transform_20, window_bounds = array<i64: 2, 1, 32>}, {pipeline_mode = #tpu.pipeline_mode<synchronous>, transform_indices = @transform_21, window_bounds = array<i64: 1, 32>}, {pipeline_mode = #tpu.pipeline_mode<synchronous>, transform_indices = @transform_22, window_bounds = array<i64: 1, 32>}, {pipeline_mode = #tpu.pipeline_mode<synchronous>, transform_indices = @transform_23, window_bounds = array<i64: 32, 32>}]} {
    %c0 = arith.constant 0 : index
    %c0_0 = arith.constant 0 : index
    %0 = vector.load %arg1[%c0, %c0_0] : memref<32x48xf32, #tpu.memory_space<vmem>>, vector<32x48xf32>
    %c0_1 = arith.constant 0 : index
    %c0_2 = arith.constant 0 : index
    %1 = vector.load %arg3[%c0_1, %c0_2] : memref<48x32xf32, #tpu.memory_space<vmem>>, vector<48x32xf32>
    %cst = arith.constant dense<0.000000e+00> : vector<32x32xf32>
    %2 = tpu.matmul %0, %1, %cst {dimension_numbers = #tpu.dot_dimension_numbers<[1], [0], [0], [1], [0, 0, 1, 1], [], []>} : vector<32x48xf32>, vector<48x32xf32>, vector<32x32xf32> -> vector<32x32xf32>
    %c0_3 = arith.constant 0 : index
    %c0_4 = arith.constant 0 : index
    %3 = vector.load %arg4[%c0_3, %c0_4] : memref<1x32xf32, #tpu.memory_space<vmem>>, vector<1x32xf32>
    %4 = vector.broadcast %3 : vector<1x32xf32> to vector<32x32xf32>
    %5 = arith.addf %2, %4 : vector<32x32xf32>
    %c0_5 = arith.constant 0 : index
    %c0_6 = arith.constant 0 : index
    %6 = vector.load %arg5[%c0_5, %c0_6] : memref<32x32xf32, #tpu.memory_space<vmem>>, vector<32x32xf32>
    %7 = arith.addf %5, %6 : vector<32x32xf32>
    %c0_7 = arith.constant 0 : index
    %c0_8 = arith.constant 0 : index
    %8 = vector.load %arg2[%c0_7, %c0_8] : memref<32x32xf32, #tpu.memory_space<vmem>>, vector<32x32xf32>
    %c0_9 = arith.constant 0 : index
    %c0_10 = arith.constant 0 : index
    %c0_11 = arith.constant 0 : index
    %9 = vector.load %arg6[%c0_9, %c0_10, %c0_11] : memref<2x1x32xf32, #tpu.memory_space<vmem>>, vector<1x1x32xf32>
    %10 = vector.shape_cast %9 : vector<1x1x32xf32> to vector<1x32xf32>
    %c0_12 = arith.constant 0 : index
    %c0_13 = arith.constant 0 : index
    %c0_14 = arith.constant 0 : index
    %11 = vector.load %arg7[%c0_12, %c0_13, %c0_14] : memref<2x1x32xf32, #tpu.memory_space<vmem>>, vector<1x1x32xf32>
    %12 = vector.shape_cast %11 : vector<1x1x32xf32> to vector<1x32xf32>
    %cst_15 = arith.constant dense<0.000000e+00> : vector<32xf32>
    %13 = vector.multi_reduction <add>, %7, %cst_15 [1] : vector<32x32xf32> to vector<32xf32>
    %14 = vector.shape_cast %13 : vector<32xf32> to vector<32x1xf32>
    %cst_16 = arith.constant 3.200000e+01 : f32
    %15 = vector.broadcast %cst_16 : f32 to vector<32x1xf32>
    %16 = arith.divf %14, %15 : vector<32x1xf32>
    %17 = vector.broadcast %16 : vector<32x1xf32> to vector<32x32xf32>
    %18 = arith.subf %7, %17 : vector<32x32xf32>
    %19 = arith.mulf %18, %18 : vector<32x32xf32>
    %cst_17 = arith.constant dense<0.000000e+00> : vector<32xf32>
    %20 = vector.multi_reduction <add>, %19, %cst_17 [1] : vector<32x32xf32> to vector<32xf32>
    %21 = vector.shape_cast %20 : vector<32xf32> to vector<32x1xf32>
    %cst_18 = arith.constant 3.200000e+01 : f32
    %22 = vector.broadcast %cst_18 : f32 to vector<32x1xf32>
    %23 = arith.divf %21, %22 : vector<32x1xf32>
    %cst_19 = arith.constant 9.99999974E-6 : f32
    %24 = vector.broadcast %cst_19 : f32 to vector<32x1xf32>
    %25 = arith.addf %23, %24 : vector<32x1xf32>
    %26 = math.rsqrt %25 : vector<32x1xf32>
    %27 = vector.broadcast %26 : vector<32x1xf32> to vector<32x32xf32>
    %28 = arith.mulf %18, %27 : vector<32x32xf32>
    %29 = vector.broadcast %10 : vector<1x32xf32> to vector<32x32xf32>
    %30 = arith.mulf %28, %29 : vector<32x32xf32>
    %31 = vector.broadcast %12 : vector<1x32xf32> to vector<32x32xf32>
    %32 = arith.addf %30, %31 : vector<32x32xf32>
    %c0_20 = arith.constant 0 : index
    %c0_21 = arith.constant 0 : index
    %c0_22 = arith.constant 0 : index
    %33 = vector.load %arg8[%c0_20, %c0_21, %c0_22] : memref<8x32x8xf32, #tpu.memory_space<vmem>>, vector<1x32x8xf32>
    %34 = vector.shape_cast %33 : vector<1x32x8xf32> to vector<32x8xf32>
    %cst_23 = arith.constant dense<0.000000e+00> : vector<32x8xf32>
    %35 = tpu.matmul %32, %34, %cst_23 {dimension_numbers = #tpu.dot_dimension_numbers<[1], [0], [0], [1], [0, 0, 1, 1], [], []>} : vector<32x32xf32>, vector<32x8xf32>, vector<32x8xf32> -> vector<32x8xf32>
    %c0_24 = arith.constant 0 : index
    %c0_25 = arith.constant 0 : index
    %c0_26 = arith.constant 0 : index
    %36 = vector.load %arg9[%c0_24, %c0_25, %c0_26] : memref<8x1x8xf32, #tpu.memory_space<vmem>>, vector<1x1x8xf32>
    %37 = vector.shape_cast %36 : vector<1x1x8xf32> to vector<1x8xf32>
    %38 = vector.broadcast %37 : vector<1x8xf32> to vector<32x8xf32>
    %39 = arith.addf %35, %38 : vector<32x8xf32>
    %c0_27 = arith.constant 0 : index
    %c0_28 = arith.constant 0 : index
    %c0_29 = arith.constant 0 : index
    %40 = vector.load %arg10[%c0_27, %c0_28, %c0_29] : memref<8x32x8xf32, #tpu.memory_space<vmem>>, vector<1x32x8xf32>
    %41 = vector.shape_cast %40 : vector<1x32x8xf32> to vector<32x8xf32>
    %cst_30 = arith.constant dense<0.000000e+00> : vector<32x8xf32>
    %42 = tpu.matmul %32, %41, %cst_30 {dimension_numbers = #tpu.dot_dimension_numbers<[1], [0], [0], [1], [0, 0, 1, 1], [], []>} : vector<32x32xf32>, vector<32x8xf32>, vector<32x8xf32> -> vector<32x8xf32>
    %c0_31 = arith.constant 0 : index
    %c0_32 = arith.constant 0 : index
    %c0_33 = arith.constant 0 : index
    %43 = vector.load %arg11[%c0_31, %c0_32, %c0_33] : memref<8x1x8xf32, #tpu.memory_space<vmem>>, vector<1x1x8xf32>
    %44 = vector.shape_cast %43 : vector<1x1x8xf32> to vector<1x8xf32>
    %45 = vector.broadcast %44 : vector<1x8xf32> to vector<32x8xf32>
    %46 = arith.addf %42, %45 : vector<32x8xf32>
    %c0_34 = arith.constant 0 : index
    %c0_35 = arith.constant 0 : index
    %c0_36 = arith.constant 0 : index
    %47 = vector.load %arg12[%c0_34, %c0_35, %c0_36] : memref<8x32x8xf32, #tpu.memory_space<vmem>>, vector<1x32x8xf32>
    %48 = vector.shape_cast %47 : vector<1x32x8xf32> to vector<32x8xf32>
    %cst_37 = arith.constant dense<0.000000e+00> : vector<32x8xf32>
    %49 = tpu.matmul %32, %48, %cst_37 {dimension_numbers = #tpu.dot_dimension_numbers<[1], [0], [0], [1], [0, 0, 1, 1], [], []>} : vector<32x32xf32>, vector<32x8xf32>, vector<32x8xf32> -> vector<32x8xf32>
    %c0_38 = arith.constant 0 : index
    %c0_39 = arith.constant 0 : index
    %c0_40 = arith.constant 0 : index
    %50 = vector.load %arg13[%c0_38, %c0_39, %c0_40] : memref<8x1x8xf32, #tpu.memory_space<vmem>>, vector<1x1x8xf32>
    %51 = vector.shape_cast %50 : vector<1x1x8xf32> to vector<1x8xf32>
    %52 = vector.broadcast %51 : vector<1x8xf32> to vector<32x8xf32>
    %53 = arith.addf %49, %52 : vector<32x8xf32>
    %cst_41 = arith.constant dense<0.000000e+00> : vector<32x32xf32>
    %54 = tpu.matmul %39, %46, %cst_41 {dimension_numbers = #tpu.dot_dimension_numbers<[1], [1], [0], [0], [0, 0, 1, 0], [], []>} : vector<32x8xf32>, vector<32x8xf32>, vector<32x32xf32> -> vector<32x32xf32>
    %cst_42 = arith.constant 0.353553385 : f32
    %55 = vector.broadcast %cst_42 : f32 to vector<32x32xf32>
    %56 = arith.mulf %54, %55 : vector<32x32xf32>
    %57 = arith.addf %56, %8 : vector<32x32xf32>
    %cst_43 = arith.constant dense<0xFF800000> : vector<32xf32>
    %58 = vector.multi_reduction <maximumf>, %57, %cst_43 [1] : vector<32x32xf32> to vector<32xf32>
    %59 = vector.shape_cast %58 : vector<32xf32> to vector<32x1xf32>
    %60 = vector.broadcast %59 : vector<32x1xf32> to vector<32x32xf32>
    %61 = arith.subf %57, %60 : vector<32x32xf32>
    %62 = math.exp %61 : vector<32x32xf32>
    %cst_44 = arith.constant dense<0.000000e+00> : vector<32xf32>
    %63 = vector.multi_reduction <add>, %62, %cst_44 [1] : vector<32x32xf32> to vector<32xf32>
    %64 = vector.shape_cast %63 : vector<32xf32> to vector<32x1xf32>
    %65 = tpu.reciprocal %64 {approx = true} : vector<32x1xf32> -> vector<32x1xf32>
    %66 = vector.broadcast %65 : vector<32x1xf32> to vector<32x32xf32>
    %67 = arith.mulf %62, %66 : vector<32x32xf32>
    %cst_45 = arith.constant dense<0.000000e+00> : vector<32x8xf32>
    %68 = tpu.matmul %67, %53, %cst_45 {dimension_numbers = #tpu.dot_dimension_numbers<[1], [0], [0], [1], [0, 0, 1, 1], [], []>} : vector<32x32xf32>, vector<32x8xf32>, vector<32x8xf32> -> vector<32x8xf32>
    %c0_46 = arith.constant 0 : index
    %c0_47 = arith.constant 0 : index
    %c0_48 = arith.constant 0 : index
    %69 = vector.load %arg14[%c0_46, %c0_47, %c0_48] : memref<8x8x32xf32, #tpu.memory_space<vmem>>, vector<1x8x32xf32>
    %70 = vector.shape_cast %69 : vector<1x8x32xf32> to vector<8x32xf32>
    %cst_49 = arith.constant dense<0.000000e+00> : vector<32x32xf32>
    %71 = tpu.matmul %68, %70, %cst_49 {dimension_numbers = #tpu.dot_dimension_numbers<[1], [0], [0], [1], [0, 0, 1, 1], [], []>} : vector<32x8xf32>, vector<8x32xf32>, vector<32x32xf32> -> vector<32x32xf32>
    %c1 = arith.constant 1 : index
    %c0_50 = arith.constant 0 : index
    %c0_51 = arith.constant 0 : index
    %72 = vector.load %arg8[%c1, %c0_50, %c0_51] : memref<8x32x8xf32, #tpu.memory_space<vmem>>, vector<1x32x8xf32>
    %73 = vector.shape_cast %72 : vector<1x32x8xf32> to vector<32x8xf32>
    %cst_52 = arith.constant dense<0.000000e+00> : vector<32x8xf32>
    %74 = tpu.matmul %32, %73, %cst_52 {dimension_numbers = #tpu.dot_dimension_numbers<[1], [0], [0], [1], [0, 0, 1, 1], [], []>} : vector<32x32xf32>, vector<32x8xf32>, vector<32x8xf32> -> vector<32x8xf32>
    %c1_53 = arith.constant 1 : index
    %c0_54 = arith.constant 0 : index
    %c0_55 = arith.constant 0 : index
    %75 = vector.load %arg9[%c1_53, %c0_54, %c0_55] : memref<8x1x8xf32, #tpu.memory_space<vmem>>, vector<1x1x8xf32>
    %76 = vector.shape_cast %75 : vector<1x1x8xf32> to vector<1x8xf32>
    %77 = vector.broadcast %76 : vector<1x8xf32> to vector<32x8xf32>
    %78 = arith.addf %74, %77 : vector<32x8xf32>
    %c1_56 = arith.constant 1 : index
    %c0_57 = arith.constant 0 : index
    %c0_58 = arith.constant 0 : index
    %79 = vector.load %arg10[%c1_56, %c0_57, %c0_58] : memref<8x32x8xf32, #tpu.memory_space<vmem>>, vector<1x32x8xf32>
    %80 = vector.shape_cast %79 : vector<1x32x8xf32> to vector<32x8xf32>
    %cst_59 = arith.constant dense<0.000000e+00> : vector<32x8xf32>
    %81 = tpu.matmul %32, %80, %cst_59 {dimension_numbers = #tpu.dot_dimension_numbers<[1], [0], [0], [1], [0, 0, 1, 1], [], []>} : vector<32x32xf32>, vector<32x8xf32>, vector<32x8xf32> -> vector<32x8xf32>
    %c1_60 = arith.constant 1 : index
    %c0_61 = arith.constant 0 : index
    %c0_62 = arith.constant 0 : index
    %82 = vector.load %arg11[%c1_60, %c0_61, %c0_62] : memref<8x1x8xf32, #tpu.memory_space<vmem>>, vector<1x1x8xf32>
    %83 = vector.shape_cast %82 : vector<1x1x8xf32> to vector<1x8xf32>
    %84 = vector.broadcast %83 : vector<1x8xf32> to vector<32x8xf32>
    %85 = arith.addf %81, %84 : vector<32x8xf32>
    %c1_63 = arith.constant 1 : index
    %c0_64 = arith.constant 0 : index
    %c0_65 = arith.constant 0 : index
    %86 = vector.load %arg12[%c1_63, %c0_64, %c0_65] : memref<8x32x8xf32, #tpu.memory_space<vmem>>, vector<1x32x8xf32>
    %87 = vector.shape_cast %86 : vector<1x32x8xf32> to vector<32x8xf32>
    %cst_66 = arith.constant dense<0.000000e+00> : vector<32x8xf32>
    %88 = tpu.matmul %32, %87, %cst_66 {dimension_numbers = #tpu.dot_dimension_numbers<[1], [0], [0], [1], [0, 0, 1, 1], [], []>} : vector<32x32xf32>, vector<32x8xf32>, vector<32x8xf32> -> vector<32x8xf32>
    %c1_67 = arith.constant 1 : index
    %c0_68 = arith.constant 0 : index
    %c0_69 = arith.constant 0 : index
    %89 = vector.load %arg13[%c1_67, %c0_68, %c0_69] : memref<8x1x8xf32, #tpu.memory_space<vmem>>, vector<1x1x8xf32>
    %90 = vector.shape_cast %89 : vector<1x1x8xf32> to vector<1x8xf32>
    %91 = vector.broadcast %90 : vector<1x8xf32> to vector<32x8xf32>
    %92 = arith.addf %88, %91 : vector<32x8xf32>
    %cst_70 = arith.constant dense<0.000000e+00> : vector<32x32xf32>
    %93 = tpu.matmul %78, %85, %cst_70 {dimension_numbers = #tpu.dot_dimension_numbers<[1], [1], [0], [0], [0, 0, 1, 0], [], []>} : vector<32x8xf32>, vector<32x8xf32>, vector<32x32xf32> -> vector<32x32xf32>
    %cst_71 = arith.constant 0.353553385 : f32
    %94 = vector.broadcast %cst_71 : f32 to vector<32x32xf32>
    %95 = arith.mulf %93, %94 : vector<32x32xf32>
    %96 = arith.addf %95, %8 : vector<32x32xf32>
    %cst_72 = arith.constant dense<0xFF800000> : vector<32xf32>
    %97 = vector.multi_reduction <maximumf>, %96, %cst_72 [1] : vector<32x32xf32> to vector<32xf32>
    %98 = vector.shape_cast %97 : vector<32xf32> to vector<32x1xf32>
    %99 = vector.broadcast %98 : vector<32x1xf32> to vector<32x32xf32>
    %100 = arith.subf %96, %99 : vector<32x32xf32>
    %101 = math.exp %100 : vector<32x32xf32>
    %cst_73 = arith.constant dense<0.000000e+00> : vector<32xf32>
    %102 = vector.multi_reduction <add>, %101, %cst_73 [1] : vector<32x32xf32> to vector<32xf32>
    %103 = vector.shape_cast %102 : vector<32xf32> to vector<32x1xf32>
    %104 = tpu.reciprocal %103 {approx = true} : vector<32x1xf32> -> vector<32x1xf32>
    %105 = vector.broadcast %104 : vector<32x1xf32> to vector<32x32xf32>
    %106 = arith.mulf %101, %105 : vector<32x32xf32>
    %cst_74 = arith.constant dense<0.000000e+00> : vector<32x8xf32>
    %107 = tpu.matmul %106, %92, %cst_74 {dimension_numbers = #tpu.dot_dimension_numbers<[1], [0], [0], [1], [0, 0, 1, 1], [], []>} : vector<32x32xf32>, vector<32x8xf32>, vector<32x8xf32> -> vector<32x8xf32>
    %c1_75 = arith.constant 1 : index
    %c0_76 = arith.constant 0 : index
    %c0_77 = arith.constant 0 : index
    %108 = vector.load %arg14[%c1_75, %c0_76, %c0_77] : memref<8x8x32xf32, #tpu.memory_space<vmem>>, vector<1x8x32xf32>
    %109 = vector.shape_cast %108 : vector<1x8x32xf32> to vector<8x32xf32>
    %cst_78 = arith.constant dense<0.000000e+00> : vector<32x32xf32>
    %110 = tpu.matmul %107, %109, %cst_78 {dimension_numbers = #tpu.dot_dimension_numbers<[1], [0], [0], [1], [0, 0, 1, 1], [], []>} : vector<32x8xf32>, vector<8x32xf32>, vector<32x32xf32> -> vector<32x32xf32>
    %111 = arith.addf %71, %110 : vector<32x32xf32>
    %c2 = arith.constant 2 : index
    %c0_79 = arith.constant 0 : index
    %c0_80 = arith.constant 0 : index
    %112 = vector.load %arg8[%c2, %c0_79, %c0_80] : memref<8x32x8xf32, #tpu.memory_space<vmem>>, vector<1x32x8xf32>
    %113 = vector.shape_cast %112 : vector<1x32x8xf32> to vector<32x8xf32>
    %cst_81 = arith.constant dense<0.000000e+00> : vector<32x8xf32>
    %114 = tpu.matmul %32, %113, %cst_81 {dimension_numbers = #tpu.dot_dimension_numbers<[1], [0], [0], [1], [0, 0, 1, 1], [], []>} : vector<32x32xf32>, vector<32x8xf32>, vector<32x8xf32> -> vector<32x8xf32>
    %c2_82 = arith.constant 2 : index
    %c0_83 = arith.constant 0 : index
    %c0_84 = arith.constant 0 : index
    %115 = vector.load %arg9[%c2_82, %c0_83, %c0_84] : memref<8x1x8xf32, #tpu.memory_space<vmem>>, vector<1x1x8xf32>
    %116 = vector.shape_cast %115 : vector<1x1x8xf32> to vector<1x8xf32>
    %117 = vector.broadcast %116 : vector<1x8xf32> to vector<32x8xf32>
    %118 = arith.addf %114, %117 : vector<32x8xf32>
    %c2_85 = arith.constant 2 : index
    %c0_86 = arith.constant 0 : index
    %c0_87 = arith.constant 0 : index
    %119 = vector.load %arg10[%c2_85, %c0_86, %c0_87] : memref<8x32x8xf32, #tpu.memory_space<vmem>>, vector<1x32x8xf32>
    %120 = vector.shape_cast %119 : vector<1x32x8xf32> to vector<32x8xf32>
    %cst_88 = arith.constant dense<0.000000e+00> : vector<32x8xf32>
    %121 = tpu.matmul %32, %120, %cst_88 {dimension_numbers = #tpu.dot_dimension_numbers<[1], [0], [0], [1], [0, 0, 1, 1], [], []>} : vector<32x32xf32>, vector<32x8xf32>, vector<32x8xf32> -> vector<32x8xf32>
    %c2_89 = arith.constant 2 : index
    %c0_90 = arith.constant 0 : index
    %c0_91 = arith.constant 0 : index
    %122 = vector.load %arg11[%c2_89, %c0_90, %c0_91] : memref<8x1x8xf32, #tpu.memory_space<vmem>>, vector<1x1x8xf32>
    %123 = vector.shape_cast %122 : vector<1x1x8xf32> to vector<1x8xf32>
    %124 = vector.broadcast %123 : vector<1x8xf32> to vector<32x8xf32>
    %125 = arith.addf %121, %124 : vector<32x8xf32>
    %c2_92 = arith.constant 2 : index
    %c0_93 = arith.constant 0 : index
    %c0_94 = arith.constant 0 : index
    %126 = vector.load %arg12[%c2_92, %c0_93, %c0_94] : memref<8x32x8xf32, #tpu.memory_space<vmem>>, vector<1x32x8xf32>
    %127 = vector.shape_cast %126 : vector<1x32x8xf32> to vector<32x8xf32>
    %cst_95 = arith.constant dense<0.000000e+00> : vector<32x8xf32>
    %128 = tpu.matmul %32, %127, %cst_95 {dimension_numbers = #tpu.dot_dimension_numbers<[1], [0], [0], [1], [0, 0, 1, 1], [], []>} : vector<32x32xf32>, vector<32x8xf32>, vector<32x8xf32> -> vector<32x8xf32>
    %c2_96 = arith.constant 2 : index
    %c0_97 = arith.constant 0 : index
    %c0_98 = arith.constant 0 : index
    %129 = vector.load %arg13[%c2_96, %c0_97, %c0_98] : memref<8x1x8xf32, #tpu.memory_space<vmem>>, vector<1x1x8xf32>
    %130 = vector.shape_cast %129 : vector<1x1x8xf32> to vector<1x8xf32>
    %131 = vector.broadcast %130 : vector<1x8xf32> to vector<32x8xf32>
    %132 = arith.addf %128, %131 : vector<32x8xf32>
    %cst_99 = arith.constant dense<0.000000e+00> : vector<32x32xf32>
    %133 = tpu.matmul %118, %125, %cst_99 {dimension_numbers = #tpu.dot_dimension_numbers<[1], [1], [0], [0], [0, 0, 1, 0], [], []>} : vector<32x8xf32>, vector<32x8xf32>, vector<32x32xf32> -> vector<32x32xf32>
    %cst_100 = arith.constant 0.353553385 : f32
    %134 = vector.broadcast %cst_100 : f32 to vector<32x32xf32>
    %135 = arith.mulf %133, %134 : vector<32x32xf32>
    %136 = arith.addf %135, %8 : vector<32x32xf32>
    %cst_101 = arith.constant dense<0xFF800000> : vector<32xf32>
    %137 = vector.multi_reduction <maximumf>, %136, %cst_101 [1] : vector<32x32xf32> to vector<32xf32>
    %138 = vector.shape_cast %137 : vector<32xf32> to vector<32x1xf32>
    %139 = vector.broadcast %138 : vector<32x1xf32> to vector<32x32xf32>
    %140 = arith.subf %136, %139 : vector<32x32xf32>
    %141 = math.exp %140 : vector<32x32xf32>
    %cst_102 = arith.constant dense<0.000000e+00> : vector<32xf32>
    %142 = vector.multi_reduction <add>, %141, %cst_102 [1] : vector<32x32xf32> to vector<32xf32>
    %143 = vector.shape_cast %142 : vector<32xf32> to vector<32x1xf32>
    %144 = tpu.reciprocal %143 {approx = true} : vector<32x1xf32> -> vector<32x1xf32>
    %145 = vector.broadcast %144 : vector<32x1xf32> to vector<32x32xf32>
    %146 = arith.mulf %141, %145 : vector<32x32xf32>
    %cst_103 = arith.constant dense<0.000000e+00> : vector<32x8xf32>
    %147 = tpu.matmul %146, %132, %cst_103 {dimension_numbers = #tpu.dot_dimension_numbers<[1], [0], [0], [1], [0, 0, 1, 1], [], []>} : vector<32x32xf32>, vector<32x8xf32>, vector<32x8xf32> -> vector<32x8xf32>
    %c2_104 = arith.constant 2 : index
    %c0_105 = arith.constant 0 : index
    %c0_106 = arith.constant 0 : index
    %148 = vector.load %arg14[%c2_104, %c0_105, %c0_106] : memref<8x8x32xf32, #tpu.memory_space<vmem>>, vector<1x8x32xf32>
    %149 = vector.shape_cast %148 : vector<1x8x32xf32> to vector<8x32xf32>
    %cst_107 = arith.constant dense<0.000000e+00> : vector<32x32xf32>
    %150 = tpu.matmul %147, %149, %cst_107 {dimension_numbers = #tpu.dot_dimension_numbers<[1], [0], [0], [1], [0, 0, 1, 1], [], []>} : vector<32x8xf32>, vector<8x32xf32>, vector<32x32xf32> -> vector<32x32xf32>
    %151 = arith.addf %111, %150 : vector<32x32xf32>
    %c3 = arith.constant 3 : index
    %c0_108 = arith.constant 0 : index
    %c0_109 = arith.constant 0 : index
    %152 = vector.load %arg8[%c3, %c0_108, %c0_109] : memref<8x32x8xf32, #tpu.memory_space<vmem>>, vector<1x32x8xf32>
    %153 = vector.shape_cast %152 : vector<1x32x8xf32> to vector<32x8xf32>
    %cst_110 = arith.constant dense<0.000000e+00> : vector<32x8xf32>
    %154 = tpu.matmul %32, %153, %cst_110 {dimension_numbers = #tpu.dot_dimension_numbers<[1], [0], [0], [1], [0, 0, 1, 1], [], []>} : vector<32x32xf32>, vector<32x8xf32>, vector<32x8xf32> -> vector<32x8xf32>
    %c3_111 = arith.constant 3 : index
    %c0_112 = arith.constant 0 : index
    %c0_113 = arith.constant 0 : index
    %155 = vector.load %arg9[%c3_111, %c0_112, %c0_113] : memref<8x1x8xf32, #tpu.memory_space<vmem>>, vector<1x1x8xf32>
    %156 = vector.shape_cast %155 : vector<1x1x8xf32> to vector<1x8xf32>
    %157 = vector.broadcast %156 : vector<1x8xf32> to vector<32x8xf32>
    %158 = arith.addf %154, %157 : vector<32x8xf32>
    %c3_114 = arith.constant 3 : index
    %c0_115 = arith.constant 0 : index
    %c0_116 = arith.constant 0 : index
    %159 = vector.load %arg10[%c3_114, %c0_115, %c0_116] : memref<8x32x8xf32, #tpu.memory_space<vmem>>, vector<1x32x8xf32>
    %160 = vector.shape_cast %159 : vector<1x32x8xf32> to vector<32x8xf32>
    %cst_117 = arith.constant dense<0.000000e+00> : vector<32x8xf32>
    %161 = tpu.matmul %32, %160, %cst_117 {dimension_numbers = #tpu.dot_dimension_numbers<[1], [0], [0], [1], [0, 0, 1, 1], [], []>} : vector<32x32xf32>, vector<32x8xf32>, vector<32x8xf32> -> vector<32x8xf32>
    %c3_118 = arith.constant 3 : index
    %c0_119 = arith.constant 0 : index
    %c0_120 = arith.constant 0 : index
    %162 = vector.load %arg11[%c3_118, %c0_119, %c0_120] : memref<8x1x8xf32, #tpu.memory_space<vmem>>, vector<1x1x8xf32>
    %163 = vector.shape_cast %162 : vector<1x1x8xf32> to vector<1x8xf32>
    %164 = vector.broadcast %163 : vector<1x8xf32> to vector<32x8xf32>
    %165 = arith.addf %161, %164 : vector<32x8xf32>
    %c3_121 = arith.constant 3 : index
    %c0_122 = arith.constant 0 : index
    %c0_123 = arith.constant 0 : index
    %166 = vector.load %arg12[%c3_121, %c0_122, %c0_123] : memref<8x32x8xf32, #tpu.memory_space<vmem>>, vector<1x32x8xf32>
    %167 = vector.shape_cast %166 : vector<1x32x8xf32> to vector<32x8xf32>
    %cst_124 = arith.constant dense<0.000000e+00> : vector<32x8xf32>
    %168 = tpu.matmul %32, %167, %cst_124 {dimension_numbers = #tpu.dot_dimension_numbers<[1], [0], [0], [1], [0, 0, 1, 1], [], []>} : vector<32x32xf32>, vector<32x8xf32>, vector<32x8xf32> -> vector<32x8xf32>
    %c3_125 = arith.constant 3 : index
    %c0_126 = arith.constant 0 : index
    %c0_127 = arith.constant 0 : index
    %169 = vector.load %arg13[%c3_125, %c0_126, %c0_127] : memref<8x1x8xf32, #tpu.memory_space<vmem>>, vector<1x1x8xf32>
    %170 = vector.shape_cast %169 : vector<1x1x8xf32> to vector<1x8xf32>
    %171 = vector.broadcast %170 : vector<1x8xf32> to vector<32x8xf32>
    %172 = arith.addf %168, %171 : vector<32x8xf32>
    %cst_128 = arith.constant dense<0.000000e+00> : vector<32x32xf32>
    %173 = tpu.matmul %158, %165, %cst_128 {dimension_numbers = #tpu.dot_dimension_numbers<[1], [1], [0], [0], [0, 0, 1, 0], [], []>} : vector<32x8xf32>, vector<32x8xf32>, vector<32x32xf32> -> vector<32x32xf32>
    %cst_129 = arith.constant 0.353553385 : f32
    %174 = vector.broadcast %cst_129 : f32 to vector<32x32xf32>
    %175 = arith.mulf %173, %174 : vector<32x32xf32>
    %176 = arith.addf %175, %8 : vector<32x32xf32>
    %cst_130 = arith.constant dense<0xFF800000> : vector<32xf32>
    %177 = vector.multi_reduction <maximumf>, %176, %cst_130 [1] : vector<32x32xf32> to vector<32xf32>
    %178 = vector.shape_cast %177 : vector<32xf32> to vector<32x1xf32>
    %179 = vector.broadcast %178 : vector<32x1xf32> to vector<32x32xf32>
    %180 = arith.subf %176, %179 : vector<32x32xf32>
    %181 = math.exp %180 : vector<32x32xf32>
    %cst_131 = arith.constant dense<0.000000e+00> : vector<32xf32>
    %182 = vector.multi_reduction <add>, %181, %cst_131 [1] : vector<32x32xf32> to vector<32xf32>
    %183 = vector.shape_cast %182 : vector<32xf32> to vector<32x1xf32>
    %184 = tpu.reciprocal %183 {approx = true} : vector<32x1xf32> -> vector<32x1xf32>
    %185 = vector.broadcast %184 : vector<32x1xf32> to vector<32x32xf32>
    %186 = arith.mulf %181, %185 : vector<32x32xf32>
    %cst_132 = arith.constant dense<0.000000e+00> : vector<32x8xf32>
    %187 = tpu.matmul %186, %172, %cst_132 {dimension_numbers = #tpu.dot_dimension_numbers<[1], [0], [0], [1], [0, 0, 1, 1], [], []>} : vector<32x32xf32>, vector<32x8xf32>, vector<32x8xf32> -> vector<32x8xf32>
    %c3_133 = arith.constant 3 : index
    %c0_134 = arith.constant 0 : index
    %c0_135 = arith.constant 0 : index
    %188 = vector.load %arg14[%c3_133, %c0_134, %c0_135] : memref<8x8x32xf32, #tpu.memory_space<vmem>>, vector<1x8x32xf32>
    %189 = vector.shape_cast %188 : vector<1x8x32xf32> to vector<8x32xf32>
    %cst_136 = arith.constant dense<0.000000e+00> : vector<32x32xf32>
    %190 = tpu.matmul %187, %189, %cst_136 {dimension_numbers = #tpu.dot_dimension_numbers<[1], [0], [0], [1], [0, 0, 1, 1], [], []>} : vector<32x8xf32>, vector<8x32xf32>, vector<32x32xf32> -> vector<32x32xf32>
    %191 = arith.addf %151, %190 : vector<32x32xf32>
    %192 = arith.addf %7, %191 : vector<32x32xf32>
    %c0_137 = arith.constant 0 : index
    %c0_138 = arith.constant 0 : index
    %c0_139 = arith.constant 0 : index
    %193 = vector.load %arg15[%c0_137, %c0_138, %c0_139] : memref<2x1x32xf32, #tpu.memory_space<vmem>>, vector<1x1x32xf32>
    %194 = vector.shape_cast %193 : vector<1x1x32xf32> to vector<1x32xf32>
    %195 = vector.broadcast %194 : vector<1x32xf32> to vector<32x32xf32>
    %196 = arith.addf %192, %195 : vector<32x32xf32>
    %c0_140 = arith.constant 0 : index
    %c0_141 = arith.constant 0 : index
    %c0_142 = arith.constant 0 : index
    %197 = vector.load %arg16[%c0_140, %c0_141, %c0_142] : memref<2x1x32xf32, #tpu.memory_space<vmem>>, vector<1x1x32xf32>
    %198 = vector.shape_cast %197 : vector<1x1x32xf32> to vector<1x32xf32>
    %c0_143 = arith.constant 0 : index
    %c0_144 = arith.constant 0 : index
    %c0_145 = arith.constant 0 : index
    %199 = vector.load %arg17[%c0_143, %c0_144, %c0_145] : memref<2x1x32xf32, #tpu.memory_space<vmem>>, vector<1x1x32xf32>
    %200 = vector.shape_cast %199 : vector<1x1x32xf32> to vector<1x32xf32>
    %cst_146 = arith.constant dense<0.000000e+00> : vector<32xf32>
    %201 = vector.multi_reduction <add>, %196, %cst_146 [1] : vector<32x32xf32> to vector<32xf32>
    %202 = vector.shape_cast %201 : vector<32xf32> to vector<32x1xf32>
    %cst_147 = arith.constant 3.200000e+01 : f32
    %203 = vector.broadcast %cst_147 : f32 to vector<32x1xf32>
    %204 = arith.divf %202, %203 : vector<32x1xf32>
    %205 = vector.broadcast %204 : vector<32x1xf32> to vector<32x32xf32>
    %206 = arith.subf %196, %205 : vector<32x32xf32>
    %207 = arith.mulf %206, %206 : vector<32x32xf32>
    %cst_148 = arith.constant dense<0.000000e+00> : vector<32xf32>
    %208 = vector.multi_reduction <add>, %207, %cst_148 [1] : vector<32x32xf32> to vector<32xf32>
    %209 = vector.shape_cast %208 : vector<32xf32> to vector<32x1xf32>
    %cst_149 = arith.constant 3.200000e+01 : f32
    %210 = vector.broadcast %cst_149 : f32 to vector<32x1xf32>
    %211 = arith.divf %209, %210 : vector<32x1xf32>
    %cst_150 = arith.constant 9.99999974E-6 : f32
    %212 = vector.broadcast %cst_150 : f32 to vector<32x1xf32>
    %213 = arith.addf %211, %212 : vector<32x1xf32>
    %214 = math.rsqrt %213 : vector<32x1xf32>
    %215 = vector.broadcast %214 : vector<32x1xf32> to vector<32x32xf32>
    %216 = arith.mulf %206, %215 : vector<32x32xf32>
    %217 = vector.broadcast %198 : vector<1x32xf32> to vector<32x32xf32>
    %218 = arith.mulf %216, %217 : vector<32x32xf32>
    %219 = vector.broadcast %200 : vector<1x32xf32> to vector<32x32xf32>
    %220 = arith.addf %218, %219 : vector<32x32xf32>
    %c0_151 = arith.constant 0 : index
    %c0_152 = arith.constant 0 : index
    %c0_153 = arith.constant 0 : index
    %221 = vector.load %arg18[%c0_151, %c0_152, %c0_153] : memref<2x32x128xf32, #tpu.memory_space<vmem>>, vector<1x32x128xf32>
    %222 = vector.shape_cast %221 : vector<1x32x128xf32> to vector<32x128xf32>
    %cst_154 = arith.constant dense<0.000000e+00> : vector<32x128xf32>
    %223 = tpu.matmul %220, %222, %cst_154 {dimension_numbers = #tpu.dot_dimension_numbers<[1], [0], [0], [1], [0, 0, 1, 1], [], []>} : vector<32x32xf32>, vector<32x128xf32>, vector<32x128xf32> -> vector<32x128xf32>
    %c0_155 = arith.constant 0 : index
    %c0_156 = arith.constant 0 : index
    %c0_157 = arith.constant 0 : index
    %224 = vector.load %arg19[%c0_155, %c0_156, %c0_157] : memref<2x1x128xf32, #tpu.memory_space<vmem>>, vector<1x1x128xf32>
    %225 = vector.shape_cast %224 : vector<1x1x128xf32> to vector<1x128xf32>
    %226 = vector.broadcast %225 : vector<1x128xf32> to vector<32x128xf32>
    %227 = arith.addf %223, %226 : vector<32x128xf32>
    %cst_158 = arith.constant 5.000000e-01 : f32
    %228 = vector.broadcast %cst_158 : f32 to vector<32x128xf32>
    %229 = arith.mulf %228, %227 : vector<32x128xf32>
    %cst_159 = arith.constant 4.471500e-02 : f32
    %230 = vector.broadcast %cst_159 : f32 to vector<32x128xf32>
    %231 = arith.mulf %230, %227 : vector<32x128xf32>
    %232 = arith.mulf %231, %227 : vector<32x128xf32>
    %233 = arith.mulf %232, %227 : vector<32x128xf32>
    %234 = arith.addf %227, %233 : vector<32x128xf32>
    %cst_160 = arith.constant 0.797884583 : f32
    %235 = vector.broadcast %cst_160 : f32 to vector<32x128xf32>
    %236 = arith.mulf %235, %234 : vector<32x128xf32>
    %237 = math.tanh %236 : vector<32x128xf32>
    %cst_161 = arith.constant 1.000000e+00 : f32
    %238 = vector.broadcast %cst_161 : f32 to vector<32x128xf32>
    %239 = arith.addf %238, %237 : vector<32x128xf32>
    %240 = arith.mulf %229, %239 : vector<32x128xf32>
    %c0_162 = arith.constant 0 : index
    %c0_163 = arith.constant 0 : index
    %c0_164 = arith.constant 0 : index
    %241 = vector.load %arg20[%c0_162, %c0_163, %c0_164] : memref<2x128x32xf32, #tpu.memory_space<vmem>>, vector<1x128x32xf32>
    %242 = vector.shape_cast %241 : vector<1x128x32xf32> to vector<128x32xf32>
    %cst_165 = arith.constant dense<0.000000e+00> : vector<32x32xf32>
    %243 = tpu.matmul %240, %242, %cst_165 {dimension_numbers = #tpu.dot_dimension_numbers<[1], [0], [0], [1], [0, 0, 1, 1], [], []>} : vector<32x128xf32>, vector<128x32xf32>, vector<32x32xf32> -> vector<32x32xf32>
    %c0_166 = arith.constant 0 : index
    %c0_167 = arith.constant 0 : index
    %c0_168 = arith.constant 0 : index
    %244 = vector.load %arg21[%c0_166, %c0_167, %c0_168] : memref<2x1x32xf32, #tpu.memory_space<vmem>>, vector<1x1x32xf32>
    %245 = vector.shape_cast %244 : vector<1x1x32xf32> to vector<1x32xf32>
    %246 = vector.broadcast %245 : vector<1x32xf32> to vector<32x32xf32>
    %247 = arith.addf %243, %246 : vector<32x32xf32>
    %248 = arith.addf %196, %247 : vector<32x32xf32>
    %c1_169 = arith.constant 1 : index
    %c0_170 = arith.constant 0 : index
    %c0_171 = arith.constant 0 : index
    %249 = vector.load %arg6[%c1_169, %c0_170, %c0_171] : memref<2x1x32xf32, #tpu.memory_space<vmem>>, vector<1x1x32xf32>
    %250 = vector.shape_cast %249 : vector<1x1x32xf32> to vector<1x32xf32>
    %c1_172 = arith.constant 1 : index
    %c0_173 = arith.constant 0 : index
    %c0_174 = arith.constant 0 : index
    %251 = vector.load %arg7[%c1_172, %c0_173, %c0_174] : memref<2x1x32xf32, #tpu.memory_space<vmem>>, vector<1x1x32xf32>
    %252 = vector.shape_cast %251 : vector<1x1x32xf32> to vector<1x32xf32>
    %cst_175 = arith.constant dense<0.000000e+00> : vector<32xf32>
    %253 = vector.multi_reduction <add>, %248, %cst_175 [1] : vector<32x32xf32> to vector<32xf32>
    %254 = vector.shape_cast %253 : vector<32xf32> to vector<32x1xf32>
    %cst_176 = arith.constant 3.200000e+01 : f32
    %255 = vector.broadcast %cst_176 : f32 to vector<32x1xf32>
    %256 = arith.divf %254, %255 : vector<32x1xf32>
    %257 = vector.broadcast %256 : vector<32x1xf32> to vector<32x32xf32>
    %258 = arith.subf %248, %257 : vector<32x32xf32>
    %259 = arith.mulf %258, %258 : vector<32x32xf32>
    %cst_177 = arith.constant dense<0.000000e+00> : vector<32xf32>
    %260 = vector.multi_reduction <add>, %259, %cst_177 [1] : vector<32x32xf32> to vector<32xf32>
    %261 = vector.shape_cast %260 : vector<32xf32> to vector<32x1xf32>
    %cst_178 = arith.constant 3.200000e+01 : f32
    %262 = vector.broadcast %cst_178 : f32 to vector<32x1xf32>
    %263 = arith.divf %261, %262 : vector<32x1xf32>
    %cst_179 = arith.constant 9.99999974E-6 : f32
    %264 = vector.broadcast %cst_179 : f32 to vector<32x1xf32>
    %265 = arith.addf %263, %264 : vector<32x1xf32>
    %266 = math.rsqrt %265 : vector<32x1xf32>
    %267 = vector.broadcast %266 : vector<32x1xf32> to vector<32x32xf32>
    %268 = arith.mulf %258, %267 : vector<32x32xf32>
    %269 = vector.broadcast %250 : vector<1x32xf32> to vector<32x32xf32>
    %270 = arith.mulf %268, %269 : vector<32x32xf32>
    %271 = vector.broadcast %252 : vector<1x32xf32> to vector<32x32xf32>
    %272 = arith.addf %270, %271 : vector<32x32xf32>
    %c4 = arith.constant 4 : index
    %c0_180 = arith.constant 0 : index
    %c0_181 = arith.constant 0 : index
    %273 = vector.load %arg8[%c4, %c0_180, %c0_181] : memref<8x32x8xf32, #tpu.memory_space<vmem>>, vector<1x32x8xf32>
    %274 = vector.shape_cast %273 : vector<1x32x8xf32> to vector<32x8xf32>
    %cst_182 = arith.constant dense<0.000000e+00> : vector<32x8xf32>
    %275 = tpu.matmul %272, %274, %cst_182 {dimension_numbers = #tpu.dot_dimension_numbers<[1], [0], [0], [1], [0, 0, 1, 1], [], []>} : vector<32x32xf32>, vector<32x8xf32>, vector<32x8xf32> -> vector<32x8xf32>
    %c4_183 = arith.constant 4 : index
    %c0_184 = arith.constant 0 : index
    %c0_185 = arith.constant 0 : index
    %276 = vector.load %arg9[%c4_183, %c0_184, %c0_185] : memref<8x1x8xf32, #tpu.memory_space<vmem>>, vector<1x1x8xf32>
    %277 = vector.shape_cast %276 : vector<1x1x8xf32> to vector<1x8xf32>
    %278 = vector.broadcast %277 : vector<1x8xf32> to vector<32x8xf32>
    %279 = arith.addf %275, %278 : vector<32x8xf32>
    %c4_186 = arith.constant 4 : index
    %c0_187 = arith.constant 0 : index
    %c0_188 = arith.constant 0 : index
    %280 = vector.load %arg10[%c4_186, %c0_187, %c0_188] : memref<8x32x8xf32, #tpu.memory_space<vmem>>, vector<1x32x8xf32>
    %281 = vector.shape_cast %280 : vector<1x32x8xf32> to vector<32x8xf32>
    %cst_189 = arith.constant dense<0.000000e+00> : vector<32x8xf32>
    %282 = tpu.matmul %272, %281, %cst_189 {dimension_numbers = #tpu.dot_dimension_numbers<[1], [0], [0], [1], [0, 0, 1, 1], [], []>} : vector<32x32xf32>, vector<32x8xf32>, vector<32x8xf32> -> vector<32x8xf32>
    %c4_190 = arith.constant 4 : index
    %c0_191 = arith.constant 0 : index
    %c0_192 = arith.constant 0 : index
    %283 = vector.load %arg11[%c4_190, %c0_191, %c0_192] : memref<8x1x8xf32, #tpu.memory_space<vmem>>, vector<1x1x8xf32>
    %284 = vector.shape_cast %283 : vector<1x1x8xf32> to vector<1x8xf32>
    %285 = vector.broadcast %284 : vector<1x8xf32> to vector<32x8xf32>
    %286 = arith.addf %282, %285 : vector<32x8xf32>
    %c4_193 = arith.constant 4 : index
    %c0_194 = arith.constant 0 : index
    %c0_195 = arith.constant 0 : index
    %287 = vector.load %arg12[%c4_193, %c0_194, %c0_195] : memref<8x32x8xf32, #tpu.memory_space<vmem>>, vector<1x32x8xf32>
    %288 = vector.shape_cast %287 : vector<1x32x8xf32> to vector<32x8xf32>
    %cst_196 = arith.constant dense<0.000000e+00> : vector<32x8xf32>
    %289 = tpu.matmul %272, %288, %cst_196 {dimension_numbers = #tpu.dot_dimension_numbers<[1], [0], [0], [1], [0, 0, 1, 1], [], []>} : vector<32x32xf32>, vector<32x8xf32>, vector<32x8xf32> -> vector<32x8xf32>
    %c4_197 = arith.constant 4 : index
    %c0_198 = arith.constant 0 : index
    %c0_199 = arith.constant 0 : index
    %290 = vector.load %arg13[%c4_197, %c0_198, %c0_199] : memref<8x1x8xf32, #tpu.memory_space<vmem>>, vector<1x1x8xf32>
    %291 = vector.shape_cast %290 : vector<1x1x8xf32> to vector<1x8xf32>
    %292 = vector.broadcast %291 : vector<1x8xf32> to vector<32x8xf32>
    %293 = arith.addf %289, %292 : vector<32x8xf32>
    %cst_200 = arith.constant dense<0.000000e+00> : vector<32x32xf32>
    %294 = tpu.matmul %279, %286, %cst_200 {dimension_numbers = #tpu.dot_dimension_numbers<[1], [1], [0], [0], [0, 0, 1, 0], [], []>} : vector<32x8xf32>, vector<32x8xf32>, vector<32x32xf32> -> vector<32x32xf32>
    %cst_201 = arith.constant 0.353553385 : f32
    %295 = vector.broadcast %cst_201 : f32 to vector<32x32xf32>
    %296 = arith.mulf %294, %295 : vector<32x32xf32>
    %297 = arith.addf %296, %8 : vector<32x32xf32>
    %cst_202 = arith.constant dense<0xFF800000> : vector<32xf32>
    %298 = vector.multi_reduction <maximumf>, %297, %cst_202 [1] : vector<32x32xf32> to vector<32xf32>
    %299 = vector.shape_cast %298 : vector<32xf32> to vector<32x1xf32>
    %300 = vector.broadcast %299 : vector<32x1xf32> to vector<32x32xf32>
    %301 = arith.subf %297, %300 : vector<32x32xf32>
    %302 = math.exp %301 : vector<32x32xf32>
    %cst_203 = arith.constant dense<0.000000e+00> : vector<32xf32>
    %303 = vector.multi_reduction <add>, %302, %cst_203 [1] : vector<32x32xf32> to vector<32xf32>
    %304 = vector.shape_cast %303 : vector<32xf32> to vector<32x1xf32>
    %305 = tpu.reciprocal %304 {approx = true} : vector<32x1xf32> -> vector<32x1xf32>
    %306 = vector.broadcast %305 : vector<32x1xf32> to vector<32x32xf32>
    %307 = arith.mulf %302, %306 : vector<32x32xf32>
    %cst_204 = arith.constant dense<0.000000e+00> : vector<32x8xf32>
    %308 = tpu.matmul %307, %293, %cst_204 {dimension_numbers = #tpu.dot_dimension_numbers<[1], [0], [0], [1], [0, 0, 1, 1], [], []>} : vector<32x32xf32>, vector<32x8xf32>, vector<32x8xf32> -> vector<32x8xf32>
    %c4_205 = arith.constant 4 : index
    %c0_206 = arith.constant 0 : index
    %c0_207 = arith.constant 0 : index
    %309 = vector.load %arg14[%c4_205, %c0_206, %c0_207] : memref<8x8x32xf32, #tpu.memory_space<vmem>>, vector<1x8x32xf32>
    %310 = vector.shape_cast %309 : vector<1x8x32xf32> to vector<8x32xf32>
    %cst_208 = arith.constant dense<0.000000e+00> : vector<32x32xf32>
    %311 = tpu.matmul %308, %310, %cst_208 {dimension_numbers = #tpu.dot_dimension_numbers<[1], [0], [0], [1], [0, 0, 1, 1], [], []>} : vector<32x8xf32>, vector<8x32xf32>, vector<32x32xf32> -> vector<32x32xf32>
    %c5 = arith.constant 5 : index
    %c0_209 = arith.constant 0 : index
    %c0_210 = arith.constant 0 : index
    %312 = vector.load %arg8[%c5, %c0_209, %c0_210] : memref<8x32x8xf32, #tpu.memory_space<vmem>>, vector<1x32x8xf32>
    %313 = vector.shape_cast %312 : vector<1x32x8xf32> to vector<32x8xf32>
    %cst_211 = arith.constant dense<0.000000e+00> : vector<32x8xf32>
    %314 = tpu.matmul %272, %313, %cst_211 {dimension_numbers = #tpu.dot_dimension_numbers<[1], [0], [0], [1], [0, 0, 1, 1], [], []>} : vector<32x32xf32>, vector<32x8xf32>, vector<32x8xf32> -> vector<32x8xf32>
    %c5_212 = arith.constant 5 : index
    %c0_213 = arith.constant 0 : index
    %c0_214 = arith.constant 0 : index
    %315 = vector.load %arg9[%c5_212, %c0_213, %c0_214] : memref<8x1x8xf32, #tpu.memory_space<vmem>>, vector<1x1x8xf32>
    %316 = vector.shape_cast %315 : vector<1x1x8xf32> to vector<1x8xf32>
    %317 = vector.broadcast %316 : vector<1x8xf32> to vector<32x8xf32>
    %318 = arith.addf %314, %317 : vector<32x8xf32>
    %c5_215 = arith.constant 5 : index
    %c0_216 = arith.constant 0 : index
    %c0_217 = arith.constant 0 : index
    %319 = vector.load %arg10[%c5_215, %c0_216, %c0_217] : memref<8x32x8xf32, #tpu.memory_space<vmem>>, vector<1x32x8xf32>
    %320 = vector.shape_cast %319 : vector<1x32x8xf32> to vector<32x8xf32>
    %cst_218 = arith.constant dense<0.000000e+00> : vector<32x8xf32>
    %321 = tpu.matmul %272, %320, %cst_218 {dimension_numbers = #tpu.dot_dimension_numbers<[1], [0], [0], [1], [0, 0, 1, 1], [], []>} : vector<32x32xf32>, vector<32x8xf32>, vector<32x8xf32> -> vector<32x8xf32>
    %c5_219 = arith.constant 5 : index
    %c0_220 = arith.constant 0 : index
    %c0_221 = arith.constant 0 : index
    %322 = vector.load %arg11[%c5_219, %c0_220, %c0_221] : memref<8x1x8xf32, #tpu.memory_space<vmem>>, vector<1x1x8xf32>
    %323 = vector.shape_cast %322 : vector<1x1x8xf32> to vector<1x8xf32>
    %324 = vector.broadcast %323 : vector<1x8xf32> to vector<32x8xf32>
    %325 = arith.addf %321, %324 : vector<32x8xf32>
    %c5_222 = arith.constant 5 : index
    %c0_223 = arith.constant 0 : index
    %c0_224 = arith.constant 0 : index
    %326 = vector.load %arg12[%c5_222, %c0_223, %c0_224] : memref<8x32x8xf32, #tpu.memory_space<vmem>>, vector<1x32x8xf32>
    %327 = vector.shape_cast %326 : vector<1x32x8xf32> to vector<32x8xf32>
    %cst_225 = arith.constant dense<0.000000e+00> : vector<32x8xf32>
    %328 = tpu.matmul %272, %327, %cst_225 {dimension_numbers = #tpu.dot_dimension_numbers<[1], [0], [0], [1], [0, 0, 1, 1], [], []>} : vector<32x32xf32>, vector<32x8xf32>, vector<32x8xf32> -> vector<32x8xf32>
    %c5_226 = arith.constant 5 : index
    %c0_227 = arith.constant 0 : index
    %c0_228 = arith.constant 0 : index
    %329 = vector.load %arg13[%c5_226, %c0_227, %c0_228] : memref<8x1x8xf32, #tpu.memory_space<vmem>>, vector<1x1x8xf32>
    %330 = vector.shape_cast %329 : vector<1x1x8xf32> to vector<1x8xf32>
    %331 = vector.broadcast %330 : vector<1x8xf32> to vector<32x8xf32>
    %332 = arith.addf %328, %331 : vector<32x8xf32>
    %cst_229 = arith.constant dense<0.000000e+00> : vector<32x32xf32>
    %333 = tpu.matmul %318, %325, %cst_229 {dimension_numbers = #tpu.dot_dimension_numbers<[1], [1], [0], [0], [0, 0, 1, 0], [], []>} : vector<32x8xf32>, vector<32x8xf32>, vector<32x32xf32> -> vector<32x32xf32>
    %cst_230 = arith.constant 0.353553385 : f32
    %334 = vector.broadcast %cst_230 : f32 to vector<32x32xf32>
    %335 = arith.mulf %333, %334 : vector<32x32xf32>
    %336 = arith.addf %335, %8 : vector<32x32xf32>
    %cst_231 = arith.constant dense<0xFF800000> : vector<32xf32>
    %337 = vector.multi_reduction <maximumf>, %336, %cst_231 [1] : vector<32x32xf32> to vector<32xf32>
    %338 = vector.shape_cast %337 : vector<32xf32> to vector<32x1xf32>
    %339 = vector.broadcast %338 : vector<32x1xf32> to vector<32x32xf32>
    %340 = arith.subf %336, %339 : vector<32x32xf32>
    %341 = math.exp %340 : vector<32x32xf32>
    %cst_232 = arith.constant dense<0.000000e+00> : vector<32xf32>
    %342 = vector.multi_reduction <add>, %341, %cst_232 [1] : vector<32x32xf32> to vector<32xf32>
    %343 = vector.shape_cast %342 : vector<32xf32> to vector<32x1xf32>
    %344 = tpu.reciprocal %343 {approx = true} : vector<32x1xf32> -> vector<32x1xf32>
    %345 = vector.broadcast %344 : vector<32x1xf32> to vector<32x32xf32>
    %346 = arith.mulf %341, %345 : vector<32x32xf32>
    %cst_233 = arith.constant dense<0.000000e+00> : vector<32x8xf32>
    %347 = tpu.matmul %346, %332, %cst_233 {dimension_numbers = #tpu.dot_dimension_numbers<[1], [0], [0], [1], [0, 0, 1, 1], [], []>} : vector<32x32xf32>, vector<32x8xf32>, vector<32x8xf32> -> vector<32x8xf32>
    %c5_234 = arith.constant 5 : index
    %c0_235 = arith.constant 0 : index
    %c0_236 = arith.constant 0 : index
    %348 = vector.load %arg14[%c5_234, %c0_235, %c0_236] : memref<8x8x32xf32, #tpu.memory_space<vmem>>, vector<1x8x32xf32>
    %349 = vector.shape_cast %348 : vector<1x8x32xf32> to vector<8x32xf32>
    %cst_237 = arith.constant dense<0.000000e+00> : vector<32x32xf32>
    %350 = tpu.matmul %347, %349, %cst_237 {dimension_numbers = #tpu.dot_dimension_numbers<[1], [0], [0], [1], [0, 0, 1, 1], [], []>} : vector<32x8xf32>, vector<8x32xf32>, vector<32x32xf32> -> vector<32x32xf32>
    %351 = arith.addf %311, %350 : vector<32x32xf32>
    %c6 = arith.constant 6 : index
    %c0_238 = arith.constant 0 : index
    %c0_239 = arith.constant 0 : index
    %352 = vector.load %arg8[%c6, %c0_238, %c0_239] : memref<8x32x8xf32, #tpu.memory_space<vmem>>, vector<1x32x8xf32>
    %353 = vector.shape_cast %352 : vector<1x32x8xf32> to vector<32x8xf32>
    %cst_240 = arith.constant dense<0.000000e+00> : vector<32x8xf32>
    %354 = tpu.matmul %272, %353, %cst_240 {dimension_numbers = #tpu.dot_dimension_numbers<[1], [0], [0], [1], [0, 0, 1, 1], [], []>} : vector<32x32xf32>, vector<32x8xf32>, vector<32x8xf32> -> vector<32x8xf32>
    %c6_241 = arith.constant 6 : index
    %c0_242 = arith.constant 0 : index
    %c0_243 = arith.constant 0 : index
    %355 = vector.load %arg9[%c6_241, %c0_242, %c0_243] : memref<8x1x8xf32, #tpu.memory_space<vmem>>, vector<1x1x8xf32>
    %356 = vector.shape_cast %355 : vector<1x1x8xf32> to vector<1x8xf32>
    %357 = vector.broadcast %356 : vector<1x8xf32> to vector<32x8xf32>
    %358 = arith.addf %354, %357 : vector<32x8xf32>
    %c6_244 = arith.constant 6 : index
    %c0_245 = arith.constant 0 : index
    %c0_246 = arith.constant 0 : index
    %359 = vector.load %arg10[%c6_244, %c0_245, %c0_246] : memref<8x32x8xf32, #tpu.memory_space<vmem>>, vector<1x32x8xf32>
    %360 = vector.shape_cast %359 : vector<1x32x8xf32> to vector<32x8xf32>
    %cst_247 = arith.constant dense<0.000000e+00> : vector<32x8xf32>
    %361 = tpu.matmul %272, %360, %cst_247 {dimension_numbers = #tpu.dot_dimension_numbers<[1], [0], [0], [1], [0, 0, 1, 1], [], []>} : vector<32x32xf32>, vector<32x8xf32>, vector<32x8xf32> -> vector<32x8xf32>
    %c6_248 = arith.constant 6 : index
    %c0_249 = arith.constant 0 : index
    %c0_250 = arith.constant 0 : index
    %362 = vector.load %arg11[%c6_248, %c0_249, %c0_250] : memref<8x1x8xf32, #tpu.memory_space<vmem>>, vector<1x1x8xf32>
    %363 = vector.shape_cast %362 : vector<1x1x8xf32> to vector<1x8xf32>
    %364 = vector.broadcast %363 : vector<1x8xf32> to vector<32x8xf32>
    %365 = arith.addf %361, %364 : vector<32x8xf32>
    %c6_251 = arith.constant 6 : index
    %c0_252 = arith.constant 0 : index
    %c0_253 = arith.constant 0 : index
    %366 = vector.load %arg12[%c6_251, %c0_252, %c0_253] : memref<8x32x8xf32, #tpu.memory_space<vmem>>, vector<1x32x8xf32>
    %367 = vector.shape_cast %366 : vector<1x32x8xf32> to vector<32x8xf32>
    %cst_254 = arith.constant dense<0.000000e+00> : vector<32x8xf32>
    %368 = tpu.matmul %272, %367, %cst_254 {dimension_numbers = #tpu.dot_dimension_numbers<[1], [0], [0], [1], [0, 0, 1, 1], [], []>} : vector<32x32xf32>, vector<32x8xf32>, vector<32x8xf32> -> vector<32x8xf32>
    %c6_255 = arith.constant 6 : index
    %c0_256 = arith.constant 0 : index
    %c0_257 = arith.constant 0 : index
    %369 = vector.load %arg13[%c6_255, %c0_256, %c0_257] : memref<8x1x8xf32, #tpu.memory_space<vmem>>, vector<1x1x8xf32>
    %370 = vector.shape_cast %369 : vector<1x1x8xf32> to vector<1x8xf32>
    %371 = vector.broadcast %370 : vector<1x8xf32> to vector<32x8xf32>
    %372 = arith.addf %368, %371 : vector<32x8xf32>
    %cst_258 = arith.constant dense<0.000000e+00> : vector<32x32xf32>
    %373 = tpu.matmul %358, %365, %cst_258 {dimension_numbers = #tpu.dot_dimension_numbers<[1], [1], [0], [0], [0, 0, 1, 0], [], []>} : vector<32x8xf32>, vector<32x8xf32>, vector<32x32xf32> -> vector<32x32xf32>
    %cst_259 = arith.constant 0.353553385 : f32
    %374 = vector.broadcast %cst_259 : f32 to vector<32x32xf32>
    %375 = arith.mulf %373, %374 : vector<32x32xf32>
    %376 = arith.addf %375, %8 : vector<32x32xf32>
    %cst_260 = arith.constant dense<0xFF800000> : vector<32xf32>
    %377 = vector.multi_reduction <maximumf>, %376, %cst_260 [1] : vector<32x32xf32> to vector<32xf32>
    %378 = vector.shape_cast %377 : vector<32xf32> to vector<32x1xf32>
    %379 = vector.broadcast %378 : vector<32x1xf32> to vector<32x32xf32>
    %380 = arith.subf %376, %379 : vector<32x32xf32>
    %381 = math.exp %380 : vector<32x32xf32>
    %cst_261 = arith.constant dense<0.000000e+00> : vector<32xf32>
    %382 = vector.multi_reduction <add>, %381, %cst_261 [1] : vector<32x32xf32> to vector<32xf32>
    %383 = vector.shape_cast %382 : vector<32xf32> to vector<32x1xf32>
    %384 = tpu.reciprocal %383 {approx = true} : vector<32x1xf32> -> vector<32x1xf32>
    %385 = vector.broadcast %384 : vector<32x1xf32> to vector<32x32xf32>
    %386 = arith.mulf %381, %385 : vector<32x32xf32>
    %cst_262 = arith.constant dense<0.000000e+00> : vector<32x8xf32>
    %387 = tpu.matmul %386, %372, %cst_262 {dimension_numbers = #tpu.dot_dimension_numbers<[1], [0], [0], [1], [0, 0, 1, 1], [], []>} : vector<32x32xf32>, vector<32x8xf32>, vector<32x8xf32> -> vector<32x8xf32>
    %c6_263 = arith.constant 6 : index
    %c0_264 = arith.constant 0 : index
    %c0_265 = arith.constant 0 : index
    %388 = vector.load %arg14[%c6_263, %c0_264, %c0_265] : memref<8x8x32xf32, #tpu.memory_space<vmem>>, vector<1x8x32xf32>
    %389 = vector.shape_cast %388 : vector<1x8x32xf32> to vector<8x32xf32>
    %cst_266 = arith.constant dense<0.000000e+00> : vector<32x32xf32>
    %390 = tpu.matmul %387, %389, %cst_266 {dimension_numbers = #tpu.dot_dimension_numbers<[1], [0], [0], [1], [0, 0, 1, 1], [], []>} : vector<32x8xf32>, vector<8x32xf32>, vector<32x32xf32> -> vector<32x32xf32>
    %391 = arith.addf %351, %390 : vector<32x32xf32>
    %c7 = arith.constant 7 : index
    %c0_267 = arith.constant 0 : index
    %c0_268 = arith.constant 0 : index
    %392 = vector.load %arg8[%c7, %c0_267, %c0_268] : memref<8x32x8xf32, #tpu.memory_space<vmem>>, vector<1x32x8xf32>
    %393 = vector.shape_cast %392 : vector<1x32x8xf32> to vector<32x8xf32>
    %cst_269 = arith.constant dense<0.000000e+00> : vector<32x8xf32>
    %394 = tpu.matmul %272, %393, %cst_269 {dimension_numbers = #tpu.dot_dimension_numbers<[1], [0], [0], [1], [0, 0, 1, 1], [], []>} : vector<32x32xf32>, vector<32x8xf32>, vector<32x8xf32> -> vector<32x8xf32>
    %c7_270 = arith.constant 7 : index
    %c0_271 = arith.constant 0 : index
    %c0_272 = arith.constant 0 : index
    %395 = vector.load %arg9[%c7_270, %c0_271, %c0_272] : memref<8x1x8xf32, #tpu.memory_space<vmem>>, vector<1x1x8xf32>
    %396 = vector.shape_cast %395 : vector<1x1x8xf32> to vector<1x8xf32>
    %397 = vector.broadcast %396 : vector<1x8xf32> to vector<32x8xf32>
    %398 = arith.addf %394, %397 : vector<32x8xf32>
    %c7_273 = arith.constant 7 : index
    %c0_274 = arith.constant 0 : index
    %c0_275 = arith.constant 0 : index
    %399 = vector.load %arg10[%c7_273, %c0_274, %c0_275] : memref<8x32x8xf32, #tpu.memory_space<vmem>>, vector<1x32x8xf32>
    %400 = vector.shape_cast %399 : vector<1x32x8xf32> to vector<32x8xf32>
    %cst_276 = arith.constant dense<0.000000e+00> : vector<32x8xf32>
    %401 = tpu.matmul %272, %400, %cst_276 {dimension_numbers = #tpu.dot_dimension_numbers<[1], [0], [0], [1], [0, 0, 1, 1], [], []>} : vector<32x32xf32>, vector<32x8xf32>, vector<32x8xf32> -> vector<32x8xf32>
    %c7_277 = arith.constant 7 : index
    %c0_278 = arith.constant 0 : index
    %c0_279 = arith.constant 0 : index
    %402 = vector.load %arg11[%c7_277, %c0_278, %c0_279] : memref<8x1x8xf32, #tpu.memory_space<vmem>>, vector<1x1x8xf32>
    %403 = vector.shape_cast %402 : vector<1x1x8xf32> to vector<1x8xf32>
    %404 = vector.broadcast %403 : vector<1x8xf32> to vector<32x8xf32>
    %405 = arith.addf %401, %404 : vector<32x8xf32>
    %c7_280 = arith.constant 7 : index
    %c0_281 = arith.constant 0 : index
    %c0_282 = arith.constant 0 : index
    %406 = vector.load %arg12[%c7_280, %c0_281, %c0_282] : memref<8x32x8xf32, #tpu.memory_space<vmem>>, vector<1x32x8xf32>
    %407 = vector.shape_cast %406 : vector<1x32x8xf32> to vector<32x8xf32>
    %cst_283 = arith.constant dense<0.000000e+00> : vector<32x8xf32>
    %408 = tpu.matmul %272, %407, %cst_283 {dimension_numbers = #tpu.dot_dimension_numbers<[1], [0], [0], [1], [0, 0, 1, 1], [], []>} : vector<32x32xf32>, vector<32x8xf32>, vector<32x8xf32> -> vector<32x8xf32>
    %c7_284 = arith.constant 7 : index
    %c0_285 = arith.constant 0 : index
    %c0_286 = arith.constant 0 : index
    %409 = vector.load %arg13[%c7_284, %c0_285, %c0_286] : memref<8x1x8xf32, #tpu.memory_space<vmem>>, vector<1x1x8xf32>
    %410 = vector.shape_cast %409 : vector<1x1x8xf32> to vector<1x8xf32>
    %411 = vector.broadcast %410 : vector<1x8xf32> to vector<32x8xf32>
    %412 = arith.addf %408, %411 : vector<32x8xf32>
    %cst_287 = arith.constant dense<0.000000e+00> : vector<32x32xf32>
    %413 = tpu.matmul %398, %405, %cst_287 {dimension_numbers = #tpu.dot_dimension_numbers<[1], [1], [0], [0], [0, 0, 1, 0], [], []>} : vector<32x8xf32>, vector<32x8xf32>, vector<32x32xf32> -> vector<32x32xf32>
    %cst_288 = arith.constant 0.353553385 : f32
    %414 = vector.broadcast %cst_288 : f32 to vector<32x32xf32>
    %415 = arith.mulf %413, %414 : vector<32x32xf32>
    %416 = arith.addf %415, %8 : vector<32x32xf32>
    %cst_289 = arith.constant dense<0xFF800000> : vector<32xf32>
    %417 = vector.multi_reduction <maximumf>, %416, %cst_289 [1] : vector<32x32xf32> to vector<32xf32>
    %418 = vector.shape_cast %417 : vector<32xf32> to vector<32x1xf32>
    %419 = vector.broadcast %418 : vector<32x1xf32> to vector<32x32xf32>
    %420 = arith.subf %416, %419 : vector<32x32xf32>
    %421 = math.exp %420 : vector<32x32xf32>
    %cst_290 = arith.constant dense<0.000000e+00> : vector<32xf32>
    %422 = vector.multi_reduction <add>, %421, %cst_290 [1] : vector<32x32xf32> to vector<32xf32>
    %423 = vector.shape_cast %422 : vector<32xf32> to vector<32x1xf32>
    %424 = tpu.reciprocal %423 {approx = true} : vector<32x1xf32> -> vector<32x1xf32>
    %425 = vector.broadcast %424 : vector<32x1xf32> to vector<32x32xf32>
    %426 = arith.mulf %421, %425 : vector<32x32xf32>
    %cst_291 = arith.constant dense<0.000000e+00> : vector<32x8xf32>
    %427 = tpu.matmul %426, %412, %cst_291 {dimension_numbers = #tpu.dot_dimension_numbers<[1], [0], [0], [1], [0, 0, 1, 1], [], []>} : vector<32x32xf32>, vector<32x8xf32>, vector<32x8xf32> -> vector<32x8xf32>
    %c7_292 = arith.constant 7 : index
    %c0_293 = arith.constant 0 : index
    %c0_294 = arith.constant 0 : index
    %428 = vector.load %arg14[%c7_292, %c0_293, %c0_294] : memref<8x8x32xf32, #tpu.memory_space<vmem>>, vector<1x8x32xf32>
    %429 = vector.shape_cast %428 : vector<1x8x32xf32> to vector<8x32xf32>
    %cst_295 = arith.constant dense<0.000000e+00> : vector<32x32xf32>
    %430 = tpu.matmul %427, %429, %cst_295 {dimension_numbers = #tpu.dot_dimension_numbers<[1], [0], [0], [1], [0, 0, 1, 1], [], []>} : vector<32x8xf32>, vector<8x32xf32>, vector<32x32xf32> -> vector<32x32xf32>
    %431 = arith.addf %391, %430 : vector<32x32xf32>
    %432 = arith.addf %248, %431 : vector<32x32xf32>
    %c1_296 = arith.constant 1 : index
    %c0_297 = arith.constant 0 : index
    %c0_298 = arith.constant 0 : index
    %433 = vector.load %arg15[%c1_296, %c0_297, %c0_298] : memref<2x1x32xf32, #tpu.memory_space<vmem>>, vector<1x1x32xf32>
    %434 = vector.shape_cast %433 : vector<1x1x32xf32> to vector<1x32xf32>
    %435 = vector.broadcast %434 : vector<1x32xf32> to vector<32x32xf32>
    %436 = arith.addf %432, %435 : vector<32x32xf32>
    %c1_299 = arith.constant 1 : index
    %c0_300 = arith.constant 0 : index
    %c0_301 = arith.constant 0 : index
    %437 = vector.load %arg16[%c1_299, %c0_300, %c0_301] : memref<2x1x32xf32, #tpu.memory_space<vmem>>, vector<1x1x32xf32>
    %438 = vector.shape_cast %437 : vector<1x1x32xf32> to vector<1x32xf32>
    %c1_302 = arith.constant 1 : index
    %c0_303 = arith.constant 0 : index
    %c0_304 = arith.constant 0 : index
    %439 = vector.load %arg17[%c1_302, %c0_303, %c0_304] : memref<2x1x32xf32, #tpu.memory_space<vmem>>, vector<1x1x32xf32>
    %440 = vector.shape_cast %439 : vector<1x1x32xf32> to vector<1x32xf32>
    %cst_305 = arith.constant dense<0.000000e+00> : vector<32xf32>
    %441 = vector.multi_reduction <add>, %436, %cst_305 [1] : vector<32x32xf32> to vector<32xf32>
    %442 = vector.shape_cast %441 : vector<32xf32> to vector<32x1xf32>
    %cst_306 = arith.constant 3.200000e+01 : f32
    %443 = vector.broadcast %cst_306 : f32 to vector<32x1xf32>
    %444 = arith.divf %442, %443 : vector<32x1xf32>
    %445 = vector.broadcast %444 : vector<32x1xf32> to vector<32x32xf32>
    %446 = arith.subf %436, %445 : vector<32x32xf32>
    %447 = arith.mulf %446, %446 : vector<32x32xf32>
    %cst_307 = arith.constant dense<0.000000e+00> : vector<32xf32>
    %448 = vector.multi_reduction <add>, %447, %cst_307 [1] : vector<32x32xf32> to vector<32xf32>
    %449 = vector.shape_cast %448 : vector<32xf32> to vector<32x1xf32>
    %cst_308 = arith.constant 3.200000e+01 : f32
    %450 = vector.broadcast %cst_308 : f32 to vector<32x1xf32>
    %451 = arith.divf %449, %450 : vector<32x1xf32>
    %cst_309 = arith.constant 9.99999974E-6 : f32
    %452 = vector.broadcast %cst_309 : f32 to vector<32x1xf32>
    %453 = arith.addf %451, %452 : vector<32x1xf32>
    %454 = math.rsqrt %453 : vector<32x1xf32>
    %455 = vector.broadcast %454 : vector<32x1xf32> to vector<32x32xf32>
    %456 = arith.mulf %446, %455 : vector<32x32xf32>
    %457 = vector.broadcast %438 : vector<1x32xf32> to vector<32x32xf32>
    %458 = arith.mulf %456, %457 : vector<32x32xf32>
    %459 = vector.broadcast %440 : vector<1x32xf32> to vector<32x32xf32>
    %460 = arith.addf %458, %459 : vector<32x32xf32>
    %c1_310 = arith.constant 1 : index
    %c0_311 = arith.constant 0 : index
    %c0_312 = arith.constant 0 : index
    %461 = vector.load %arg18[%c1_310, %c0_311, %c0_312] : memref<2x32x128xf32, #tpu.memory_space<vmem>>, vector<1x32x128xf32>
    %462 = vector.shape_cast %461 : vector<1x32x128xf32> to vector<32x128xf32>
    %cst_313 = arith.constant dense<0.000000e+00> : vector<32x128xf32>
    %463 = tpu.matmul %460, %462, %cst_313 {dimension_numbers = #tpu.dot_dimension_numbers<[1], [0], [0], [1], [0, 0, 1, 1], [], []>} : vector<32x32xf32>, vector<32x128xf32>, vector<32x128xf32> -> vector<32x128xf32>
    %c1_314 = arith.constant 1 : index
    %c0_315 = arith.constant 0 : index
    %c0_316 = arith.constant 0 : index
    %464 = vector.load %arg19[%c1_314, %c0_315, %c0_316] : memref<2x1x128xf32, #tpu.memory_space<vmem>>, vector<1x1x128xf32>
    %465 = vector.shape_cast %464 : vector<1x1x128xf32> to vector<1x128xf32>
    %466 = vector.broadcast %465 : vector<1x128xf32> to vector<32x128xf32>
    %467 = arith.addf %463, %466 : vector<32x128xf32>
    %cst_317 = arith.constant 5.000000e-01 : f32
    %468 = vector.broadcast %cst_317 : f32 to vector<32x128xf32>
    %469 = arith.mulf %468, %467 : vector<32x128xf32>
    %cst_318 = arith.constant 4.471500e-02 : f32
    %470 = vector.broadcast %cst_318 : f32 to vector<32x128xf32>
    %471 = arith.mulf %470, %467 : vector<32x128xf32>
    %472 = arith.mulf %471, %467 : vector<32x128xf32>
    %473 = arith.mulf %472, %467 : vector<32x128xf32>
    %474 = arith.addf %467, %473 : vector<32x128xf32>
    %cst_319 = arith.constant 0.797884583 : f32
    %475 = vector.broadcast %cst_319 : f32 to vector<32x128xf32>
    %476 = arith.mulf %475, %474 : vector<32x128xf32>
    %477 = math.tanh %476 : vector<32x128xf32>
    %cst_320 = arith.constant 1.000000e+00 : f32
    %478 = vector.broadcast %cst_320 : f32 to vector<32x128xf32>
    %479 = arith.addf %478, %477 : vector<32x128xf32>
    %480 = arith.mulf %469, %479 : vector<32x128xf32>
    %c1_321 = arith.constant 1 : index
    %c0_322 = arith.constant 0 : index
    %c0_323 = arith.constant 0 : index
    %481 = vector.load %arg20[%c1_321, %c0_322, %c0_323] : memref<2x128x32xf32, #tpu.memory_space<vmem>>, vector<1x128x32xf32>
    %482 = vector.shape_cast %481 : vector<1x128x32xf32> to vector<128x32xf32>
    %cst_324 = arith.constant dense<0.000000e+00> : vector<32x32xf32>
    %483 = tpu.matmul %480, %482, %cst_324 {dimension_numbers = #tpu.dot_dimension_numbers<[1], [0], [0], [1], [0, 0, 1, 1], [], []>} : vector<32x128xf32>, vector<128x32xf32>, vector<32x32xf32> -> vector<32x32xf32>
    %c1_325 = arith.constant 1 : index
    %c0_326 = arith.constant 0 : index
    %c0_327 = arith.constant 0 : index
    %484 = vector.load %arg21[%c1_325, %c0_326, %c0_327] : memref<2x1x32xf32, #tpu.memory_space<vmem>>, vector<1x1x32xf32>
    %485 = vector.shape_cast %484 : vector<1x1x32xf32> to vector<1x32xf32>
    %486 = vector.broadcast %485 : vector<1x32xf32> to vector<32x32xf32>
    %487 = arith.addf %483, %486 : vector<32x32xf32>
    %488 = arith.addf %436, %487 : vector<32x32xf32>
    %c0_328 = arith.constant 0 : index
    %c0_329 = arith.constant 0 : index
    %489 = vector.load %arg22[%c0_328, %c0_329] : memref<1x32xf32, #tpu.memory_space<vmem>>, vector<1x32xf32>
    %c0_330 = arith.constant 0 : index
    %c0_331 = arith.constant 0 : index
    %490 = vector.load %arg23[%c0_330, %c0_331] : memref<1x32xf32, #tpu.memory_space<vmem>>, vector<1x32xf32>
    %cst_332 = arith.constant dense<0.000000e+00> : vector<32xf32>
    %491 = vector.multi_reduction <add>, %488, %cst_332 [1] : vector<32x32xf32> to vector<32xf32>
    %492 = vector.shape_cast %491 : vector<32xf32> to vector<32x1xf32>
    %cst_333 = arith.constant 3.200000e+01 : f32
    %493 = vector.broadcast %cst_333 : f32 to vector<32x1xf32>
    %494 = arith.divf %492, %493 : vector<32x1xf32>
    %495 = vector.broadcast %494 : vector<32x1xf32> to vector<32x32xf32>
    %496 = arith.subf %488, %495 : vector<32x32xf32>
    %497 = arith.mulf %496, %496 : vector<32x32xf32>
    %cst_334 = arith.constant dense<0.000000e+00> : vector<32xf32>
    %498 = vector.multi_reduction <add>, %497, %cst_334 [1] : vector<32x32xf32> to vector<32xf32>
    %499 = vector.shape_cast %498 : vector<32xf32> to vector<32x1xf32>
    %cst_335 = arith.constant 3.200000e+01 : f32
    %500 = vector.broadcast %cst_335 : f32 to vector<32x1xf32>
    %501 = arith.divf %499, %500 : vector<32x1xf32>
    %cst_336 = arith.constant 9.99999974E-6 : f32
    %502 = vector.broadcast %cst_336 : f32 to vector<32x1xf32>
    %503 = arith.addf %501, %502 : vector<32x1xf32>
    %504 = math.rsqrt %503 : vector<32x1xf32>
    %505 = vector.broadcast %504 : vector<32x1xf32> to vector<32x32xf32>
    %506 = arith.mulf %496, %505 : vector<32x32xf32>
    %507 = vector.broadcast %489 : vector<1x32xf32> to vector<32x32xf32>
    %508 = arith.mulf %506, %507 : vector<32x32xf32>
    %509 = vector.broadcast %490 : vector<1x32xf32> to vector<32x32xf32>
    %510 = arith.addf %508, %509 : vector<32x32xf32>
    %c0_337 = arith.constant 0 : index
    %c0_338 = arith.constant 0 : index
    %511 = vector.load %arg24[%c0_337, %c0_338] : memref<32x32xf32, #tpu.memory_space<vmem>>, vector<32x32xf32>
    tpu.vector_store %arg24[%c0_337, %c0_338], %510 {strides = array<i32>} : memref<32x32xf32, #tpu.memory_space<vmem>>, vector<32x32xf32>,
    return
  }
  func.func @transform_0(%arg0: i32) -> (i32, i32) {
    %c0_i32 = arith.constant 0 : i32
    %c0_i32_0 = arith.constant 0 : i32
    %c0_i32_1 = arith.constant 0 : i32
    return %c0_i32, %c0_i32_0 : i32, i32
  }
  func.func @transform_1(%arg0: i32) -> (i32, i32) {
    %c0_i32 = arith.constant 0 : i32
    %c0_i32_0 = arith.constant 0 : i32
    %c0_i32_1 = arith.constant 0 : i32
    return %c0_i32, %c0_i32_0 : i32, i32
  }
  func.func @transform_2(%arg0: i32) -> (i32, i32) {
    %c0_i32 = arith.constant 0 : i32
    %c0_i32_0 = arith.constant 0 : i32
    %c0_i32_1 = arith.constant 0 : i32
    return %c0_i32, %c0_i32_0 : i32, i32
  }
  func.func @transform_3(%arg0: i32) -> (i32, i32) {
    %c0_i32 = arith.constant 0 : i32
    %c0_i32_0 = arith.constant 0 : i32
    %c0_i32_1 = arith.constant 0 : i32
    return %c0_i32, %c0_i32_0 : i32, i32
  }
  func.func @transform_4(%arg0: i32) -> (i32, i32) {
    %c0_i32 = arith.constant 0 : i32
    %c0_i32_0 = arith.constant 0 : i32
    %c0_i32_1 = arith.constant 0 : i32
    return %c0_i32, %c0_i32_0 : i32, i32
  }
  func.func @transform_5(%arg0: i32) -> (i32, i32, i32) {
    %c0_i32 = arith.constant 0 : i32
    %c0_i32_0 = arith.constant 0 : i32
    %c0_i32_1 = arith.constant 0 : i32
    %c0_i32_2 = arith.constant 0 : i32
    return %c0_i32, %c0_i32_0, %c0_i32_1 : i32, i32, i32
  }
  func.func @transform_6(%arg0: i32) -> (i32, i32, i32) {
    %c0_i32 = arith.constant 0 : i32
    %c0_i32_0 = arith.constant 0 : i32
    %c0_i32_1 = arith.constant 0 : i32
    %c0_i32_2 = arith.constant 0 : i32
    return %c0_i32, %c0_i32_0, %c0_i32_1 : i32, i32, i32
  }
  func.func @transform_7(%arg0: i32) -> (i32, i32, i32) {
    %c0_i32 = arith.constant 0 : i32
    %c0_i32_0 = arith.constant 0 : i32
    %c0_i32_1 = arith.constant 0 : i32
    %c0_i32_2 = arith.constant 0 : i32
    return %c0_i32, %c0_i32_0, %c0_i32_1 : i32, i32, i32
  }
  func.func @transform_8(%arg0: i32) -> (i32, i32, i32) {
    %c0_i32 = arith.constant 0 : i32
    %c0_i32_0 = arith.constant 0 : i32
    %c0_i32_1 = arith.constant 0 : i32
    %c0_i32_2 = arith.constant 0 : i32
    return %c0_i32, %c0_i32_0, %c0_i32_1 : i32, i32, i32
  }
  func.func @transform_9(%arg0: i32) -> (i32, i32, i32) {
    %c0_i32 = arith.constant 0 : i32
    %c0_i32_0 = arith.constant 0 : i32
    %c0_i32_1 = arith.constant 0 : i32
    %c0_i32_2 = arith.constant 0 : i32
    return %c0_i32, %c0_i32_0, %c0_i32_1 : i32, i32, i32
  }
  func.func @transform_10(%arg0: i32) -> (i32, i32, i32) {
    %c0_i32 = arith.constant 0 : i32
    %c0_i32_0 = arith.constant 0 : i32
    %c0_i32_1 = arith.constant 0 : i32
    %c0_i32_2 = arith.constant 0 : i32
    return %c0_i32, %c0_i32_0, %c0_i32_1 : i32, i32, i32
  }
  func.func @transform_11(%arg0: i32) -> (i32, i32, i32) {
    %c0_i32 = arith.constant 0 : i32
    %c0_i32_0 = arith.constant 0 : i32
    %c0_i32_1 = arith.constant 0 : i32
    %c0_i32_2 = arith.constant 0 : i32
    return %c0_i32, %c0_i32_0, %c0_i32_1 : i32, i32, i32
  }
  func.func @transform_12(%arg0: i32) -> (i32, i32, i32) {
    %c0_i32 = arith.constant 0 : i32
    %c0_i32_0 = arith.constant 0 : i32
    %c0_i32_1 = arith.constant 0 : i32
    %c0_i32_2 = arith.constant 0 : i32
    return %c0_i32, %c0_i32_0, %c0_i32_1 : i32, i32, i32
  }
  func.func @transform_13(%arg0: i32) -> (i32, i32, i32) {
    %c0_i32 = arith.constant 0 : i32
    %c0_i32_0 = arith.constant 0 : i32
    %c0_i32_1 = arith.constant 0 : i32
    %c0_i32_2 = arith.constant 0 : i32
    return %c0_i32, %c0_i32_0, %c0_i32_1 : i32, i32, i32
  }
  func.func @transform_14(%arg0: i32) -> (i32, i32, i32) {
    %c0_i32 = arith.constant 0 : i32
    %c0_i32_0 = arith.constant 0 : i32
    %c0_i32_1 = arith.constant 0 : i32
    %c0_i32_2 = arith.constant 0 : i32
    return %c0_i32, %c0_i32_0, %c0_i32_1 : i32, i32, i32
  }
  func.func @transform_15(%arg0: i32) -> (i32, i32, i32) {
    %c0_i32 = arith.constant 0 : i32
    %c0_i32_0 = arith.constant 0 : i32
    %c0_i32_1 = arith.constant 0 : i32
    %c0_i32_2 = arith.constant 0 : i32
    return %c0_i32, %c0_i32_0, %c0_i32_1 : i32, i32, i32
  }
  func.func @transform_16(%arg0: i32) -> (i32, i32, i32) {
    %c0_i32 = arith.constant 0 : i32
    %c0_i32_0 = arith.constant 0 : i32
    %c0_i32_1 = arith.constant 0 : i32
    %c0_i32_2 = arith.constant 0 : i32
    return %c0_i32, %c0_i32_0, %c0_i32_1 : i32, i32, i32
  }
  func.func @transform_17(%arg0: i32) -> (i32, i32, i32) {
    %c0_i32 = arith.constant 0 : i32
    %c0_i32_0 = arith.constant 0 : i32
    %c0_i32_1 = arith.constant 0 : i32
    %c0_i32_2 = arith.constant 0 : i32
    return %c0_i32, %c0_i32_0, %c0_i32_1 : i32, i32, i32
  }
  func.func @transform_18(%arg0: i32) -> (i32, i32, i32) {
    %c0_i32 = arith.constant 0 : i32
    %c0_i32_0 = arith.constant 0 : i32
    %c0_i32_1 = arith.constant 0 : i32
    %c0_i32_2 = arith.constant 0 : i32
    return %c0_i32, %c0_i32_0, %c0_i32_1 : i32, i32, i32
  }
  func.func @transform_19(%arg0: i32) -> (i32, i32, i32) {
    %c0_i32 = arith.constant 0 : i32
    %c0_i32_0 = arith.constant 0 : i32
    %c0_i32_1 = arith.constant 0 : i32
    %c0_i32_2 = arith.constant 0 : i32
    return %c0_i32, %c0_i32_0, %c0_i32_1 : i32, i32, i32
  }
  func.func @transform_20(%arg0: i32) -> (i32, i32, i32) {
    %c0_i32 = arith.constant 0 : i32
    %c0_i32_0 = arith.constant 0 : i32
    %c0_i32_1 = arith.constant 0 : i32
    %c0_i32_2 = arith.constant 0 : i32
    return %c0_i32, %c0_i32_0, %c0_i32_1 : i32, i32, i32
  }
  func.func @transform_21(%arg0: i32) -> (i32, i32) {
    %c0_i32 = arith.constant 0 : i32
    %c0_i32_0 = arith.constant 0 : i32
    %c0_i32_1 = arith.constant 0 : i32
    return %c0_i32, %c0_i32_0 : i32, i32
  }
  func.func @transform_22(%arg0: i32) -> (i32, i32) {
    %c0_i32 = arith.constant 0 : i32
    %c0_i32_0 = arith.constant 0 : i32
    %c0_i32_1 = arith.constant 0 : i32
    return %c0_i32, %c0_i32_0 : i32, i32
  }
  func.func @transform_23(%arg0: i32) -> (i32, i32) {
    %c0_i32 = arith.constant 0 : i32
    %c0_i32_0 = arith.constant 0 : i32
    %c0_i32_1 = arith.constant 0 : i32
    return %c0_i32, %c0_i32_0 : i32, i32
  }
}

module attributes {stable_mosaic.version = 11 : i64} {
  func.func @_fim_vq_kernel(%arg0: i32, %arg1: memref<32x32xf32, #tpu.memory_space<vmem>>, %arg2: memref<32x32xf32, #tpu.memory_space<vmem>>, %arg3: memref<32x16xf32, #tpu.memory_space<vmem>>, %arg4: memref<1x16xf32, #tpu.memory_space<vmem>>, %arg5: memref<1x1x16xf32, #tpu.memory_space<vmem>>, %arg6: memref<1x1x16xf32, #tpu.memory_space<vmem>>, %arg7: memref<2x16x8xf32, #tpu.memory_space<vmem>>, %arg8: memref<2x1x8xf32, #tpu.memory_space<vmem>>, %arg9: memref<2x16x8xf32, #tpu.memory_space<vmem>>, %arg10: memref<2x1x8xf32, #tpu.memory_space<vmem>>, %arg11: memref<2x16x8xf32, #tpu.memory_space<vmem>>, %arg12: memref<2x1x8xf32, #tpu.memory_space<vmem>>, %arg13: memref<2x8x16xf32, #tpu.memory_space<vmem>>, %arg14: memref<1x1x16xf32, #tpu.memory_space<vmem>>, %arg15: memref<1x1x16xf32, #tpu.memory_space<vmem>>, %arg16: memref<1x1x16xf32, #tpu.memory_space<vmem>>, %arg17: memref<1x16x64xf32, #tpu.memory_space<vmem>>, %arg18: memref<1x1x64xf32, #tpu.memory_space<vmem>>, %arg19: memref<1x64x16xf32, #tpu.memory_space<vmem>>, %arg20: memref<1x1x16xf32, #tpu.memory_space<vmem>>, %arg21: memref<1x16xf32, #tpu.memory_space<vmem>>, %arg22: memref<1x16xf32, #tpu.memory_space<vmem>>, %arg23: memref<16x1xf32, #tpu.memory_space<vmem>>, %arg24: memref<1x1xf32, #tpu.memory_space<vmem>>, %arg25: memref<32x32xf32, #tpu.memory_space<vmem>>, %arg26: memref<1x32xf32, #tpu.memory_space<vmem>>, %arg27: memref<1x32xf32, #tpu.memory_space<vmem>>, %arg28: memref<1x32xf32, #tpu.memory_space<vmem>>, %arg29: memref<24x32xf32, #tpu.memory_space<vmem>>, %arg30: memref<32x32xf32, #tpu.memory_space<vmem>>, %arg31: memref<32x128xf32, #tpu.memory_space<vmem>>, %arg32: memref<32x128xf32, #tpu.memory_space<vmem>>) attributes {dimension_semantics = [#tpu.dimension_semantics<arbitrary>], iteration_bounds = array<i64: 1>, scalar_prefetch = 0 : i64, scratch_operands = 0 : i64, tpu.core_type = #tpu.core_type<tc>, window_params = [{pipeline_mode = #tpu.pipeline_mode<synchronous>, transform_indices = @transform_0, window_bounds = array<i64: 32, 32>}, {pipeline_mode = #tpu.pipeline_mode<synchronous>, transform_indices = @transform_1, window_bounds = array<i64: 32, 32>}, {pipeline_mode = #tpu.pipeline_mode<synchronous>, transform_indices = @transform_2, window_bounds = array<i64: 32, 16>}, {pipeline_mode = #tpu.pipeline_mode<synchronous>, transform_indices = @transform_3, window_bounds = array<i64: 1, 16>}, {pipeline_mode = #tpu.pipeline_mode<synchronous>, transform_indices = @transform_4, window_bounds = array<i64: 1, 1, 16>}, {pipeline_mode = #tpu.pipeline_mode<synchronous>, transform_indices = @transform_5, window_bounds = array<i64: 1, 1, 16>}, {pipeline_mode = #tpu.pipeline_mode<synchronous>, transform_indices = @transform_6, window_bounds = array<i64: 2, 16, 8>}, {pipeline_mode = #tpu.pipeline_mode<synchronous>, transform_indices = @transform_7, window_bounds = array<i64: 2, 1, 8>}, {pipeline_mode = #tpu.pipeline_mode<synchronous>, transform_indices = @transform_8, window_bounds = array<i64: 2, 16, 8>}, {pipeline_mode = #tpu.pipeline_mode<synchronous>, transform_indices = @transform_9, window_bounds = array<i64: 2, 1, 8>}, {pipeline_mode = #tpu.pipeline_mode<synchronous>, transform_indices = @transform_10, window_bounds = array<i64: 2, 16, 8>}, {pipeline_mode = #tpu.pipeline_mode<synchronous>, transform_indices = @transform_11, window_bounds = array<i64: 2, 1, 8>}, {pipeline_mode = #tpu.pipeline_mode<synchronous>, transform_indices = @transform_12, window_bounds = array<i64: 2, 8, 16>}, {pipeline_mode = #tpu.pipeline_mode<synchronous>, transform_indices = @transform_13, window_bounds = array<i64: 1, 1, 16>}, {pipeline_mode = #tpu.pipeline_mode<synchronous>, transform_indices = @transform_14, window_bounds = array<i64: 1, 1, 16>}, {pipeline_mode = #tpu.pipeline_mode<synchronous>, transform_indices = @transform_15, window_bounds = array<i64: 1, 1, 16>}, {pipeline_mode = #tpu.pipeline_mode<synchronous>, transform_indices = @transform_16, window_bounds = array<i64: 1, 16, 64>}, {pipeline_mode = #tpu.pipeline_mode<synchronous>, transform_indices = @transform_17, window_bounds = array<i64: 1, 1, 64>}, {pipeline_mode = #tpu.pipeline_mode<synchronous>, transform_indices = @transform_18, window_bounds = array<i64: 1, 64, 16>}, {pipeline_mode = #tpu.pipeline_mode<synchronous>, transform_indices = @transform_19, window_bounds = array<i64: 1, 1, 16>}, {pipeline_mode = #tpu.pipeline_mode<synchronous>, transform_indices = @transform_20, window_bounds = array<i64: 1, 16>}, {pipeline_mode = #tpu.pipeline_mode<synchronous>, transform_indices = @transform_21, window_bounds = array<i64: 1, 16>}, {pipeline_mode = #tpu.pipeline_mode<synchronous>, transform_indices = @transform_22, window_bounds = array<i64: 16, 1>}, {pipeline_mode = #tpu.pipeline_mode<synchronous>, transform_indices = @transform_23, window_bounds = array<i64: 1, 1>}, {pipeline_mode = #tpu.pipeline_mode<synchronous>, transform_indices = @transform_24, window_bounds = array<i64: 32, 32>}, {pipeline_mode = #tpu.pipeline_mode<synchronous>, transform_indices = @transform_25, window_bounds = array<i64: 1, 32>}, {pipeline_mode = #tpu.pipeline_mode<synchronous>, transform_indices = @transform_26, window_bounds = array<i64: 1, 32>}, {pipeline_mode = #tpu.pipeline_mode<synchronous>, transform_indices = @transform_27, window_bounds = array<i64: 1, 32>}, {pipeline_mode = #tpu.pipeline_mode<synchronous>, transform_indices = @transform_28, window_bounds = array<i64: 24, 32>}, {pipeline_mode = #tpu.pipeline_mode<synchronous>, transform_indices = @transform_29, window_bounds = array<i64: 32, 32>}, {pipeline_mode = #tpu.pipeline_mode<synchronous>, transform_indices = @transform_30, window_bounds = array<i64: 32, 128>}, {pipeline_mode = #tpu.pipeline_mode<synchronous>, transform_indices = @transform_31, window_bounds = array<i64: 32, 128>}]} {
    %c0 = arith.constant 0 : index
    %c0_0 = arith.constant 0 : index
    %0 = vector.load %arg1[%c0, %c0_0] : memref<32x32xf32, #tpu.memory_space<vmem>>, vector<32x32xf32>
    %c0_1 = arith.constant 0 : index
    %c0_2 = arith.constant 0 : index
    %1 = vector.load %arg2[%c0_1, %c0_2] : memref<32x32xf32, #tpu.memory_space<vmem>>, vector<32x32xf32>
    %c0_3 = arith.constant 0 : index
    %c0_4 = arith.constant 0 : index
    %2 = vector.load %arg3[%c0_3, %c0_4] : memref<32x16xf32, #tpu.memory_space<vmem>>, vector<32x16xf32>
    %cst = arith.constant dense<0.000000e+00> : vector<32x16xf32>
    %3 = tpu.matmul %0, %2, %cst {dimension_numbers = #tpu.dot_dimension_numbers<[1], [0], [0], [1], [0, 0, 1, 1], [], []>} : vector<32x32xf32>, vector<32x16xf32>, vector<32x16xf32> -> vector<32x16xf32>
    %c0_5 = arith.constant 0 : index
    %c0_6 = arith.constant 0 : index
    %4 = vector.load %arg4[%c0_5, %c0_6] : memref<1x16xf32, #tpu.memory_space<vmem>>, vector<1x16xf32>
    %5 = vector.broadcast %4 : vector<1x16xf32> to vector<32x16xf32>
    %6 = arith.addf %3, %5 : vector<32x16xf32>
    %c0_7 = arith.constant 0 : index
    %c0_8 = arith.constant 0 : index
    %c0_9 = arith.constant 0 : index
    %7 = vector.load %arg5[%c0_7, %c0_8, %c0_9] : memref<1x1x16xf32, #tpu.memory_space<vmem>>, vector<1x1x16xf32>
    %8 = vector.shape_cast %7 : vector<1x1x16xf32> to vector<1x16xf32>
    %c0_10 = arith.constant 0 : index
    %c0_11 = arith.constant 0 : index
    %c0_12 = arith.constant 0 : index
    %9 = vector.load %arg6[%c0_10, %c0_11, %c0_12] : memref<1x1x16xf32, #tpu.memory_space<vmem>>, vector<1x1x16xf32>
    %10 = vector.shape_cast %9 : vector<1x1x16xf32> to vector<1x16xf32>
    %cst_13 = arith.constant dense<0.000000e+00> : vector<32xf32>
    %11 = vector.multi_reduction <add>, %6, %cst_13 [1] : vector<32x16xf32> to vector<32xf32>
    %12 = vector.shape_cast %11 : vector<32xf32> to vector<32x1xf32>
    %cst_14 = arith.constant 1.600000e+01 : f32
    %13 = vector.broadcast %cst_14 : f32 to vector<32x1xf32>
    %14 = arith.divf %12, %13 : vector<32x1xf32>
    %15 = vector.broadcast %14 : vector<32x1xf32> to vector<32x16xf32>
    %16 = arith.subf %6, %15 : vector<32x16xf32>
    %17 = arith.mulf %16, %16 : vector<32x16xf32>
    %cst_15 = arith.constant dense<0.000000e+00> : vector<32xf32>
    %18 = vector.multi_reduction <add>, %17, %cst_15 [1] : vector<32x16xf32> to vector<32xf32>
    %19 = vector.shape_cast %18 : vector<32xf32> to vector<32x1xf32>
    %cst_16 = arith.constant 1.600000e+01 : f32
    %20 = vector.broadcast %cst_16 : f32 to vector<32x1xf32>
    %21 = arith.divf %19, %20 : vector<32x1xf32>
    %cst_17 = arith.constant 9.99999997E-7 : f32
    %22 = vector.broadcast %cst_17 : f32 to vector<32x1xf32>
    %23 = arith.addf %21, %22 : vector<32x1xf32>
    %24 = math.rsqrt %23 : vector<32x1xf32>
    %25 = vector.broadcast %24 : vector<32x1xf32> to vector<32x16xf32>
    %26 = arith.mulf %16, %25 : vector<32x16xf32>
    %27 = vector.broadcast %8 : vector<1x16xf32> to vector<32x16xf32>
    %28 = arith.mulf %26, %27 : vector<32x16xf32>
    %29 = vector.broadcast %10 : vector<1x16xf32> to vector<32x16xf32>
    %30 = arith.addf %28, %29 : vector<32x16xf32>
    %c0_18 = arith.constant 0 : index
    %c0_19 = arith.constant 0 : index
    %c0_20 = arith.constant 0 : index
    %31 = vector.load %arg7[%c0_18, %c0_19, %c0_20] : memref<2x16x8xf32, #tpu.memory_space<vmem>>, vector<1x16x8xf32>
    %32 = vector.shape_cast %31 : vector<1x16x8xf32> to vector<16x8xf32>
    %cst_21 = arith.constant dense<0.000000e+00> : vector<32x8xf32>
    %33 = tpu.matmul %30, %32, %cst_21 {dimension_numbers = #tpu.dot_dimension_numbers<[1], [0], [0], [1], [0, 0, 1, 1], [], []>} : vector<32x16xf32>, vector<16x8xf32>, vector<32x8xf32> -> vector<32x8xf32>
    %c0_22 = arith.constant 0 : index
    %c0_23 = arith.constant 0 : index
    %c0_24 = arith.constant 0 : index
    %34 = vector.load %arg8[%c0_22, %c0_23, %c0_24] : memref<2x1x8xf32, #tpu.memory_space<vmem>>, vector<1x1x8xf32>
    %35 = vector.shape_cast %34 : vector<1x1x8xf32> to vector<1x8xf32>
    %36 = vector.broadcast %35 : vector<1x8xf32> to vector<32x8xf32>
    %37 = arith.addf %33, %36 : vector<32x8xf32>
    %c0_25 = arith.constant 0 : index
    %c0_26 = arith.constant 0 : index
    %c0_27 = arith.constant 0 : index
    %38 = vector.load %arg9[%c0_25, %c0_26, %c0_27] : memref<2x16x8xf32, #tpu.memory_space<vmem>>, vector<1x16x8xf32>
    %39 = vector.shape_cast %38 : vector<1x16x8xf32> to vector<16x8xf32>
    %cst_28 = arith.constant dense<0.000000e+00> : vector<32x8xf32>
    %40 = tpu.matmul %30, %39, %cst_28 {dimension_numbers = #tpu.dot_dimension_numbers<[1], [0], [0], [1], [0, 0, 1, 1], [], []>} : vector<32x16xf32>, vector<16x8xf32>, vector<32x8xf32> -> vector<32x8xf32>
    %c0_29 = arith.constant 0 : index
    %c0_30 = arith.constant 0 : index
    %c0_31 = arith.constant 0 : index
    %41 = vector.load %arg10[%c0_29, %c0_30, %c0_31] : memref<2x1x8xf32, #tpu.memory_space<vmem>>, vector<1x1x8xf32>
    %42 = vector.shape_cast %41 : vector<1x1x8xf32> to vector<1x8xf32>
    %43 = vector.broadcast %42 : vector<1x8xf32> to vector<32x8xf32>
    %44 = arith.addf %40, %43 : vector<32x8xf32>
    %c0_32 = arith.constant 0 : index
    %c0_33 = arith.constant 0 : index
    %c0_34 = arith.constant 0 : index
    %45 = vector.load %arg11[%c0_32, %c0_33, %c0_34] : memref<2x16x8xf32, #tpu.memory_space<vmem>>, vector<1x16x8xf32>
    %46 = vector.shape_cast %45 : vector<1x16x8xf32> to vector<16x8xf32>
    %cst_35 = arith.constant dense<0.000000e+00> : vector<32x8xf32>
    %47 = tpu.matmul %30, %46, %cst_35 {dimension_numbers = #tpu.dot_dimension_numbers<[1], [0], [0], [1], [0, 0, 1, 1], [], []>} : vector<32x16xf32>, vector<16x8xf32>, vector<32x8xf32> -> vector<32x8xf32>
    %c0_36 = arith.constant 0 : index
    %c0_37 = arith.constant 0 : index
    %c0_38 = arith.constant 0 : index
    %48 = vector.load %arg12[%c0_36, %c0_37, %c0_38] : memref<2x1x8xf32, #tpu.memory_space<vmem>>, vector<1x1x8xf32>
    %49 = vector.shape_cast %48 : vector<1x1x8xf32> to vector<1x8xf32>
    %50 = vector.broadcast %49 : vector<1x8xf32> to vector<32x8xf32>
    %51 = arith.addf %47, %50 : vector<32x8xf32>
    %cst_39 = arith.constant dense<0.000000e+00> : vector<32x32xf32>
    %52 = tpu.matmul %37, %44, %cst_39 {dimension_numbers = #tpu.dot_dimension_numbers<[1], [1], [0], [0], [0, 0, 1, 0], [], []>} : vector<32x8xf32>, vector<32x8xf32>, vector<32x32xf32> -> vector<32x32xf32>
    %cst_40 = arith.constant 0.353553385 : f32
    %53 = vector.broadcast %cst_40 : f32 to vector<32x32xf32>
    %54 = arith.mulf %52, %53 : vector<32x32xf32>
    %55 = arith.addf %54, %1 : vector<32x32xf32>
    %cst_41 = arith.constant dense<0xFF800000> : vector<32xf32>
    %56 = vector.multi_reduction <maximumf>, %55, %cst_41 [1] : vector<32x32xf32> to vector<32xf32>
    %57 = vector.shape_cast %56 : vector<32xf32> to vector<32x1xf32>
    %58 = vector.broadcast %57 : vector<32x1xf32> to vector<32x32xf32>
    %59 = arith.subf %55, %58 : vector<32x32xf32>
    %60 = math.exp %59 : vector<32x32xf32>
    %cst_42 = arith.constant dense<0.000000e+00> : vector<32xf32>
    %61 = vector.multi_reduction <add>, %60, %cst_42 [1] : vector<32x32xf32> to vector<32xf32>
    %62 = vector.shape_cast %61 : vector<32xf32> to vector<32x1xf32>
    %63 = tpu.reciprocal %62 {approx = true} : vector<32x1xf32> -> vector<32x1xf32>
    %64 = vector.broadcast %63 : vector<32x1xf32> to vector<32x32xf32>
    %65 = arith.mulf %60, %64 : vector<32x32xf32>
    %cst_43 = arith.constant dense<0.000000e+00> : vector<32x8xf32>
    %66 = tpu.matmul %65, %51, %cst_43 {dimension_numbers = #tpu.dot_dimension_numbers<[1], [0], [0], [1], [0, 0, 1, 1], [], []>} : vector<32x32xf32>, vector<32x8xf32>, vector<32x8xf32> -> vector<32x8xf32>
    %c0_44 = arith.constant 0 : index
    %c0_45 = arith.constant 0 : index
    %c0_46 = arith.constant 0 : index
    %67 = vector.load %arg13[%c0_44, %c0_45, %c0_46] : memref<2x8x16xf32, #tpu.memory_space<vmem>>, vector<1x8x16xf32>
    %68 = vector.shape_cast %67 : vector<1x8x16xf32> to vector<8x16xf32>
    %cst_47 = arith.constant dense<0.000000e+00> : vector<32x16xf32>
    %69 = tpu.matmul %66, %68, %cst_47 {dimension_numbers = #tpu.dot_dimension_numbers<[1], [0], [0], [1], [0, 0, 1, 1], [], []>} : vector<32x8xf32>, vector<8x16xf32>, vector<32x16xf32> -> vector<32x16xf32>
    %c1 = arith.constant 1 : index
    %c0_48 = arith.constant 0 : index
    %c0_49 = arith.constant 0 : index
    %70 = vector.load %arg7[%c1, %c0_48, %c0_49] : memref<2x16x8xf32, #tpu.memory_space<vmem>>, vector<1x16x8xf32>
    %71 = vector.shape_cast %70 : vector<1x16x8xf32> to vector<16x8xf32>
    %cst_50 = arith.constant dense<0.000000e+00> : vector<32x8xf32>
    %72 = tpu.matmul %30, %71, %cst_50 {dimension_numbers = #tpu.dot_dimension_numbers<[1], [0], [0], [1], [0, 0, 1, 1], [], []>} : vector<32x16xf32>, vector<16x8xf32>, vector<32x8xf32> -> vector<32x8xf32>
    %c1_51 = arith.constant 1 : index
    %c0_52 = arith.constant 0 : index
    %c0_53 = arith.constant 0 : index
    %73 = vector.load %arg8[%c1_51, %c0_52, %c0_53] : memref<2x1x8xf32, #tpu.memory_space<vmem>>, vector<1x1x8xf32>
    %74 = vector.shape_cast %73 : vector<1x1x8xf32> to vector<1x8xf32>
    %75 = vector.broadcast %74 : vector<1x8xf32> to vector<32x8xf32>
    %76 = arith.addf %72, %75 : vector<32x8xf32>
    %c1_54 = arith.constant 1 : index
    %c0_55 = arith.constant 0 : index
    %c0_56 = arith.constant 0 : index
    %77 = vector.load %arg9[%c1_54, %c0_55, %c0_56] : memref<2x16x8xf32, #tpu.memory_space<vmem>>, vector<1x16x8xf32>
    %78 = vector.shape_cast %77 : vector<1x16x8xf32> to vector<16x8xf32>
    %cst_57 = arith.constant dense<0.000000e+00> : vector<32x8xf32>
    %79 = tpu.matmul %30, %78, %cst_57 {dimension_numbers = #tpu.dot_dimension_numbers<[1], [0], [0], [1], [0, 0, 1, 1], [], []>} : vector<32x16xf32>, vector<16x8xf32>, vector<32x8xf32> -> vector<32x8xf32>
    %c1_58 = arith.constant 1 : index
    %c0_59 = arith.constant 0 : index
    %c0_60 = arith.constant 0 : index
    %80 = vector.load %arg10[%c1_58, %c0_59, %c0_60] : memref<2x1x8xf32, #tpu.memory_space<vmem>>, vector<1x1x8xf32>
    %81 = vector.shape_cast %80 : vector<1x1x8xf32> to vector<1x8xf32>
    %82 = vector.broadcast %81 : vector<1x8xf32> to vector<32x8xf32>
    %83 = arith.addf %79, %82 : vector<32x8xf32>
    %c1_61 = arith.constant 1 : index
    %c0_62 = arith.constant 0 : index
    %c0_63 = arith.constant 0 : index
    %84 = vector.load %arg11[%c1_61, %c0_62, %c0_63] : memref<2x16x8xf32, #tpu.memory_space<vmem>>, vector<1x16x8xf32>
    %85 = vector.shape_cast %84 : vector<1x16x8xf32> to vector<16x8xf32>
    %cst_64 = arith.constant dense<0.000000e+00> : vector<32x8xf32>
    %86 = tpu.matmul %30, %85, %cst_64 {dimension_numbers = #tpu.dot_dimension_numbers<[1], [0], [0], [1], [0, 0, 1, 1], [], []>} : vector<32x16xf32>, vector<16x8xf32>, vector<32x8xf32> -> vector<32x8xf32>
    %c1_65 = arith.constant 1 : index
    %c0_66 = arith.constant 0 : index
    %c0_67 = arith.constant 0 : index
    %87 = vector.load %arg12[%c1_65, %c0_66, %c0_67] : memref<2x1x8xf32, #tpu.memory_space<vmem>>, vector<1x1x8xf32>
    %88 = vector.shape_cast %87 : vector<1x1x8xf32> to vector<1x8xf32>
    %89 = vector.broadcast %88 : vector<1x8xf32> to vector<32x8xf32>
    %90 = arith.addf %86, %89 : vector<32x8xf32>
    %cst_68 = arith.constant dense<0.000000e+00> : vector<32x32xf32>
    %91 = tpu.matmul %76, %83, %cst_68 {dimension_numbers = #tpu.dot_dimension_numbers<[1], [1], [0], [0], [0, 0, 1, 0], [], []>} : vector<32x8xf32>, vector<32x8xf32>, vector<32x32xf32> -> vector<32x32xf32>
    %cst_69 = arith.constant 0.353553385 : f32
    %92 = vector.broadcast %cst_69 : f32 to vector<32x32xf32>
    %93 = arith.mulf %91, %92 : vector<32x32xf32>
    %94 = arith.addf %93, %1 : vector<32x32xf32>
    %cst_70 = arith.constant dense<0xFF800000> : vector<32xf32>
    %95 = vector.multi_reduction <maximumf>, %94, %cst_70 [1] : vector<32x32xf32> to vector<32xf32>
    %96 = vector.shape_cast %95 : vector<32xf32> to vector<32x1xf32>
    %97 = vector.broadcast %96 : vector<32x1xf32> to vector<32x32xf32>
    %98 = arith.subf %94, %97 : vector<32x32xf32>
    %99 = math.exp %98 : vector<32x32xf32>
    %cst_71 = arith.constant dense<0.000000e+00> : vector<32xf32>
    %100 = vector.multi_reduction <add>, %99, %cst_71 [1] : vector<32x32xf32> to vector<32xf32>
    %101 = vector.shape_cast %100 : vector<32xf32> to vector<32x1xf32>
    %102 = tpu.reciprocal %101 {approx = true} : vector<32x1xf32> -> vector<32x1xf32>
    %103 = vector.broadcast %102 : vector<32x1xf32> to vector<32x32xf32>
    %104 = arith.mulf %99, %103 : vector<32x32xf32>
    %cst_72 = arith.constant dense<0.000000e+00> : vector<32x8xf32>
    %105 = tpu.matmul %104, %90, %cst_72 {dimension_numbers = #tpu.dot_dimension_numbers<[1], [0], [0], [1], [0, 0, 1, 1], [], []>} : vector<32x32xf32>, vector<32x8xf32>, vector<32x8xf32> -> vector<32x8xf32>
    %c1_73 = arith.constant 1 : index
    %c0_74 = arith.constant 0 : index
    %c0_75 = arith.constant 0 : index
    %106 = vector.load %arg13[%c1_73, %c0_74, %c0_75] : memref<2x8x16xf32, #tpu.memory_space<vmem>>, vector<1x8x16xf32>
    %107 = vector.shape_cast %106 : vector<1x8x16xf32> to vector<8x16xf32>
    %cst_76 = arith.constant dense<0.000000e+00> : vector<32x16xf32>
    %108 = tpu.matmul %105, %107, %cst_76 {dimension_numbers = #tpu.dot_dimension_numbers<[1], [0], [0], [1], [0, 0, 1, 1], [], []>} : vector<32x8xf32>, vector<8x16xf32>, vector<32x16xf32> -> vector<32x16xf32>
    %109 = arith.addf %69, %108 : vector<32x16xf32>
    %110 = arith.addf %6, %109 : vector<32x16xf32>
    %c0_77 = arith.constant 0 : index
    %c0_78 = arith.constant 0 : index
    %c0_79 = arith.constant 0 : index
    %111 = vector.load %arg14[%c0_77, %c0_78, %c0_79] : memref<1x1x16xf32, #tpu.memory_space<vmem>>, vector<1x1x16xf32>
    %112 = vector.shape_cast %111 : vector<1x1x16xf32> to vector<1x16xf32>
    %113 = vector.broadcast %112 : vector<1x16xf32> to vector<32x16xf32>
    %114 = arith.addf %110, %113 : vector<32x16xf32>
    %c0_80 = arith.constant 0 : index
    %c0_81 = arith.constant 0 : index
    %c0_82 = arith.constant 0 : index
    %115 = vector.load %arg15[%c0_80, %c0_81, %c0_82] : memref<1x1x16xf32, #tpu.memory_space<vmem>>, vector<1x1x16xf32>
    %116 = vector.shape_cast %115 : vector<1x1x16xf32> to vector<1x16xf32>
    %c0_83 = arith.constant 0 : index
    %c0_84 = arith.constant 0 : index
    %c0_85 = arith.constant 0 : index
    %117 = vector.load %arg16[%c0_83, %c0_84, %c0_85] : memref<1x1x16xf32, #tpu.memory_space<vmem>>, vector<1x1x16xf32>
    %118 = vector.shape_cast %117 : vector<1x1x16xf32> to vector<1x16xf32>
    %cst_86 = arith.constant dense<0.000000e+00> : vector<32xf32>
    %119 = vector.multi_reduction <add>, %114, %cst_86 [1] : vector<32x16xf32> to vector<32xf32>
    %120 = vector.shape_cast %119 : vector<32xf32> to vector<32x1xf32>
    %cst_87 = arith.constant 1.600000e+01 : f32
    %121 = vector.broadcast %cst_87 : f32 to vector<32x1xf32>
    %122 = arith.divf %120, %121 : vector<32x1xf32>
    %123 = vector.broadcast %122 : vector<32x1xf32> to vector<32x16xf32>
    %124 = arith.subf %114, %123 : vector<32x16xf32>
    %125 = arith.mulf %124, %124 : vector<32x16xf32>
    %cst_88 = arith.constant dense<0.000000e+00> : vector<32xf32>
    %126 = vector.multi_reduction <add>, %125, %cst_88 [1] : vector<32x16xf32> to vector<32xf32>
    %127 = vector.shape_cast %126 : vector<32xf32> to vector<32x1xf32>
    %cst_89 = arith.constant 1.600000e+01 : f32
    %128 = vector.broadcast %cst_89 : f32 to vector<32x1xf32>
    %129 = arith.divf %127, %128 : vector<32x1xf32>
    %cst_90 = arith.constant 9.99999997E-7 : f32
    %130 = vector.broadcast %cst_90 : f32 to vector<32x1xf32>
    %131 = arith.addf %129, %130 : vector<32x1xf32>
    %132 = math.rsqrt %131 : vector<32x1xf32>
    %133 = vector.broadcast %132 : vector<32x1xf32> to vector<32x16xf32>
    %134 = arith.mulf %124, %133 : vector<32x16xf32>
    %135 = vector.broadcast %116 : vector<1x16xf32> to vector<32x16xf32>
    %136 = arith.mulf %134, %135 : vector<32x16xf32>
    %137 = vector.broadcast %118 : vector<1x16xf32> to vector<32x16xf32>
    %138 = arith.addf %136, %137 : vector<32x16xf32>
    %c0_91 = arith.constant 0 : index
    %c0_92 = arith.constant 0 : index
    %c0_93 = arith.constant 0 : index
    %139 = vector.load %arg17[%c0_91, %c0_92, %c0_93] : memref<1x16x64xf32, #tpu.memory_space<vmem>>, vector<1x16x64xf32>
    %140 = vector.shape_cast %139 : vector<1x16x64xf32> to vector<16x64xf32>
    %cst_94 = arith.constant dense<0.000000e+00> : vector<32x64xf32>
    %141 = tpu.matmul %138, %140, %cst_94 {dimension_numbers = #tpu.dot_dimension_numbers<[1], [0], [0], [1], [0, 0, 1, 1], [], []>} : vector<32x16xf32>, vector<16x64xf32>, vector<32x64xf32> -> vector<32x64xf32>
    %c0_95 = arith.constant 0 : index
    %c0_96 = arith.constant 0 : index
    %c0_97 = arith.constant 0 : index
    %142 = vector.load %arg18[%c0_95, %c0_96, %c0_97] : memref<1x1x64xf32, #tpu.memory_space<vmem>>, vector<1x1x64xf32>
    %143 = vector.shape_cast %142 : vector<1x1x64xf32> to vector<1x64xf32>
    %144 = vector.broadcast %143 : vector<1x64xf32> to vector<32x64xf32>
    %145 = arith.addf %141, %144 : vector<32x64xf32>
    %cst_98 = arith.constant 5.000000e-01 : f32
    %146 = vector.broadcast %cst_98 : f32 to vector<32x64xf32>
    %147 = arith.mulf %146, %145 : vector<32x64xf32>
    %cst_99 = arith.constant 4.471500e-02 : f32
    %148 = vector.broadcast %cst_99 : f32 to vector<32x64xf32>
    %149 = arith.mulf %148, %145 : vector<32x64xf32>
    %150 = arith.mulf %149, %145 : vector<32x64xf32>
    %151 = arith.mulf %150, %145 : vector<32x64xf32>
    %152 = arith.addf %145, %151 : vector<32x64xf32>
    %cst_100 = arith.constant 0.797884583 : f32
    %153 = vector.broadcast %cst_100 : f32 to vector<32x64xf32>
    %154 = arith.mulf %153, %152 : vector<32x64xf32>
    %155 = math.tanh %154 : vector<32x64xf32>
    %cst_101 = arith.constant 1.000000e+00 : f32
    %156 = vector.broadcast %cst_101 : f32 to vector<32x64xf32>
    %157 = arith.addf %156, %155 : vector<32x64xf32>
    %158 = arith.mulf %147, %157 : vector<32x64xf32>
    %c0_102 = arith.constant 0 : index
    %c0_103 = arith.constant 0 : index
    %c0_104 = arith.constant 0 : index
    %159 = vector.load %arg19[%c0_102, %c0_103, %c0_104] : memref<1x64x16xf32, #tpu.memory_space<vmem>>, vector<1x64x16xf32>
    %160 = vector.shape_cast %159 : vector<1x64x16xf32> to vector<64x16xf32>
    %cst_105 = arith.constant dense<0.000000e+00> : vector<32x16xf32>
    %161 = tpu.matmul %158, %160, %cst_105 {dimension_numbers = #tpu.dot_dimension_numbers<[1], [0], [0], [1], [0, 0, 1, 1], [], []>} : vector<32x64xf32>, vector<64x16xf32>, vector<32x16xf32> -> vector<32x16xf32>
    %c0_106 = arith.constant 0 : index
    %c0_107 = arith.constant 0 : index
    %c0_108 = arith.constant 0 : index
    %162 = vector.load %arg20[%c0_106, %c0_107, %c0_108] : memref<1x1x16xf32, #tpu.memory_space<vmem>>, vector<1x1x16xf32>
    %163 = vector.shape_cast %162 : vector<1x1x16xf32> to vector<1x16xf32>
    %164 = vector.broadcast %163 : vector<1x16xf32> to vector<32x16xf32>
    %165 = arith.addf %161, %164 : vector<32x16xf32>
    %166 = arith.addf %114, %165 : vector<32x16xf32>
    %c0_109 = arith.constant 0 : index
    %c0_110 = arith.constant 0 : index
    %167 = vector.load %arg21[%c0_109, %c0_110] : memref<1x16xf32, #tpu.memory_space<vmem>>, vector<1x16xf32>
    %c0_111 = arith.constant 0 : index
    %c0_112 = arith.constant 0 : index
    %168 = vector.load %arg22[%c0_111, %c0_112] : memref<1x16xf32, #tpu.memory_space<vmem>>, vector<1x16xf32>
    %cst_113 = arith.constant dense<0.000000e+00> : vector<32xf32>
    %169 = vector.multi_reduction <add>, %166, %cst_113 [1] : vector<32x16xf32> to vector<32xf32>
    %170 = vector.shape_cast %169 : vector<32xf32> to vector<32x1xf32>
    %cst_114 = arith.constant 1.600000e+01 : f32
    %171 = vector.broadcast %cst_114 : f32 to vector<32x1xf32>
    %172 = arith.divf %170, %171 : vector<32x1xf32>
    %173 = vector.broadcast %172 : vector<32x1xf32> to vector<32x16xf32>
    %174 = arith.subf %166, %173 : vector<32x16xf32>
    %175 = arith.mulf %174, %174 : vector<32x16xf32>
    %cst_115 = arith.constant dense<0.000000e+00> : vector<32xf32>
    %176 = vector.multi_reduction <add>, %175, %cst_115 [1] : vector<32x16xf32> to vector<32xf32>
    %177 = vector.shape_cast %176 : vector<32xf32> to vector<32x1xf32>
    %cst_116 = arith.constant 1.600000e+01 : f32
    %178 = vector.broadcast %cst_116 : f32 to vector<32x1xf32>
    %179 = arith.divf %177, %178 : vector<32x1xf32>
    %cst_117 = arith.constant 9.99999997E-7 : f32
    %180 = vector.broadcast %cst_117 : f32 to vector<32x1xf32>
    %181 = arith.addf %179, %180 : vector<32x1xf32>
    %182 = math.rsqrt %181 : vector<32x1xf32>
    %183 = vector.broadcast %182 : vector<32x1xf32> to vector<32x16xf32>
    %184 = arith.mulf %174, %183 : vector<32x16xf32>
    %185 = vector.broadcast %167 : vector<1x16xf32> to vector<32x16xf32>
    %186 = arith.mulf %184, %185 : vector<32x16xf32>
    %187 = vector.broadcast %168 : vector<1x16xf32> to vector<32x16xf32>
    %188 = arith.addf %186, %187 : vector<32x16xf32>
    %c0_118 = arith.constant 0 : index
    %c0_119 = arith.constant 0 : index
    %189 = vector.load %arg23[%c0_118, %c0_119] : memref<16x1xf32, #tpu.memory_space<vmem>>, vector<16x1xf32>
    %cst_120 = arith.constant dense<0.000000e+00> : vector<32x1xf32>
    %190 = tpu.matmul %188, %189, %cst_120 {dimension_numbers = #tpu.dot_dimension_numbers<[1], [0], [0], [1], [0, 0, 1, 1], [], []>} : vector<32x16xf32>, vector<16x1xf32>, vector<32x1xf32> -> vector<32x1xf32>
    %c0_121 = arith.constant 0 : index
    %c0_122 = arith.constant 0 : index
    %191 = vector.load %arg24[%c0_121, %c0_122] : memref<1x1xf32, #tpu.memory_space<vmem>>, vector<1x1xf32>
    %192 = vector.broadcast %191 : vector<1x1xf32> to vector<32x1xf32>
    %193 = arith.addf %190, %192 : vector<32x1xf32>
    %cst_123 = arith.constant 0.000000e+00 : f32
    %194 = vector.broadcast %cst_123 : f32 to vector<32x1xf32>
    %195 = arith.subf %194, %193 : vector<32x1xf32>
    %196 = math.exp %195 : vector<32x1xf32>
    %cst_124 = arith.constant 1.000000e+00 : f32
    %197 = vector.broadcast %cst_124 : f32 to vector<32x1xf32>
    %198 = arith.addf %197, %196 : vector<32x1xf32>
    %cst_125 = arith.constant 1.000000e+00 : f32
    %199 = vector.broadcast %cst_125 : f32 to vector<32x1xf32>
    %200 = arith.divf %199, %198 : vector<32x1xf32>
    %c0_126 = arith.constant 0 : index
    %c0_127 = arith.constant 0 : index
    %201 = vector.load %arg25[%c0_126, %c0_127] : memref<32x32xf32, #tpu.memory_space<vmem>>, vector<32x32xf32>
    %cst_128 = arith.constant dense<0.000000e+00> : vector<32x32xf32>
    %202 = tpu.matmul %0, %201, %cst_128 {dimension_numbers = #tpu.dot_dimension_numbers<[1], [0], [0], [1], [0, 0, 1, 1], [], []>} : vector<32x32xf32>, vector<32x32xf32>, vector<32x32xf32> -> vector<32x32xf32>
    %c0_129 = arith.constant 0 : index
    %c0_130 = arith.constant 0 : index
    %203 = vector.load %arg26[%c0_129, %c0_130] : memref<1x32xf32, #tpu.memory_space<vmem>>, vector<1x32xf32>
    %204 = vector.broadcast %203 : vector<1x32xf32> to vector<32x32xf32>
    %205 = arith.addf %202, %204 : vector<32x32xf32>
    %c0_131 = arith.constant 0 : index
    %c0_132 = arith.constant 0 : index
    %206 = vector.load %arg27[%c0_131, %c0_132] : memref<1x32xf32, #tpu.memory_space<vmem>>, vector<1x32xf32>
    %c0_133 = arith.constant 0 : index
    %c0_134 = arith.constant 0 : index
    %207 = vector.load %arg28[%c0_133, %c0_134] : memref<1x32xf32, #tpu.memory_space<vmem>>, vector<1x32xf32>
    %cst_135 = arith.constant dense<0.000000e+00> : vector<32xf32>
    %208 = vector.multi_reduction <add>, %205, %cst_135 [1] : vector<32x32xf32> to vector<32xf32>
    %209 = vector.shape_cast %208 : vector<32xf32> to vector<32x1xf32>
    %cst_136 = arith.constant 3.200000e+01 : f32
    %210 = vector.broadcast %cst_136 : f32 to vector<32x1xf32>
    %211 = arith.divf %209, %210 : vector<32x1xf32>
    %212 = vector.broadcast %211 : vector<32x1xf32> to vector<32x32xf32>
    %213 = arith.subf %205, %212 : vector<32x32xf32>
    %214 = arith.mulf %213, %213 : vector<32x32xf32>
    %cst_137 = arith.constant dense<0.000000e+00> : vector<32xf32>
    %215 = vector.multi_reduction <add>, %214, %cst_137 [1] : vector<32x32xf32> to vector<32xf32>
    %216 = vector.shape_cast %215 : vector<32xf32> to vector<32x1xf32>
    %cst_138 = arith.constant 3.200000e+01 : f32
    %217 = vector.broadcast %cst_138 : f32 to vector<32x1xf32>
    %218 = arith.divf %216, %217 : vector<32x1xf32>
    %cst_139 = arith.constant 9.99999974E-6 : f32
    %219 = vector.broadcast %cst_139 : f32 to vector<32x1xf32>
    %220 = arith.addf %218, %219 : vector<32x1xf32>
    %221 = math.rsqrt %220 : vector<32x1xf32>
    %222 = vector.broadcast %221 : vector<32x1xf32> to vector<32x32xf32>
    %223 = arith.mulf %213, %222 : vector<32x32xf32>
    %224 = vector.broadcast %206 : vector<1x32xf32> to vector<32x32xf32>
    %225 = arith.mulf %223, %224 : vector<32x32xf32>
    %226 = vector.broadcast %207 : vector<1x32xf32> to vector<32x32xf32>
    %227 = arith.addf %225, %226 : vector<32x32xf32>
    %c0_140 = arith.constant 0 : index
    %c0_141 = arith.constant 0 : index
    %228 = vector.load %arg29[%c0_140, %c0_141] : memref<24x32xf32, #tpu.memory_space<vmem>>, vector<24x32xf32>
    %cst_142 = arith.constant dense<0.000000e+00> : vector<32x24xf32>
    %229 = tpu.matmul %227, %228, %cst_142 {dimension_numbers = #tpu.dot_dimension_numbers<[1], [1], [0], [0], [0, 0, 1, 0], [], []>} : vector<32x32xf32>, vector<24x32xf32>, vector<32x24xf32> -> vector<32x24xf32>
    %cst_143 = arith.constant 1.000000e+00 : f32
    %230 = vector.broadcast %cst_143 : f32 to vector<1x32xf32>
    %231 = arith.mulf %228, %228 : vector<24x32xf32>
    %cst_144 = arith.constant dense<0.000000e+00> : vector<1x24xf32>
    %232 = tpu.matmul %230, %231, %cst_144 {dimension_numbers = #tpu.dot_dimension_numbers<[1], [1], [0], [0], [0, 0, 1, 0], [], []>} : vector<1x32xf32>, vector<24x32xf32>, vector<1x24xf32> -> vector<1x24xf32>
    %cst_145 = arith.constant 2.000000e+00 : f32
    %233 = vector.broadcast %cst_145 : f32 to vector<32x24xf32>
    %234 = arith.mulf %233, %229 : vector<32x24xf32>
    %235 = vector.broadcast %232 : vector<1x24xf32> to vector<32x24xf32>
    %236 = arith.subf %235, %234 : vector<32x24xf32>
    %237 = tpu.iota {dimensions = array<i32: 1>} : vector<32x24xi32>
    %c16_i32 = arith.constant 16 : i32
    %238 = vector.broadcast %c16_i32 : i32 to vector<32x24xi32>
    %239 = arith.cmpi slt, %237, %238 : vector<32x24xi32>
    %240 = arith.extui %239 : vector<32x24xi1> to vector<32x24xi32>
    %241 = arith.sitofp %240 : vector<32x24xi32> to vector<32x24xf32>
    %242 = arith.mulf %241, %236 : vector<32x24xf32>
    %cst_146 = arith.constant 1.000000e+00 : f32
    %243 = vector.broadcast %cst_146 : f32 to vector<32x24xf32>
    %244 = arith.subf %243, %241 : vector<32x24xf32>
    %cst_147 = arith.constant 1.000000e+30 : f32
    %245 = vector.broadcast %cst_147 : f32 to vector<32x24xf32>
    %246 = arith.mulf %244, %245 : vector<32x24xf32>
    %247 = arith.addf %242, %246 : vector<32x24xf32>
    %cst_148 = arith.constant 1.000000e+00 : f32
    %248 = vector.broadcast %cst_148 : f32 to vector<32x24xf32>
    %249 = arith.subf %248, %241 : vector<32x24xf32>
    %250 = arith.mulf %249, %236 : vector<32x24xf32>
    %cst_149 = arith.constant 1.000000e+30 : f32
    %251 = vector.broadcast %cst_149 : f32 to vector<32x24xf32>
    %252 = arith.mulf %241, %251 : vector<32x24xf32>
    %253 = arith.addf %250, %252 : vector<32x24xf32>
    %cst_150 = arith.constant 6.000000e-01 : f32
    %254 = vector.broadcast %cst_150 : f32 to vector<32x1xf32>
    %255 = arith.cmpf ogt, %200, %254 : vector<32x1xf32>
    %256 = arith.extui %255 : vector<32x1xi1> to vector<32x1xi32>
    %257 = arith.sitofp %256 : vector<32x1xi32> to vector<32x1xf32>
    %258 = vector.broadcast %257 : vector<32x1xf32> to vector<32x24xf32>
    %259 = arith.mulf %258, %247 : vector<32x24xf32>
    %cst_151 = arith.constant 1.000000e+00 : f32
    %260 = vector.broadcast %cst_151 : f32 to vector<32x1xf32>
    %261 = arith.subf %260, %257 : vector<32x1xf32>
    %262 = vector.broadcast %261 : vector<32x1xf32> to vector<32x24xf32>
    %263 = arith.mulf %262, %253 : vector<32x24xf32>
    %264 = arith.addf %259, %263 : vector<32x24xf32>
    %cst_152 = arith.constant dense<0x7F800000> : vector<32xf32>
    %265 = vector.multi_reduction <minimumf>, %264, %cst_152 [1] : vector<32x24xf32> to vector<32xf32>
    %266 = vector.shape_cast %265 : vector<32xf32> to vector<32x1xf32>
    %267 = vector.broadcast %266 : vector<32x1xf32> to vector<32x24xf32>
    %268 = arith.cmpf ole, %264, %267 : vector<32x24xf32>
    %c24_i32 = arith.constant 24 : i32
    %269 = vector.broadcast %c24_i32 : i32 to vector<32x24xi32>
    %270 = arith.select %268, %237, %269 : vector<32x24xi1>, vector<32x24xi32>
    %cst_153 = arith.constant dense<2147483647> : vector<32xi32>
    %271 = vector.multi_reduction <minsi>, %270, %cst_153 [1] : vector<32x24xi32> to vector<32xi32>
    %272 = vector.shape_cast %271 : vector<32xi32> to vector<32x1xi32>
    %273 = vector.broadcast %272 : vector<32x1xi32> to vector<32x24xi32>
    %274 = arith.cmpi eq, %237, %273 : vector<32x24xi32>
    %275 = arith.extui %274 : vector<32x24xi1> to vector<32x24xi32>
    %276 = arith.sitofp %275 : vector<32x24xi32> to vector<32x24xf32>
    %cst_154 = arith.constant dense<0.000000e+00> : vector<32x32xf32>
    %277 = tpu.matmul %276, %228, %cst_154 {dimension_numbers = #tpu.dot_dimension_numbers<[1], [0], [0], [1], [0, 0, 1, 1], [], []>} : vector<32x24xf32>, vector<24x32xf32>, vector<32x32xf32> -> vector<32x32xf32>
    %278 = arith.subf %227, %277 : vector<32x32xf32>
    %279 = arith.mulf %278, %278 : vector<32x32xf32>
    %cst_155 = arith.constant dense<0.000000e+00> : vector<32xf32>
    %280 = vector.multi_reduction <add>, %279, %cst_155 [1] : vector<32x32xf32> to vector<32xf32>
    %281 = vector.shape_cast %280 : vector<32xf32> to vector<32x1xf32>
    %cst_156 = arith.constant 3.200000e+01 : f32
    %282 = vector.broadcast %cst_156 : f32 to vector<32x1xf32>
    %283 = arith.divf %281, %282 : vector<32x1xf32>
    %cst_157 = arith.constant 1.250000e+00 : f32
    %284 = vector.broadcast %cst_157 : f32 to vector<32x1xf32>
    %285 = arith.mulf %283, %284 : vector<32x1xf32>
    %286 = arith.mulf %200, %285 : vector<32x1xf32>
    %cst_158 = arith.constant 0.000000e+00 : f32
    %287 = vector.broadcast %cst_158 : f32 to vector<32x128xf32>
    %c0_159 = arith.constant 0 : index
    %c0_160 = arith.constant 0 : index
    %288 = vector.load %arg30[%c0_159, %c0_160] : memref<32x32xf32, #tpu.memory_space<vmem>>, vector<32x32xf32>
    tpu.vector_store %arg30[%c0_159, %c0_160], %277 {strides = array<i32>} : memref<32x32xf32, #tpu.memory_space<vmem>>, vector<32x32xf32>,
    %289 = vector.broadcast %193 : vector<32x1xf32> to vector<32x128xf32>
    %290 = arith.addf %289, %287 : vector<32x128xf32>
    %c0_161 = arith.constant 0 : index
    %c0_162 = arith.constant 0 : index
    %291 = vector.load %arg31[%c0_161, %c0_162] : memref<32x128xf32, #tpu.memory_space<vmem>>, vector<32x128xf32>
    tpu.vector_store %arg31[%c0_161, %c0_162], %290 {strides = array<i32>} : memref<32x128xf32, #tpu.memory_space<vmem>>, vector<32x128xf32>,
    %292 = vector.broadcast %286 : vector<32x1xf32> to vector<32x128xf32>
    %293 = arith.addf %292, %287 : vector<32x128xf32>
    %c0_163 = arith.constant 0 : index
    %c0_164 = arith.constant 0 : index
    %294 = vector.load %arg32[%c0_163, %c0_164] : memref<32x128xf32, #tpu.memory_space<vmem>>, vector<32x128xf32>
    tpu.vector_store %arg32[%c0_163, %c0_164], %293 {strides = array<i32>} : memref<32x128xf32, #tpu.memory_space<vmem>>, vector<32x128xf32>,
    return
  }
  func.func @transform_0(%arg0: i32) -> (i32, i32) {
    %c0_i32 = arith.constant 0 : i32
    %c0_i32_0 = arith.constant 0 : i32
    %c0_i32_1 = arith.constant 0 : i32
    return %c0_i32, %c0_i32_0 : i32, i32
  }
  func.func @transform_1(%arg0: i32) -> (i32, i32) {
    %c0_i32 = arith.constant 0 : i32
    %c0_i32_0 = arith.constant 0 : i32
    %c0_i32_1 = arith.constant 0 : i32
    return %c0_i32, %c0_i32_0 : i32, i32
  }
  func.func @transform_2(%arg0: i32) -> (i32, i32) {
    %c0_i32 = arith.constant 0 : i32
    %c0_i32_0 = arith.constant 0 : i32
    %c0_i32_1 = arith.constant 0 : i32
    return %c0_i32, %c0_i32_0 : i32, i32
  }
  func.func @transform_3(%arg0: i32) -> (i32, i32) {
    %c0_i32 = arith.constant 0 : i32
    %c0_i32_0 = arith.constant 0 : i32
    %c0_i32_1 = arith.constant 0 : i32
    return %c0_i32, %c0_i32_0 : i32, i32
  }
  func.func @transform_4(%arg0: i32) -> (i32, i32, i32) {
    %c0_i32 = arith.constant 0 : i32
    %c0_i32_0 = arith.constant 0 : i32
    %c0_i32_1 = arith.constant 0 : i32
    %c0_i32_2 = arith.constant 0 : i32
    return %c0_i32, %c0_i32_0, %c0_i32_1 : i32, i32, i32
  }
  func.func @transform_5(%arg0: i32) -> (i32, i32, i32) {
    %c0_i32 = arith.constant 0 : i32
    %c0_i32_0 = arith.constant 0 : i32
    %c0_i32_1 = arith.constant 0 : i32
    %c0_i32_2 = arith.constant 0 : i32
    return %c0_i32, %c0_i32_0, %c0_i32_1 : i32, i32, i32
  }
  func.func @transform_6(%arg0: i32) -> (i32, i32, i32) {
    %c0_i32 = arith.constant 0 : i32
    %c0_i32_0 = arith.constant 0 : i32
    %c0_i32_1 = arith.constant 0 : i32
    %c0_i32_2 = arith.constant 0 : i32
    return %c0_i32, %c0_i32_0, %c0_i32_1 : i32, i32, i32
  }
  func.func @transform_7(%arg0: i32) -> (i32, i32, i32) {
    %c0_i32 = arith.constant 0 : i32
    %c0_i32_0 = arith.constant 0 : i32
    %c0_i32_1 = arith.constant 0 : i32
    %c0_i32_2 = arith.constant 0 : i32
    return %c0_i32, %c0_i32_0, %c0_i32_1 : i32, i32, i32
  }
  func.func @transform_8(%arg0: i32) -> (i32, i32, i32) {
    %c0_i32 = arith.constant 0 : i32
    %c0_i32_0 = arith.constant 0 : i32
    %c0_i32_1 = arith.constant 0 : i32
    %c0_i32_2 = arith.constant 0 : i32
    return %c0_i32, %c0_i32_0, %c0_i32_1 : i32, i32, i32
  }
  func.func @transform_9(%arg0: i32) -> (i32, i32, i32) {
    %c0_i32 = arith.constant 0 : i32
    %c0_i32_0 = arith.constant 0 : i32
    %c0_i32_1 = arith.constant 0 : i32
    %c0_i32_2 = arith.constant 0 : i32
    return %c0_i32, %c0_i32_0, %c0_i32_1 : i32, i32, i32
  }
  func.func @transform_10(%arg0: i32) -> (i32, i32, i32) {
    %c0_i32 = arith.constant 0 : i32
    %c0_i32_0 = arith.constant 0 : i32
    %c0_i32_1 = arith.constant 0 : i32
    %c0_i32_2 = arith.constant 0 : i32
    return %c0_i32, %c0_i32_0, %c0_i32_1 : i32, i32, i32
  }
  func.func @transform_11(%arg0: i32) -> (i32, i32, i32) {
    %c0_i32 = arith.constant 0 : i32
    %c0_i32_0 = arith.constant 0 : i32
    %c0_i32_1 = arith.constant 0 : i32
    %c0_i32_2 = arith.constant 0 : i32
    return %c0_i32, %c0_i32_0, %c0_i32_1 : i32, i32, i32
  }
  func.func @transform_12(%arg0: i32) -> (i32, i32, i32) {
    %c0_i32 = arith.constant 0 : i32
    %c0_i32_0 = arith.constant 0 : i32
    %c0_i32_1 = arith.constant 0 : i32
    %c0_i32_2 = arith.constant 0 : i32
    return %c0_i32, %c0_i32_0, %c0_i32_1 : i32, i32, i32
  }
  func.func @transform_13(%arg0: i32) -> (i32, i32, i32) {
    %c0_i32 = arith.constant 0 : i32
    %c0_i32_0 = arith.constant 0 : i32
    %c0_i32_1 = arith.constant 0 : i32
    %c0_i32_2 = arith.constant 0 : i32
    return %c0_i32, %c0_i32_0, %c0_i32_1 : i32, i32, i32
  }
  func.func @transform_14(%arg0: i32) -> (i32, i32, i32) {
    %c0_i32 = arith.constant 0 : i32
    %c0_i32_0 = arith.constant 0 : i32
    %c0_i32_1 = arith.constant 0 : i32
    %c0_i32_2 = arith.constant 0 : i32
    return %c0_i32, %c0_i32_0, %c0_i32_1 : i32, i32, i32
  }
  func.func @transform_15(%arg0: i32) -> (i32, i32, i32) {
    %c0_i32 = arith.constant 0 : i32
    %c0_i32_0 = arith.constant 0 : i32
    %c0_i32_1 = arith.constant 0 : i32
    %c0_i32_2 = arith.constant 0 : i32
    return %c0_i32, %c0_i32_0, %c0_i32_1 : i32, i32, i32
  }
  func.func @transform_16(%arg0: i32) -> (i32, i32, i32) {
    %c0_i32 = arith.constant 0 : i32
    %c0_i32_0 = arith.constant 0 : i32
    %c0_i32_1 = arith.constant 0 : i32
    %c0_i32_2 = arith.constant 0 : i32
    return %c0_i32, %c0_i32_0, %c0_i32_1 : i32, i32, i32
  }
  func.func @transform_17(%arg0: i32) -> (i32, i32, i32) {
    %c0_i32 = arith.constant 0 : i32
    %c0_i32_0 = arith.constant 0 : i32
    %c0_i32_1 = arith.constant 0 : i32
    %c0_i32_2 = arith.constant 0 : i32
    return %c0_i32, %c0_i32_0, %c0_i32_1 : i32, i32, i32
  }
  func.func @transform_18(%arg0: i32) -> (i32, i32, i32) {
    %c0_i32 = arith.constant 0 : i32
    %c0_i32_0 = arith.constant 0 : i32
    %c0_i32_1 = arith.constant 0 : i32
    %c0_i32_2 = arith.constant 0 : i32
    return %c0_i32, %c0_i32_0, %c0_i32_1 : i32, i32, i32
  }
  func.func @transform_19(%arg0: i32) -> (i32, i32, i32) {
    %c0_i32 = arith.constant 0 : i32
    %c0_i32_0 = arith.constant 0 : i32
    %c0_i32_1 = arith.constant 0 : i32
    %c0_i32_2 = arith.constant 0 : i32
    return %c0_i32, %c0_i32_0, %c0_i32_1 : i32, i32, i32
  }
  func.func @transform_20(%arg0: i32) -> (i32, i32) {
    %c0_i32 = arith.constant 0 : i32
    %c0_i32_0 = arith.constant 0 : i32
    %c0_i32_1 = arith.constant 0 : i32
    return %c0_i32, %c0_i32_0 : i32, i32
  }
  func.func @transform_21(%arg0: i32) -> (i32, i32) {
    %c0_i32 = arith.constant 0 : i32
    %c0_i32_0 = arith.constant 0 : i32
    %c0_i32_1 = arith.constant 0 : i32
    return %c0_i32, %c0_i32_0 : i32, i32
  }
  func.func @transform_22(%arg0: i32) -> (i32, i32) {
    %c0_i32 = arith.constant 0 : i32
    %c0_i32_0 = arith.constant 0 : i32
    %c0_i32_1 = arith.constant 0 : i32
    return %c0_i32, %c0_i32_0 : i32, i32
  }
  func.func @transform_23(%arg0: i32) -> (i32, i32) {
    %c0_i32 = arith.constant 0 : i32
    %c0_i32_0 = arith.constant 0 : i32
    %c0_i32_1 = arith.constant 0 : i32
    return %c0_i32, %c0_i32_0 : i32, i32
  }
  func.func @transform_24(%arg0: i32) -> (i32, i32) {
    %c0_i32 = arith.constant 0 : i32
    %c0_i32_0 = arith.constant 0 : i32
    %c0_i32_1 = arith.constant 0 : i32
    return %c0_i32, %c0_i32_0 : i32, i32
  }
  func.func @transform_25(%arg0: i32) -> (i32, i32) {
    %c0_i32 = arith.constant 0 : i32
    %c0_i32_0 = arith.constant 0 : i32
    %c0_i32_1 = arith.constant 0 : i32
    return %c0_i32, %c0_i32_0 : i32, i32
  }
  func.func @transform_26(%arg0: i32) -> (i32, i32) {
    %c0_i32 = arith.constant 0 : i32
    %c0_i32_0 = arith.constant 0 : i32
    %c0_i32_1 = arith.constant 0 : i32
    return %c0_i32, %c0_i32_0 : i32, i32
  }
  func.func @transform_27(%arg0: i32) -> (i32, i32) {
    %c0_i32 = arith.constant 0 : i32
    %c0_i32_0 = arith.constant 0 : i32
    %c0_i32_1 = arith.constant 0 : i32
    return %c0_i32, %c0_i32_0 : i32, i32
  }
  func.func @transform_28(%arg0: i32) -> (i32, i32) {
    %c0_i32 = arith.constant 0 : i32
    %c0_i32_0 = arith.constant 0 : i32
    %c0_i32_1 = arith.constant 0 : i32
    return %c0_i32, %c0_i32_0 : i32, i32
  }
  func.func @transform_29(%arg0: i32) -> (i32, i32) {
    %c0_i32 = arith.constant 0 : i32
    %c0_i32_0 = arith.constant 0 : i32
    %c0_i32_1 = arith.constant 0 : i32
    return %c0_i32, %c0_i32_0 : i32, i32
  }
  func.func @transform_30(%arg0: i32) -> (i32, i32) {
    %c0_i32 = arith.constant 0 : i32
    %c0_i32_0 = arith.constant 0 : i32
    %c0_i32_1 = arith.constant 0 : i32
    return %c0_i32, %c0_i32_0 : i32, i32
  }
  func.func @transform_31(%arg0: i32) -> (i32, i32) {
    %c0_i32 = arith.constant 0 : i32
    %c0_i32_0 = arith.constant 0 : i32
    %c0_i32_1 = arith.constant 0 : i32
    return %c0_i32, %c0_i32_0 : i32, i32
  }
}

module attributes {stable_mosaic.version = 11 : i64} {
  func.func @_decoder_kernel(%arg0: i32, %arg1: memref<32x32xf32, #tpu.memory_space<vmem>>, %arg2: memref<32x32xf32, #tpu.memory_space<vmem>>, %arg3: memref<32x32xf32, #tpu.memory_space<vmem>>, %arg4: memref<1x32xf32, #tpu.memory_space<vmem>>, %arg5: memref<32x32xf32, #tpu.memory_space<vmem>>, %arg6: memref<1x1x32xf32, #tpu.memory_space<vmem>>, %arg7: memref<1x1x32xf32, #tpu.memory_space<vmem>>, %arg8: memref<4x32x8xf32, #tpu.memory_space<vmem>>, %arg9: memref<4x1x8xf32, #tpu.memory_space<vmem>>, %arg10: memref<4x32x8xf32, #tpu.memory_space<vmem>>, %arg11: memref<4x1x8xf32, #tpu.memory_space<vmem>>, %arg12: memref<4x32x8xf32, #tpu.memory_space<vmem>>, %arg13: memref<4x1x8xf32, #tpu.memory_space<vmem>>, %arg14: memref<4x8x32xf32, #tpu.memory_space<vmem>>, %arg15: memref<1x1x32xf32, #tpu.memory_space<vmem>>, %arg16: memref<1x1x32xf32, #tpu.memory_space<vmem>>, %arg17: memref<1x1x32xf32, #tpu.memory_space<vmem>>, %arg18: memref<1x32x128xf32, #tpu.memory_space<vmem>>, %arg19: memref<1x1x128xf32, #tpu.memory_space<vmem>>, %arg20: memref<1x128x32xf32, #tpu.memory_space<vmem>>, %arg21: memref<1x1x32xf32, #tpu.memory_space<vmem>>, %arg22: memref<1x32xf32, #tpu.memory_space<vmem>>, %arg23: memref<1x32xf32, #tpu.memory_space<vmem>>, %arg24: memref<32x48xf32, #tpu.memory_space<vmem>>, %arg25: memref<1x48xf32, #tpu.memory_space<vmem>>, %arg26: memref<32x48xf32, #tpu.memory_space<vmem>>) attributes {dimension_semantics = [#tpu.dimension_semantics<arbitrary>], iteration_bounds = array<i64: 1>, scalar_prefetch = 0 : i64, scratch_operands = 0 : i64, tpu.core_type = #tpu.core_type<tc>, window_params = [{pipeline_mode = #tpu.pipeline_mode<synchronous>, transform_indices = @transform_0, window_bounds = array<i64: 32, 32>}, {pipeline_mode = #tpu.pipeline_mode<synchronous>, transform_indices = @transform_1, window_bounds = array<i64: 32, 32>}, {pipeline_mode = #tpu.pipeline_mode<synchronous>, transform_indices = @transform_2, window_bounds = array<i64: 32, 32>}, {pipeline_mode = #tpu.pipeline_mode<synchronous>, transform_indices = @transform_3, window_bounds = array<i64: 1, 32>}, {pipeline_mode = #tpu.pipeline_mode<synchronous>, transform_indices = @transform_4, window_bounds = array<i64: 32, 32>}, {pipeline_mode = #tpu.pipeline_mode<synchronous>, transform_indices = @transform_5, window_bounds = array<i64: 1, 1, 32>}, {pipeline_mode = #tpu.pipeline_mode<synchronous>, transform_indices = @transform_6, window_bounds = array<i64: 1, 1, 32>}, {pipeline_mode = #tpu.pipeline_mode<synchronous>, transform_indices = @transform_7, window_bounds = array<i64: 4, 32, 8>}, {pipeline_mode = #tpu.pipeline_mode<synchronous>, transform_indices = @transform_8, window_bounds = array<i64: 4, 1, 8>}, {pipeline_mode = #tpu.pipeline_mode<synchronous>, transform_indices = @transform_9, window_bounds = array<i64: 4, 32, 8>}, {pipeline_mode = #tpu.pipeline_mode<synchronous>, transform_indices = @transform_10, window_bounds = array<i64: 4, 1, 8>}, {pipeline_mode = #tpu.pipeline_mode<synchronous>, transform_indices = @transform_11, window_bounds = array<i64: 4, 32, 8>}, {pipeline_mode = #tpu.pipeline_mode<synchronous>, transform_indices = @transform_12, window_bounds = array<i64: 4, 1, 8>}, {pipeline_mode = #tpu.pipeline_mode<synchronous>, transform_indices = @transform_13, window_bounds = array<i64: 4, 8, 32>}, {pipeline_mode = #tpu.pipeline_mode<synchronous>, transform_indices = @transform_14, window_bounds = array<i64: 1, 1, 32>}, {pipeline_mode = #tpu.pipeline_mode<synchronous>, transform_indices = @transform_15, window_bounds = array<i64: 1, 1, 32>}, {pipeline_mode = #tpu.pipeline_mode<synchronous>, transform_indices = @transform_16, window_bounds = array<i64: 1, 1, 32>}, {pipeline_mode = #tpu.pipeline_mode<synchronous>, transform_indices = @transform_17, window_bounds = array<i64: 1, 32, 128>}, {pipeline_mode = #tpu.pipeline_mode<synchronous>, transform_indices = @transform_18, window_bounds = array<i64: 1, 1, 128>}, {pipeline_mode = #tpu.pipeline_mode<synchronous>, transform_indices = @transform_19, window_bounds = array<i64: 1, 128, 32>}, {pipeline_mode = #tpu.pipeline_mode<synchronous>, transform_indices = @transform_20, window_bounds = array<i64: 1, 1, 32>}, {pipeline_mode = #tpu.pipeline_mode<synchronous>, transform_indices = @transform_21, window_bounds = array<i64: 1, 32>}, {pipeline_mode = #tpu.pipeline_mode<synchronous>, transform_indices = @transform_22, window_bounds = array<i64: 1, 32>}, {pipeline_mode = #tpu.pipeline_mode<synchronous>, transform_indices = @transform_23, window_bounds = array<i64: 32, 48>}, {pipeline_mode = #tpu.pipeline_mode<synchronous>, transform_indices = @transform_24, window_bounds = array<i64: 1, 48>}, {pipeline_mode = #tpu.pipeline_mode<synchronous>, transform_indices = @transform_25, window_bounds = array<i64: 32, 48>}]} {
    %c0 = arith.constant 0 : index
    %c0_0 = arith.constant 0 : index
    %0 = vector.load %arg1[%c0, %c0_0] : memref<32x32xf32, #tpu.memory_space<vmem>>, vector<32x32xf32>
    %c0_1 = arith.constant 0 : index
    %c0_2 = arith.constant 0 : index
    %1 = vector.load %arg3[%c0_1, %c0_2] : memref<32x32xf32, #tpu.memory_space<vmem>>, vector<32x32xf32>
    %cst = arith.constant dense<0.000000e+00> : vector<32x32xf32>
    %2 = tpu.matmul %0, %1, %cst {dimension_numbers = #tpu.dot_dimension_numbers<[1], [0], [0], [1], [0, 0, 1, 1], [], []>} : vector<32x32xf32>, vector<32x32xf32>, vector<32x32xf32> -> vector<32x32xf32>
    %c0_3 = arith.constant 0 : index
    %c0_4 = arith.constant 0 : index
    %3 = vector.load %arg4[%c0_3, %c0_4] : memref<1x32xf32, #tpu.memory_space<vmem>>, vector<1x32xf32>
    %4 = vector.broadcast %3 : vector<1x32xf32> to vector<32x32xf32>
    %5 = arith.addf %2, %4 : vector<32x32xf32>
    %c0_5 = arith.constant 0 : index
    %c0_6 = arith.constant 0 : index
    %6 = vector.load %arg5[%c0_5, %c0_6] : memref<32x32xf32, #tpu.memory_space<vmem>>, vector<32x32xf32>
    %7 = arith.addf %5, %6 : vector<32x32xf32>
    %c0_7 = arith.constant 0 : index
    %c0_8 = arith.constant 0 : index
    %8 = vector.load %arg2[%c0_7, %c0_8] : memref<32x32xf32, #tpu.memory_space<vmem>>, vector<32x32xf32>
    %c0_9 = arith.constant 0 : index
    %c0_10 = arith.constant 0 : index
    %c0_11 = arith.constant 0 : index
    %9 = vector.load %arg6[%c0_9, %c0_10, %c0_11] : memref<1x1x32xf32, #tpu.memory_space<vmem>>, vector<1x1x32xf32>
    %10 = vector.shape_cast %9 : vector<1x1x32xf32> to vector<1x32xf32>
    %c0_12 = arith.constant 0 : index
    %c0_13 = arith.constant 0 : index
    %c0_14 = arith.constant 0 : index
    %11 = vector.load %arg7[%c0_12, %c0_13, %c0_14] : memref<1x1x32xf32, #tpu.memory_space<vmem>>, vector<1x1x32xf32>
    %12 = vector.shape_cast %11 : vector<1x1x32xf32> to vector<1x32xf32>
    %cst_15 = arith.constant dense<0.000000e+00> : vector<32xf32>
    %13 = vector.multi_reduction <add>, %7, %cst_15 [1] : vector<32x32xf32> to vector<32xf32>
    %14 = vector.shape_cast %13 : vector<32xf32> to vector<32x1xf32>
    %cst_16 = arith.constant 3.200000e+01 : f32
    %15 = vector.broadcast %cst_16 : f32 to vector<32x1xf32>
    %16 = arith.divf %14, %15 : vector<32x1xf32>
    %17 = vector.broadcast %16 : vector<32x1xf32> to vector<32x32xf32>
    %18 = arith.subf %7, %17 : vector<32x32xf32>
    %19 = arith.mulf %18, %18 : vector<32x32xf32>
    %cst_17 = arith.constant dense<0.000000e+00> : vector<32xf32>
    %20 = vector.multi_reduction <add>, %19, %cst_17 [1] : vector<32x32xf32> to vector<32xf32>
    %21 = vector.shape_cast %20 : vector<32xf32> to vector<32x1xf32>
    %cst_18 = arith.constant 3.200000e+01 : f32
    %22 = vector.broadcast %cst_18 : f32 to vector<32x1xf32>
    %23 = arith.divf %21, %22 : vector<32x1xf32>
    %cst_19 = arith.constant 9.99999974E-6 : f32
    %24 = vector.broadcast %cst_19 : f32 to vector<32x1xf32>
    %25 = arith.addf %23, %24 : vector<32x1xf32>
    %26 = math.rsqrt %25 : vector<32x1xf32>
    %27 = vector.broadcast %26 : vector<32x1xf32> to vector<32x32xf32>
    %28 = arith.mulf %18, %27 : vector<32x32xf32>
    %29 = vector.broadcast %10 : vector<1x32xf32> to vector<32x32xf32>
    %30 = arith.mulf %28, %29 : vector<32x32xf32>
    %31 = vector.broadcast %12 : vector<1x32xf32> to vector<32x32xf32>
    %32 = arith.addf %30, %31 : vector<32x32xf32>
    %c0_20 = arith.constant 0 : index
    %c0_21 = arith.constant 0 : index
    %c0_22 = arith.constant 0 : index
    %33 = vector.load %arg8[%c0_20, %c0_21, %c0_22] : memref<4x32x8xf32, #tpu.memory_space<vmem>>, vector<1x32x8xf32>
    %34 = vector.shape_cast %33 : vector<1x32x8xf32> to vector<32x8xf32>
    %cst_23 = arith.constant dense<0.000000e+00> : vector<32x8xf32>
    %35 = tpu.matmul %32, %34, %cst_23 {dimension_numbers = #tpu.dot_dimension_numbers<[1], [0], [0], [1], [0, 0, 1, 1], [], []>} : vector<32x32xf32>, vector<32x8xf32>, vector<32x8xf32> -> vector<32x8xf32>
    %c0_24 = arith.constant 0 : index
    %c0_25 = arith.constant 0 : index
    %c0_26 = arith.constant 0 : index
    %36 = vector.load %arg9[%c0_24, %c0_25, %c0_26] : memref<4x1x8xf32, #tpu.memory_space<vmem>>, vector<1x1x8xf32>
    %37 = vector.shape_cast %36 : vector<1x1x8xf32> to vector<1x8xf32>
    %38 = vector.broadcast %37 : vector<1x8xf32> to vector<32x8xf32>
    %39 = arith.addf %35, %38 : vector<32x8xf32>
    %c0_27 = arith.constant 0 : index
    %c0_28 = arith.constant 0 : index
    %c0_29 = arith.constant 0 : index
    %40 = vector.load %arg10[%c0_27, %c0_28, %c0_29] : memref<4x32x8xf32, #tpu.memory_space<vmem>>, vector<1x32x8xf32>
    %41 = vector.shape_cast %40 : vector<1x32x8xf32> to vector<32x8xf32>
    %cst_30 = arith.constant dense<0.000000e+00> : vector<32x8xf32>
    %42 = tpu.matmul %32, %41, %cst_30 {dimension_numbers = #tpu.dot_dimension_numbers<[1], [0], [0], [1], [0, 0, 1, 1], [], []>} : vector<32x32xf32>, vector<32x8xf32>, vector<32x8xf32> -> vector<32x8xf32>
    %c0_31 = arith.constant 0 : index
    %c0_32 = arith.constant 0 : index
    %c0_33 = arith.constant 0 : index
    %43 = vector.load %arg11[%c0_31, %c0_32, %c0_33] : memref<4x1x8xf32, #tpu.memory_space<vmem>>, vector<1x1x8xf32>
    %44 = vector.shape_cast %43 : vector<1x1x8xf32> to vector<1x8xf32>
    %45 = vector.broadcast %44 : vector<1x8xf32> to vector<32x8xf32>
    %46 = arith.addf %42, %45 : vector<32x8xf32>
    %c0_34 = arith.constant 0 : index
    %c0_35 = arith.constant 0 : index
    %c0_36 = arith.constant 0 : index
    %47 = vector.load %arg12[%c0_34, %c0_35, %c0_36] : memref<4x32x8xf32, #tpu.memory_space<vmem>>, vector<1x32x8xf32>
    %48 = vector.shape_cast %47 : vector<1x32x8xf32> to vector<32x8xf32>
    %cst_37 = arith.constant dense<0.000000e+00> : vector<32x8xf32>
    %49 = tpu.matmul %32, %48, %cst_37 {dimension_numbers = #tpu.dot_dimension_numbers<[1], [0], [0], [1], [0, 0, 1, 1], [], []>} : vector<32x32xf32>, vector<32x8xf32>, vector<32x8xf32> -> vector<32x8xf32>
    %c0_38 = arith.constant 0 : index
    %c0_39 = arith.constant 0 : index
    %c0_40 = arith.constant 0 : index
    %50 = vector.load %arg13[%c0_38, %c0_39, %c0_40] : memref<4x1x8xf32, #tpu.memory_space<vmem>>, vector<1x1x8xf32>
    %51 = vector.shape_cast %50 : vector<1x1x8xf32> to vector<1x8xf32>
    %52 = vector.broadcast %51 : vector<1x8xf32> to vector<32x8xf32>
    %53 = arith.addf %49, %52 : vector<32x8xf32>
    %cst_41 = arith.constant dense<0.000000e+00> : vector<32x32xf32>
    %54 = tpu.matmul %39, %46, %cst_41 {dimension_numbers = #tpu.dot_dimension_numbers<[1], [1], [0], [0], [0, 0, 1, 0], [], []>} : vector<32x8xf32>, vector<32x8xf32>, vector<32x32xf32> -> vector<32x32xf32>
    %cst_42 = arith.constant 0.353553385 : f32
    %55 = vector.broadcast %cst_42 : f32 to vector<32x32xf32>
    %56 = arith.mulf %54, %55 : vector<32x32xf32>
    %57 = arith.addf %56, %8 : vector<32x32xf32>
    %cst_43 = arith.constant dense<0xFF800000> : vector<32xf32>
    %58 = vector.multi_reduction <maximumf>, %57, %cst_43 [1] : vector<32x32xf32> to vector<32xf32>
    %59 = vector.shape_cast %58 : vector<32xf32> to vector<32x1xf32>
    %60 = vector.broadcast %59 : vector<32x1xf32> to vector<32x32xf32>
    %61 = arith.subf %57, %60 : vector<32x32xf32>
    %62 = math.exp %61 : vector<32x32xf32>
    %cst_44 = arith.constant dense<0.000000e+00> : vector<32xf32>
    %63 = vector.multi_reduction <add>, %62, %cst_44 [1] : vector<32x32xf32> to vector<32xf32>
    %64 = vector.shape_cast %63 : vector<32xf32> to vector<32x1xf32>
    %65 = tpu.reciprocal %64 {approx = true} : vector<32x1xf32> -> vector<32x1xf32>
    %66 = vector.broadcast %65 : vector<32x1xf32> to vector<32x32xf32>
    %67 = arith.mulf %62, %66 : vector<32x32xf32>
    %cst_45 = arith.constant dense<0.000000e+00> : vector<32x8xf32>
    %68 = tpu.matmul %67, %53, %cst_45 {dimension_numbers = #tpu.dot_dimension_numbers<[1], [0], [0], [1], [0, 0, 1, 1], [], []>} : vector<32x32xf32>, vector<32x8xf32>, vector<32x8xf32> -> vector<32x8xf32>
    %c0_46 = arith.constant 0 : index
    %c0_47 = arith.constant 0 : index
    %c0_48 = arith.constant 0 : index
    %69 = vector.load %arg14[%c0_46, %c0_47, %c0_48] : memref<4x8x32xf32, #tpu.memory_space<vmem>>, vector<1x8x32xf32>
    %70 = vector.shape_cast %69 : vector<1x8x32xf32> to vector<8x32xf32>
    %cst_49 = arith.constant dense<0.000000e+00> : vector<32x32xf32>
    %71 = tpu.matmul %68, %70, %cst_49 {dimension_numbers = #tpu.dot_dimension_numbers<[1], [0], [0], [1], [0, 0, 1, 1], [], []>} : vector<32x8xf32>, vector<8x32xf32>, vector<32x32xf32> -> vector<32x32xf32>
    %c1 = arith.constant 1 : index
    %c0_50 = arith.constant 0 : index
    %c0_51 = arith.constant 0 : index
    %72 = vector.load %arg8[%c1, %c0_50, %c0_51] : memref<4x32x8xf32, #tpu.memory_space<vmem>>, vector<1x32x8xf32>
    %73 = vector.shape_cast %72 : vector<1x32x8xf32> to vector<32x8xf32>
    %cst_52 = arith.constant dense<0.000000e+00> : vector<32x8xf32>
    %74 = tpu.matmul %32, %73, %cst_52 {dimension_numbers = #tpu.dot_dimension_numbers<[1], [0], [0], [1], [0, 0, 1, 1], [], []>} : vector<32x32xf32>, vector<32x8xf32>, vector<32x8xf32> -> vector<32x8xf32>
    %c1_53 = arith.constant 1 : index
    %c0_54 = arith.constant 0 : index
    %c0_55 = arith.constant 0 : index
    %75 = vector.load %arg9[%c1_53, %c0_54, %c0_55] : memref<4x1x8xf32, #tpu.memory_space<vmem>>, vector<1x1x8xf32>
    %76 = vector.shape_cast %75 : vector<1x1x8xf32> to vector<1x8xf32>
    %77 = vector.broadcast %76 : vector<1x8xf32> to vector<32x8xf32>
    %78 = arith.addf %74, %77 : vector<32x8xf32>
    %c1_56 = arith.constant 1 : index
    %c0_57 = arith.constant 0 : index
    %c0_58 = arith.constant 0 : index
    %79 = vector.load %arg10[%c1_56, %c0_57, %c0_58] : memref<4x32x8xf32, #tpu.memory_space<vmem>>, vector<1x32x8xf32>
    %80 = vector.shape_cast %79 : vector<1x32x8xf32> to vector<32x8xf32>
    %cst_59 = arith.constant dense<0.000000e+00> : vector<32x8xf32>
    %81 = tpu.matmul %32, %80, %cst_59 {dimension_numbers = #tpu.dot_dimension_numbers<[1], [0], [0], [1], [0, 0, 1, 1], [], []>} : vector<32x32xf32>, vector<32x8xf32>, vector<32x8xf32> -> vector<32x8xf32>
    %c1_60 = arith.constant 1 : index
    %c0_61 = arith.constant 0 : index
    %c0_62 = arith.constant 0 : index
    %82 = vector.load %arg11[%c1_60, %c0_61, %c0_62] : memref<4x1x8xf32, #tpu.memory_space<vmem>>, vector<1x1x8xf32>
    %83 = vector.shape_cast %82 : vector<1x1x8xf32> to vector<1x8xf32>
    %84 = vector.broadcast %83 : vector<1x8xf32> to vector<32x8xf32>
    %85 = arith.addf %81, %84 : vector<32x8xf32>
    %c1_63 = arith.constant 1 : index
    %c0_64 = arith.constant 0 : index
    %c0_65 = arith.constant 0 : index
    %86 = vector.load %arg12[%c1_63, %c0_64, %c0_65] : memref<4x32x8xf32, #tpu.memory_space<vmem>>, vector<1x32x8xf32>
    %87 = vector.shape_cast %86 : vector<1x32x8xf32> to vector<32x8xf32>
    %cst_66 = arith.constant dense<0.000000e+00> : vector<32x8xf32>
    %88 = tpu.matmul %32, %87, %cst_66 {dimension_numbers = #tpu.dot_dimension_numbers<[1], [0], [0], [1], [0, 0, 1, 1], [], []>} : vector<32x32xf32>, vector<32x8xf32>, vector<32x8xf32> -> vector<32x8xf32>
    %c1_67 = arith.constant 1 : index
    %c0_68 = arith.constant 0 : index
    %c0_69 = arith.constant 0 : index
    %89 = vector.load %arg13[%c1_67, %c0_68, %c0_69] : memref<4x1x8xf32, #tpu.memory_space<vmem>>, vector<1x1x8xf32>
    %90 = vector.shape_cast %89 : vector<1x1x8xf32> to vector<1x8xf32>
    %91 = vector.broadcast %90 : vector<1x8xf32> to vector<32x8xf32>
    %92 = arith.addf %88, %91 : vector<32x8xf32>
    %cst_70 = arith.constant dense<0.000000e+00> : vector<32x32xf32>
    %93 = tpu.matmul %78, %85, %cst_70 {dimension_numbers = #tpu.dot_dimension_numbers<[1], [1], [0], [0], [0, 0, 1, 0], [], []>} : vector<32x8xf32>, vector<32x8xf32>, vector<32x32xf32> -> vector<32x32xf32>
    %cst_71 = arith.constant 0.353553385 : f32
    %94 = vector.broadcast %cst_71 : f32 to vector<32x32xf32>
    %95 = arith.mulf %93, %94 : vector<32x32xf32>
    %96 = arith.addf %95, %8 : vector<32x32xf32>
    %cst_72 = arith.constant dense<0xFF800000> : vector<32xf32>
    %97 = vector.multi_reduction <maximumf>, %96, %cst_72 [1] : vector<32x32xf32> to vector<32xf32>
    %98 = vector.shape_cast %97 : vector<32xf32> to vector<32x1xf32>
    %99 = vector.broadcast %98 : vector<32x1xf32> to vector<32x32xf32>
    %100 = arith.subf %96, %99 : vector<32x32xf32>
    %101 = math.exp %100 : vector<32x32xf32>
    %cst_73 = arith.constant dense<0.000000e+00> : vector<32xf32>
    %102 = vector.multi_reduction <add>, %101, %cst_73 [1] : vector<32x32xf32> to vector<32xf32>
    %103 = vector.shape_cast %102 : vector<32xf32> to vector<32x1xf32>
    %104 = tpu.reciprocal %103 {approx = true} : vector<32x1xf32> -> vector<32x1xf32>
    %105 = vector.broadcast %104 : vector<32x1xf32> to vector<32x32xf32>
    %106 = arith.mulf %101, %105 : vector<32x32xf32>
    %cst_74 = arith.constant dense<0.000000e+00> : vector<32x8xf32>
    %107 = tpu.matmul %106, %92, %cst_74 {dimension_numbers = #tpu.dot_dimension_numbers<[1], [0], [0], [1], [0, 0, 1, 1], [], []>} : vector<32x32xf32>, vector<32x8xf32>, vector<32x8xf32> -> vector<32x8xf32>
    %c1_75 = arith.constant 1 : index
    %c0_76 = arith.constant 0 : index
    %c0_77 = arith.constant 0 : index
    %108 = vector.load %arg14[%c1_75, %c0_76, %c0_77] : memref<4x8x32xf32, #tpu.memory_space<vmem>>, vector<1x8x32xf32>
    %109 = vector.shape_cast %108 : vector<1x8x32xf32> to vector<8x32xf32>
    %cst_78 = arith.constant dense<0.000000e+00> : vector<32x32xf32>
    %110 = tpu.matmul %107, %109, %cst_78 {dimension_numbers = #tpu.dot_dimension_numbers<[1], [0], [0], [1], [0, 0, 1, 1], [], []>} : vector<32x8xf32>, vector<8x32xf32>, vector<32x32xf32> -> vector<32x32xf32>
    %111 = arith.addf %71, %110 : vector<32x32xf32>
    %c2 = arith.constant 2 : index
    %c0_79 = arith.constant 0 : index
    %c0_80 = arith.constant 0 : index
    %112 = vector.load %arg8[%c2, %c0_79, %c0_80] : memref<4x32x8xf32, #tpu.memory_space<vmem>>, vector<1x32x8xf32>
    %113 = vector.shape_cast %112 : vector<1x32x8xf32> to vector<32x8xf32>
    %cst_81 = arith.constant dense<0.000000e+00> : vector<32x8xf32>
    %114 = tpu.matmul %32, %113, %cst_81 {dimension_numbers = #tpu.dot_dimension_numbers<[1], [0], [0], [1], [0, 0, 1, 1], [], []>} : vector<32x32xf32>, vector<32x8xf32>, vector<32x8xf32> -> vector<32x8xf32>
    %c2_82 = arith.constant 2 : index
    %c0_83 = arith.constant 0 : index
    %c0_84 = arith.constant 0 : index
    %115 = vector.load %arg9[%c2_82, %c0_83, %c0_84] : memref<4x1x8xf32, #tpu.memory_space<vmem>>, vector<1x1x8xf32>
    %116 = vector.shape_cast %115 : vector<1x1x8xf32> to vector<1x8xf32>
    %117 = vector.broadcast %116 : vector<1x8xf32> to vector<32x8xf32>
    %118 = arith.addf %114, %117 : vector<32x8xf32>
    %c2_85 = arith.constant 2 : index
    %c0_86 = arith.constant 0 : index
    %c0_87 = arith.constant 0 : index
    %119 = vector.load %arg10[%c2_85, %c0_86, %c0_87] : memref<4x32x8xf32, #tpu.memory_space<vmem>>, vector<1x32x8xf32>
    %120 = vector.shape_cast %119 : vector<1x32x8xf32> to vector<32x8xf32>
    %cst_88 = arith.constant dense<0.000000e+00> : vector<32x8xf32>
    %121 = tpu.matmul %32, %120, %cst_88 {dimension_numbers = #tpu.dot_dimension_numbers<[1], [0], [0], [1], [0, 0, 1, 1], [], []>} : vector<32x32xf32>, vector<32x8xf32>, vector<32x8xf32> -> vector<32x8xf32>
    %c2_89 = arith.constant 2 : index
    %c0_90 = arith.constant 0 : index
    %c0_91 = arith.constant 0 : index
    %122 = vector.load %arg11[%c2_89, %c0_90, %c0_91] : memref<4x1x8xf32, #tpu.memory_space<vmem>>, vector<1x1x8xf32>
    %123 = vector.shape_cast %122 : vector<1x1x8xf32> to vector<1x8xf32>
    %124 = vector.broadcast %123 : vector<1x8xf32> to vector<32x8xf32>
    %125 = arith.addf %121, %124 : vector<32x8xf32>
    %c2_92 = arith.constant 2 : index
    %c0_93 = arith.constant 0 : index
    %c0_94 = arith.constant 0 : index
    %126 = vector.load %arg12[%c2_92, %c0_93, %c0_94] : memref<4x32x8xf32, #tpu.memory_space<vmem>>, vector<1x32x8xf32>
    %127 = vector.shape_cast %126 : vector<1x32x8xf32> to vector<32x8xf32>
    %cst_95 = arith.constant dense<0.000000e+00> : vector<32x8xf32>
    %128 = tpu.matmul %32, %127, %cst_95 {dimension_numbers = #tpu.dot_dimension_numbers<[1], [0], [0], [1], [0, 0, 1, 1], [], []>} : vector<32x32xf32>, vector<32x8xf32>, vector<32x8xf32> -> vector<32x8xf32>
    %c2_96 = arith.constant 2 : index
    %c0_97 = arith.constant 0 : index
    %c0_98 = arith.constant 0 : index
    %129 = vector.load %arg13[%c2_96, %c0_97, %c0_98] : memref<4x1x8xf32, #tpu.memory_space<vmem>>, vector<1x1x8xf32>
    %130 = vector.shape_cast %129 : vector<1x1x8xf32> to vector<1x8xf32>
    %131 = vector.broadcast %130 : vector<1x8xf32> to vector<32x8xf32>
    %132 = arith.addf %128, %131 : vector<32x8xf32>
    %cst_99 = arith.constant dense<0.000000e+00> : vector<32x32xf32>
    %133 = tpu.matmul %118, %125, %cst_99 {dimension_numbers = #tpu.dot_dimension_numbers<[1], [1], [0], [0], [0, 0, 1, 0], [], []>} : vector<32x8xf32>, vector<32x8xf32>, vector<32x32xf32> -> vector<32x32xf32>
    %cst_100 = arith.constant 0.353553385 : f32
    %134 = vector.broadcast %cst_100 : f32 to vector<32x32xf32>
    %135 = arith.mulf %133, %134 : vector<32x32xf32>
    %136 = arith.addf %135, %8 : vector<32x32xf32>
    %cst_101 = arith.constant dense<0xFF800000> : vector<32xf32>
    %137 = vector.multi_reduction <maximumf>, %136, %cst_101 [1] : vector<32x32xf32> to vector<32xf32>
    %138 = vector.shape_cast %137 : vector<32xf32> to vector<32x1xf32>
    %139 = vector.broadcast %138 : vector<32x1xf32> to vector<32x32xf32>
    %140 = arith.subf %136, %139 : vector<32x32xf32>
    %141 = math.exp %140 : vector<32x32xf32>
    %cst_102 = arith.constant dense<0.000000e+00> : vector<32xf32>
    %142 = vector.multi_reduction <add>, %141, %cst_102 [1] : vector<32x32xf32> to vector<32xf32>
    %143 = vector.shape_cast %142 : vector<32xf32> to vector<32x1xf32>
    %144 = tpu.reciprocal %143 {approx = true} : vector<32x1xf32> -> vector<32x1xf32>
    %145 = vector.broadcast %144 : vector<32x1xf32> to vector<32x32xf32>
    %146 = arith.mulf %141, %145 : vector<32x32xf32>
    %cst_103 = arith.constant dense<0.000000e+00> : vector<32x8xf32>
    %147 = tpu.matmul %146, %132, %cst_103 {dimension_numbers = #tpu.dot_dimension_numbers<[1], [0], [0], [1], [0, 0, 1, 1], [], []>} : vector<32x32xf32>, vector<32x8xf32>, vector<32x8xf32> -> vector<32x8xf32>
    %c2_104 = arith.constant 2 : index
    %c0_105 = arith.constant 0 : index
    %c0_106 = arith.constant 0 : index
    %148 = vector.load %arg14[%c2_104, %c0_105, %c0_106] : memref<4x8x32xf32, #tpu.memory_space<vmem>>, vector<1x8x32xf32>
    %149 = vector.shape_cast %148 : vector<1x8x32xf32> to vector<8x32xf32>
    %cst_107 = arith.constant dense<0.000000e+00> : vector<32x32xf32>
    %150 = tpu.matmul %147, %149, %cst_107 {dimension_numbers = #tpu.dot_dimension_numbers<[1], [0], [0], [1], [0, 0, 1, 1], [], []>} : vector<32x8xf32>, vector<8x32xf32>, vector<32x32xf32> -> vector<32x32xf32>
    %151 = arith.addf %111, %150 : vector<32x32xf32>
    %c3 = arith.constant 3 : index
    %c0_108 = arith.constant 0 : index
    %c0_109 = arith.constant 0 : index
    %152 = vector.load %arg8[%c3, %c0_108, %c0_109] : memref<4x32x8xf32, #tpu.memory_space<vmem>>, vector<1x32x8xf32>
    %153 = vector.shape_cast %152 : vector<1x32x8xf32> to vector<32x8xf32>
    %cst_110 = arith.constant dense<0.000000e+00> : vector<32x8xf32>
    %154 = tpu.matmul %32, %153, %cst_110 {dimension_numbers = #tpu.dot_dimension_numbers<[1], [0], [0], [1], [0, 0, 1, 1], [], []>} : vector<32x32xf32>, vector<32x8xf32>, vector<32x8xf32> -> vector<32x8xf32>
    %c3_111 = arith.constant 3 : index
    %c0_112 = arith.constant 0 : index
    %c0_113 = arith.constant 0 : index
    %155 = vector.load %arg9[%c3_111, %c0_112, %c0_113] : memref<4x1x8xf32, #tpu.memory_space<vmem>>, vector<1x1x8xf32>
    %156 = vector.shape_cast %155 : vector<1x1x8xf32> to vector<1x8xf32>
    %157 = vector.broadcast %156 : vector<1x8xf32> to vector<32x8xf32>
    %158 = arith.addf %154, %157 : vector<32x8xf32>
    %c3_114 = arith.constant 3 : index
    %c0_115 = arith.constant 0 : index
    %c0_116 = arith.constant 0 : index
    %159 = vector.load %arg10[%c3_114, %c0_115, %c0_116] : memref<4x32x8xf32, #tpu.memory_space<vmem>>, vector<1x32x8xf32>
    %160 = vector.shape_cast %159 : vector<1x32x8xf32> to vector<32x8xf32>
    %cst_117 = arith.constant dense<0.000000e+00> : vector<32x8xf32>
    %161 = tpu.matmul %32, %160, %cst_117 {dimension_numbers = #tpu.dot_dimension_numbers<[1], [0], [0], [1], [0, 0, 1, 1], [], []>} : vector<32x32xf32>, vector<32x8xf32>, vector<32x8xf32> -> vector<32x8xf32>
    %c3_118 = arith.constant 3 : index
    %c0_119 = arith.constant 0 : index
    %c0_120 = arith.constant 0 : index
    %162 = vector.load %arg11[%c3_118, %c0_119, %c0_120] : memref<4x1x8xf32, #tpu.memory_space<vmem>>, vector<1x1x8xf32>
    %163 = vector.shape_cast %162 : vector<1x1x8xf32> to vector<1x8xf32>
    %164 = vector.broadcast %163 : vector<1x8xf32> to vector<32x8xf32>
    %165 = arith.addf %161, %164 : vector<32x8xf32>
    %c3_121 = arith.constant 3 : index
    %c0_122 = arith.constant 0 : index
    %c0_123 = arith.constant 0 : index
    %166 = vector.load %arg12[%c3_121, %c0_122, %c0_123] : memref<4x32x8xf32, #tpu.memory_space<vmem>>, vector<1x32x8xf32>
    %167 = vector.shape_cast %166 : vector<1x32x8xf32> to vector<32x8xf32>
    %cst_124 = arith.constant dense<0.000000e+00> : vector<32x8xf32>
    %168 = tpu.matmul %32, %167, %cst_124 {dimension_numbers = #tpu.dot_dimension_numbers<[1], [0], [0], [1], [0, 0, 1, 1], [], []>} : vector<32x32xf32>, vector<32x8xf32>, vector<32x8xf32> -> vector<32x8xf32>
    %c3_125 = arith.constant 3 : index
    %c0_126 = arith.constant 0 : index
    %c0_127 = arith.constant 0 : index
    %169 = vector.load %arg13[%c3_125, %c0_126, %c0_127] : memref<4x1x8xf32, #tpu.memory_space<vmem>>, vector<1x1x8xf32>
    %170 = vector.shape_cast %169 : vector<1x1x8xf32> to vector<1x8xf32>
    %171 = vector.broadcast %170 : vector<1x8xf32> to vector<32x8xf32>
    %172 = arith.addf %168, %171 : vector<32x8xf32>
    %cst_128 = arith.constant dense<0.000000e+00> : vector<32x32xf32>
    %173 = tpu.matmul %158, %165, %cst_128 {dimension_numbers = #tpu.dot_dimension_numbers<[1], [1], [0], [0], [0, 0, 1, 0], [], []>} : vector<32x8xf32>, vector<32x8xf32>, vector<32x32xf32> -> vector<32x32xf32>
    %cst_129 = arith.constant 0.353553385 : f32
    %174 = vector.broadcast %cst_129 : f32 to vector<32x32xf32>
    %175 = arith.mulf %173, %174 : vector<32x32xf32>
    %176 = arith.addf %175, %8 : vector<32x32xf32>
    %cst_130 = arith.constant dense<0xFF800000> : vector<32xf32>
    %177 = vector.multi_reduction <maximumf>, %176, %cst_130 [1] : vector<32x32xf32> to vector<32xf32>
    %178 = vector.shape_cast %177 : vector<32xf32> to vector<32x1xf32>
    %179 = vector.broadcast %178 : vector<32x1xf32> to vector<32x32xf32>
    %180 = arith.subf %176, %179 : vector<32x32xf32>
    %181 = math.exp %180 : vector<32x32xf32>
    %cst_131 = arith.constant dense<0.000000e+00> : vector<32xf32>
    %182 = vector.multi_reduction <add>, %181, %cst_131 [1] : vector<32x32xf32> to vector<32xf32>
    %183 = vector.shape_cast %182 : vector<32xf32> to vector<32x1xf32>
    %184 = tpu.reciprocal %183 {approx = true} : vector<32x1xf32> -> vector<32x1xf32>
    %185 = vector.broadcast %184 : vector<32x1xf32> to vector<32x32xf32>
    %186 = arith.mulf %181, %185 : vector<32x32xf32>
    %cst_132 = arith.constant dense<0.000000e+00> : vector<32x8xf32>
    %187 = tpu.matmul %186, %172, %cst_132 {dimension_numbers = #tpu.dot_dimension_numbers<[1], [0], [0], [1], [0, 0, 1, 1], [], []>} : vector<32x32xf32>, vector<32x8xf32>, vector<32x8xf32> -> vector<32x8xf32>
    %c3_133 = arith.constant 3 : index
    %c0_134 = arith.constant 0 : index
    %c0_135 = arith.constant 0 : index
    %188 = vector.load %arg14[%c3_133, %c0_134, %c0_135] : memref<4x8x32xf32, #tpu.memory_space<vmem>>, vector<1x8x32xf32>
    %189 = vector.shape_cast %188 : vector<1x8x32xf32> to vector<8x32xf32>
    %cst_136 = arith.constant dense<0.000000e+00> : vector<32x32xf32>
    %190 = tpu.matmul %187, %189, %cst_136 {dimension_numbers = #tpu.dot_dimension_numbers<[1], [0], [0], [1], [0, 0, 1, 1], [], []>} : vector<32x8xf32>, vector<8x32xf32>, vector<32x32xf32> -> vector<32x32xf32>
    %191 = arith.addf %151, %190 : vector<32x32xf32>
    %192 = arith.addf %7, %191 : vector<32x32xf32>
    %c0_137 = arith.constant 0 : index
    %c0_138 = arith.constant 0 : index
    %c0_139 = arith.constant 0 : index
    %193 = vector.load %arg15[%c0_137, %c0_138, %c0_139] : memref<1x1x32xf32, #tpu.memory_space<vmem>>, vector<1x1x32xf32>
    %194 = vector.shape_cast %193 : vector<1x1x32xf32> to vector<1x32xf32>
    %195 = vector.broadcast %194 : vector<1x32xf32> to vector<32x32xf32>
    %196 = arith.addf %192, %195 : vector<32x32xf32>
    %c0_140 = arith.constant 0 : index
    %c0_141 = arith.constant 0 : index
    %c0_142 = arith.constant 0 : index
    %197 = vector.load %arg16[%c0_140, %c0_141, %c0_142] : memref<1x1x32xf32, #tpu.memory_space<vmem>>, vector<1x1x32xf32>
    %198 = vector.shape_cast %197 : vector<1x1x32xf32> to vector<1x32xf32>
    %c0_143 = arith.constant 0 : index
    %c0_144 = arith.constant 0 : index
    %c0_145 = arith.constant 0 : index
    %199 = vector.load %arg17[%c0_143, %c0_144, %c0_145] : memref<1x1x32xf32, #tpu.memory_space<vmem>>, vector<1x1x32xf32>
    %200 = vector.shape_cast %199 : vector<1x1x32xf32> to vector<1x32xf32>
    %cst_146 = arith.constant dense<0.000000e+00> : vector<32xf32>
    %201 = vector.multi_reduction <add>, %196, %cst_146 [1] : vector<32x32xf32> to vector<32xf32>
    %202 = vector.shape_cast %201 : vector<32xf32> to vector<32x1xf32>
    %cst_147 = arith.constant 3.200000e+01 : f32
    %203 = vector.broadcast %cst_147 : f32 to vector<32x1xf32>
    %204 = arith.divf %202, %203 : vector<32x1xf32>
    %205 = vector.broadcast %204 : vector<32x1xf32> to vector<32x32xf32>
    %206 = arith.subf %196, %205 : vector<32x32xf32>
    %207 = arith.mulf %206, %206 : vector<32x32xf32>
    %cst_148 = arith.constant dense<0.000000e+00> : vector<32xf32>
    %208 = vector.multi_reduction <add>, %207, %cst_148 [1] : vector<32x32xf32> to vector<32xf32>
    %209 = vector.shape_cast %208 : vector<32xf32> to vector<32x1xf32>
    %cst_149 = arith.constant 3.200000e+01 : f32
    %210 = vector.broadcast %cst_149 : f32 to vector<32x1xf32>
    %211 = arith.divf %209, %210 : vector<32x1xf32>
    %cst_150 = arith.constant 9.99999974E-6 : f32
    %212 = vector.broadcast %cst_150 : f32 to vector<32x1xf32>
    %213 = arith.addf %211, %212 : vector<32x1xf32>
    %214 = math.rsqrt %213 : vector<32x1xf32>
    %215 = vector.broadcast %214 : vector<32x1xf32> to vector<32x32xf32>
    %216 = arith.mulf %206, %215 : vector<32x32xf32>
    %217 = vector.broadcast %198 : vector<1x32xf32> to vector<32x32xf32>
    %218 = arith.mulf %216, %217 : vector<32x32xf32>
    %219 = vector.broadcast %200 : vector<1x32xf32> to vector<32x32xf32>
    %220 = arith.addf %218, %219 : vector<32x32xf32>
    %c0_151 = arith.constant 0 : index
    %c0_152 = arith.constant 0 : index
    %c0_153 = arith.constant 0 : index
    %221 = vector.load %arg18[%c0_151, %c0_152, %c0_153] : memref<1x32x128xf32, #tpu.memory_space<vmem>>, vector<1x32x128xf32>
    %222 = vector.shape_cast %221 : vector<1x32x128xf32> to vector<32x128xf32>
    %cst_154 = arith.constant dense<0.000000e+00> : vector<32x128xf32>
    %223 = tpu.matmul %220, %222, %cst_154 {dimension_numbers = #tpu.dot_dimension_numbers<[1], [0], [0], [1], [0, 0, 1, 1], [], []>} : vector<32x32xf32>, vector<32x128xf32>, vector<32x128xf32> -> vector<32x128xf32>
    %c0_155 = arith.constant 0 : index
    %c0_156 = arith.constant 0 : index
    %c0_157 = arith.constant 0 : index
    %224 = vector.load %arg19[%c0_155, %c0_156, %c0_157] : memref<1x1x128xf32, #tpu.memory_space<vmem>>, vector<1x1x128xf32>
    %225 = vector.shape_cast %224 : vector<1x1x128xf32> to vector<1x128xf32>
    %226 = vector.broadcast %225 : vector<1x128xf32> to vector<32x128xf32>
    %227 = arith.addf %223, %226 : vector<32x128xf32>
    %cst_158 = arith.constant 5.000000e-01 : f32
    %228 = vector.broadcast %cst_158 : f32 to vector<32x128xf32>
    %229 = arith.mulf %228, %227 : vector<32x128xf32>
    %cst_159 = arith.constant 4.471500e-02 : f32
    %230 = vector.broadcast %cst_159 : f32 to vector<32x128xf32>
    %231 = arith.mulf %230, %227 : vector<32x128xf32>
    %232 = arith.mulf %231, %227 : vector<32x128xf32>
    %233 = arith.mulf %232, %227 : vector<32x128xf32>
    %234 = arith.addf %227, %233 : vector<32x128xf32>
    %cst_160 = arith.constant 0.797884583 : f32
    %235 = vector.broadcast %cst_160 : f32 to vector<32x128xf32>
    %236 = arith.mulf %235, %234 : vector<32x128xf32>
    %237 = math.tanh %236 : vector<32x128xf32>
    %cst_161 = arith.constant 1.000000e+00 : f32
    %238 = vector.broadcast %cst_161 : f32 to vector<32x128xf32>
    %239 = arith.addf %238, %237 : vector<32x128xf32>
    %240 = arith.mulf %229, %239 : vector<32x128xf32>
    %c0_162 = arith.constant 0 : index
    %c0_163 = arith.constant 0 : index
    %c0_164 = arith.constant 0 : index
    %241 = vector.load %arg20[%c0_162, %c0_163, %c0_164] : memref<1x128x32xf32, #tpu.memory_space<vmem>>, vector<1x128x32xf32>
    %242 = vector.shape_cast %241 : vector<1x128x32xf32> to vector<128x32xf32>
    %cst_165 = arith.constant dense<0.000000e+00> : vector<32x32xf32>
    %243 = tpu.matmul %240, %242, %cst_165 {dimension_numbers = #tpu.dot_dimension_numbers<[1], [0], [0], [1], [0, 0, 1, 1], [], []>} : vector<32x128xf32>, vector<128x32xf32>, vector<32x32xf32> -> vector<32x32xf32>
    %c0_166 = arith.constant 0 : index
    %c0_167 = arith.constant 0 : index
    %c0_168 = arith.constant 0 : index
    %244 = vector.load %arg21[%c0_166, %c0_167, %c0_168] : memref<1x1x32xf32, #tpu.memory_space<vmem>>, vector<1x1x32xf32>
    %245 = vector.shape_cast %244 : vector<1x1x32xf32> to vector<1x32xf32>
    %246 = vector.broadcast %245 : vector<1x32xf32> to vector<32x32xf32>
    %247 = arith.addf %243, %246 : vector<32x32xf32>
    %248 = arith.addf %196, %247 : vector<32x32xf32>
    %c0_169 = arith.constant 0 : index
    %c0_170 = arith.constant 0 : index
    %249 = vector.load %arg22[%c0_169, %c0_170] : memref<1x32xf32, #tpu.memory_space<vmem>>, vector<1x32xf32>
    %c0_171 = arith.constant 0 : index
    %c0_172 = arith.constant 0 : index
    %250 = vector.load %arg23[%c0_171, %c0_172] : memref<1x32xf32, #tpu.memory_space<vmem>>, vector<1x32xf32>
    %cst_173 = arith.constant dense<0.000000e+00> : vector<32xf32>
    %251 = vector.multi_reduction <add>, %248, %cst_173 [1] : vector<32x32xf32> to vector<32xf32>
    %252 = vector.shape_cast %251 : vector<32xf32> to vector<32x1xf32>
    %cst_174 = arith.constant 3.200000e+01 : f32
    %253 = vector.broadcast %cst_174 : f32 to vector<32x1xf32>
    %254 = arith.divf %252, %253 : vector<32x1xf32>
    %255 = vector.broadcast %254 : vector<32x1xf32> to vector<32x32xf32>
    %256 = arith.subf %248, %255 : vector<32x32xf32>
    %257 = arith.mulf %256, %256 : vector<32x32xf32>
    %cst_175 = arith.constant dense<0.000000e+00> : vector<32xf32>
    %258 = vector.multi_reduction <add>, %257, %cst_175 [1] : vector<32x32xf32> to vector<32xf32>
    %259 = vector.shape_cast %258 : vector<32xf32> to vector<32x1xf32>
    %cst_176 = arith.constant 3.200000e+01 : f32
    %260 = vector.broadcast %cst_176 : f32 to vector<32x1xf32>
    %261 = arith.divf %259, %260 : vector<32x1xf32>
    %cst_177 = arith.constant 9.99999974E-6 : f32
    %262 = vector.broadcast %cst_177 : f32 to vector<32x1xf32>
    %263 = arith.addf %261, %262 : vector<32x1xf32>
    %264 = math.rsqrt %263 : vector<32x1xf32>
    %265 = vector.broadcast %264 : vector<32x1xf32> to vector<32x32xf32>
    %266 = arith.mulf %256, %265 : vector<32x32xf32>
    %267 = vector.broadcast %249 : vector<1x32xf32> to vector<32x32xf32>
    %268 = arith.mulf %266, %267 : vector<32x32xf32>
    %269 = vector.broadcast %250 : vector<1x32xf32> to vector<32x32xf32>
    %270 = arith.addf %268, %269 : vector<32x32xf32>
    %c0_178 = arith.constant 0 : index
    %c0_179 = arith.constant 0 : index
    %271 = vector.load %arg24[%c0_178, %c0_179] : memref<32x48xf32, #tpu.memory_space<vmem>>, vector<32x48xf32>
    %cst_180 = arith.constant dense<0.000000e+00> : vector<32x48xf32>
    %272 = tpu.matmul %270, %271, %cst_180 {dimension_numbers = #tpu.dot_dimension_numbers<[1], [0], [0], [1], [0, 0, 1, 1], [], []>} : vector<32x32xf32>, vector<32x48xf32>, vector<32x48xf32> -> vector<32x48xf32>
    %c0_181 = arith.constant 0 : index
    %c0_182 = arith.constant 0 : index
    %273 = vector.load %arg25[%c0_181, %c0_182] : memref<1x48xf32, #tpu.memory_space<vmem>>, vector<1x48xf32>
    %274 = vector.broadcast %273 : vector<1x48xf32> to vector<32x48xf32>
    %275 = arith.addf %272, %274 : vector<32x48xf32>
    %c0_183 = arith.constant 0 : index
    %c0_184 = arith.constant 0 : index
    %276 = vector.load %arg26[%c0_183, %c0_184] : memref<32x48xf32, #tpu.memory_space<vmem>>, vector<32x48xf32>
    tpu.vector_store %arg26[%c0_183, %c0_184], %275 {strides = array<i32>} : memref<32x48xf32, #tpu.memory_space<vmem>>, vector<32x48xf32>,
    return
  }
  func.func @transform_0(%arg0: i32) -> (i32, i32) {
    %c0_i32 = arith.constant 0 : i32
    %c0_i32_0 = arith.constant 0 : i32
    %c0_i32_1 = arith.constant 0 : i32
    return %c0_i32, %c0_i32_0 : i32, i32
  }
  func.func @transform_1(%arg0: i32) -> (i32, i32) {
    %c0_i32 = arith.constant 0 : i32
    %c0_i32_0 = arith.constant 0 : i32
    %c0_i32_1 = arith.constant 0 : i32
    return %c0_i32, %c0_i32_0 : i32, i32
  }
  func.func @transform_2(%arg0: i32) -> (i32, i32) {
    %c0_i32 = arith.constant 0 : i32
    %c0_i32_0 = arith.constant 0 : i32
    %c0_i32_1 = arith.constant 0 : i32
    return %c0_i32, %c0_i32_0 : i32, i32
  }
  func.func @transform_3(%arg0: i32) -> (i32, i32) {
    %c0_i32 = arith.constant 0 : i32
    %c0_i32_0 = arith.constant 0 : i32
    %c0_i32_1 = arith.constant 0 : i32
    return %c0_i32, %c0_i32_0 : i32, i32
  }
  func.func @transform_4(%arg0: i32) -> (i32, i32) {
    %c0_i32 = arith.constant 0 : i32
    %c0_i32_0 = arith.constant 0 : i32
    %c0_i32_1 = arith.constant 0 : i32
    return %c0_i32, %c0_i32_0 : i32, i32
  }
  func.func @transform_5(%arg0: i32) -> (i32, i32, i32) {
    %c0_i32 = arith.constant 0 : i32
    %c0_i32_0 = arith.constant 0 : i32
    %c0_i32_1 = arith.constant 0 : i32
    %c0_i32_2 = arith.constant 0 : i32
    return %c0_i32, %c0_i32_0, %c0_i32_1 : i32, i32, i32
  }
  func.func @transform_6(%arg0: i32) -> (i32, i32, i32) {
    %c0_i32 = arith.constant 0 : i32
    %c0_i32_0 = arith.constant 0 : i32
    %c0_i32_1 = arith.constant 0 : i32
    %c0_i32_2 = arith.constant 0 : i32
    return %c0_i32, %c0_i32_0, %c0_i32_1 : i32, i32, i32
  }
  func.func @transform_7(%arg0: i32) -> (i32, i32, i32) {
    %c0_i32 = arith.constant 0 : i32
    %c0_i32_0 = arith.constant 0 : i32
    %c0_i32_1 = arith.constant 0 : i32
    %c0_i32_2 = arith.constant 0 : i32
    return %c0_i32, %c0_i32_0, %c0_i32_1 : i32, i32, i32
  }
  func.func @transform_8(%arg0: i32) -> (i32, i32, i32) {
    %c0_i32 = arith.constant 0 : i32
    %c0_i32_0 = arith.constant 0 : i32
    %c0_i32_1 = arith.constant 0 : i32
    %c0_i32_2 = arith.constant 0 : i32
    return %c0_i32, %c0_i32_0, %c0_i32_1 : i32, i32, i32
  }
  func.func @transform_9(%arg0: i32) -> (i32, i32, i32) {
    %c0_i32 = arith.constant 0 : i32
    %c0_i32_0 = arith.constant 0 : i32
    %c0_i32_1 = arith.constant 0 : i32
    %c0_i32_2 = arith.constant 0 : i32
    return %c0_i32, %c0_i32_0, %c0_i32_1 : i32, i32, i32
  }
  func.func @transform_10(%arg0: i32) -> (i32, i32, i32) {
    %c0_i32 = arith.constant 0 : i32
    %c0_i32_0 = arith.constant 0 : i32
    %c0_i32_1 = arith.constant 0 : i32
    %c0_i32_2 = arith.constant 0 : i32
    return %c0_i32, %c0_i32_0, %c0_i32_1 : i32, i32, i32
  }
  func.func @transform_11(%arg0: i32) -> (i32, i32, i32) {
    %c0_i32 = arith.constant 0 : i32
    %c0_i32_0 = arith.constant 0 : i32
    %c0_i32_1 = arith.constant 0 : i32
    %c0_i32_2 = arith.constant 0 : i32
    return %c0_i32, %c0_i32_0, %c0_i32_1 : i32, i32, i32
  }
  func.func @transform_12(%arg0: i32) -> (i32, i32, i32) {
    %c0_i32 = arith.constant 0 : i32
    %c0_i32_0 = arith.constant 0 : i32
    %c0_i32_1 = arith.constant 0 : i32
    %c0_i32_2 = arith.constant 0 : i32
    return %c0_i32, %c0_i32_0, %c0_i32_1 : i32, i32, i32
  }
  func.func @transform_13(%arg0: i32) -> (i32, i32, i32) {
    %c0_i32 = arith.constant 0 : i32
    %c0_i32_0 = arith.constant 0 : i32
    %c0_i32_1 = arith.constant 0 : i32
    %c0_i32_2 = arith.constant 0 : i32
    return %c0_i32, %c0_i32_0, %c0_i32_1 : i32, i32, i32
  }
  func.func @transform_14(%arg0: i32) -> (i32, i32, i32) {
    %c0_i32 = arith.constant 0 : i32
    %c0_i32_0 = arith.constant 0 : i32
    %c0_i32_1 = arith.constant 0 : i32
    %c0_i32_2 = arith.constant 0 : i32
    return %c0_i32, %c0_i32_0, %c0_i32_1 : i32, i32, i32
  }
  func.func @transform_15(%arg0: i32) -> (i32, i32, i32) {
    %c0_i32 = arith.constant 0 : i32
    %c0_i32_0 = arith.constant 0 : i32
    %c0_i32_1 = arith.constant 0 : i32
    %c0_i32_2 = arith.constant 0 : i32
    return %c0_i32, %c0_i32_0, %c0_i32_1 : i32, i32, i32
  }
  func.func @transform_16(%arg0: i32) -> (i32, i32, i32) {
    %c0_i32 = arith.constant 0 : i32
    %c0_i32_0 = arith.constant 0 : i32
    %c0_i32_1 = arith.constant 0 : i32
    %c0_i32_2 = arith.constant 0 : i32
    return %c0_i32, %c0_i32_0, %c0_i32_1 : i32, i32, i32
  }
  func.func @transform_17(%arg0: i32) -> (i32, i32, i32) {
    %c0_i32 = arith.constant 0 : i32
    %c0_i32_0 = arith.constant 0 : i32
    %c0_i32_1 = arith.constant 0 : i32
    %c0_i32_2 = arith.constant 0 : i32
    return %c0_i32, %c0_i32_0, %c0_i32_1 : i32, i32, i32
  }
  func.func @transform_18(%arg0: i32) -> (i32, i32, i32) {
    %c0_i32 = arith.constant 0 : i32
    %c0_i32_0 = arith.constant 0 : i32
    %c0_i32_1 = arith.constant 0 : i32
    %c0_i32_2 = arith.constant 0 : i32
    return %c0_i32, %c0_i32_0, %c0_i32_1 : i32, i32, i32
  }
  func.func @transform_19(%arg0: i32) -> (i32, i32, i32) {
    %c0_i32 = arith.constant 0 : i32
    %c0_i32_0 = arith.constant 0 : i32
    %c0_i32_1 = arith.constant 0 : i32
    %c0_i32_2 = arith.constant 0 : i32
    return %c0_i32, %c0_i32_0, %c0_i32_1 : i32, i32, i32
  }
  func.func @transform_20(%arg0: i32) -> (i32, i32, i32) {
    %c0_i32 = arith.constant 0 : i32
    %c0_i32_0 = arith.constant 0 : i32
    %c0_i32_1 = arith.constant 0 : i32
    %c0_i32_2 = arith.constant 0 : i32
    return %c0_i32, %c0_i32_0, %c0_i32_1 : i32, i32, i32
  }
  func.func @transform_21(%arg0: i32) -> (i32, i32) {
    %c0_i32 = arith.constant 0 : i32
    %c0_i32_0 = arith.constant 0 : i32
    %c0_i32_1 = arith.constant 0 : i32
    return %c0_i32, %c0_i32_0 : i32, i32
  }
  func.func @transform_22(%arg0: i32) -> (i32, i32) {
    %c0_i32 = arith.constant 0 : i32
    %c0_i32_0 = arith.constant 0 : i32
    %c0_i32_1 = arith.constant 0 : i32
    return %c0_i32, %c0_i32_0 : i32, i32
  }
  func.func @transform_23(%arg0: i32) -> (i32, i32) {
    %c0_i32 = arith.constant 0 : i32
    %c0_i32_0 = arith.constant 0 : i32
    %c0_i32_1 = arith.constant 0 : i32
    return %c0_i32, %c0_i32_0 : i32, i32
  }
  func.func @transform_24(%arg0: i32) -> (i32, i32) {
    %c0_i32 = arith.constant 0 : i32
    %c0_i32_0 = arith.constant 0 : i32
    %c0_i32_1 = arith.constant 0 : i32
    return %c0_i32, %c0_i32_0 : i32, i32
  }
  func.func @transform_25(%arg0: i32) -> (i32, i32) {
    %c0_i32 = arith.constant 0 : i32
    %c0_i32_0 = arith.constant 0 : i32
    %c0_i32_1 = arith.constant 0 : i32
    return %c0_i32, %c0_i32_0 : i32, i32
  }
}

</mosaic_0001>

<bundles_post_ra>
// kernel: eq.10
= control target key start
LH: loop header
LB: loop body
LE: loop exit
PB: predicated region body
PF: predicated region fallthrough
CT: control target
= control target key end

     0   :  { %vm8_vm0 = vcmask 130048   ;;  %vm14_vm1 = vcmask 261248   ;;  %s42_s0 = inlined_call_operand.vmem [shape: s32[2,16], index: 0, kind: input, shape index: {}]   ;;  %s43_s1 = inlined_call_operand.vmem [shape: s32[32], index: 1, kind: output, shape index: {}]  }
   0x1   :  { %v5_v0 = vld [vmem:[%s42_s0] sm:$0x3]  ;;  %s25_s0 = smov 16  }
   0x2   :  { %6 = vst [vmem:[#allocation1] sm:$0x3] %v5_v0 }
   0x9   :  { %v11_v1 = vld [vmem:[#allocation1 + $0x1] sm:$0x1]   ;;  %v7_v2 = vld [vmem:[#allocation1] sm:$0x1]  }
   0xa   :  { %12 = vrot.lane.b32.xlu0 %v11_v1, %s25_s0  ;;  %9 = vst.msk [vmem:[#allocation0] sm:$0x1] %vm8_vm0, %v7_v2  }
  0x7c   :  { %v13_v3 = vpop.permute.xlu0 %12  }
  0x7d   :  { %15 = vst.msk [vmem:[#allocation0] sm:$0x1] %vm14_vm1, %v13_v3  }
  0x84   :  { %v20_v4 = vld [vmem:[#allocation0] sm:$0x1] }
  0x85   :  { %23 = vst [vmem:[%s43_s1] sm:$0x1] %v20_v4 }

// kernel: custom-call.11
= control target key start
LH: loop header
LB: loop body
LE: loop exit
PB: predicated region body
PF: predicated region fallthrough
CT: control target
= control target key end

     0   :  { %5 = vsyncpa [#allocation6], 0  ;;  %v77_v1 = vlaneseq  ;;  %v534_v2 = vmov 0   ;;  %s563_s14 = smov 0   ;;  %s604_s0 = inlined_call_operand.vmem [shape: f32[2,2], index: 0, kind: input, shape index: {}]   ;;  %s605_s1 = inlined_call_operand.vmem [shape: f32[2,2], index: 1, kind: output, shape index: {0}]   ;;  %s606_s2 = inlined_call_operand.hbm [shape: s32[2], index: 2, kind: output, shape index: {1}]   ;;  %s607_s3 = inlined_call_operand.vmem [shape: s32[2], index: 3, kind: output, shape index: {2}]  }
   0x1   :  { %v67_v0 = vld [vmem:[%s604_s0] sm:$0x3]  ;;  %76 = vst [vmem:[#allocation4] sm:$0x1] %v534_v2 }
   0x2   :  { %68 = vst [vmem:[#allocation1] sm:$0x3] %v67_v0  ;;  %v560_v3 = vshrl.u32 %v77_v1, 7 }
   0x4   :  { %81 = vst [vmem:[#allocation9] sm:$0xff] %v560_v3 }
   0x9   :  { %v72_v4 = vld [vmem:[#allocation1] sm:$0x3] }
   0xa   :  { %73 = vst [vmem:[#allocation0] sm:$0x3] %v72_v4 }
  0x11   :  { %v74_v5 = vld [vmem:[#allocation0] sm:$0xff] }
  0x12   :  { %75 = vst [vmem:[#allocation2] sm:$0xff] %v74_v5 }
  0x13 LB: > { %vm97_vm0 = vcmp.lt.s32.totalorder %v560_v3, 2  ;;  %v570_v8 = vstv %s532_s14  ;;  %s138_s0 = ssub.s32 128, %s532_s14  ;;  %v144_v38 = vand.u32 127, %v77_v1  ;;  %v147_v40 = vld [vmem:[#allocation4] ss:$0 sm:$0xff]  ;;  %s150_s15 = scalar_lea.vmem [#allocation2], %s532_s14  ;;  %s532_s14 = sphi %s563_s14, %s87_s14  }
  0x14   : > { %vm96_vm1 = vcmp.ge.s32.totalorder %v560_v3, %v570_v8  ;;  %s156_s17 = scalar_lea.vmem [#allocation9], %s532_s14  ;;  %vm176_vm15 = vcmp.gt.s32.totalorder %v560_v3, %v570_v8  ;;  %s87_s14 = sadd.s32 1, %s532_s14  }
  0x15   : > { %vm98_vm3 = vmand %vm96_vm1, %vm97_vm0  ;;  %vm168_vm12 = vcmp.gt.s32.totalorder %v144_v38, %v570_v8  ;;  %vm145_vm13 = vcmp.eq.s32.totalorder %v144_v38, %v570_v8  ;;  %v158_v42 = vld [vmem:[%s156_s17] ss:$0 sm:$0xff]  ;;  %p84_p0 = scmp.ge.s32.totalorder %s87_s14, 2  }
  0x16   : > { %vm180_vm1 = vmand %vm176_vm15, %vm145_vm13  ;;  %s535_s20 = smov (%p84_p0), [#allocation5]  }
  0x17   :  { %s328_s21 = sshll.u32 (%p84_p0), %s535_s20, 4  ;;  %s329_s21 = int_to_ptr.vmem [resolvable:$true] %s328_s21 }
  0x18   :  { %s504_s24 = scalar_lea.vmem (%p84_p0), %s329_s21, 16  ;;  %s508_s25 = scalar_lea.vmem (%p84_p0), %s329_s21, 32 }
  0x19   : > { %v92_v6 = vld [vmem:[#allocation2] sm:$0xff]  ;;  %v152_v41 = vld [vmem:[%s150_s15] ss:$0 sm:$0xff]  ;;  %p505_p1 = scmp.ne.s32.totalorder (%p84_p0), %s329_s21, %s504_s24  ;;  %p509_p2 = scmp.lt.s32.totalorder (%p84_p0), %s329_s21, %s329_s21 }
  0x1a   : > { %v93_v7 = vand.u32 2147483647, %v92_v6  ;;  %p510_p3 = scmp.lt.s32.totalorder (%p84_p0), %s508_s25, %s504_s24 }
  0x1c   : > { %vm483_vm2 = vcmp.gt.f32.partialorder %v93_v7, -inf  ;;  %p511_p4 = por (%p84_p0), %p510_p3, %p509_p2 }
  0x1d   : > { %vm100_vm4 = vmand %vm98_vm3, %vm483_vm2 }
  0x1e   : > { %v101_v9 = vsel %vm100_vm4, %v560_v3, %v570_v8  ;;  %v102_v10 = vsel %vm100_vm4, %v93_v7, -inf  ;;  %p512_p5 = pnand (%p84_p0), %p511_p4, %p505_p1 }
  0x1f   : > { %v103_v11 = vrot.slane %v102_v10, 1  ;;  %v104_v12 = vrot.slane %v101_v9, 1 }
  0x21   : > { %vm105_vm5 = vcmp.ge.f32.partialorder %v103_v11, %v102_v10  ;;  %v108_v13 = vrot.slane %v103_v11, 1  ;;  %v109_v14 = vrot.slane %v104_v12, 1 }
  0x22   : > { %v106_v15 = vsel %vm105_vm5, %v103_v11, %v102_v10  ;;  %v107_v16 = vsel %vm105_vm5, %v104_v12, %v101_v9 }
  0x23   : > { %vm110_vm6 = vcmp.ge.f32.partialorder %v108_v13, %v106_v15  ;;  %v113_v17 = vrot.slane %v108_v13, 1  ;;  %v114_v18 = vrot.slane %v109_v14, 1 }
  0x24   : > { %v111_v19 = vsel %vm110_vm6, %v108_v13, %v106_v15  ;;  %v112_v20 = vsel %vm110_vm6, %v109_v14, %v107_v16 }
  0x25   : > { %vm115_vm7 = vcmp.ge.f32.partialorder %v113_v17, %v111_v19  ;;  %v118_v21 = vrot.slane %v113_v17, 1  ;;  %v119_v22 = vrot.slane %v114_v18, 1 }
  0x26   : > { %v116_v23 = vsel %vm115_vm7, %v113_v17, %v111_v19  ;;  %v117_v24 = vsel %vm115_vm7, %v114_v18, %v112_v20 }
  0x27   : > { %vm120_vm8 = vcmp.ge.f32.partialorder %v118_v21, %v116_v23  ;;  %v123_v25 = vrot.slane %v118_v21, 1  ;;  %v124_v26 = vrot.slane %v119_v22, 1 }
  0x28   : > { %v121_v27 = vsel %vm120_vm8, %v118_v21, %v116_v23  ;;  %v122_v28 = vsel %vm120_vm8, %v119_v22, %v117_v24 }
  0x29   : > { %vm125_vm9 = vcmp.ge.f32.partialorder %v123_v25, %v121_v27  ;;  %v128_v29 = vrot.slane %v123_v25, 1  ;;  %v129_v30 = vrot.slane %v124_v26, 1 }
  0x2a   : > { %v126_v31 = vsel %vm125_vm9, %v123_v25, %v121_v27  ;;  %v127_v32 = vsel %vm125_vm9, %v124_v26, %v122_v28 }
  0x2b   : > { %vm130_vm10 = vcmp.ge.f32.partialorder %v128_v29, %v126_v31  ;;  %v133_v33 = vrot.slane %v128_v29, 1  ;;  %v134_v34 = vrot.slane %v129_v30, 1 }
  0x2c   : > { %v131_v35 = vsel %vm130_vm10, %v128_v29, %v126_v31  ;;  %v132_v36 = vsel %vm130_vm10, %v129_v30, %v127_v32 }
  0x2d   : > { %vm135_vm11 = vcmp.ge.f32.partialorder %v133_v33, %v131_v35 }
  0x2e   : > { %v137_v37 = vsel %vm135_vm11, %v134_v34, %v132_v36 }
  0x2f   : > { %139 = vrot.lane.b32.xlu0 %v137_v37, %s138_s0 }
  0xa1   : > { %v140_v39 = vpop.permute.xlu0 %139 }
  0xa2   : > { %490 = vpush %v140_v39 }
  0xd3   : > { %s491_s16 = spop %490 }
  0xd4   : > { %v146_v43 = vstv %s491_s16  ;;  %s151_s18 = scalar_lea.vmem [#allocation2], %s491_s16  ;;  %s157_s19 = scalar_lea.vmem [#allocation9], %s491_s16 }
  0xd5   : > { %v153_v44 = vld [vmem:[%s151_s18] ss:$0 sm:$0xff]  ;;  %v148_v46 = vsel %vm145_vm13, %v146_v43, %v147_v40 }
  0xd6   : > { %v159_v45 = vld [vmem:[%s157_s19] ss:$0 sm:$0xff]  ;;  %154 = vst [vmem:[%s151_s18] sm:$0x1] %v152_v41  ;;  %vm162_vm14 = vcmp.ne.f32.partialorder %v153_v44, 0.0  ;;  %149 = vst [vmem:[#allocation4] sm:$0x1] %v148_v46 }
  0xd7   : > { %160 = vst [vmem:[%s157_s19] sm:$0x1] %v158_v42  ;;  %155 = vst [vmem:[%s150_s15] sm:$0x1] %v153_v44  ;;  %v169_v53 = vsel %vm168_vm12, %v153_v44, 0.0 }
  0xd8   : > { %161 = vst [vmem:[%s156_s17] sm:$0x1] %v159_v45  ;;  %vm163_vm0 = vmand %vm145_vm13, %vm162_vm14 }
  0xd9   : > { %v164_v47 = vsel %vm163_vm0, %v153_v44, 1.0 }
  0xda   : > { %v177_v48 = vsel %vm176_vm15, %v164_v47, 1.0 }
  0xdb   : > { %502 = vrcp.f32 %v177_v48 }
  0xdd   :  { %v248_v59 = vld [vmem:[#allocation4] sm:$0x1] (%p84_p0) }
  0xde   : > { %v173_v50 = vld [vmem:[#allocation2] sm:$0xff]  ;;  %251 = vst [vmem:[#allocation5] sm:$0x1] (%p84_p0), %v248_v59 }
  0xdf   :  { %v187_v57 = vld [vmem:[#allocation9] sm:$0xff] (%p84_p0) }
  0xe8   : > { %v503_v49 = vpop.eup %502 }
  0xe9   : > { %v179_v51 = vmul.f32 %v503_v49, %v173_v50 }
  0xeb   : > { %v181_v52 = vsel %vm180_vm1, %v179_v51, 0.0 }
  0xec   : > { %182 = vadd.xlane.f32.xlu0 %v181_v52 }
 0x119   :  { %203 = vxpose.xlu0.b32.start.end [1/1] (short) (narrow) (%p84_p0), %v187_v57, 8 }
 0x175   : > { %v183_v54 = vpop.xlane.xlu0 %182 }
 0x176   : > { %v184_v55 = vmul.f32 %v183_v54, %v169_v53  ;;  %86 = sbr.rel (!%p84_p0) target bundleno = 19 (0x13), region = 163 }
 0x178   : > { %v185_v56 = vsub.f32 %v179_v51, %v184_v55 }
 0x17a   : > { %186 = vst [vmem:[#allocation2] sm:$0xff] %v185_v56 }
 0x181   :  { %v240_v58 = vld [vmem:[#allocation2] sm:$0x3] }
 0x182   :  { %243 = vst [vmem:[#allocation3] sm:$0x3] %v240_v58 }
 0x189   :  { %v321_v60 = vld [vmem:[#allocation3] sm:$0x3] }
 0x18a   :  { %322 = vst [vmem:[%s605_s1] sm:$0x3] %v321_v60 }
 0x18b   :  { %515 = shalt.err (!%p512_p5)
}
 0x18c   :  { %331 = dma.vmem_to_hbm [thread:$0]  %s329_s21, 16, %s606_s2, [#allocation6]  }
 0x195   :  { %v219_v61 = vpop.trf.xlu0 }
 0x196   :  { %235 = vst [vmem:[#allocation7] sm:$0x1] %v219_v61 }
 0x19d   :  { %v256_v62 = vld [vmem:[#allocation7] sm:$0x1] }
 0x19e   :  { %259 = vst [vmem:[#allocation8] sm:$0x1] %v256_v62 }
 0x1a5   :  { %v395_v63 = vld [vmem:[#allocation8] sm:$0x1] }
 0x1a6   :  { %396 = vst [vmem:[%s607_s3] sm:$0x1] %v395_v63 }
 0x1a7   :  { %528 = dma.done.wait [#allocation6], 16  }
 0x1a8   :  { %529 = vsyncadd [#allocation6], 4294967280 }
 0x1a9   :  { %402 = vsyncpa [#allocation6], 1 }

// kernel: custom-call.13
= control target key start
LH: loop header
LB: loop body
LE: loop exit
PB: predicated region body
PF: predicated region fallthrough
CT: control target
= control target key end

     0   :  { %v40_v1 = vlaneseq  ;;  %v135_v9 = vmov -1.0   ;;  %s158_s0 = inlined_call_operand.vmem [shape: f32[1,2,2], index: 0, kind: input, shape index: {}]   ;;  %s159_s1 = inlined_call_operand.vmem [shape: f32[1,2,2], index: 1, kind: output, shape index: {}]  }
   0x1   :  { %v18_v0 = vld [vmem:[%s158_s0] sm:$0x3] }
   0x2   :  { %19 = vst [vmem:[#allocation1] sm:$0x3] %v18_v0  ;;  %v41_v2 = vand.u32 127, %v40_v1  ;;  %v44_v3 = vshrl.u32 %v40_v1, 7 }
   0x4   :  { %vm42_vm0 = vcmp.lt.s32.totalorder %v41_v2, 2  ;;  %vm51_vm1 = vcmp.ge.s32.totalorder %v44_v3, %v41_v2  ;;  %vm46_vm3 = vcmp.eq.s32.totalorder %v44_v3, %v41_v2  ;;  %vm62_vm4 = vcmp.eq.s32.totalorder %v41_v2, %v44_v3 }
   0x5   :  { %vm149_vm2 = vmand %vm51_vm1, %vm42_vm0  ;;  %vm65_vm5 = vcmp.eq.s32.totalorder %v41_v2, 0  ;;  %vm73_vm6 = vcmp.eq.s32.totalorder %v41_v2, 1 }
   0x6   :  { %v66_v10 = vsel %vm65_vm5, 1.0, %v135_v9 }
   0x7   :  { %v67_v11 = vsel %vm62_vm4, %v66_v10, 0.0 }
   0x9   :  { %v38_v5 = vld [vmem:[#allocation1] sm:$0x3] }
   0xa   :  { %39 = vst [vmem:[#allocation0] sm:$0x3] %v38_v5 }
  0x11   :  { %v47_v6 = vld [vmem:[#allocation0] sm:$0xff] }
  0x12   :  { %v48_v7 = vsel %vm46_vm3, %v47_v6, 0.0  ;;  %v53_v8 = vsel %vm149_vm2, %v47_v6, 0.0 }
  0x13   :  { %49 = vadd.xlane.f32.xlu0 %v48_v7 }
  0x9c   :  { %v50_v12 = vpop.xlane.xlu0 %49 }
  0x9d   :  { %133 = vrcp.f32 %v50_v12  ;;  %vm80_vm7 = vweird.f32 %v50_v12 }
  0xaa   :  { %v134_v13 = vpop.eup %133 }
  0xab   :  { %v55_v14 = vmul.f32 %v134_v13, %v53_v8 }
  0xad   :  { %56 = vst [vmem:[#allocation4] sm:$0xff] %v55_v14 }
  0xb4   :  { %v69_v15 = vld [vmem:[#allocation4 + $0x1] ss:$0 sm:$0xff] }
  0xb5   :  { %v70_v16 = vxor.u32 2147483648, %v69_v15 }
  0xb7   :  { %v74_v17 = vmul.f32 %v70_v16, %v67_v11 }
  0xb9   :  { %75 = vadd.xlane.f32.xlu0 %v74_v17 }
 0x142   :  { %v76_v18 = vpop.xlane.xlu0 %75 }
 0x143   :  { %v77_v19 = vsel %vm73_vm6, %v76_v18, %v67_v11 }
 0x144   :  { %v79_v20 = vmul.f32 %v134_v13, %v77_v19 }
 0x146   :  { %v81_v21 = vsel %vm80_vm7, %v77_v19, %v79_v20 }
 0x147   :  { %82 = vst [vmem:[#allocation2] sm:$0xff] %v81_v21 }
 0x14e   :  { %v87_v22 = vld [vmem:[#allocation2] sm:$0x3] }
 0x14f   :  { %90 = vst [vmem:[#allocation3] sm:$0x3] %v87_v22 }
 0x156   :  { %v107_v23 = vld [vmem:[#allocation3] sm:$0x3] }
 0x157   :  { %108 = vst [vmem:[%s159_s1] sm:$0x3] %v107_v23 }

// kernel: custom-call.12
= control target key start
LH: loop header
LB: loop body
LE: loop exit
PB: predicated region body
PF: predicated region fallthrough
CT: control target
= control target key end

     0   :  { %v40_v1 = vlaneseq  ;;  %v134_v9 = vmov -1.0   ;;  %s157_s0 = inlined_call_operand.vmem [shape: f32[1,2,2], index: 0, kind: input, shape index: {}]   ;;  %s158_s1 = inlined_call_operand.vmem [shape: f32[1,2,2], index: 1, kind: output, shape index: {}]  }
   0x1   :  { %v18_v0 = vld [vmem:[%s157_s0] sm:$0x3] }
   0x2   :  { %19 = vst [vmem:[#allocation1] sm:$0x3] %v18_v0  ;;  %v41_v2 = vand.u32 127, %v40_v1  ;;  %v44_v3 = vshrl.u32 %v40_v1, 7 }
   0x4   :  { %vm42_vm0 = vcmp.lt.s32.totalorder %v41_v2, 2  ;;  %vm51_vm1 = vcmp.le.s32.totalorder %v44_v3, %v41_v2  ;;  %vm46_vm3 = vcmp.eq.s32.totalorder %v44_v3, %v41_v2  ;;  %vm62_vm4 = vcmp.eq.s32.totalorder %v41_v2, %v44_v3 }
   0x5   :  { %vm148_vm2 = vmand %vm51_vm1, %vm42_vm0  ;;  %vm65_vm5 = vcmp.eq.s32.totalorder %v41_v2, 1  ;;  %vm72_vm6 = vcmp.eq.s32.totalorder %v41_v2, 0 }
   0x6   :  { %v66_v10 = vsel %vm65_vm5, 1.0, %v134_v9 }
   0x7   :  { %v67_v11 = vsel %vm62_vm4, %v66_v10, 0.0 }
   0x9   :  { %v38_v5 = vld [vmem:[#allocation1] sm:$0x3] }
   0xa   :  { %39 = vst [vmem:[#allocation0] sm:$0x3] %v38_v5 }
  0x11   :  { %v47_v6 = vld [vmem:[#allocation0] sm:$0xff] }
  0x12   :  { %v48_v7 = vsel %vm46_vm3, %v47_v6, 0.0  ;;  %v53_v8 = vsel %vm148_vm2, %v47_v6, 0.0 }
  0x13   :  { %49 = vadd.xlane.f32.xlu0 %v48_v7 }
  0x9c   :  { %v50_v12 = vpop.xlane.xlu0 %49 }
  0x9d   :  { %132 = vrcp.f32 %v50_v12  ;;  %vm79_vm7 = vweird.f32 %v50_v12 }
  0xaa   :  { %v133_v13 = vpop.eup %132 }
  0xab   :  { %v55_v14 = vmul.f32 %v133_v13, %v53_v8 }
  0xad   :  { %56 = vst [vmem:[#allocation4] sm:$0xff] %v55_v14 }
  0xb4   :  { %v68_v15 = vld [vmem:[#allocation4] ss:$0 sm:$0xff] }
  0xb5   :  { %v69_v16 = vxor.u32 2147483648, %v68_v15 }
  0xb7   :  { %v73_v17 = vmul.f32 %v69_v16, %v67_v11 }
  0xb9   :  { %74 = vadd.xlane.f32.xlu0 %v73_v17 }
 0x142   :  { %v75_v18 = vpop.xlane.xlu0 %74 }
 0x143   :  { %v76_v19 = vsel %vm72_vm6, %v75_v18, %v67_v11 }
 0x144   :  { %v78_v20 = vmul.f32 %v133_v13, %v76_v19 }
 0x146   :  { %v80_v21 = vsel %vm79_vm7, %v76_v19, %v78_v20 }
 0x147   :  { %81 = vst [vmem:[#allocation2] sm:$0xff] %v80_v21 }
 0x14e   :  { %v86_v22 = vld [vmem:[#allocation2] sm:$0x3] }
 0x14f   :  { %89 = vst [vmem:[#allocation3] sm:$0x3] %v86_v22 }
 0x156   :  { %v106_v23 = vld [vmem:[#allocation3] sm:$0x3] }
 0x157   :  { %107 = vst [vmem:[%s158_s1] sm:$0x3] %v106_v23 }

// kernel: forward.4
= control target key start
LH: loop header
LB: loop body
LE: loop exit
PB: predicated region body
PF: predicated region fallthrough
CT: control target
= control target key end

     0   :  { %s3608_s3 = smov 2   ;;  %vm148_vm0 = vcmask 261120   ;;  %s3609_s10 = smov 3   ;;  %vm248_vm1 = vcmask 130048   ;;  %vm616_vm2 = vcmask 64512   ;;  %vm1864_vm3 = vcmask 523264   ;;  %s4162_s0 = inlined_call_operand.smem [shape: u32[32], index: -1, kind: input, shape index: {}] }
   0x1   :  { %s2934_s6 = sld [smem:[%s4162_s0 + %s3608_s3]]   ;;  %s3610_s14 = smov 6   ;;  %vm3636_vm8 = vmmov 0   ;;  %vm2639_vm10 = vcmask 195584  }
   0x2   :  { %s3654_s9 = sld [smem:[%s4162_s0]]   ;;  %s3611_s18 = smov 8  }
   0x3   :  { %s2935_s13 = sld [smem:[%s4162_s0 + %s3609_s10]]   ;;  %s3612_s22 = smov 10  }
   0x4   :  { %s3702_s17 = sld [smem:[%s4162_s0 + %s3610_s14]]   ;;  %s3613_s26 = smov 4  }
   0x5   :  { %s3707_s21 = sld [smem:[%s4162_s0 + %s3611_s18]]   ;;  %s3614_s30 = smov 5  }
   0x6   :  { %s3714_s25 = sld [smem:[%s4162_s0 + %s3612_s22]]   ;;  %s3615_s4 = smov 7  }
   0x7   :  { %v140_v0 = vld [vmem:[%s2934_s6 + $0x18] sm:$0xff]  ;;  %v139_v1 = vld [vmem:[%s2934_s6 + $0x10] sm:$0xff]  ;;  %v138_v3 = vld [vmem:[%s2934_s6 + $0x8] sm:$0xff]  ;;  %s2936_s29 = sld [smem:[%s4162_s0 + %s3613_s26]]   ;;  %s3616_s8 = smov 9  }
   0x8   :  { %3230 = vmatprep.subr.mxu0 %v140_v0  ;;  %v129_v2 = vld [vmem:[%s3654_s9] sm:$0xff]  ;;  %v130_v5 = vld [vmem:[%s3654_s9 + $0x8] sm:$0xff]  ;;  %v131_v6 = vld [vmem:[%s3654_s9 + $0x10] sm:$0xff]  ;;  %s2937_s3 = sld [smem:[%s4162_s0 + %s3614_s30]]   ;;  %s3618_s18 = smov 1  }
   0x9   :  { %3231 = vmatpush3.msra.mxu0 %v140_v0  ;;  %3238 = vmatprep.mubr.msk.f32.mxu0 %vm148_vm0, %v129_v2  ;;  %v137_v4 = vld [vmem:[%s2934_s6] sm:$0xff]  ;;  %v132_v7 = vld [vmem:[%s3654_s9 + $0x18] sm:$0xff]  ;;  %s3763_s7 = sld [smem:[%s4162_s0 + %s3615_s4]]   ;;  %s3638_s22 = smov 26  }
   0xa   :  { %3232 = vmatprep.subr.mxu0 %v139_v1  ;;  %v2964_v9 = vld [vmem:[%s2935_s13] ss:$0 sm:$0xff]  ;;  %v323_v41 = vld [vmem:[%s3702_s17 + $0x8] sm:$0xff]  ;;  %s3768_s12 = sld [smem:[%s4162_s0 + %s3616_s8]]   ;;  %s3617_s13 = smov 11  }
   0xb   :  { %3233 = vmatpush3.msra.mxu0 %v139_v1  ;;  %3465 = vmatprep.subr.mxu1 %v323_v41  ;;  %v322_v42 = vld [vmem:[%s3702_s17] sm:$0xff]  ;;  %v429_v43 = vld [vmem:[%s3707_s21 + $0x8] sm:$0xff]  ;;  %s3773_s16 = sld [smem:[%s4162_s0 + %s3617_s13]]   ;;  %s3639_s26 = smov 27  }
   0xc   :  { %3234 = vmatprep.subr.mxu0 %v138_v3  ;;  %3467 = vmatpush3.msra.mxu1 %v323_v41  ;;  %v523_v44 = vld [vmem:[%s3714_s25 + $0x8] sm:$0xff]  ;;  %s3640_s30 = smov 29   ;;  %s3641_s4 = smov 30  }
   0xd   :  { %3235 = vmatpush3.msra.mxu0 %v138_v3  ;;  %3466 = vmatprep.subr.mxu1 %v322_v42  ;;  %v2969_v58 = vld [vmem:[%s2936_s29] ss:$0 sm:$0xff]  ;;  %s3621_s29 = smov 16   ;;  %s3642_s8 = smov 31  }
   0xe   :  { %3236 = vmatprep.subr.mxu0 %v137_v4  ;;  %3468 = vmatpush3.msra.mxu1 %v322_v42  ;;  %v2970_v60 = vld [vmem:[%s2937_s3] ss:$0 sm:$0xff]  ;;  %s2948_s2 = sld [smem:[%s4162_s0 + %s3621_s29]]   ;;  %s3622_s3 = smov 14  }
   0xf   :  { %3237 = vmatpush3.msra.mxu0 %v137_v4  ;;  %3254 = vmatprep.subr.mxu1 %v429_v43  ;;  %s2946_s6 = sld [smem:[%s4162_s0 + %s3622_s3]]  }
  0x10   :  { %3239 = vmatmul.mubr.msk.f32.vlgmr.msra.gmra.mxu0 %vm148_vm0, %v130_v5  ;;  %3244 = vmatprep.subr.mxu0 %v323_v41  ;;  %s2959_s29 = sld [smem:[%s4162_s0 + %s3639_s26]]  }
  0x11   :  { %3241 = vmatprep.mubr.msk.f32.mxu0 %vm148_vm0, %v131_v6  ;;  %3245 = vmatpush3.msra.mxu0 %v323_v41  ;;  %v3007_v41 = vld [vmem:[%s3707_s21 + $0x18] sm:$0xff]  ;;  %s2961_s3 = sld [smem:[%s4162_s0 + %s3640_s30]]  }
  0x12   :  { %3246 = vmatprep.subr.mxu0 %v322_v42 }
  0x13   :  { %3247 = vmatpush3.msra.mxu0 %v322_v42 }
  0x14   :  { %3242 = vmatmul.mubr.msk.f32.gmra.mxu0 %vm148_vm0, %v132_v7  ;;  %3264 = vmatprep.subr.mxu0 %v523_v44 }
  0xd0   :  { %v3240_v8 = vpop.f32.mrf.mxu0 }
  0xd1   :  { %v3669_v13 = vadd.f32 %v3240_v8, %v2964_v9 }
  0xd2   :  { %v227_v10 = vpop.f32.mrf.mxu0 }
  0xd3   :  { %v3667_v11 = vadd.f32 %v2964_v9, %v227_v10  ;;  %v252_v19 = vsel %vm248_vm1, %v3669_v13, 0.0  ;;  %v428_v10 = vld [vmem:[%s3707_s21] sm:$0xff] }
  0xd4   :  { %v3243_v12 = vpop.f32.mrf.mxu0 }
  0xd5   :  { %v249_v14 = vsel %vm248_vm1, %v3667_v11, 0.0  ;;  %v3675_v17 = vadd.f32 %v3243_v12, %v2964_v9 }
  0xd6   :  { %v237_v15 = vpop.f32.mrf.mxu0  ;;  %250 = vadd.xlane.f32.xlu1 %v249_v14  ;;  %v522_v14 = vld [vmem:[%s3714_s25] sm:$0xff] }
  0xd7   :  { %v3673_v16 = vadd.f32 %v2964_v9, %v237_v15  ;;  %v258_v20 = vsel %vm248_vm1, %v3675_v17, 0.0 }
  0xd9   :  { %v255_v18 = vsel %vm248_vm1, %v3673_v16, 0.0 }
  0xda   :  { %256 = vadd.xlane.f32.xlu0 %v255_v18  ;;  %253 = vadd.xlane.f32.xlu1 %v252_v19 }
  0xde   :  { %259 = vadd.xlane.f32.xlu0 %v258_v20 }
 0x15f   :  { %v251_v21 = vpop.xlane.xlu1 %250 }
 0x160   :  { %v262_v22 = vmul.f32 0.0625, %v251_v21  ;;  %v2971_v21 = vld [vmem:[%s3763_s7] ss:$0 sm:$0xff] }
 0x162   :  { %v3684_v26 = vsub.f32 %v3667_v11, %v262_v22 }
 0x163   :  { %v257_v23 = vpop.xlane.xlu0 %256  ;;  %v254_v24 = vpop.xlane.xlu1 %253 }
 0x164   :  { %v264_v25 = vmul.f32 0.0625, %v257_v23  ;;  %v263_v28 = vmul.f32 0.0625, %v254_v24  ;;  %v270_v35 = vmul.f32 %v3684_v26, %v3684_v26 }
 0x166   :  { %v268_v27 = vsub.f32 %v3673_v16, %v264_v25  ;;  %v3688_v32 = vsub.f32 %v3669_v13, %v263_v28  ;;  %v274_v38 = vsel %vm248_vm1, %v270_v35, 0.0  ;;  %v2976_v25 = vld [vmem:[%s3768_s12] ss:$0 sm:$0xff] }
 0x167   :  { %v260_v29 = vpop.xlane.xlu0 %259 }
 0x168   :  { %v265_v30 = vmul.f32 0.0625, %v260_v29  ;;  %v272_v31 = vmul.f32 %v268_v27, %v268_v27  ;;  %v271_v39 = vmul.f32 %v3688_v32, %v3688_v32 }
 0x16a   :  { %v269_v33 = vsub.f32 %v3675_v17, %v265_v30  ;;  %v280_v34 = vsel %vm248_vm1, %v272_v31, 0.0  ;;  %v277_v40 = vsel %vm248_vm1, %v271_v39, 0.0 }
 0x16b   :  { %281 = vadd.xlane.f32.xlu0 %v280_v34 }
 0x16c   :  { %v273_v36 = vmul.f32 %v269_v33, %v269_v33 }
 0x16e   :  { %v283_v37 = vsel %vm248_vm1, %v273_v36, 0.0 }
 0x16f   :  { %284 = vadd.xlane.f32.xlu1 %v283_v37  ;;  %275 = vadd.xlane.f32.xlu0 %v274_v38 }
 0x173   :  { %278 = vadd.xlane.f32.xlu1 %v277_v40 }
 0x1f4   :  { %v282_v45 = vpop.xlane.xlu0 %281 }
 0x1f5   :  { %v288_v46 = vmul.f32 0.0625, %v282_v45 }
 0x1f7   :  { %v292_v47 = vadd.f32 1e-06, %v288_v46 }
 0x1f8   :  { %v276_v48 = vpop.xlane.xlu0 %275  ;;  %v285_v49 = vpop.xlane.xlu1 %284 }
 0x1f9   :  { %3516 = vrsqrt.f32 %v292_v47  ;;  %v286_v50 = vmul.f32 0.0625, %v276_v48  ;;  %v289_v51 = vmul.f32 0.0625, %v285_v49 }
 0x1fb   :  { %v290_v52 = vadd.f32 1e-06, %v286_v50  ;;  %v293_v53 = vadd.f32 1e-06, %v289_v51 }
 0x1fc   :  { %v279_v54 = vpop.xlane.xlu1 %278 }
 0x1fd   :  { %3518 = vrsqrt.f32 %v290_v52  ;;  %v287_v55 = vmul.f32 0.0625, %v279_v54 }
 0x1fe   :  { %3520 = vrsqrt.f32 %v293_v53 }
 0x1ff   :  { %v291_v56 = vadd.f32 1e-06, %v287_v55 }
 0x201   :  { %3522 = vrsqrt.f32 %v291_v56 }
 0x206   :  { %v3517_v57 = vpop.eup %3516 }
 0x207   :  { %v300_v59 = vmul.f32 %v3517_v57, %v268_v27 }
 0x209   :  { %v310_v61 = vmul.f32 %v2969_v58, %v300_v59 }
 0x20a   :  { %v3519_v62 = vpop.eup %3518 }
 0x20b   :  { %v3521_v63 = vpop.eup %3520  ;;  %v298_v0 = vmul.f32 %v3519_v62, %v3684_v26  ;;  %v3725_v1 = vadd.f32 %v2970_v60, %v310_v61 }
 0x20c   :  { %v301_v2 = vmul.f32 %v3521_v63, %v269_v33 }
 0x20d   :  { %v308_v3 = vmul.f32 %v2969_v58, %v298_v0  ;;  %3251 = vmatprep.mubr.msk.f32.mxu1 %vm248_vm1, %v3725_v1 }
 0x20e   :  { %v3523_v4 = vpop.eup %3522  ;;  %v311_v5 = vmul.f32 %v2969_v58, %v301_v2 }
 0x20f   :  { %v299_v6 = vmul.f32 %v3523_v4, %v3688_v32  ;;  %v3730_v7 = vadd.f32 %v2970_v60, %v308_v3  ;;  %v2981_v32 = vld [vmem:[%s3773_s16] ss:$0 sm:$0xff] }
 0x210   :  { %v3732_v8 = vadd.f32 %v2970_v60, %v311_v5  ;;  %v3009_v5 = vld [vmem:[%s3768_s12 + $0x1] ss:$0 sm:$0xff]  ;;  %s3624_s12 = smov 18  }
 0x211   :  { %v309_v9 = vmul.f32 %v2969_v58, %v299_v6  ;;  %3248 = vmatprep.mubr.msk.f32.mxu0 %vm248_vm1, %v3730_v7  ;;  %s2950_s15 = sld [smem:[%s4162_s0 + %s3624_s12]]  }
 0x212   :  { %3252 = vmatmul.mubr.msk.f32.vlgmr.msra.gmra.mxu1 %vm248_vm1, %v3732_v8  ;;  %s2963_s12 = sld [smem:[%s4162_s0 + %s3642_s8]]  }
 0x213   :  { %3255 = vmatpush3.msra.mxu1 %v429_v43  ;;  %3258 = vmatprep.mubr.msk.f32.mxu1 %vm248_vm1, %v3730_v7  ;;  %v3741_v12 = vadd.f32 %v2970_v60, %v309_v9 }
 0x214   :  { %3256 = vmatprep.subr.mxu1 %v428_v10 }
 0x215   :  { %3257 = vmatpush3.msra.mxu1 %v428_v10  ;;  %3249 = vmatmul.mubr.msk.f32.vlgmr.msra.gmra.mxu0 %vm248_vm1, %v3741_v12 }
 0x216   :  { %3259 = vmatmul.mubr.msk.f32.vlgmr.msra.gmra.mxu1 %vm248_vm1, %v3741_v12  ;;  %3265 = vmatpush3.msra.mxu0 %v523_v44  ;;  %v3006_v44 = vld [vmem:[%s3707_s21 + $0x10] sm:$0xff]  ;;  %s2933_s21 = sld [smem:[%s4162_s0 + %s3618_s18]]  }
 0x217   :  { %3261 = vmatprep.mubr.msk.f32.mxu1 %vm248_vm1, %v3725_v1  ;;  %3268 = vmatprep.mubr.msk.f32.mxu0 %vm248_vm1, %v3730_v7 }
 0x218   :  { %3266 = vmatprep.subr.mxu0 %v522_v14 }
 0x219   :  { %3267 = vmatpush3.msra.mxu0 %v522_v14 }
 0x21a   :  { %3262 = vmatmul.mubr.msk.f32.gmra.mxu1 %vm248_vm1, %v3732_v8  ;;  %3269 = vmatmul.mubr.msk.f32.vlgmr.msra.gmra.mxu0 %vm248_vm1, %v3741_v12 }
 0x21b   :  { %3271 = vmatprep.mubr.msk.f32.mxu0 %vm248_vm1, %v3725_v1 }
 0x21c   :  { %v3803_v47 = vld [vmem:[%s2933_s21 + $0x8] sm:$0xff]  ;;  %v3805_v50 = vld [vmem:[%s2933_s21] sm:$0xff]  ;;  %v3808_v54 = vld [vmem:[%s2933_s21 + $0x18] sm:$0xff] }
 0x21d   :  { %v3812_v59 = vld [vmem:[%s2933_s21 + $0x10] sm:$0xff]  ;;  %s3626_s21 = smov 19  }
 0x21e   :  { %3272 = vmatmul.mubr.msk.f32.gmra.mxu0 %vm248_vm1, %v3732_v8  ;;  %s2951_s23 = sld [smem:[%s4162_s0 + %s3626_s21]]  }
 0x2d2   :  { %v3253_v15 = vpop.f32.mrf.mxu1 }
 0x2d3   :  { %v425_v45 = vadd.f32 %v3253_v15, %v2971_v21 }
 0x2d4   :  { %v419_v18 = vpop.f32.mrf.mxu1 }
 0x2d5   :  { %v3250_v19 = vpop.f32.mrf.mxu0  ;;  %v420_v43 = vadd.f32 %v2971_v21, %v419_v18 }
 0x2d6   :  { %v3260_v20 = vpop.f32.mrf.mxu1  ;;  %v415_v42 = vadd.f32 %v3250_v19, %v2971_v21 }
 0x2d7   :  { %v409_v22 = vpop.f32.mrf.mxu0  ;;  %v509_v36 = vadd.f32 %v3260_v20, %v2976_v25 }
 0x2d8   :  { %v410_v23 = vadd.f32 %v2971_v21, %v409_v22  ;;  %v503_v24 = vpop.f32.mrf.mxu1 }
 0x2d9   :  { %v504_v39 = vadd.f32 %v2976_v25, %v503_v24 }
 0x2da   :  { %v3263_v26 = vpop.f32.mrf.mxu1  ;;  %v3270_v27 = vpop.f32.mrf.mxu0  ;;  %3282 = vmatprep.mubr.msk.f32.mxu1 %vm616_vm2, %v410_v23 }
 0x2db   :  { %v519_v28 = vadd.f32 %v3263_v26, %v2976_v25  ;;  %v603_v38 = vadd.f32 %v3270_v27, %v2981_v32 }
 0x2dc   :  { %v513_v29 = vpop.f32.mrf.mxu1  ;;  %v597_v30 = vpop.f32.mrf.mxu0 }
 0x2dd   :  { %v514_v31 = vadd.f32 %v2976_v25, %v513_v29  ;;  %3274 = vmatprep.subr.msk.mxu1 %vm616_vm2, %v519_v28  ;;  %v598_v40 = vadd.f32 %v2981_v32, %v597_v30 }
 0x2de   :  { %v3273_v33 = vpop.f32.mrf.mxu0  ;;  %3275 = vmatpush3.xpose.msk.msra.mxu1 %vm616_vm2, %v519_v28 }
 0x2df   :  { %v613_v34 = vadd.f32 %v3273_v33, %v2981_v32  ;;  %3276 = vmatprep.subr.msk.mxu1 %vm616_vm2, %v514_v31 }
 0x2e0   :  { %v607_v35 = vpop.f32.mrf.mxu0 }
 0x2e1   :  { %v608_v37 = vadd.f32 %v2981_v32, %v607_v35  ;;  %3288 = vmatprep.subr.mxu0 %v613_v34 }
 0x2e2   :  { %3277 = vmatpush3.xpose.msk.msra.mxu1 %vm616_vm2, %v514_v31  ;;  %3289 = vmatpush3.msra.mxu0 %v613_v34 }
 0x2e3   :  { %3278 = vmatprep.subr.msk.mxu1 %vm616_vm2, %v509_v36  ;;  %3290 = vmatprep.subr.mxu0 %v608_v37 }
 0x2e4   :  { %3291 = vmatpush3.msra.mxu0 %v608_v37 }
 0x2e5   :  { %3292 = vmatprep.subr.mxu0 %v603_v38 }
 0x2e6   :  { %3279 = vmatpush3.xpose.msk.msra.mxu1 %vm616_vm2, %v509_v36  ;;  %3293 = vmatpush3.msra.mxu0 %v603_v38 }
 0x2e7   :  { %3280 = vmatprep.subr.msk.mxu1 %vm616_vm2, %v504_v39  ;;  %3294 = vmatprep.subr.mxu0 %v598_v40 }
 0x2e8   :  { %3295 = vmatpush3.msra.mxu0 %v598_v40 }
 0x2ea   :  { %3281 = vmatpush3.xpose.msk.msra.mxu1 %vm616_vm2, %v504_v39  ;;  %v2999_v39 = vld [vmem:[%s3702_s17 + $0x18] sm:$0xff] }
 0x2eb   :  { %3312 = vmatprep.subr.mxu1 %v3007_v41  ;;  %3302 = vmatprep.subr.mxu0 %v2999_v39 }
 0x2ed   :  { %3283 = vmatmul.mubr.msk.f32.vlgmr.msra.gmra.mxu1 %vm616_vm2, %v415_v42 }
 0x2ee   :  { %3285 = vmatprep.mubr.msk.f32.mxu1 %vm616_vm2, %v420_v43  ;;  %3313 = vmatpush3.msra.mxu1 %v3007_v41 }
 0x2ef   :  { %3314 = vmatprep.subr.mxu1 %v3006_v44 }
 0x2f0   :  { %3315 = vmatpush3.msra.mxu1 %v3006_v44 }
 0x2f1   :  { %3286 = vmatmul.mubr.msk.f32.gmra.mxu1 %vm616_vm2, %v425_v45 }
 0x2f2   :  { %3316 = vmatprep.mubr.msk.f32.mxu1 %vm248_vm1, %v3730_v7 }
 0x2f5   :  { %3317 = vmatmul.mubr.msk.f32.vlgmr.msra.gmra.mxu1 %vm248_vm1, %v3741_v12 }
 0x2f6   :  { %3319 = vmatprep.mubr.msk.f32.mxu1 %vm248_vm1, %v3725_v1 }
 0x2f9   :  { %3320 = vmatmul.mubr.msk.f32.gmra.mxu1 %vm248_vm1, %v3732_v8 }
 0x3ad   :  { %v3284_v46 = vpop.f32.mrf.mxu1 }
 0x3ae   :  { %v727_v48 = vmul.f32 0.35355338, %v3284_v46 }
 0x3af   :  { %v707_v49 = vpop.f32.mrf.mxu1 }
 0x3b0   :  { %v726_v51 = vmul.f32 0.35355338, %v707_v49  ;;  %v731_v52 = vadd.f32 %v727_v48, %v3803_v47 }
 0x3b1   :  { %v3287_v53 = vpop.f32.mrf.mxu1 }
 0x3b2   :  { %v729_v55 = vmul.f32 0.35355338, %v3287_v53  ;;  %v737_v56 = vsel %vm148_vm0, %v731_v52, -inf  ;;  %v730_v57 = vadd.f32 %v726_v51, %v3805_v50  ;;  %v2998_v51 = vld [vmem:[%s3702_s17 + $0x10] sm:$0xff]  ;;  %s3619_s17 = smov 12  }
 0x3b3   :  { %738 = vmax.xlane.f32.xlu1 %v737_v56  ;;  %v717_v58 = vpop.f32.mrf.mxu1  ;;  %s3859_s24 = sld [smem:[%s4162_s0 + %s3619_s17]]  }
 0x3b4   :  { %v728_v60 = vmul.f32 0.35355338, %v717_v58  ;;  %v734_v61 = vsel %vm148_vm0, %v730_v57, -inf  ;;  %v733_v62 = vadd.f32 %v729_v55, %v3808_v54  ;;  %v3015_v55 = vld [vmem:[%s3714_s25 + $0x18] sm:$0xff] }
 0x3b5   :  { %735 = vmax.xlane.f32.xlu0 %v734_v61  ;;  %v3318_v63 = vpop.f32.mrf.mxu1 }
 0x3b6   :  { %v743_v0 = vsel %vm148_vm0, %v733_v62, -inf  ;;  %v732_v2 = vadd.f32 %v728_v60, %v3812_v59  ;;  %v1055_v15 = vadd.f32 %v3318_v63, %v3009_v5  ;;  %v3001_v63 = vld [vmem:[%s3763_s7 + $0x1] ss:$0 sm:$0xff]  ;;  %s3623_s7 = smov 15  }
 0x3b7   :  { %744 = vmax.xlane.f32.xlu1 %v743_v0  ;;  %v1049_v3 = vpop.f32.mrf.mxu1  ;;  %s2947_s11 = sld [smem:[%s4162_s0 + %s3623_s7]]  }
 0x3b8   :  { %v740_v4 = vsel %vm148_vm0, %v732_v2, -inf  ;;  %v1050_v18 = vadd.f32 %v3009_v5, %v1049_v3  ;;  %s2962_s7 = sld [smem:[%s4162_s0 + %s3641_s4]]  }
 0x3b9   :  { %v3321_v6 = vpop.f32.mrf.mxu1  ;;  %741 = vmax.xlane.f32.xlu0 %v740_v4  ;;  %v875_v58 = vld [vmem:[%s3859_s24] sm:$0xff] }
 0x3ba   :  { %v1065_v9 = vadd.f32 %v3321_v6, %v3009_v5 }
 0x3bb   :  { %v1059_v10 = vpop.f32.mrf.mxu1 }
 0x3bc   :  { %v1060_v14 = vadd.f32 %v3009_v5, %v1059_v10  ;;  %3332 = vmatprep.subr.msk.mxu1 %vm616_vm2, %v1065_v9  ;;  %v3017_v10 = vld [vmem:[%s3773_s16 + $0x1] ss:$0 sm:$0xff]  ;;  %s3625_s16 = smov 17  }
 0x3bd   :  { %3333 = vmatpush3.xpose.msk.msra.mxu1 %vm616_vm2, %v1065_v9  ;;  %s2949_s20 = sld [smem:[%s4162_s0 + %s3625_s16]]  }
 0x3be   :  { %3334 = vmatprep.subr.msk.mxu1 %vm616_vm2, %v1060_v14 }
 0x3c1   :  { %3335 = vmatpush3.xpose.msk.msra.mxu1 %vm616_vm2, %v1060_v14 }
 0x3c2   :  { %3336 = vmatprep.subr.msk.mxu1 %vm616_vm2, %v1055_v15 }
 0x3c5   :  { %3337 = vmatpush3.xpose.msk.msra.mxu1 %vm616_vm2, %v1055_v15 }
 0x3c6   :  { %3338 = vmatprep.subr.msk.mxu1 %vm616_vm2, %v1050_v18 }
 0x3c9   :  { %3339 = vmatpush3.xpose.msk.msra.mxu1 %vm616_vm2, %v1050_v18 }
 0x3ca   :  { %3368 = vmatprep.subr.mxu1 %v875_v58 }
 0x43c   :  { %v739_v19 = vpop.xlane.xlu1 %738 }
 0x43d   :  { %v747_v20 = vsub.f32 %v731_v52, %v739_v19 }
 0x43e   :  { %v736_v21 = vpop.xlane.xlu0 %735 }
 0x43f   :  { %v752_v22 = vmul.f32 1.442695, %v747_v20  ;;  %v746_v23 = vsub.f32 %v730_v57, %v736_v21  ;;  %v3014_v57 = vld [vmem:[%s3714_s25 + $0x10] sm:$0xff]  ;;  %s3620_s25 = smov 13  }
 0x440   :  { %v745_v24 = vpop.xlane.xlu1 %744  ;;  %s2945_s28 = sld [smem:[%s4162_s0 + %s3620_s25]]  }
 0x441   :  { %3524 = vpow2.f32 %v752_v22  ;;  %v750_v25 = vmul.f32 1.442695, %v746_v23  ;;  %v749_v26 = vsub.f32 %v733_v62, %v745_v24  ;;  %s2958_s25 = sld [smem:[%s4162_s0 + %s3638_s22]]  }
 0x442   :  { %v742_v27 = vpop.xlane.xlu0 %741 }
 0x443   :  { %3526 = vpow2.f32 %v750_v25  ;;  %v756_v28 = vmul.f32 1.442695, %v749_v26  ;;  %v748_v29 = vsub.f32 %v732_v2, %v742_v27 }
 0x445   :  { %3528 = vpow2.f32 %v756_v28  ;;  %v754_v30 = vmul.f32 1.442695, %v748_v29 }
 0x447   :  { %3530 = vpow2.f32 %v754_v30 }
 0x44e   :  { %v3525_v31 = vpop.eup %3524 }
 0x44f   :  { %v761_v32 = vsel %vm148_vm0, %v3525_v31, 0.0 }
 0x450   :  { %v3527_v33 = vpop.eup %3526  ;;  %762 = vadd.xlane.f32.xlu1 %v761_v32 }
 0x451   :  { %v758_v34 = vsel %vm148_vm0, %v3527_v33, 0.0 }
 0x452   :  { %v3529_v35 = vpop.eup %3528  ;;  %759 = vadd.xlane.f32.xlu0 %v758_v34 }
 0x453   :  { %v767_v36 = vsel %vm148_vm0, %v3529_v35, 0.0 }
 0x454   :  { %v3531_v37 = vpop.eup %3530  ;;  %768 = vadd.xlane.f32.xlu1 %v767_v36 }
 0x455   :  { %v764_v38 = vsel %vm148_vm0, %v3531_v37, 0.0 }
 0x456   :  { %765 = vadd.xlane.f32.xlu0 %v764_v38 }
 0x4d9   :  { %v763_v40 = vpop.xlane.xlu1 %762 }
 0x4da   :  { %3532 = vrcp.f32 %v763_v40 }
 0x4db   :  { %v760_v41 = vpop.xlane.xlu0 %759 }
 0x4dc   :  { %3534 = vrcp.f32 %v760_v41 }
 0x4dd   :  { %v769_v42 = vpop.xlane.xlu1 %768 }
 0x4de   :  { %3536 = vrcp.f32 %v769_v42 }
 0x4df   :  { %v766_v43 = vpop.xlane.xlu0 %765 }
 0x4e0   :  { %3538 = vrcp.f32 %v766_v43 }
 0x4e7   :  { %v3533_v44 = vpop.eup %3532 }
 0x4e8   :  { %v775_v48 = vmul.f32 %v3533_v44, %v3525_v31 }
 0x4e9   :  { %v3535_v45 = vpop.eup %3534 }
 0x4ea   :  { %v774_v46 = vmul.f32 %v3535_v45, %v3527_v33 }
 0x4eb   :  { %v3537_v49 = vpop.eup %3536 }
 0x4ec   :  { %3296 = vmatprep.mubr.msk.f32.mxu0 %vm148_vm0, %v774_v46  ;;  %v777_v56 = vmul.f32 %v3537_v49, %v3529_v35 }
 0x4ed   :  { %v3539_v52 = vpop.eup %3538  ;;  %3297 = vmatmul.mubr.msk.f32.vlgmr.msra.gmra.mxu0 %vm148_vm0, %v775_v48 }
 0x4ee   :  { %3303 = vmatpush3.msra.mxu0 %v2999_v39  ;;  %v776_v53 = vmul.f32 %v3539_v52, %v3531_v37 }
 0x4ef   :  { %3304 = vmatprep.subr.mxu0 %v2998_v51 }
 0x4f0   :  { %3299 = vmatprep.mubr.msk.f32.mxu0 %vm148_vm0, %v776_v53  ;;  %3305 = vmatpush3.msra.mxu0 %v2998_v51 }
 0x4f1   :  { %3300 = vmatmul.mubr.msk.f32.gmra.mxu0 %vm148_vm0, %v777_v56  ;;  %3322 = vmatprep.subr.mxu0 %v3015_v55 }
 0x4f2   :  { %3306 = vmatprep.mubr.msk.f32.mxu0 %vm248_vm1, %v3730_v7 }
 0x4f5   :  { %3307 = vmatmul.mubr.msk.f32.vlgmr.msra.gmra.mxu0 %vm248_vm1, %v3741_v12 }
 0x4f6   :  { %3309 = vmatprep.mubr.msk.f32.mxu0 %vm248_vm1, %v3725_v1  ;;  %3323 = vmatpush3.msra.mxu0 %v3015_v55 }
 0x4f7   :  { %3324 = vmatprep.subr.mxu0 %v3014_v57 }
 0x4f8   :  { %3325 = vmatpush3.msra.mxu0 %v3014_v57  ;;  %v3034_v57 = vld [vmem:[%s3859_s24 + $0x8] sm:$0xff]  ;;  %s3627_s24 = smov 22  }
 0x4f9   :  { %3310 = vmatmul.mubr.msk.f32.gmra.mxu0 %vm248_vm1, %v3732_v8  ;;  %s2954_s27 = sld [smem:[%s4162_s0 + %s3627_s24]]  }
 0x4fa   :  { %3326 = vmatprep.mubr.msk.f32.mxu0 %vm248_vm1, %v3730_v7 }
 0x4fd   :  { %3327 = vmatmul.mubr.msk.f32.vlgmr.msra.gmra.mxu0 %vm248_vm1, %v3741_v12 }
 0x4fe   :  { %3329 = vmatprep.mubr.msk.f32.mxu0 %vm248_vm1, %v3725_v1 }
 0x501   :  { %3330 = vmatmul.mubr.msk.f32.gmra.mxu0 %vm248_vm1, %v3732_v8 }
 0x5ad   :  { %v3298_v60 = vpop.f32.mrf.mxu0 }
 0x5af   :  { %v856_v7 = vpop.f32.mrf.mxu0 }
 0x5b1   :  { %v3301_v61 = vpop.f32.mrf.mxu0 }
 0x5b3   :  { %v866_v62 = vpop.f32.mrf.mxu0 }
 0x5b5   :  { %v3308_v12 = vpop.f32.mrf.mxu0 }
 0x5b6   :  { %v959_v2 = vadd.f32 %v3308_v12, %v3001_v63 }
 0x5b7   :  { %v953_v1 = vpop.f32.mrf.mxu0 }
 0x5b8   :  { %v954_v0 = vadd.f32 %v3001_v63, %v953_v1 }
 0x5b9   :  { %v3311_v8 = vpop.f32.mrf.mxu0 }
 0x5ba   :  { %3340 = vmatprep.mubr.msk.f32.mxu1 %vm616_vm2, %v954_v0  ;;  %v969_v5 = vadd.f32 %v3311_v8, %v3001_v63 }
 0x5bb   :  { %v963_v3 = vpop.f32.mrf.mxu0  ;;  %3341 = vmatmul.mubr.msk.f32.vlgmr.msra.gmra.mxu1 %vm616_vm2, %v959_v2 }
 0x5bc   :  { %v964_v4 = vadd.f32 %v3001_v63, %v963_v3  ;;  %3369 = vmatpush3.msra.mxu1 %v875_v58 }
 0x5bd   :  { %v3328_v6 = vpop.f32.mrf.mxu0 }
 0x5be   :  { %3343 = vmatprep.mubr.msk.f32.mxu1 %vm616_vm2, %v964_v4  ;;  %v1151_v20 = vadd.f32 %v3328_v6, %v3017_v10 }
 0x5bf   :  { %v1145_v9 = vpop.f32.mrf.mxu0  ;;  %3344 = vmatmul.mubr.msk.f32.gmra.mxu1 %vm616_vm2, %v969_v5 }
 0x5c0   :  { %3370 = vmatprep.mubr.msk.f32.mxu1 %vm616_vm2, %v856_v7  ;;  %v1146_v21 = vadd.f32 %v3017_v10, %v1145_v9 }
 0x5c1   :  { %v3331_v14 = vpop.f32.mrf.mxu0 }
 0x5c2   :  { %v1161_v15 = vadd.f32 %v3331_v14, %v3017_v10 }
 0x5c3   :  { %v1155_v18 = vpop.f32.mrf.mxu0  ;;  %3371 = vmatmul.mubr.msk.f32.vlgmr.msra.gmra.mxu1 %vm616_vm2, %v3298_v60 }
 0x5c4   :  { %v1156_v19 = vadd.f32 %v3017_v10, %v1155_v18  ;;  %3346 = vmatprep.subr.mxu0 %v1161_v15  ;;  %3373 = vmatprep.mubr.msk.f32.mxu1 %vm616_vm2, %v866_v62 }
 0x5c5   :  { %3347 = vmatpush3.msra.mxu0 %v1161_v15 }
 0x5c6   :  { %3348 = vmatprep.subr.mxu0 %v1156_v19 }
 0x5c7   :  { %3349 = vmatpush3.msra.mxu0 %v1156_v19  ;;  %3374 = vmatmul.mubr.msk.f32.gmra.mxu1 %vm616_vm2, %v3301_v61 }
 0x5c8   :  { %3350 = vmatprep.subr.mxu0 %v1151_v20 }
 0x5c9   :  { %3351 = vmatpush3.msra.mxu0 %v1151_v20  ;;  %v3043_v20 = vld [vmem:[%s2945_s28] ss:$0 sm:$0xff]  ;;  %s3628_s28 = smov 24  }
 0x5ca   :  { %3352 = vmatprep.subr.mxu0 %v1146_v21  ;;  %s3964_s1 = sld [smem:[%s4162_s0 + %s3628_s28]]  }
 0x5cb   :  { %3353 = vmatpush3.msra.mxu0 %v1146_v21 }
 0x5cc   :  { %3360 = vmatprep.subr.mxu0 %v3034_v57 }
 0x67b   :  { %v3342_v22 = vpop.f32.mrf.mxu1 }
 0x67c   :  { %v1274_v23 = vmul.f32 0.35355338, %v3342_v22 }
 0x67d   :  { %v1254_v24 = vpop.f32.mrf.mxu1 }
 0x67e   :  { %v1273_v25 = vmul.f32 0.35355338, %v1254_v24  ;;  %v1278_v26 = vadd.f32 %v1274_v23, %v3803_v47 }
 0x67f   :  { %v3345_v27 = vpop.f32.mrf.mxu1 }
 0x680   :  { %v1276_v28 = vmul.f32 0.35355338, %v3345_v27  ;;  %v1284_v29 = vsel %vm148_vm0, %v1278_v26, -inf  ;;  %v1277_v30 = vadd.f32 %v1273_v25, %v3805_v50 }
 0x681   :  { %1285 = vmax.xlane.f32.xlu1 %v1284_v29  ;;  %v1264_v31 = vpop.f32.mrf.mxu1 }
 0x682   :  { %v1275_v32 = vmul.f32 0.35355338, %v1264_v31  ;;  %v1281_v33 = vsel %vm148_vm0, %v1277_v30, -inf  ;;  %v1280_v34 = vadd.f32 %v1276_v28, %v3808_v54 }
 0x683   :  { %1282 = vmax.xlane.f32.xlu0 %v1281_v33  ;;  %v3372_v10 = vpop.f32.mrf.mxu1 }
 0x684   :  { %v1290_v35 = vsel %vm148_vm0, %v1280_v34, -inf  ;;  %v1279_v36 = vadd.f32 %v1275_v32, %v3812_v59 }
 0x685   :  { %1291 = vmax.xlane.f32.xlu1 %v1290_v35  ;;  %v1599_v14 = vpop.f32.mrf.mxu1 }
 0x686   :  { %v1287_v47 = vsel %vm148_vm0, %v1279_v36, -inf }
 0x687   :  { %1288 = vmax.xlane.f32.xlu0 %v1287_v47  ;;  %v3375_v19 = vpop.f32.mrf.mxu1 }
 0x689   :  { %v1609_v28 = vpop.f32.mrf.mxu1 }
 0x70a   :  { %v1286_v37 = vpop.xlane.xlu1 %1285 }
 0x70b   :  { %v1294_v38 = vsub.f32 %v1278_v26, %v1286_v37 }
 0x70c   :  { %v1283_v39 = vpop.xlane.xlu0 %1282 }
 0x70d   :  { %v1299_v50 = vmul.f32 1.442695, %v1294_v38  ;;  %v1293_v40 = vsub.f32 %v1277_v30, %v1283_v39 }
 0x70e   :  { %v1292_v41 = vpop.xlane.xlu1 %1291 }
 0x70f   :  { %3540 = vpow2.f32 %v1299_v50  ;;  %v1297_v42 = vmul.f32 1.442695, %v1293_v40  ;;  %v1296_v43 = vsub.f32 %v1280_v34, %v1292_v41 }
 0x710   :  { %v1289_v44 = vpop.xlane.xlu0 %1288 }
 0x711   :  { %3542 = vpow2.f32 %v1297_v42  ;;  %v1303_v54 = vmul.f32 1.442695, %v1296_v43  ;;  %v1295_v45 = vsub.f32 %v1279_v36, %v1289_v44 }
 0x713   :  { %3544 = vpow2.f32 %v1303_v54  ;;  %v1301_v59 = vmul.f32 1.442695, %v1295_v45 }
 0x715   :  { %3546 = vpow2.f32 %v1301_v59 }
 0x71c   :  { %v3541_v46 = vpop.eup %3540 }
 0x71d   :  { %v1308_v48 = vsel %vm148_vm0, %v3541_v46, 0.0 }
 0x71e   :  { %v3543_v49 = vpop.eup %3542  ;;  %1309 = vadd.xlane.f32.xlu1 %v1308_v48 }
 0x71f   :  { %v1305_v51 = vsel %vm148_vm0, %v3543_v49, 0.0 }
 0x720   :  { %v3545_v52 = vpop.eup %3544  ;;  %1306 = vadd.xlane.f32.xlu0 %v1305_v51 }
 0x721   :  { %v1314_v53 = vsel %vm148_vm0, %v3545_v52, 0.0 }
 0x722   :  { %v3547_v55 = vpop.eup %3546  ;;  %1315 = vadd.xlane.f32.xlu1 %v1314_v53 }
 0x723   :  { %v1311_v56 = vsel %vm148_vm0, %v3547_v55, 0.0 }
 0x724   :  { %1312 = vadd.xlane.f32.xlu0 %v1311_v56  ;;  %v1707_v56 = vld [vmem:[%s2948_s2] sm:$0xff] }
 0x7a7   :  { %v1310_v58 = vpop.xlane.xlu1 %1309 }
 0x7a8   :  { %3548 = vrcp.f32 %v1310_v58 }
 0x7a9   :  { %v1307_v60 = vpop.xlane.xlu0 %1306 }
 0x7aa   :  { %3550 = vrcp.f32 %v1307_v60 }
 0x7ab   :  { %v1316_v7 = vpop.xlane.xlu1 %1315 }
 0x7ac   :  { %3552 = vrcp.f32 %v1316_v7 }
 0x7ad   :  { %v1313_v61 = vpop.xlane.xlu0 %1312 }
 0x7ae   :  { %3554 = vrcp.f32 %v1313_v61 }
 0x7b5   :  { %v3549_v62 = vpop.eup %3548 }
 0x7b6   :  { %v1322_v1 = vmul.f32 %v3549_v62, %v3541_v46 }
 0x7b7   :  { %v3551_v12 = vpop.eup %3550 }
 0x7b8   :  { %v1321_v63 = vmul.f32 %v3551_v12, %v3543_v49 }
 0x7b9   :  { %v3553_v0 = vpop.eup %3552 }
 0x7ba   :  { %3354 = vmatprep.mubr.msk.f32.mxu0 %vm148_vm0, %v1321_v63  ;;  %v1324_v3 = vmul.f32 %v3553_v0, %v3545_v52 }
 0x7bb   :  { %v3555_v2 = vpop.eup %3554  ;;  %3355 = vmatmul.mubr.msk.f32.vlgmr.msra.gmra.mxu0 %vm148_vm0, %v1322_v1 }
 0x7bc   :  { %v1323_v8 = vmul.f32 %v3555_v2, %v3547_v55  ;;  %3361 = vmatpush3.msra.mxu0 %v3034_v57  ;;  %v1708_v55 = vld [vmem:[%s2948_s2 + $0x8] sm:$0xff]  ;;  %s3629_s2 = smov 23  }
 0x7bd   :  { %3376 = vmatprep.subr.mxu0 %v1708_v55  ;;  %s2955_s5 = sld [smem:[%s4162_s0 + %s3629_s2]]  }
 0x7be   :  { %3357 = vmatprep.mubr.msk.f32.mxu0 %vm148_vm0, %v1323_v8 }
 0x7bf   :  { %3358 = vmatmul.mubr.msk.f32.gmra.mxu0 %vm148_vm0, %v1324_v3 }
 0x87b   :  { %v3356_v4 = vpop.f32.mrf.mxu0 }
 0x87d   :  { %v1403_v5 = vpop.f32.mrf.mxu0 }
 0x87e   :  { %3362 = vmatprep.mubr.msk.f32.mxu0 %vm616_vm2, %v1403_v5  ;;  %v3044_v5 = vld [vmem:[%s2946_s6] ss:$0 sm:$0xff]  ;;  %s3630_s6 = smov 20  }
 0x87f   :  { %v3359_v6 = vpop.f32.mrf.mxu0  ;;  %3363 = vmatmul.mubr.msk.f32.vlgmr.msra.gmra.mxu0 %vm616_vm2, %v3356_v4  ;;  %s2952_s10 = sld [smem:[%s4162_s0 + %s3630_s6]]  }
 0x880   :  { %3377 = vmatpush3.msra.mxu0 %v1708_v55 }
 0x881   :  { %v1413_v9 = vpop.f32.mrf.mxu0  ;;  %3378 = vmatprep.subr.mxu0 %v1707_v56 }
 0x882   :  { %3365 = vmatprep.mubr.msk.f32.mxu0 %vm616_vm2, %v1413_v9  ;;  %3379 = vmatpush3.msra.mxu0 %v1707_v56 }
 0x883   :  { %3366 = vmatmul.mubr.msk.f32.gmra.mxu0 %vm616_vm2, %v3359_v6 }
 0x93f   :  { %v3364_v15 = vpop.f32.mrf.mxu0 }
 0x940   :  { %v1605_v18 = vadd.f32 %v3372_v10, %v3364_v15  ;;  %v3045_v15 = vld [vmem:[%s2947_s11] ss:$0 sm:$0xff]  ;;  %s3631_s11 = smov 21  }
 0x941   :  { %v1502_v21 = vpop.f32.mrf.mxu0  ;;  %s2953_s14 = sld [smem:[%s4162_s0 + %s3631_s11]]  }
 0x942   :  { %v1619_v22 = vadd.f32 %v1605_v18, %v3669_v13  ;;  %v1600_v23 = vadd.f32 %v1599_v14, %v1502_v21 }
 0x943   :  { %v3367_v24 = vpop.f32.mrf.mxu0 }
 0x944   :  { %v3897_v25 = vadd.f32 %v3043_v20, %v1619_v22  ;;  %v1618_v26 = vadd.f32 %v1600_v23, %v3667_v11  ;;  %v1615_v27 = vadd.f32 %v3375_v19, %v3367_v24 }
 0x945   :  { %v1512_v29 = vpop.f32.mrf.mxu0 }
 0x946   :  { %v3900_v30 = vadd.f32 %v3043_v20, %v1618_v26  ;;  %v1621_v31 = vadd.f32 %v1615_v27, %v3675_v17  ;;  %v1610_v32 = vadd.f32 %v1609_v28, %v1512_v29  ;;  %v1638_v33 = vsel %vm248_vm1, %v3897_v25, 0.0  ;;  %v1856_v29 = vld [vmem:[%s2950_s15 + $0x38] sm:$0xff] }
 0x947   :  { %1639 = vadd.xlane.f32.xlu1 %v1638_v33  ;;  %3386 = vmatprep.subr.mxu1 %v1856_v29  ;;  %v1853_v33 = vld [vmem:[%s2950_s15 + $0x20] sm:$0xff] }
 0x948   :  { %v3905_v34 = vadd.f32 %v3043_v20, %v1621_v31  ;;  %v1620_v13 = vadd.f32 %v1610_v32, %v3673_v16  ;;  %v1635_v35 = vsel %vm248_vm1, %v3900_v30, 0.0  ;;  %3387 = vmatpush3.msra.mxu1 %v1856_v29  ;;  %v1855_v31 = vld [vmem:[%s2950_s15 + $0x30] sm:$0xff]  ;;  %v1854_v32 = vld [vmem:[%s2950_s15 + $0x28] sm:$0xff] }
 0x949   :  { %1636 = vadd.xlane.f32.xlu0 %v1635_v35  ;;  %3388 = vmatprep.subr.mxu1 %v1855_v31  ;;  %v1851_v35 = vld [vmem:[%s2950_s15 + $0x10] sm:$0xff] }
 0x94a   :  { %v3910_v11 = vadd.f32 %v3043_v20, %v1620_v13  ;;  %v1644_v36 = vsel %vm248_vm1, %v3905_v34, 0.0  ;;  %3389 = vmatpush3.msra.mxu1 %v1855_v31  ;;  %v1852_v13 = vld [vmem:[%s2950_s15 + $0x18] sm:$0xff] }
 0x94b   :  { %1645 = vadd.xlane.f32.xlu1 %v1644_v36  ;;  %3390 = vmatprep.subr.mxu1 %v1854_v32  ;;  %v1850_v36 = vld [vmem:[%s2950_s15 + $0x8] sm:$0xff] }
 0x94c   :  { %v1641_v17 = vsel %vm248_vm1, %v3910_v11, 0.0  ;;  %3391 = vmatpush3.msra.mxu1 %v1854_v32 }
 0x94d   :  { %1642 = vadd.xlane.f32.xlu0 %v1641_v17  ;;  %3392 = vmatprep.subr.mxu1 %v1853_v33  ;;  %v1849_v17 = vld [vmem:[%s2950_s15] sm:$0xff]  ;;  %s3633_s15 = smov 25  }
 0x94e   :  { %3393 = vmatpush3.msra.mxu1 %v1853_v33  ;;  %s2957_s19 = sld [smem:[%s4162_s0 + %s3633_s15]]  }
 0x94f   :  { %3394 = vmatprep.subr.mxu1 %v1852_v13 }
 0x950   :  { %3395 = vmatpush3.msra.mxu1 %v1852_v13 }
 0x951   :  { %3396 = vmatprep.subr.mxu1 %v1851_v35 }
 0x952   :  { %3397 = vmatpush3.msra.mxu1 %v1851_v35 }
 0x953   :  { %3398 = vmatprep.subr.mxu1 %v1850_v36 }
 0x954   :  { %3399 = vmatpush3.msra.mxu1 %v1850_v36 }
 0x955   :  { %3400 = vmatprep.subr.mxu1 %v1849_v17 }
 0x956   :  { %3401 = vmatpush3.msra.mxu1 %v1849_v17 }
 0x9d0   :  { %v1640_v47 = vpop.xlane.xlu1 %1639 }
 0x9d1   :  { %v1648_v37 = vmul.f32 0.0625, %v1640_v47  ;;  %v3046_v47 = vld [vmem:[%s2949_s20] ss:$0 sm:$0xff] }
 0x9d2   :  { %v1637_v38 = vpop.xlane.xlu0 %1636 }
 0x9d3   :  { %v1652_v39 = vsub.f32 %v3897_v25, %v1648_v37  ;;  %v1647_v16 = vmul.f32 0.0625, %v1637_v38 }
 0x9d4   :  { %v1646_v50 = vpop.xlane.xlu1 %1645 }
 0x9d5   :  { %v1651_v40 = vsub.f32 %v3900_v30, %v1647_v16  ;;  %v1650_v41 = vmul.f32 0.0625, %v1646_v50  ;;  %v1656_v42 = vmul.f32 %v1652_v39, %v1652_v39 }
 0x9d6   :  { %v1643_v43 = vpop.xlane.xlu0 %1642 }
 0x9d7   :  { %v1654_v44 = vsub.f32 %v3905_v34, %v1650_v41  ;;  %v1649_v54 = vmul.f32 0.0625, %v1643_v43  ;;  %v1662_v45 = vsel %vm248_vm1, %v1656_v42, 0.0  ;;  %v1655_v59 = vmul.f32 %v1651_v40, %v1651_v40 }
 0x9d8   :  { %1663 = vadd.xlane.f32.xlu1 %v1662_v45 }
 0x9d9   :  { %v1653_v46 = vsub.f32 %v3910_v11, %v1649_v54  ;;  %v1659_v48 = vsel %vm248_vm1, %v1655_v59, 0.0  ;;  %v1658_v49 = vmul.f32 %v1654_v44, %v1654_v44 }
 0x9da   :  { %1660 = vadd.xlane.f32.xlu0 %v1659_v48 }
 0x9db   :  { %v1668_v51 = vsel %vm248_vm1, %v1658_v49, 0.0  ;;  %v1657_v52 = vmul.f32 %v1653_v46, %v1653_v46 }
 0x9dc   :  { %1669 = vadd.xlane.f32.xlu1 %v1668_v51 }
 0x9dd   :  { %v1665_v53 = vsel %vm248_vm1, %v1657_v52, 0.0 }
 0x9de   :  { %1666 = vadd.xlane.f32.xlu0 %v1665_v53 }
 0xa61   :  { %v1664_v57 = vpop.xlane.xlu1 %1663 }
 0xa62   :  { %v1672_v58 = vmul.f32 0.0625, %v1664_v57 }
 0xa63   :  { %v1661_v60 = vpop.xlane.xlu0 %1660 }
 0xa64   :  { %v1676_v7 = vadd.f32 1e-06, %v1672_v58  ;;  %v1671_v61 = vmul.f32 0.0625, %v1661_v60 }
 0xa65   :  { %v1670_v62 = vpop.xlane.xlu1 %1669 }
 0xa66   :  { %3556 = vrsqrt.f32 %v1676_v7  ;;  %v1675_v12 = vadd.f32 1e-06, %v1671_v61  ;;  %v1674_v63 = vmul.f32 0.0625, %v1670_v62 }
 0xa67   :  { %v1667_v1 = vpop.xlane.xlu0 %1666 }
 0xa68   :  { %3558 = vrsqrt.f32 %v1675_v12  ;;  %v1678_v0 = vadd.f32 1e-06, %v1674_v63  ;;  %v1673_v2 = vmul.f32 0.0625, %v1667_v1 }
 0xa6a   :  { %3560 = vrsqrt.f32 %v1678_v0  ;;  %v1677_v8 = vadd.f32 1e-06, %v1673_v2 }
 0xa6c   :  { %3562 = vrsqrt.f32 %v1677_v8 }
 0xa73   :  { %v3557_v3 = vpop.eup %3556 }
 0xa74   :  { %v1684_v4 = vmul.f32 %v3557_v3, %v1652_v39 }
 0xa75   :  { %v3559_v6 = vpop.eup %3558 }
 0xa76   :  { %v1683_v9 = vmul.f32 %v3559_v6, %v1651_v40  ;;  %v1694_v14 = vmul.f32 %v3044_v5, %v1684_v4 }
 0xa77   :  { %v3561_v10 = vpop.eup %3560 }
 0xa78   :  { %v1693_v18 = vmul.f32 %v3044_v5, %v1683_v9  ;;  %v1686_v19 = vmul.f32 %v3561_v10, %v1654_v44  ;;  %v1704_v23 = vadd.f32 %v3045_v15, %v1694_v14 }
 0xa79   :  { %v3563_v20 = vpop.eup %3562 }
 0xa7a   :  { %v1703_v21 = vadd.f32 %v3045_v15, %v1693_v18  ;;  %v1685_v22 = vmul.f32 %v3563_v20, %v1653_v46  ;;  %v1696_v24 = vmul.f32 %v3044_v5, %v1686_v19 }
 0xa7c   :  { %3380 = vmatprep.mubr.msk.f32.mxu0 %vm248_vm1, %v1703_v21  ;;  %v1695_v26 = vmul.f32 %v3044_v5, %v1685_v22  ;;  %v1706_v28 = vadd.f32 %v3045_v15, %v1696_v24  ;;  %v3051_v21 = vld [vmem:[%s2951_s23] ss:$0 sm:$0xff] }
 0xa7d   :  { %3381 = vmatmul.mubr.msk.f32.vlgmr.msra.gmra.mxu0 %vm248_vm1, %v1704_v23 }
 0xa7e   :  { %v1705_v27 = vadd.f32 %v3045_v15, %v1695_v26 }
 0xa80   :  { %3383 = vmatprep.mubr.msk.f32.mxu0 %vm248_vm1, %v1705_v27 }
 0xa81   :  { %3384 = vmatmul.mubr.msk.f32.gmra.mxu0 %vm248_vm1, %v1706_v28 }
 0xb3d   :  { %v3382_v37 = vpop.f32.mrf.mxu0 }
 0xb3e   :  { %v1800_v38 = vadd.f32 %v3382_v37, %v3046_v47 }
 0xb3f   :  { %v1794_v39 = vpop.f32.mrf.mxu0 }
 0xb40   :  { %v1818_v16 = vmul.f32 0.044715, %v1800_v38  ;;  %v1795_v50 = vadd.f32 %v3046_v47, %v1794_v39  ;;  %v1814_v4 = vmul.f32 0.5, %v1800_v38 }
 0xb41   :  { %v3385_v40 = vpop.f32.mrf.mxu0 }
 0xb42   :  { %v1822_v41 = vmul.f32 %v1818_v16, %v1800_v38  ;;  %v1817_v42 = vmul.f32 0.044715, %v1795_v50  ;;  %v1810_v43 = vadd.f32 %v3385_v40, %v3046_v47  ;;  %v1813_v2 = vmul.f32 0.5, %v1795_v50 }
 0xb43   :  { %v1804_v44 = vpop.f32.mrf.mxu0 }
 0xb44   :  { %v1826_v54 = vmul.f32 %v1822_v41, %v1800_v38  ;;  %v1821_v45 = vmul.f32 %v1817_v42, %v1795_v50  ;;  %v1820_v59 = vmul.f32 0.044715, %v1810_v43  ;;  %v1805_v46 = vadd.f32 %v3046_v47, %v1804_v44 }
 0xb45   :  { %v1816_v18 = vmul.f32 0.5, %v1810_v43 }
 0xb46   :  { %v1830_v48 = vadd.f32 %v1826_v54, %v1800_v38  ;;  %v1825_v49 = vmul.f32 %v1821_v45, %v1795_v50  ;;  %v1824_v51 = vmul.f32 %v1820_v59, %v1810_v43  ;;  %v1819_v52 = vmul.f32 0.044715, %v1805_v46 }
 0xb47   :  { %v1815_v14 = vmul.f32 0.5, %v1805_v46 }
 0xb48   :  { %v1834_v53 = vmul.f32 0.7978846, %v1830_v48  ;;  %v1829_v55 = vadd.f32 %v1825_v49, %v1795_v50  ;;  %v1828_v56 = vmul.f32 %v1824_v51, %v1810_v43  ;;  %v1823_v57 = vmul.f32 %v1819_v52, %v1805_v46  ;;  %v2041_v52 = vld [vmem:[%s2954_s27 + $0x8] sm:$0xff] }
 0xb49   :  { %3408 = vmatprep.subr.mxu0 %v2041_v52 }
 0xb4a   :  { %3564 = vtanh.f32 %v1834_v53  ;;  %v1832_v58 = vadd.f32 %v1828_v56, %v1810_v43  ;;  %v1827_v60 = vmul.f32 %v1823_v57, %v1805_v46  ;;  %v1833_v7 = vmul.f32 0.7978846, %v1829_v55  ;;  %v2040_v53 = vld [vmem:[%s2954_s27] sm:$0xff]  ;;  %3409 = vmatpush3.msra.mxu0 %v2041_v52  ;;  %v2173_v55 = vld [vmem:[%s3964_s1 + $0x18] sm:$0xff] }
 0xb4b   :  { %3410 = vmatprep.subr.mxu0 %v2040_v53  ;;  %v69_v56 = vstv %s2955_s5 }
 0xb4c   :  { %v1831_v61 = vadd.f32 %v1827_v60, %v1805_v46  ;;  %3566 = vtanh.f32 %v1833_v7  ;;  %v1836_v62 = vmul.f32 0.7978846, %v1832_v58  ;;  %3411 = vmatpush3.msra.mxu0 %v2040_v53  ;;  %70 = vst [vmem:[#allocation2] sm:$0x1] %v69_v56 }
 0xb4d   :  { %3418 = vmatprep.subr.mxu0 %v2173_v55 }
 0xb4e   :  { %v1835_v12 = vmul.f32 0.7978846, %v1831_v61  ;;  %3568 = vtanh.f32 %v1836_v62 }
 0xb50   :  { %3570 = vtanh.f32 %v1835_v12 }
 0xb57   :  { %v3565_v63 = vpop.eup %3564 }
 0xb58   :  { %v1842_v0 = vadd.f32 1.0, %v3565_v63 }
 0xb59   :  { %v3567_v1 = vpop.eup %3566 }
 0xb5a   :  { %v1841_v8 = vadd.f32 1.0, %v3567_v1  ;;  %v1846_v9 = vmul.f32 %v1842_v0, %v1814_v4 }
 0xb5b   :  { %v3569_v3 = vpop.eup %3568 }
 0xb5c   :  { %v1845_v5 = vmul.f32 %v1841_v8, %v1813_v2  ;;  %v1844_v10 = vadd.f32 1.0, %v3569_v3 }
 0xb5d   :  { %v3571_v6 = vpop.eup %3570 }
 0xb5e   :  { %3402 = vmatprep.mubr.msk.f32.mxu1 %vm1864_vm3, %v1845_v5  ;;  %v1843_v15 = vadd.f32 1.0, %v3571_v6  ;;  %v1848_v20 = vmul.f32 %v1844_v10, %v1816_v18  ;;  %v3056_v5 = vld [vmem:[%s2952_s10] ss:$0 sm:$0xff] }
 0xb5f   :  { %3403 = vmatmul.mubr.msk.f32.vlgmr.msra.gmra.mxu1 %vm1864_vm3, %v1846_v9 }
 0xb60   :  { %v1847_v19 = vmul.f32 %v1843_v15, %v1815_v14  ;;  %v3057_v15 = vld [vmem:[%s2953_s14] ss:$0 sm:$0xff] }
 0xb62   :  { %3405 = vmatprep.mubr.msk.f32.mxu1 %vm1864_vm3, %v1847_v19 }
 0xb63   :  { %3406 = vmatmul.mubr.msk.f32.gmra.mxu1 %vm1864_vm3, %v1848_v20 }
 0xc1f   :  { %v3404_v22 = vpop.f32.mrf.mxu1 }
 0xc20   :  { %v1949_v23 = vadd.f32 %v3404_v22, %v3051_v21 }
 0xc21   :  { %v1943_v24 = vpop.f32.mrf.mxu1 }
 0xc22   :  { %v1944_v26 = vadd.f32 %v3051_v21, %v1943_v24  ;;  %v1963_v27 = vadd.f32 %v1949_v23, %v3897_v25 }
 0xc23   :  { %v3407_v28 = vpop.f32.mrf.mxu1 }
 0xc24   :  { %v1959_v29 = vadd.f32 %v3407_v28, %v3051_v21  ;;  %v1971_v31 = vsel %vm248_vm1, %v1963_v27, 0.0  ;;  %v1962_v32 = vadd.f32 %v1944_v26, %v3900_v30  ;;  %v2172_v26 = vld [vmem:[%s3964_s1 + $0x10] sm:$0xff] }
 0xc25   :  { %1972 = vadd.xlane.f32.xlu1 %v1971_v31  ;;  %v1953_v33 = vpop.f32.mrf.mxu1 }
 0xc26   :  { %v1954_v13 = vadd.f32 %v3051_v21, %v1953_v33  ;;  %v1968_v35 = vsel %vm248_vm1, %v1962_v32, 0.0  ;;  %v1965_v36 = vadd.f32 %v1959_v29, %v3905_v34  ;;  %v2171_v29 = vld [vmem:[%s3964_s1 + $0x8] sm:$0xff]  ;;  %v3604_v33 = vld [vmem:[%s3654_s9] sm:$0xff] }
 0xc27   :  { %1969 = vadd.xlane.f32.xlu0 %v1968_v35  ;;  %v3606_v35 = vld [vmem:[%s3654_s9 + $0x10] sm:$0xff] }
 0xc28   :  { %v1977_v17 = vsel %vm248_vm1, %v1965_v36, 0.0  ;;  %v1964_v47 = vadd.f32 %v1954_v13, %v3910_v11  ;;  %v3605_v13 = vld [vmem:[%s3654_s9 + $0x8] sm:$0xff] }
 0xc29   :  { %1978 = vadd.xlane.f32.xlu1 %v1977_v17  ;;  %v3632_v17 = vmov 0.0  }
 0xc2a   :  { %v1974_v25 = vsel %vm248_vm1, %v1964_v47, 0.0 }
 0xc2b   :  { %1975 = vadd.xlane.f32.xlu0 %v1974_v25 }
 0xcae   :  { %v1973_v37 = vpop.xlane.xlu1 %1972 }
 0xcaf   :  { %v1981_v38 = vmul.f32 0.0625, %v1973_v37 }
 0xcb0   :  { %v1970_v39 = vpop.xlane.xlu0 %1969 }
 0xcb1   :  { %v1985_v30 = vsub.f32 %v1963_v27, %v1981_v38  ;;  %v1980_v16 = vmul.f32 0.0625, %v1970_v39  ;;  %v3063_v39 = vld [vmem:[%s2957_s19] ss:$0 sm:$0xff] }
 0xcb2   :  { %v1979_v50 = vpop.xlane.xlu1 %1978 }
 0xcb3   :  { %v1984_v40 = vsub.f32 %v1962_v32, %v1980_v16  ;;  %v1983_v41 = vmul.f32 0.0625, %v1979_v50  ;;  %v1989_v42 = vmul.f32 %v1985_v30, %v1985_v30  ;;  %v2170_v32 = vld [vmem:[%s3964_s1] sm:$0xff] }
 0xcb4   :  { %v1976_v43 = vpop.xlane.xlu0 %1975 }
 0xcb5   :  { %v1987_v34 = vsub.f32 %v1965_v36, %v1983_v41  ;;  %v1982_v44 = vmul.f32 0.0625, %v1976_v43  ;;  %v1995_v54 = vsel %vm248_vm1, %v1989_v42, 0.0  ;;  %v1988_v45 = vmul.f32 %v1984_v40, %v1984_v40  ;;  %v3607_v36 = vld [vmem:[%s3654_s9 + $0x18] sm:$0xff]  ;;  %s3635_s9 = smov 28  }
 0xcb6   :  { %1996 = vadd.xlane.f32.xlu1 %v1995_v54  ;;  %s2960_s17 = sld [smem:[%s4162_s0 + %s3635_s9]]  }
 0xcb7   :  { %v1986_v11 = vsub.f32 %v1964_v47, %v1982_v44  ;;  %v1992_v59 = vsel %vm248_vm1, %v1988_v45, 0.0  ;;  %v1991_v46 = vmul.f32 %v1987_v34, %v1987_v34 }
 0xcb8   :  { %1993 = vadd.xlane.f32.xlu0 %v1992_v59  ;;  %v3634_v59 = vmov 0  }
 0xcb9   :  { %v2001_v48 = vsel %vm248_vm1, %v1991_v46, 0.0  ;;  %v1990_v49 = vmul.f32 %v1986_v11, %v1986_v11  ;;  %3510 = vset.pattern.permute.xlu1 %v3634_v59  ;;  %3504 = vset.pattern.permute.xlu0 %v3634_v59  ;;  %v3058_v46 = vld [vmem:[#allocation2] ss:$0 sm:$0xff] }
 0xcba   :  { %2002 = vadd.xlane.f32.xlu1 %v2001_v48 }
 0xcbb   :  { %v1998_v51 = vsel %vm248_vm1, %v1990_v49, 0.0 }
 0xcbc   :  { %1999 = vadd.xlane.f32.xlu0 %v1998_v51 }
 0xd3f   :  { %v1997_v57 = vpop.xlane.xlu1 %1996 }
 0xd40   :  { %v2005_v58 = vmul.f32 0.0625, %v1997_v57 }
 0xd41   :  { %v1994_v60 = vpop.xlane.xlu0 %1993 }
 0xd42   :  { %v2009_v7 = vadd.f32 1e-06, %v2005_v58  ;;  %v2004_v61 = vmul.f32 0.0625, %v1994_v60 }
 0xd43   :  { %v2003_v62 = vpop.xlane.xlu1 %2002 }
 0xd44   :  { %3572 = vrsqrt.f32 %v2009_v7  ;;  %v2008_v12 = vadd.f32 1e-06, %v2004_v61  ;;  %v2007_v63 = vmul.f32 0.0625, %v2003_v62 }
 0xd45   :  { %v2000_v1 = vpop.xlane.xlu0 %1999 }
 0xd46   :  { %3574 = vrsqrt.f32 %v2008_v12  ;;  %v2011_v0 = vadd.f32 1e-06, %v2007_v63  ;;  %v2006_v2 = vmul.f32 0.0625, %v2000_v1 }
 0xd48   :  { %3576 = vrsqrt.f32 %v2011_v0  ;;  %v2010_v8 = vadd.f32 1e-06, %v2006_v2 }
 0xd4a   :  { %3578 = vrsqrt.f32 %v2010_v8 }
 0xd51   :  { %v3573_v3 = vpop.eup %3572 }
 0xd52   :  { %v2017_v4 = vmul.f32 %v3573_v3, %v1985_v30 }
 0xd53   :  { %v3575_v6 = vpop.eup %3574 }
 0xd54   :  { %v2016_v9 = vmul.f32 %v3575_v6, %v1984_v40  ;;  %v2027_v14 = vmul.f32 %v3056_v5, %v2017_v4 }
 0xd55   :  { %v3577_v10 = vpop.eup %3576 }
 0xd56   :  { %v2026_v18 = vmul.f32 %v3056_v5, %v2016_v9  ;;  %v2019_v19 = vmul.f32 %v3577_v10, %v1987_v34  ;;  %v2037_v23 = vadd.f32 %v3057_v15, %v2027_v14 }
 0xd57   :  { %v3579_v20 = vpop.eup %3578 }
 0xd58   :  { %v2036_v21 = vadd.f32 %v3057_v15, %v2026_v18  ;;  %v2018_v22 = vmul.f32 %v3579_v20, %v1986_v11  ;;  %v2029_v24 = vmul.f32 %v3056_v5, %v2019_v19 }
 0xd5a   :  { %3412 = vmatprep.mubr.msk.f32.mxu0 %vm248_vm1, %v2036_v21  ;;  %v2028_v27 = vmul.f32 %v3056_v5, %v2018_v22  ;;  %v2039_v31 = vadd.f32 %v3057_v15, %v2029_v24 }
 0xd5b   :  { %3413 = vmatmul.mubr.msk.f32.vlgmr.msra.gmra.mxu0 %vm248_vm1, %v2037_v23 }
 0xd5c   :  { %3419 = vmatpush3.msra.mxu0 %v2173_v55  ;;  %v2038_v28 = vadd.f32 %v3057_v15, %v2028_v27 }
 0xd5d   :  { %3420 = vmatprep.subr.mxu0 %v2172_v26 }
 0xd5e   :  { %3421 = vmatpush3.msra.mxu0 %v2172_v26  ;;  %3415 = vmatprep.mubr.msk.f32.mxu0 %vm248_vm1, %v2038_v28 }
 0xd5f   :  { %3422 = vmatprep.subr.mxu0 %v2171_v29  ;;  %3416 = vmatmul.mubr.msk.f32.gmra.mxu0 %vm248_vm1, %v2039_v31 }
 0xd60   :  { %3423 = vmatpush3.msra.mxu0 %v2171_v29  ;;  %3426 = vmatprep.mubr.msk.f32.mxu0 %vm148_vm0, %v3604_v33 }
 0xd61   :  { %3424 = vmatprep.subr.mxu0 %v2170_v32 }
 0xd62   :  { %3425 = vmatpush3.msra.mxu0 %v2170_v32 }
 0xd63   :  { %3427 = vmatmul.mubr.msk.f32.vlgmr.msra.gmra.mxu0 %vm148_vm0, %v3605_v13  ;;  %3444 = vmatprep.subr.mxu0 %v3632_v17 }
 0xd64   :  { %3429 = vmatprep.mubr.msk.f32.mxu0 %vm148_vm0, %v3606_v35 }
 0xd67   :  { %3430 = vmatmul.mubr.msk.f32.gmra.mxu0 %vm148_vm0, %v3607_v36 }
 0xd68   :  { %3450 = vmatprep.mubr.msk.f32.mxu0 %vm3636_vm8, %v3632_v17 }
 0xe1b   :  { %v3414_v47 = vpop.f32.mrf.mxu0 }
 0xe1c   :  { %v4001_v49 = vadd.f32 %v3414_v47, %v3058_v46 }
 0xe1d   :  { %v2127_v25 = vpop.f32.mrf.mxu0 }
 0xe1e   :  { %v3999_v48 = vadd.f32 %v3058_v46, %v2127_v25  ;;  %v2147_v52 = vsub.f32 0.0, %v4001_v49 }
 0xe1f   :  { %v3417_v37 = vpop.f32.mrf.mxu0 }
 0xe20   :  { %v2146_v51 = vsub.f32 0.0, %v3999_v48  ;;  %v4007_v56 = vadd.f32 %v3417_v37, %v3058_v46  ;;  %v2152_v57 = vmul.f32 1.442695, %v2147_v52 }
 0xe21   :  { %v2137_v38 = vpop.f32.mrf.mxu0 }
 0xe22   :  { %v2150_v53 = vmul.f32 1.442695, %v2146_v51  ;;  %v4005_v55 = vadd.f32 %v3058_v46, %v2137_v38  ;;  %v2149_v60 = vsub.f32 0.0, %v4007_v56 }
 0xe23   :  { %v3428_v30 = vpop.f32.mrf.mxu0 }
 0xe24   :  { %v2253_v16 = vadd.f32 %v3428_v30, %v3063_v39  ;;  %3580 = vpow2.f32 %v2150_v53  ;;  %v2148_v58 = vsub.f32 0.0, %v4005_v55  ;;  %v2156_v61 = vmul.f32 1.442695, %v2149_v60  ;;  %v4049_v30 = vld [vmem:[%s2960_s17 + $0x10] sm:$0xff] }
 0xe25   :  { %v2247_v50 = vpop.f32.mrf.mxu0  ;;  %3582 = vpow2.f32 %v2152_v57  ;;  %3432 = vmatprep.subr.msk.mxu1 %vm148_vm0, %v4049_v30 }
 0xe26   :  { %v2248_v40 = vadd.f32 %v3063_v39, %v2247_v50  ;;  %v2271_v41 = vsel %vm148_vm0, %v2253_v16, 0.0  ;;  %v2154_v7 = vmul.f32 1.442695, %v2148_v58  ;;  %3433 = vmatpush3.xpose.msk.msra.mxu1 %vm148_vm0, %v4049_v30 }
 0xe27   :  { %2272 = vadd.xlane.f32.xlu1 %v2271_v41  ;;  %v3431_v42 = vpop.f32.mrf.mxu0 }
 0xe28   :  { %v2263_v43 = vadd.f32 %v3431_v42, %v3063_v39  ;;  %v2268_v34 = vsel %vm148_vm0, %v2248_v40, 0.0  ;;  %3584 = vpow2.f32 %v2154_v7  ;;  %v4059_v42 = vld [vmem:[%s2960_s17 + $0x8] sm:$0xff] }
 0xe29   :  { %v2257_v44 = vpop.f32.mrf.mxu0  ;;  %2269 = vadd.xlane.f32.xlu0 %v2268_v34  ;;  %3586 = vpow2.f32 %v2156_v61  ;;  %3434 = vmatprep.subr.msk.mxu1 %vm148_vm0, %v4059_v42  ;;  %v2341_v34 = vld [vmem:[%s2960_s17] sm:$0xff] }
 0xe2a   :  { %v2258_v54 = vadd.f32 %v3063_v39, %v2257_v44  ;;  %v2277_v45 = vsel %vm148_vm0, %v2263_v43, 0.0  ;;  %3435 = vmatpush3.xpose.msk.msra.mxu1 %vm148_vm0, %v4059_v42 }
 0xe2b   :  { %2278 = vadd.xlane.f32.xlu1 %v2277_v45  ;;  %3436 = vmatprep.subr.msk.mxu1 %vm148_vm0, %v2341_v34 }
 0xe2c   :  { %v2274_v11 = vsel %vm148_vm0, %v2258_v54, 0.0 }
 0xe2d   :  { %2275 = vadd.xlane.f32.xlu0 %v2274_v11  ;;  %v3637_v11 = vmov 1.0  }
 0xe2e   :  { %3437 = vmatpush3.xpose.msk.msra.mxu1 %vm148_vm0, %v2341_v34 }
 0xe2f   :  { %3453 = vmatprep.subr.mxu1 %v4049_v30 }
 0xe31   :  { %v3581_v62 = vpop.eup %3580 }
 0xe32   :  { %v3583_v63 = vpop.eup %3582  ;;  %v2158_v1 = vadd.f32 1.0, %v3581_v62 }
 0xe33   :  { %v2159_v4 = vadd.f32 1.0, %v3583_v63 }
 0xe34   :  { %3588 = vrcp.f32 %v2158_v1 }
 0xe35   :  { %v3585_v14 = vpop.eup %3584  ;;  %3590 = vrcp.f32 %v2159_v4 }
 0xe36   :  { %v3587_v22 = vpop.eup %3586  ;;  %v2160_v23 = vadd.f32 1.0, %v3585_v14 }
 0xe37   :  { %v2161_v28 = vadd.f32 1.0, %v3587_v22 }
 0xe38   :  { %3592 = vrcp.f32 %v2160_v23 }
 0xe39   :  { %3594 = vrcp.f32 %v2161_v28 }
 0xe41   :  { %v4031_v33 = vpop.eup %3588 }
 0xe42   :  { %v4033_v13 = vpop.eup %3590  ;;  %vm2571_vm4 = vcmp.gt.f32.partialorder %v4031_v33, 0.6 }
 0xe43   :  { %v3082_v35 = vsel %vm2571_vm4, 1.0, %v3632_v17  ;;  %vm2572_vm5 = vcmp.gt.f32.partialorder %v4033_v13, 0.6 }
 0xe44   :  { %v2607_v47 = vsub.f32 1.0, %v3082_v35  ;;  %v3083_v37 = vsel %vm2572_vm5, 1.0, %v3632_v17 }
 0xe45   :  { %v4038_v36 = vpop.eup %3592  ;;  %v2608_v38 = vsub.f32 1.0, %v3083_v37  ;;  %v3505_v50 = vpack.i.bf16 %v3083_v37, %v3082_v35 }
 0xe46   :  { %v4043_v25 = vpop.eup %3594  ;;  %vm2573_vm6 = vcmp.gt.f32.partialorder %v4038_v36, 0.6 }
 0xe47   :  { %vm2574_vm7 = vcmp.gt.f32.partialorder %v4043_v25, 0.6  ;;  %v3084_v39 = vsel %vm2573_vm6, 1.0, %v3632_v17 }
 0xe48   :  { %v2609_v44 = vsub.f32 1.0, %v3084_v39 }
 0xeb0   :  { %v2273_v12 = vpop.xlane.xlu1 %2272 }
 0xeb1   :  { %v2282_v0 = vmul.f32 0.03125, %v2273_v12 }
 0xeb2   :  { %v2270_v2 = vpop.xlane.xlu0 %2269 }
 0xeb3   :  { %v4011_v8 = vsub.f32 %v2253_v16, %v2282_v0  ;;  %v2281_v3 = vmul.f32 0.03125, %v2270_v2  ;;  %v2452_v16 = vmul.f32 %v4049_v30, %v4049_v30  ;;  %v3068_v0 = vld [vmem:[%s2958_s25] ss:$0 sm:$0xff] }
 0xeb4   :  { %v2279_v5 = vpop.xlane.xlu1 %2278 }
 0xeb5   :  { %v4013_v6 = vsub.f32 %v2248_v40, %v2281_v3  ;;  %v2284_v9 = vmul.f32 0.03125, %v2279_v5  ;;  %v2290_v10 = vmul.f32 %v4011_v8, %v4011_v8  ;;  %v3085_v40 = vsel %vm2574_vm7, 1.0, %v3632_v17  ;;  %3445 = vmatpush3.xpose.msk.msra.mxu0 %vm148_vm0, %v2452_v16 }
 0xeb6   :  { %v2276_v15 = vpop.xlane.xlu0 %2275  ;;  %v3511_v41 = vpack.i.bf16 %v3085_v40, %v3084_v39  ;;  %3446 = vmatprep.subr.mxu0 %v3632_v17  ;;  %v2610_v45 = vsub.f32 1.0, %v3085_v40 }
 0xeb7   :  { %v4017_v18 = vsub.f32 %v2263_v43, %v2284_v9  ;;  %v2283_v19 = vmul.f32 0.03125, %v2276_v15  ;;  %v2296_v20 = vsel %vm148_vm0, %v2290_v10, 0.0  ;;  %v2289_v21 = vmul.f32 %v4013_v6, %v4013_v6  ;;  %v3069_v9 = vld [vmem:[%s2959_s29] ss:$0 sm:$0xff] }
 0xeb8   :  { %2297 = vadd.xlane.f32.xlu1 %v2296_v20  ;;  %v2451_v43 = vmul.f32 %v4059_v42, %v4059_v42 }
 0xeb9   :  { %v4022_v24 = vsub.f32 %v2258_v54, %v2283_v19  ;;  %v2293_v26 = vsel %vm148_vm0, %v2289_v21, 0.0  ;;  %v2292_v27 = vmul.f32 %v4017_v18, %v4017_v18  ;;  %v2450_v54 = vmul.f32 %v2341_v34, %v2341_v34 }
 0xeba   :  { %2294 = vadd.xlane.f32.xlu0 %v2293_v26  ;;  %3447 = vmatpush3.xpose.msk.msra.mxu0 %vm148_vm0, %v2451_v43  ;;  %v2539_v26 = vlaneseq }
 0xebb   :  { %v2302_v29 = vsel %vm148_vm0, %v2292_v27, 0.0  ;;  %v2291_v31 = vmul.f32 %v4022_v24, %v4022_v24  ;;  %3448 = vmatprep.subr.mxu0 %v3632_v17 }
 0xebc   :  { %2303 = vadd.xlane.f32.xlu1 %v2302_v29  ;;  %v4105_v27 = vand.u32 127, %v2539_v26  ;;  %v2540_v29 = vshrl.u32 %v2539_v26, 7 }
 0xebd   :  { %v2299_v32 = vsel %vm148_vm0, %v2291_v31, 0.0 }
 0xebe   :  { %2300 = vadd.xlane.f32.xlu0 %v2299_v32  ;;  %3449 = vmatpush3.xpose.msk.msra.mxu0 %vm148_vm0, %v2450_v54  ;;  %vm2549_vm9 = vcmp.lt.s32.totalorder %v4105_v27, 16  ;;  %v2541_v31 = vsub.s32 0, %v2540_v29 }
 0xebf   :  { %v3081_v35 = vsel %vm2549_vm9, 1.0, %v3632_v17 }
 0xec0   :  { %v2566_v43 = vmul.f32 1e+30, %v3081_v35 }
 0xec1   :  { %3451 = vmatmul.mubr.msk.f32.vlgmr.msra.gmra.mxu0 %vm148_vm0, %v3637_v11 }
 0xecd   :  { %2613 = vperm.xlu1 %3510, %v2607_v47  }
 0xed1   :  { %2618 = vperm.xlu1 %3510, %v2608_v38   ;;  %v2556_v38 = vsub.f32 1.0, %v3081_v35 }
 0xed4   :  { %3506 = vperm.xlu0 %3504, %v3505_v50  }
 0xed5   :  { %3512 = vperm.xlu1 %3510, %v3511_v41  }
 0xed9   :  { %2623 = vperm.xlu1 %3510, %v2609_v44  }
 0xedd   :  { %2628 = vperm.xlu1 %3510, %v2610_v45  }
 0xf41   :  { %v2298_v59 = vpop.xlane.xlu1 %2297 }
 0xf42   :  { %v2306_v46 = vmul.f32 0.03125, %v2298_v59 }
 0xf43   :  { %v2295_v51 = vpop.xlane.xlu0 %2294 }
 0xf44   :  { %v2310_v52 = vadd.f32 1e-05, %v2306_v46  ;;  %v2305_v53 = vmul.f32 0.03125, %v2295_v51 }
 0xf45   :  { %v2304_v57 = vpop.xlane.xlu1 %2303 }
 0xf46   :  { %3596 = vrsqrt.f32 %v2310_v52  ;;  %v2309_v58 = vadd.f32 1e-05, %v2305_v53  ;;  %v2308_v60 = vmul.f32 0.03125, %v2304_v57 }
 0xf47   :  { %v2301_v7 = vpop.xlane.xlu0 %2300 }
 0xf48   :  { %3598 = vrsqrt.f32 %v2309_v58  ;;  %v2312_v61 = vadd.f32 1e-05, %v2308_v60  ;;  %v2307_v62 = vmul.f32 0.03125, %v2301_v7 }
 0xf49   :  { %v2614_v28 = vpop.permute.xlu1 %2613 }
 0xf4a   :  { %3600 = vrsqrt.f32 %v2312_v61  ;;  %v2311_v12 = vadd.f32 1e-05, %v2307_v62 }
 0xf4c   :  { %3602 = vrsqrt.f32 %v2311_v12 }
 0xf4d   :  { %v2619_v32 = vpop.permute.xlu1 %2618 }
 0xf51   :  { %v3513_v16 = vpop.permute.xlu1 %3512 }
 0xf53   :  { %v3597_v63 = vpop.eup %3596 }
 0xf54   :  { %v2318_v1 = vmul.f32 %v3597_v63, %v4011_v8 }
 0xf55   :  { %v3599_v2 = vpop.eup %3598  ;;  %v2624_v61 = vpop.permute.xlu1 %2623 }
 0xf56   :  { %v2317_v3 = vmul.f32 %v3599_v2, %v4013_v6  ;;  %v2328_v5 = vmul.f32 %v3068_v0, %v2318_v1 }
 0xf57   :  { %v3601_v4 = vpop.eup %3600 }
 0xf58   :  { %v2327_v10 = vmul.f32 %v3068_v0, %v2317_v3  ;;  %v2320_v14 = vmul.f32 %v3601_v4, %v4017_v18  ;;  %v4088_v21 = vadd.f32 %v3069_v9, %v2328_v5 }
 0xf59   :  { %v3603_v15 = vpop.eup %3602 }
 0xf5a   :  { %v4085_v19 = vadd.f32 %v3069_v9, %v2327_v10  ;;  %v2319_v20 = vmul.f32 %v3603_v15, %v4022_v24  ;;  %v2330_v22 = vmul.f32 %v3068_v0, %v2320_v14 }
 0xf5c   :  { %3438 = vmatprep.mubr.msk.f32.mxu1 %vm148_vm0, %v4085_v19  ;;  %v2329_v8 = vmul.f32 %v3068_v0, %v2319_v20  ;;  %v4097_v18 = vadd.f32 %v3069_v9, %v2330_v22  ;;  %v3514_v22 = vunpack.i.l.bf16 %v3513_v16 }
 0xf5d   :  { %3439 = vmatmul.mubr.msk.f32.vlgmr.msra.gmra.mxu1 %vm148_vm0, %v4088_v21 }
 0xf5e   :  { %v4094_v6 = vadd.f32 %v3069_v9, %v2329_v8  ;;  %3454 = vmatpush3.msra.mxu1 %v4049_v30 }
 0xf5f   :  { %3455 = vmatprep.subr.mxu1 %v4059_v42 }
 0xf60   :  { %3441 = vmatprep.mubr.msk.f32.mxu1 %vm148_vm0, %v4094_v6  ;;  %3456 = vmatpush3.msra.mxu1 %v4059_v42  ;;  %v2557_v42 = vmul.f32 1e+30, %v2556_v38 }
 0xf61   :  { %3442 = vmatmul.mubr.msk.f32.gmra.mxu1 %vm148_vm0, %v4097_v18  ;;  %3457 = vmatprep.subr.mxu1 %v2341_v34 }
 0xf62   :  { %3458 = vmatpush3.msra.mxu1 %v2341_v34  ;;  %v3507_v34 = vpop.permute.xlu0 %3506 }
 0xf63   :  { %v3509_v57 = vunpack.i.h.bf16 %v3507_v34  ;;  %v3508_v58 = vunpack.i.l.bf16 %v3507_v34 }
 0xf81   :  { %v2531_v23 = vpop.f32.mrf.mxu0 }
 0xf82   :  { %v2542_v47 = vrot.slane %v2531_v23, %v2541_v31  ;;  %v2629_v31 = vpop.permute.xlu1 %2628 }
 0xf83   :  { %v3452_v24 = vpop.f32.mrf.mxu0 }
 0xf84   :  { %v3515_v24 = vunpack.i.h.bf16 %v3513_v16 }
0x101d   :  { %v3440_v37 = vpop.f32.mrf.mxu1 }
0x101e   :  { %v2536_v39 = vmul.f32 2.0, %v3440_v37 }
0x101f   :  { %v2431_v30 = vpop.f32.mrf.mxu1 }
0x1020   :  { %v2544_v50 = vsub.f32 %v2542_v47, %v2536_v39  ;;  %v2535_v40 = vmul.f32 2.0, %v2431_v30 }
0x1021   :  { %v3443_v41 = vpop.f32.mrf.mxu1 }
0x1022   :  { %v2543_v44 = vsub.f32 %v2542_v47, %v2535_v40  ;;  %v2538_v54 = vmul.f32 2.0, %v3443_v41  ;;  %v2553_v45 = vmul.f32 %v3081_v35, %v2544_v50  ;;  %v2563_v11 = vmul.f32 %v2556_v38, %v2544_v50 }
0x1023   :  { %v2441_v59 = vpop.f32.mrf.mxu1 }
0x1024   :  { %v2552_v46 = vmul.f32 %v3081_v35, %v2543_v44  ;;  %v2562_v51 = vmul.f32 %v2556_v38, %v2543_v44  ;;  %v2546_v52 = vsub.f32 %v2542_v47, %v2538_v54  ;;  %v2537_v53 = vmul.f32 2.0, %v2441_v59 }
0x1025   :  { %v2559_v60 = vadd.f32 %v2557_v42, %v2553_v45  ;;  %v2568_v7 = vadd.f32 %v2566_v43, %v2563_v11 }
0x1026   :  { %v2555_v62 = vmul.f32 %v3081_v35, %v2546_v52  ;;  %v2565_v12 = vmul.f32 %v2556_v38, %v2546_v52  ;;  %v2545_v63 = vsub.f32 %v2542_v47, %v2537_v53  ;;  %v2558_v1 = vadd.f32 %v2557_v42, %v2552_v46 }
0x1027   :  { %v2604_v0 = vmul.f32 %v3509_v57, %v2559_v60  ;;  %v2632_v2 = vmul.f32 %v2619_v32, %v2568_v7  ;;  %v2567_v3 = vadd.f32 %v2566_v43, %v2562_v51 }
0x1028   :  { %v2554_v4 = vmul.f32 %v3081_v35, %v2545_v63  ;;  %v2564_v5 = vmul.f32 %v2556_v38, %v2545_v63  ;;  %v2603_v9 = vmul.f32 %v3508_v58, %v2558_v1  ;;  %v2561_v15 = vadd.f32 %v2557_v42, %v2555_v62 }
0x1029   :  { %v2636_v10 = vadd.f32 %v2632_v2, %v2604_v0  ;;  %v2631_v14 = vmul.f32 %v2614_v28, %v2567_v3  ;;  %v2570_v20 = vadd.f32 %v2566_v43, %v2565_v12 }
0x102a   :  { %v2560_v8 = vadd.f32 %v2557_v42, %v2554_v4  ;;  %v2569_v23 = vadd.f32 %v2566_v43, %v2564_v5  ;;  %v2606_v37 = vmul.f32 %v3515_v24, %v2561_v15 }
0x102b   :  { %v2643_v26 = vsel %vm2639_vm10, %v2636_v10, inf  ;;  %v2635_v29 = vadd.f32 %v2631_v14, %v2603_v9  ;;  %v2634_v38 = vmul.f32 %v2629_v31, %v2570_v20 }
0x102c   :  { %2644 = vmin.xlane.f32.xlu0 %v2643_v26  ;;  %v2605_v47 = vmul.f32 %v3514_v22, %v2560_v8  ;;  %v2633_v32 = vmul.f32 %v2624_v61, %v2569_v23 }
0x102d   :  { %v2640_v35 = vsel %vm2639_vm10, %v2635_v29, inf  ;;  %v2638_v30 = vadd.f32 %v2634_v38, %v2606_v37 }
0x102e   :  { %2641 = vmin.xlane.f32.xlu1 %v2640_v35  ;;  %v2637_v39 = vadd.f32 %v2633_v32, %v2605_v47 }
0x102f   :  { %v2649_v50 = vsel %vm2639_vm10, %v2638_v30, inf }
0x1030   :  { %v2646_v28 = vsel %vm2639_vm10, %v2637_v39, inf }
0x1032   :  { %2647 = vmin.xlane.f32.xlu1 %v2646_v28 }
0x1036   :  { %2650 = vmin.xlane.f32.xlu1 %v2649_v50 }
0x10b5   :  { %v2645_v16 = vpop.xlane.xlu0 %2644 }
0x10b6   :  { %vm2653_vm11 = vcmp.le.f32.partialorder %v2636_v10, %v2645_v16 }
0x10b7   :  { %v2657_v40 = vsel %vm2653_vm11, %v4105_v27, 24  ;;  %v2642_v41 = vpop.xlane.xlu1 %2641 }
0x10b8   :  { %v2675_v42 = vsel %vm2639_vm10, %v2657_v40, 2147483647  ;;  %vm2652_vm12 = vcmp.le.f32.partialorder %v2635_v29, %v2642_v41 }
0x10b9   :  { %v2656_v43 = vsel %vm2652_vm12, %v4105_v27, 24  ;;  %v2677_v34 = vshra.s32 %v2675_v42, 16  ;;  %v2676_v62 = vand.u32 65535, %v2675_v42 }
0x10ba   :  { %v2660_v44 = vsel %vm2639_vm10, %v2656_v43, 2147483647 }
0x10bb   :  { %v2648_v54 = vpop.xlane.xlu1 %2647  ;;  %v2679_v45 = vcvt.s32.f32 %v2677_v34  ;;  %v2662_v11 = vshra.s32 %v2660_v44, 16  ;;  %v2661_v12 = vand.u32 65535, %v2660_v44  ;;  %v2678_v1 = vcvt.s32.f32 %v2676_v62 }
0x10bc   :  { %vm2654_vm13 = vcmp.le.f32.partialorder %v2637_v39, %v2648_v54 }
0x10bd   :  { %v2658_v59 = vsel %vm2654_vm13, %v4105_v27, 24  ;;  %2680 = vmin.xlane.f32.xlu1 %v2679_v45  ;;  %v2664_v46 = vcvt.s32.f32 %v2662_v11  ;;  %v2663_v3 = vcvt.s32.f32 %v2661_v12 }
0x10be   :  { %v2690_v51 = vsel %vm2639_vm10, %v2658_v59, 2147483647 }
0x10bf   :  { %2665 = vmin.xlane.f32.xlu0 %v2664_v46  ;;  %v2651_v52 = vpop.xlane.xlu1 %2650  ;;  %v2692_v53 = vshra.s32 %v2690_v51, 16  ;;  %v2691_v4 = vand.u32 65535, %v2690_v51 }
0x10c0   :  { %vm2655_vm14 = vcmp.le.f32.partialorder %v2638_v30, %v2651_v52 }
0x10c1   :  { %v2659_v57 = vsel %vm2655_vm14, %v4105_v27, 24  ;;  %v2694_v58 = vcvt.s32.f32 %v2692_v53  ;;  %v2693_v10 = vcvt.s32.f32 %v2691_v4 }
0x10c2   :  { %v2705_v60 = vsel %vm2639_vm10, %v2659_v57, 2147483647 }
0x10c3   :  { %2695 = vmin.xlane.f32.xlu0 %v2694_v58  ;;  %v2707_v7 = vshra.s32 %v2705_v60, 16  ;;  %v2706_v14 = vand.u32 65535, %v2705_v60 }
0x10c5   :  { %v2709_v61 = vcvt.s32.f32 %v2707_v7  ;;  %v2708_v22 = vcvt.s32.f32 %v2706_v14 }
0x10c7   :  { %2710 = vmin.xlane.f32.xlu1 %v2709_v61 }
0x1146   :  { %v2681_v63 = vpop.xlane.xlu1 %2680 }
0x1147   :  { %vm2682_vm15 = vcmp.eq.f32.partialorder %v2679_v45, %v2681_v63  ;;  %v2687_v23 = vcvt.f32.s32 %v2681_v63 }
0x1148   :  { %v2666_v0 = vpop.xlane.xlu0 %2665  ;;  %v2683_v2 = vsel %vm2682_vm15, %v2678_v1, inf }
0x1149   :  { %2684 = vmin.xlane.f32.xlu1 %v2683_v2  ;;  %vm2667_vm1 = vcmp.eq.f32.partialorder %v2664_v46, %v2666_v0  ;;  %v2672_v24 = vcvt.f32.s32 %v2666_v0  ;;  %v2688_v29 = vshll.u32 %v2687_v23, 16 }
0x114a   :  { %v2668_v5 = vsel %vm2667_vm1, %v2663_v3, inf }
0x114b   :  { %2669 = vmin.xlane.f32.xlu0 %v2668_v5  ;;  %v2673_v32 = vshll.u32 %v2672_v24, 16 }
0x114c   :  { %v2696_v9 = vpop.xlane.xlu0 %2695 }
0x114d   :  { %vm2697_vm2 = vcmp.eq.f32.partialorder %v2694_v58, %v2696_v9  ;;  %v2702_v35 = vcvt.f32.s32 %v2696_v9 }
0x114e   :  { %v2698_v15 = vsel %vm2697_vm2, %v2693_v10, inf }
0x114f   :  { %2699 = vmin.xlane.f32.xlu0 %v2698_v15  ;;  %v2703_v30 = vshll.u32 %v2702_v35, 16 }
0x1150   :  { %v2711_v20 = vpop.xlane.xlu1 %2710 }
0x1151   :  { %vm2712_vm3 = vcmp.eq.f32.partialorder %v2709_v61, %v2711_v20  ;;  %v2717_v50 = vcvt.f32.s32 %v2711_v20 }
0x1152   :  { %v2713_v8 = vsel %vm2712_vm3, %v2708_v22, inf }
0x1153   :  { %2714 = vmin.xlane.f32.xlu1 %v2713_v8  ;;  %v2718_v34 = vshll.u32 %v2717_v50, 16 }
0x11d2   :  { %v2685_v26 = vpop.xlane.xlu1 %2684 }
0x11d3   :  { %v2686_v31 = vcvt.f32.s32 %v2685_v26 }
0x11d4   :  { %v2670_v47 = vpop.xlane.xlu0 %2669 }
0x11d5   :  { %v2689_v37 = vadd.s32 %v2688_v29, %v2686_v31  ;;  %v2671_v38 = vcvt.f32.s32 %v2670_v47 }
0x11d7   :  { %v2674_v39 = vadd.s32 %v2673_v32, %v2671_v38  ;;  %vm2721_vm4 = vcmp.eq.s32.totalorder %v4105_v27, %v2689_v37 }
0x11d8   :  { %v2700_v28 = vpop.xlane.xlu0 %2699  ;;  %v3087_v41 = vsel %vm2721_vm4, 1.0, %v3632_v17 }
0x11d9   :  { %v2701_v16 = vcvt.f32.s32 %v2700_v28  ;;  %vm2720_vm5 = vcmp.eq.s32.totalorder %v4105_v27, %v2674_v39 }
0x11da   :  { %v3086_v40 = vsel %vm2720_vm5, 1.0, %v3632_v17 }
0x11db   :  { %v2704_v42 = vadd.s32 %v2703_v30, %v2701_v16  ;;  %3459 = vmatprep.mubr.msk.f32.mxu1 %vm2639_vm10, %v3086_v40 }
0x11dc   :  { %3460 = vmatmul.mubr.msk.f32.vlgmr.msra.gmra.mxu1 %vm2639_vm10, %v3087_v41  ;;  %v2715_v43 = vpop.xlane.xlu1 %2714 }
0x11dd   :  { %v2716_v44 = vcvt.f32.s32 %v2715_v43  ;;  %vm2722_vm6 = vcmp.eq.s32.totalorder %v4105_v27, %v2704_v42 }
0x11de   :  { %v3088_v54 = vsel %vm2722_vm6, 1.0, %v3632_v17 }
0x11df   :  { %v2719_v45 = vadd.s32 %v2718_v34, %v2716_v44  ;;  %3462 = vmatprep.mubr.msk.f32.mxu1 %vm2639_vm10, %v3088_v54 }
0x11e1   :  { %vm2723_vm7 = vcmp.eq.s32.totalorder %v4105_v27, %v2719_v45 }
0x11e2   :  { %v3089_v11 = vsel %vm2723_vm7, 1.0, %v3632_v17 }
0x11e3   :  { %3463 = vmatmul.mubr.msk.f32.gmra.mxu1 %vm2639_vm10, %v3089_v11 }
0x129c   :  { %v3461_v59 = vpop.f32.mrf.mxu1 }
0x129d   :  { %v2830_v46 = vsub.f32 %v4088_v21, %v3461_v59  ;;  %2862 = vst.msk [vmem:[%s2961_s3 + $0x8] sm:$0xff] %vm148_vm0, %v3461_v59 }
0x129e   :  { %v2810_v51 = vpop.f32.mrf.mxu1 }
0x129f   :  { %v2834_v52 = vmul.f32 %v2830_v46, %v2830_v46  ;;  %v2829_v53 = vsub.f32 %v4085_v19, %v2810_v51  ;;  %2861 = vst.msk [vmem:[%s2961_s3] sm:$0xff] %vm148_vm0, %v2810_v51 }
0x12a1   :  { %v2833_v27 = vmul.f32 %v2829_v53, %v2829_v53  ;;  %v2840_v17 = vsel %vm148_vm0, %v2834_v52, 0.0 }
0x12a2   :  { %2841 = vadd.xlane.f32.xlu1 %v2840_v17 }
0x12a3   :  { %v3464_v57 = vpop.f32.mrf.mxu1  ;;  %v2837_v58 = vsel %vm148_vm0, %v2833_v27, 0.0 }
0x12a4   :  { %v2832_v60 = vsub.f32 %v4097_v18, %v3464_v57  ;;  %2864 = vst.msk [vmem:[%s2961_s3 + $0x18] sm:$0xff] %vm148_vm0, %v3464_v57  ;;  %2838 = vadd.xlane.f32.xlu0 %v2837_v58 }
0x12a5   :  { %v2820_v21 = vpop.f32.mrf.mxu1 }
0x12a6   :  { %v2836_v7 = vmul.f32 %v2832_v60, %v2832_v60  ;;  %v2831_v61 = vsub.f32 %v4094_v6, %v2820_v21  ;;  %2863 = vst.msk [vmem:[%s2961_s3 + $0x10] sm:$0xff] %vm148_vm0, %v2820_v21 }
0x12a8   :  { %v2835_v19 = vmul.f32 %v2831_v61, %v2831_v61  ;;  %v2846_v62 = vsel %vm148_vm0, %v2836_v7, 0.0 }
0x12a9   :  { %2847 = vadd.xlane.f32.xlu1 %v2846_v62 }
0x12aa   :  { %v2843_v12 = vsel %vm148_vm0, %v2835_v19, 0.0 }
0x12ab   :  { %2844 = vadd.xlane.f32.xlu0 %v2843_v12 }
0x12ba   :  { %2872 = vperm.xlu1 %3510, %v4001_v49  }
0x12be   :  { %2877 = vperm.xlu1 %3510, %v4005_v55  }
0x12c1   :  { %2867 = vperm.xlu0 %3504, %v3999_v48  }
0x12c5   :  { %2882 = vperm.xlu0 %3504, %v4007_v56  }
0x132b   :  { %v2842_v18 = vpop.xlane.xlu1 %2841 }
0x132c   :  { %v2850_v63 = vmul.f32 0.03125, %v2842_v18 }
0x132d   :  { %v2839_v6 = vpop.xlane.xlu0 %2838 }
0x132e   :  { %v2854_v1 = vmul.f32 1.25, %v2850_v63  ;;  %v2849_v0 = vmul.f32 0.03125, %v2839_v6 }
0x1330   :  { %v2858_v2 = vmul.f32 %v4033_v13, %v2854_v1  ;;  %v2853_v3 = vmul.f32 1.25, %v2849_v0 }
0x1332   :  { %v2857_v49 = vmul.f32 %v4031_v33, %v2853_v3  ;;  %2900 = vperm.xlu0 %3504, %v2858_v2   ;;  %v2848_v55 = vpop.xlane.xlu1 %2847 }
0x1333   :  { %v2852_v48 = vmul.f32 0.03125, %v2848_v55 }
0x1334   :  { %2895 = vperm.xlu1 %3510, %v2857_v49   ;;  %v2845_v56 = vpop.xlane.xlu0 %2844 }
0x1335   :  { %v2856_v4 = vmul.f32 1.25, %v2852_v48  ;;  %v2851_v5 = vmul.f32 0.03125, %v2845_v56 }
0x1336   :  { %v2873_v9 = vpop.permute.xlu1 %2872 }
0x1337   :  { %v2860_v10 = vmul.f32 %v4043_v25, %v2856_v4  ;;  %v2855_v14 = vmul.f32 1.25, %v2851_v5  ;;  %2890 = vst [vmem:[%s2962_s7 + $0x8] sm:$0xff] %v2873_v9 }
0x1339   :  { %v2859_v15 = vmul.f32 %v4038_v36, %v2855_v14  ;;  %2910 = vperm.xlu0 %3504, %v2860_v10  }
0x133a   :  { %v2878_v20 = vpop.permute.xlu1 %2877 }
0x133b   :  { %2891 = vst [vmem:[%s2962_s7 + $0x10] sm:$0xff] %v2878_v20  ;;  %2905 = vperm.xlu1 %3510, %v2859_v15  }
0x133c   :  { %v2868_v13 = vpop.permute.xlu0 %2867 }
0x133d   :  { %2889 = vst [vmem:[%s2962_s7] sm:$0xff] %v2868_v13 }
0x1340   :  { %v2883_v33 = vpop.permute.xlu0 %2882 }
0x1341   :  { %2892 = vst [vmem:[%s2962_s7 + $0x18] sm:$0xff] %v2883_v33 }
0x13ad   :  { %v2901_v22 = vpop.permute.xlu0 %2900 }
0x13ae   :  { %2918 = vst [vmem:[%s2963_s12 + $0x8] sm:$0xff] %v2901_v22 }
0x13af   :  { %v2896_v25 = vpop.permute.xlu1 %2895 }
0x13b0   :  { %2917 = vst [vmem:[%s2963_s12] sm:$0xff] %v2896_v25 }
0x13b4   :  { %v2911_v8 = vpop.permute.xlu0 %2910 }
0x13b5   :  { %2920 = vst [vmem:[%s2963_s12 + $0x18] sm:$0xff] %v2911_v8 }
0x13b6   :  { %v2906_v36 = vpop.permute.xlu1 %2905 }
0x13b7   :  { %2919 = vst [vmem:[%s2963_s12 + $0x10] sm:$0xff] %v2906_v36 }

// kernel: forward.3
= control target key start
LH: loop header
LB: loop body
LE: loop exit
PB: predicated region body
PF: predicated region fallthrough
CT: control target
= control target key end

     0   :  { %vm91_vm0 = vcmask 392192   ;;  %vm203_vm1 = vcmask 261120   ;;  %vm577_vm2 = vcmask 64512   ;;  %s9671_s2 = inlined_call_operand.vmem [shape: f32[48,32], index: 2, kind: input, shape index: {}]   ;;  %s9672_s0 = inlined_call_operand.vmem [shape: f32[32,48], index: 0, kind: input, shape index: {}]   ;;  %s9673_s3 = inlined_call_operand.vmem [shape: f32[1,32], index: 3, kind: input, shape index: {}]   ;;  %s9674_s4 = inlined_call_operand.vmem [shape: f32[32,32], index: 4, kind: input, shape index: {}]   ;;  %s9675_s7 = inlined_call_operand.vmem [shape: f32[8,32,8], index: 7, kind: input, shape index: {}]   ;;  %s9676_s11 = inlined_call_operand.vmem [shape: f32[8,32,8], index: 11, kind: input, shape index: {}]   ;;  %s9677_s9 = inlined_call_operand.vmem [shape: f32[8,32,8], index: 9, kind: input, shape index: {}]   ;;  %s9678_s5 = inlined_call_operand.vmem [shape: f32[2,1,32], index: 5, kind: input, shape index: {}]   ;;  %s9679_s6 = inlined_call_operand.vmem [shape: f32[2,1,32], index: 6, kind: input, shape index: {}]   ;;  %s9680_s8 = inlined_call_operand.vmem [shape: f32[8,1,8], index: 8, kind: input, shape index: {}]   ;;  %s9681_s12 = inlined_call_operand.vmem [shape: f32[8,1,8], index: 12, kind: input, shape index: {}]   ;;  %s9682_s10 = inlined_call_operand.vmem [shape: f32[8,1,8], index: 10, kind: input, shape index: {}]   ;;  %s9683_s1 = inlined_call_operand.vmem [shape: f32[32,32], index: 1, kind: input, shape index: {}]   ;;  %s9684_s13 = inlined_call_operand.vmem [shape: f32[8,8,32], index: 13, kind: input, shape index: {}]   ;;  %s9685_s14 = inlined_call_operand.vmem [shape: f32[2,1,32], index: 14, kind: input, shape index: {}]   ;;  %s9686_s17 = inlined_call_operand.vmem [shape: f32[2,32,128], index: 17, kind: input, shape index: {}]   ;;  %s9687_s15 = inlined_call_operand.vmem [shape: f32[2,1,32], index: 15, kind: input, shape index: {}]   ;;  %s9688_s16 = inlined_call_operand.vmem [shape: f32[2,1,32], index: 16, kind: input, shape index: {}]   ;;  %s9689_s19 = inlined_call_operand.vmem [shape: f32[2,128,32], index: 19, kind: input, shape index: {}]   ;;  %s9690_s18 = inlined_call_operand.vmem [shape: f32[2,1,128], index: 18, kind: input, shape index: {}]   ;;  %s9691_s20 = inlined_call_operand.vmem [shape: f32[2,1,32], index: 20, kind: input, shape index: {}]   ;;  %s9692_s21 = inlined_call_operand.vmem [shape: f32[1,32], index: 21, kind: input, shape index: {}]   ;;  %s9693_s22 = inlined_call_operand.vmem [shape: f32[1,32], index: 22, kind: input, shape index: {}]   ;;  %s9694_s23 = inlined_call_operand.vmem [shape: f32[32,32], index: 23, kind: output, shape index: {}]  }
   0x1   :  { %9702 = sst [smem:[#allocation2_spill]] %s9671_s2 }
   0x2   :  { %9703 = sst [smem:[#allocation3_spill]] %s9672_s0 }
   0x3   :  { %9704 = sst [smem:[#allocation4_spill]] %s9673_s3 }
   0x4   :  { %9705 = sst [smem:[#allocation5_spill]] %s9674_s4 }
   0x5   :  { %9706 = sst [smem:[#allocation6_spill]] %s9675_s7 }
   0x6   :  { %9707 = sst [smem:[#allocation7_spill]] %s9676_s11 }
   0x7   :  { %9708 = sst [smem:[#allocation8_spill]] %s9677_s9 }
   0x8   :  { %9709 = sst [smem:[#allocation9_spill]] %s9678_s5 }
   0x9   :  { %s9710_s24 = sld [smem:[#allocation2_spill]] }
   0xa   :  { %s9711_s27 = sld [smem:[#allocation3_spill]] }
   0xb   :  { %s9712_s5 = sld [smem:[#allocation4_spill]] }
   0xc   :  { %s9713_s4 = sld [smem:[#allocation5_spill]] }
   0xd   :  { %s9714_s3 = sld [smem:[#allocation6_spill]] }
   0xe   :  { %s9716_s29 = sld [smem:[#allocation8_spill]] }
   0xf   :  { %v83_v0 = vld [vmem:[%s9710_s24 + $0x28] sm:$0xff]  ;;  %v82_v1 = vld [vmem:[%s9710_s24 + $0x20] sm:$0xff]  ;;  %v81_v2 = vld [vmem:[%s9710_s24 + $0x18] sm:$0xff]  ;;  %s9717_s7 = sld [smem:[#allocation9_spill]] }
  0x10   :  { %7216 = vmatprep.subr.mxu1 %v83_v0  ;;  %v74_v3 = vld [vmem:[%s9711_s27] sm:$0xff]  ;;  %v80_v4 = vld [vmem:[%s9710_s24 + $0x10] sm:$0xff]  ;;  %v79_v5 = vld [vmem:[%s9710_s24 + $0x8] sm:$0xff] }
  0x11   :  { %7217 = vmatpush3.msra.mxu1 %v83_v0  ;;  %7228 = vmatprep.mubr.msk.f32.mxu1 %vm91_vm0, %v74_v3  ;;  %v78_v6 = vld [vmem:[%s9710_s24] sm:$0xff]  ;;  %v75_v7 = vld [vmem:[%s9711_s27 + $0x8] sm:$0xff]  ;;  %v76_v8 = vld [vmem:[%s9711_s27 + $0x10] sm:$0xff] }
  0x12   :  { %7218 = vmatprep.subr.mxu1 %v82_v1  ;;  %v77_v9 = vld [vmem:[%s9711_s27 + $0x18] sm:$0xff]  ;;  %v6374_v11 = vld [vmem:[%s9712_s5] ss:$0 sm:$0xff]  ;;  %v190_v16 = vld [vmem:[%s9713_s4 + $0x8] sm:$0xff]  ;;  %s9715_s5 = sld [smem:[#allocation7_spill]] }
  0x13   :  { %7219 = vmatpush3.msra.mxu1 %v82_v1  ;;  %v189_v13 = vld [vmem:[%s9713_s4] sm:$0xff]  ;;  %v191_v20 = vld [vmem:[%s9713_s4 + $0x10] sm:$0xff]  ;;  %v192_v25 = vld [vmem:[%s9713_s4 + $0x18] sm:$0xff] }
  0x14   :  { %7220 = vmatprep.subr.mxu1 %v81_v2  ;;  %v280_v51 = vld [vmem:[%s9714_s3 + $0x18] sm:$0xff]  ;;  %v279_v53 = vld [vmem:[%s9714_s3 + $0x10] sm:$0xff]  ;;  %v278_v55 = vld [vmem:[%s9714_s3 + $0x8] sm:$0xff] }
  0x15   :  { %7221 = vmatpush3.msra.mxu1 %v81_v2  ;;  %v277_v57 = vld [vmem:[%s9714_s3] sm:$0xff]  ;;  %v388_v59 = vld [vmem:[%s9716_s29 + $0x18] sm:$0xff] }
  0x16   :  { %7222 = vmatprep.subr.mxu1 %v80_v4 }
  0x17   :  { %7223 = vmatpush3.msra.mxu1 %v80_v4 }
  0x18   :  { %7224 = vmatprep.subr.mxu1 %v79_v5  ;;  %v484_v52 = vld [vmem:[%s9715_s5 + $0x18] sm:$0xff]  ;;  %v483_v54 = vld [vmem:[%s9715_s5 + $0x10] sm:$0xff]  ;;  %v482_v56 = vld [vmem:[%s9715_s5 + $0x8] sm:$0xff] }
  0x19   :  { %7225 = vmatpush3.msra.mxu1 %v79_v5  ;;  %7262 = vmatprep.subr.mxu0 %v484_v52  ;;  %v481_v58 = vld [vmem:[%s9715_s5] sm:$0xff] }
  0x1a   :  { %7226 = vmatprep.subr.mxu1 %v78_v6  ;;  %7263 = vmatpush3.msra.mxu0 %v484_v52 }
  0x1b   :  { %7227 = vmatpush3.msra.mxu1 %v78_v6  ;;  %7264 = vmatprep.subr.mxu0 %v483_v54 }
  0x1c   :  { %7229 = vmatmul.mubr.msk.f32.vlgmr.msra.gmra.mxu1 %vm91_vm0, %v75_v7  ;;  %7234 = vmatprep.subr.mxu1 %v280_v51 }
  0x1d   :  { %7231 = vmatprep.mubr.msk.f32.mxu1 %vm91_vm0, %v76_v8  ;;  %7235 = vmatpush3.msra.mxu1 %v280_v51 }
  0x1e   :  { %7236 = vmatprep.subr.mxu1 %v279_v53  ;;  %7265 = vmatpush3.msra.mxu0 %v483_v54 }
  0x1f   :  { %7237 = vmatpush3.msra.mxu1 %v279_v53  ;;  %7266 = vmatprep.subr.mxu0 %v482_v56 }
  0x20   :  { %7232 = vmatmul.mubr.msk.f32.gmra.mxu1 %vm91_vm0, %v77_v9  ;;  %7238 = vmatprep.subr.mxu1 %v278_v55  ;;  %v6379_v9 = vld [vmem:[%s9717_s7] ss:$0 sm:$0xff] }
  0x21   :  { %7239 = vmatpush3.msra.mxu1 %v278_v55  ;;  %7267 = vmatpush3.msra.mxu0 %v482_v56 }
  0x22   :  { %7240 = vmatprep.subr.mxu1 %v277_v57  ;;  %7268 = vmatprep.subr.mxu0 %v481_v58 }
  0x23   :  { %7241 = vmatpush3.msra.mxu1 %v277_v57  ;;  %7269 = vmatpush3.msra.mxu0 %v481_v58  ;;  %v6421_v57 = vld [vmem:[%s9716_s29 + $0x38] sm:$0xff] }
  0x24   :  { %7248 = vmatprep.subr.mxu1 %v388_v59 }
  0xdc   :  { %v7230_v10 = vpop.f32.mrf.mxu1 }
  0xdd   :  { %v176_v14 = vadd.f32 %v7230_v10, %v6374_v11 }
  0xde   :  { %v170_v12 = vpop.f32.mrf.mxu1 }
  0xdf   :  { %v171_v15 = vadd.f32 %v6374_v11, %v170_v12  ;;  %v8322_v21 = vadd.f32 %v190_v16, %v176_v14 }
  0xe0   :  { %v7233_v17 = vpop.f32.mrf.mxu1 }
  0xe1   :  { %v8317_v18 = vadd.f32 %v189_v13, %v171_v15  ;;  %v186_v22 = vadd.f32 %v7233_v17, %v6374_v11  ;;  %v207_v29 = vsel %vm203_vm1, %v8322_v21, 0.0 }
  0xe2   :  { %v180_v19 = vpop.f32.mrf.mxu1 }
  0xe3   :  { %v181_v23 = vadd.f32 %v6374_v11, %v180_v19  ;;  %v204_v24 = vsel %vm203_vm1, %v8317_v18, 0.0  ;;  %v8331_v27 = vadd.f32 %v192_v25, %v186_v22  ;;  %v6380_v11 = vld [vmem:[%s9679_s6] ss:$0 sm:$0xff] }
  0xe4   :  { %205 = vadd.xlane.f32.xlu0 %v204_v24 }
  0xe5   :  { %v8329_v26 = vadd.f32 %v191_v20, %v181_v23  ;;  %v213_v30 = vsel %vm203_vm1, %v8331_v27, 0.0 }
  0xe7   :  { %v210_v28 = vsel %vm203_vm1, %v8329_v26, 0.0 }
  0xe8   :  { %211 = vadd.xlane.f32.xlu1 %v210_v28  ;;  %208 = vadd.xlane.f32.xlu0 %v207_v29  ;;  %v387_v28 = vld [vmem:[%s9716_s29 + $0x10] sm:$0xff] }
  0xec   :  { %214 = vadd.xlane.f32.xlu1 %v213_v30  ;;  %v386_v30 = vld [vmem:[%s9716_s29 + $0x8] sm:$0xff] }
 0x16d   :  { %v206_v31 = vpop.xlane.xlu0 %205 }
 0x16e   :  { %v217_v32 = vmul.f32 0.03125, %v206_v31 }
 0x170   :  { %v8340_v33 = vsub.f32 %v8317_v18, %v217_v32  ;;  %v385_v32 = vld [vmem:[%s9716_s29] sm:$0xff] }
 0x171   :  { %v212_v34 = vpop.xlane.xlu1 %211  ;;  %v209_v35 = vpop.xlane.xlu0 %208 }
 0x172   :  { %v219_v36 = vmul.f32 0.03125, %v212_v34  ;;  %v218_v37 = vmul.f32 0.03125, %v209_v35  ;;  %v225_v38 = vmul.f32 %v8340_v33, %v8340_v33  ;;  %v6381_v35 = vld [vmem:[%s9680_s8] ss:$0 sm:$0xff] }
 0x174   :  { %v8345_v39 = vsub.f32 %v8329_v26, %v219_v36  ;;  %v8348_v40 = vsub.f32 %v8322_v21, %v218_v37  ;;  %v229_v41 = vsel %vm203_vm1, %v225_v38, 0.0 }
 0x175   :  { %v215_v42 = vpop.xlane.xlu1 %214  ;;  %230 = vadd.xlane.f32.xlu0 %v229_v41 }
 0x176   :  { %v220_v43 = vmul.f32 0.03125, %v215_v42  ;;  %v227_v44 = vmul.f32 %v8345_v39, %v8345_v39  ;;  %v226_v45 = vmul.f32 %v8348_v40, %v8348_v40 }
 0x178   :  { %v8356_v46 = vsub.f32 %v8331_v27, %v220_v43  ;;  %v235_v47 = vsel %vm203_vm1, %v227_v44, 0.0  ;;  %v232_v48 = vsel %vm203_vm1, %v226_v45, 0.0 }
 0x179   :  { %236 = vadd.xlane.f32.xlu0 %v235_v47  ;;  %233 = vadd.xlane.f32.xlu1 %v232_v48 }
 0x17a   :  { %v228_v49 = vmul.f32 %v8356_v46, %v8356_v46 }
 0x17c   :  { %v238_v50 = vsel %vm203_vm1, %v228_v49, 0.0 }
 0x17d   :  { %239 = vadd.xlane.f32.xlu1 %v238_v50  ;;  %v6386_v50 = vld [vmem:[%s9682_s10] ss:$0 sm:$0xff] }
 0x1fe   :  { %v231_v60 = vpop.xlane.xlu0 %230 }
 0x1ff   :  { %v241_v61 = vmul.f32 0.03125, %v231_v60  ;;  %v6420_v60 = vld [vmem:[%s9716_s29 + $0x30] sm:$0xff] }
 0x201   :  { %v245_v62 = vadd.f32 1e-05, %v241_v61  ;;  %v6419_v61 = vld [vmem:[%s9716_s29 + $0x28] sm:$0xff] }
 0x202   :  { %v234_v63 = vpop.xlane.xlu1 %233  ;;  %v237_v0 = vpop.xlane.xlu0 %236 }
 0x203   :  { %7962 = vrsqrt.f32 %v245_v62  ;;  %v242_v1 = vmul.f32 0.03125, %v234_v63  ;;  %v243_v2 = vmul.f32 0.03125, %v237_v0  ;;  %v6418_v63 = vld [vmem:[%s9716_s29 + $0x20] sm:$0xff] }
 0x205   :  { %v246_v3 = vadd.f32 1e-05, %v242_v1  ;;  %v247_v4 = vadd.f32 1e-05, %v243_v2  ;;  %v8485_v1 = vld [vmem:[%s9683_s1 + $0x8] sm:$0xff] }
 0x206   :  { %v240_v5 = vpop.xlane.xlu1 %239 }
 0x207   :  { %7964 = vrsqrt.f32 %v246_v3  ;;  %v244_v6 = vmul.f32 0.03125, %v240_v5 }
 0x208   :  { %7966 = vrsqrt.f32 %v247_v4  ;;  %v8490_v4 = vld [vmem:[%s9683_s1] sm:$0xff] }
 0x209   :  { %v248_v7 = vadd.f32 1e-05, %v244_v6 }
 0x20b   :  { %7968 = vrsqrt.f32 %v248_v7 }
 0x210   :  { %v7963_v8 = vpop.eup %7962 }
 0x211   :  { %v253_v10 = vmul.f32 %v7963_v8, %v8340_v33  ;;  %v8496_v8 = vld [vmem:[%s9683_s1 + $0x18] sm:$0xff] }
 0x213   :  { %v263_v12 = vmul.f32 %v6379_v9, %v253_v10 }
 0x214   :  { %v7965_v13 = vpop.eup %7964 }
 0x215   :  { %v7967_v14 = vpop.eup %7966  ;;  %v8397_v15 = vadd.f32 %v6380_v11, %v263_v12  ;;  %v254_v16 = vmul.f32 %v7965_v13, %v8348_v40  ;;  %v6391_v40 = vld [vmem:[%s9681_s12] ss:$0 sm:$0xff]  ;;  %v8503_v13 = vld [vmem:[%s9683_s1 + $0x10] sm:$0xff] }
 0x216   :  { %v255_v17 = vmul.f32 %v7967_v14, %v8345_v39 }
 0x217   :  { %v264_v19 = vmul.f32 %v6379_v9, %v254_v16  ;;  %7242 = vmatprep.mubr.msk.f32.mxu1 %vm203_vm1, %v8397_v15  ;;  %7270 = vmatprep.mubr.msk.f32.mxu0 %vm203_vm1, %v8397_v15 }
 0x218   :  { %v7969_v20 = vpop.eup %7968  ;;  %v265_v22 = vmul.f32 %v6379_v9, %v255_v17 }
 0x219   :  { %v8405_v23 = vadd.f32 %v6380_v11, %v264_v19  ;;  %v256_v24 = vmul.f32 %v7969_v20, %v8356_v46 }
 0x21a   :  { %v8408_v25 = vadd.f32 %v6380_v11, %v265_v22 }
 0x21b   :  { %v266_v29 = vmul.f32 %v6379_v9, %v256_v24  ;;  %7243 = vmatmul.mubr.msk.f32.vlgmr.msra.gmra.mxu1 %vm203_vm1, %v8405_v23  ;;  %7271 = vmatmul.mubr.msk.f32.vlgmr.msra.gmra.mxu0 %vm203_vm1, %v8405_v23 }
 0x21c   :  { %7249 = vmatpush3.msra.mxu1 %v388_v59  ;;  %7245 = vmatprep.mubr.msk.f32.mxu1 %vm203_vm1, %v8408_v25 }
 0x21d   :  { %v8422_v31 = vadd.f32 %v6380_v11, %v266_v29  ;;  %7250 = vmatprep.subr.mxu1 %v387_v28  ;;  %7273 = vmatprep.mubr.msk.f32.mxu0 %vm203_vm1, %v8408_v25  ;;  %v6423_v29 = vld [vmem:[%s9682_s10 + $0x1] ss:$0 sm:$0xff] }
 0x21e   :  { %7251 = vmatpush3.msra.mxu1 %v387_v28 }
 0x21f   :  { %7252 = vmatprep.subr.mxu1 %v386_v30  ;;  %7246 = vmatmul.mubr.msk.f32.gmra.mxu1 %vm203_vm1, %v8422_v31 }
 0x220   :  { %7253 = vmatpush3.msra.mxu1 %v386_v30  ;;  %7274 = vmatmul.mubr.msk.f32.gmra.mxu0 %vm203_vm1, %v8422_v31 }
 0x221   :  { %7254 = vmatprep.subr.mxu1 %v385_v32  ;;  %7256 = vmatprep.mubr.msk.f32.mxu1 %vm203_vm1, %v8397_v15 }
 0x222   :  { %7255 = vmatpush3.msra.mxu1 %v385_v32 }
 0x223   :  { %7257 = vmatmul.mubr.msk.f32.vlgmr.msra.gmra.mxu1 %vm203_vm1, %v8405_v23 }
 0x224   :  { %7259 = vmatprep.mubr.msk.f32.mxu1 %vm203_vm1, %v8408_v25 }
 0x227   :  { %7260 = vmatmul.mubr.msk.f32.gmra.mxu1 %vm203_vm1, %v8422_v31 }
 0x2db   :  { %v7244_v33 = vpop.f32.mrf.mxu1  ;;  %v7272_v34 = vpop.f32.mrf.mxu0 }
 0x2dc   :  { %v564_v47 = vadd.f32 %v7272_v34, %v6391_v40  ;;  %v372_v58 = vadd.f32 %v7244_v33, %v6381_v35 }
 0x2dd   :  { %v366_v36 = vpop.f32.mrf.mxu1  ;;  %v558_v37 = vpop.f32.mrf.mxu0 }
 0x2de   :  { %v367_v38 = vadd.f32 %v6381_v35, %v366_v36  ;;  %v559_v49 = vadd.f32 %v6391_v40, %v558_v37 }
 0x2df   :  { %v7247_v39 = vpop.f32.mrf.mxu1 }
 0x2e0   :  { %v7275_v41 = vpop.f32.mrf.mxu0  ;;  %7284 = vmatprep.mubr.msk.f32.mxu1 %vm577_vm2, %v367_v38  ;;  %v382_v62 = vadd.f32 %v7247_v39, %v6381_v35 }
 0x2e1   :  { %v574_v42 = vadd.f32 %v7275_v41, %v6391_v40  ;;  %v376_v43 = vpop.f32.mrf.mxu1 }
 0x2e2   :  { %v568_v44 = vpop.f32.mrf.mxu0  ;;  %v377_v59 = vadd.f32 %v6381_v35, %v376_v43 }
 0x2e3   :  { %v569_v45 = vadd.f32 %v6391_v40, %v568_v44  ;;  %7290 = vmatprep.subr.mxu0 %v574_v42  ;;  %v7258_v46 = vpop.f32.mrf.mxu1 }
 0x2e4   :  { %7291 = vmatpush3.msra.mxu0 %v574_v42  ;;  %v468_v55 = vadd.f32 %v7258_v46, %v6386_v50 }
 0x2e5   :  { %7292 = vmatprep.subr.mxu0 %v569_v45  ;;  %v462_v48 = vpop.f32.mrf.mxu1 }
 0x2e6   :  { %7293 = vmatpush3.msra.mxu0 %v569_v45  ;;  %v463_v56 = vadd.f32 %v6386_v50, %v462_v48 }
 0x2e7   :  { %7294 = vmatprep.subr.mxu0 %v564_v47  ;;  %v7261_v51 = vpop.f32.mrf.mxu1 }
 0x2e8   :  { %v478_v52 = vadd.f32 %v7261_v51, %v6386_v50  ;;  %7295 = vmatpush3.msra.mxu0 %v564_v47 }
 0x2e9   :  { %7296 = vmatprep.subr.mxu0 %v559_v49  ;;  %v472_v53 = vpop.f32.mrf.mxu1 }
 0x2ea   :  { %v473_v54 = vadd.f32 %v6386_v50, %v472_v53  ;;  %7297 = vmatpush3.msra.mxu0 %v559_v49  ;;  %7276 = vmatprep.subr.msk.mxu1 %vm577_vm2, %v478_v52 }
 0x2eb   :  { %7277 = vmatpush3.xpose.msk.msra.mxu1 %vm577_vm2, %v478_v52 }
 0x2ec   :  { %7278 = vmatprep.subr.msk.mxu1 %vm577_vm2, %v473_v54 }
 0x2ef   :  { %7279 = vmatpush3.xpose.msk.msra.mxu1 %vm577_vm2, %v473_v54 }
 0x2f0   :  { %7280 = vmatprep.subr.msk.mxu1 %vm577_vm2, %v468_v55 }
 0x2f3   :  { %7281 = vmatpush3.xpose.msk.msra.mxu1 %vm577_vm2, %v468_v55 }
 0x2f4   :  { %7282 = vmatprep.subr.msk.mxu1 %vm577_vm2, %v463_v56 }
 0x2f7   :  { %7283 = vmatpush3.xpose.msk.msra.mxu1 %vm577_vm2, %v463_v56 }
 0x2f8   :  { %7318 = vmatprep.subr.mxu1 %v6421_v57 }
 0x2fa   :  { %7285 = vmatmul.mubr.msk.f32.vlgmr.msra.gmra.mxu1 %vm577_vm2, %v372_v58 }
 0x2fb   :  { %7287 = vmatprep.mubr.msk.f32.mxu1 %vm577_vm2, %v377_v59  ;;  %7319 = vmatpush3.msra.mxu1 %v6421_v57  ;;  %v6411_v57 = vld [vmem:[%s9714_s3 + $0x38] sm:$0xff] }
 0x2fc   :  { %7320 = vmatprep.subr.mxu1 %v6420_v60  ;;  %7304 = vmatprep.subr.mxu0 %v6411_v57 }
 0x2fd   :  { %7321 = vmatpush3.msra.mxu1 %v6420_v60 }
 0x2fe   :  { %7288 = vmatmul.mubr.msk.f32.gmra.mxu1 %vm577_vm2, %v382_v62  ;;  %7322 = vmatprep.subr.mxu1 %v6419_v61 }
 0x2ff   :  { %7323 = vmatpush3.msra.mxu1 %v6419_v61  ;;  %7326 = vmatprep.mubr.msk.f32.mxu1 %vm203_vm1, %v8397_v15 }
 0x300   :  { %7324 = vmatprep.subr.mxu1 %v6418_v63 }
 0x301   :  { %7325 = vmatpush3.msra.mxu1 %v6418_v63 }
 0x302   :  { %7327 = vmatmul.mubr.msk.f32.vlgmr.msra.gmra.mxu1 %vm203_vm1, %v8405_v23 }
 0x303   :  { %7329 = vmatprep.mubr.msk.f32.mxu1 %vm203_vm1, %v8408_v25 }
 0x306   :  { %7330 = vmatmul.mubr.msk.f32.gmra.mxu1 %vm203_vm1, %v8422_v31 }
 0x3ba   :  { %v7286_v0 = vpop.f32.mrf.mxu1 }
 0x3bb   :  { %v688_v2 = vmul.f32 0.35355338, %v7286_v0 }
 0x3bc   :  { %v668_v3 = vpop.f32.mrf.mxu1 }
 0x3bd   :  { %v687_v5 = vmul.f32 0.35355338, %v668_v3  ;;  %v692_v6 = vadd.f32 %v688_v2, %v8485_v1 }
 0x3be   :  { %v7289_v7 = vpop.f32.mrf.mxu1 }
 0x3bf   :  { %v690_v9 = vmul.f32 0.35355338, %v7289_v7  ;;  %v698_v10 = vsel %vm203_vm1, %v692_v6, -inf  ;;  %v691_v11 = vadd.f32 %v687_v5, %v8490_v4  ;;  %v6410_v5 = vld [vmem:[%s9714_s3 + $0x30] sm:$0xff] }
 0x3c0   :  { %699 = vmax.xlane.f32.xlu1 %v698_v10  ;;  %v678_v12 = vpop.f32.mrf.mxu1 }
 0x3c1   :  { %v689_v14 = vmul.f32 0.35355338, %v678_v12  ;;  %v695_v16 = vsel %vm203_vm1, %v691_v11, -inf  ;;  %v694_v17 = vadd.f32 %v690_v9, %v8496_v8  ;;  %v6409_v9 = vld [vmem:[%s9714_s3 + $0x28] sm:$0xff]  ;;  %v6431_v12 = vld [vmem:[%s9715_s5 + $0x38] sm:$0xff] }
 0x3c2   :  { %696 = vmax.xlane.f32.xlu0 %v695_v16  ;;  %v7328_v19 = vpop.f32.mrf.mxu1  ;;  %v6429_v16 = vld [vmem:[%s9715_s5 + $0x28] sm:$0xff] }
 0x3c3   :  { %v704_v20 = vsel %vm203_vm1, %v694_v17, -inf  ;;  %v693_v22 = vadd.f32 %v689_v14, %v8503_v13  ;;  %v1020_v35 = vadd.f32 %v7328_v19, %v6423_v29  ;;  %v6430_v14 = vld [vmem:[%s9715_s5 + $0x30] sm:$0xff]  ;;  %v836_v19 = vld [vmem:[%s9684_s13] sm:$0xff] }
 0x3c4   :  { %705 = vmax.xlane.f32.xlu1 %v704_v20  ;;  %v1014_v24 = vpop.f32.mrf.mxu1 }
 0x3c5   :  { %v701_v28 = vsel %vm203_vm1, %v693_v22, -inf  ;;  %v1015_v36 = vadd.f32 %v6423_v29, %v1014_v24 }
 0x3c6   :  { %v7331_v30 = vpop.f32.mrf.mxu1  ;;  %702 = vmax.xlane.f32.xlu0 %v701_v28 }
 0x3c7   :  { %v1030_v32 = vadd.f32 %v7331_v30, %v6423_v29  ;;  %v6413_v30 = vld [vmem:[%s9680_s8 + $0x1] ss:$0 sm:$0xff] }
 0x3c8   :  { %v1024_v33 = vpop.f32.mrf.mxu1 }
 0x3c9   :  { %v1025_v34 = vadd.f32 %v6423_v29, %v1024_v33  ;;  %7346 = vmatprep.subr.msk.mxu1 %vm577_vm2, %v1030_v32 }
 0x3ca   :  { %7347 = vmatpush3.xpose.msk.msra.mxu1 %vm577_vm2, %v1030_v32 }
 0x3cb   :  { %7348 = vmatprep.subr.msk.mxu1 %vm577_vm2, %v1025_v34 }
 0x3ce   :  { %7349 = vmatpush3.xpose.msk.msra.mxu1 %vm577_vm2, %v1025_v34 }
 0x3cf   :  { %7350 = vmatprep.subr.msk.mxu1 %vm577_vm2, %v1020_v35 }
 0x3d2   :  { %7351 = vmatpush3.xpose.msk.msra.mxu1 %vm577_vm2, %v1020_v35 }
 0x3d3   :  { %7352 = vmatprep.subr.msk.mxu1 %vm577_vm2, %v1015_v36 }
 0x3d6   :  { %7353 = vmatpush3.xpose.msk.msra.mxu1 %vm577_vm2, %v1015_v36  ;;  %v6472_v36 = vld [vmem:[%s9716_s29 + $0x58] sm:$0xff] }
 0x3d7   :  { %7382 = vmatprep.subr.mxu1 %v836_v19 }
 0x449   :  { %v700_v37 = vpop.xlane.xlu1 %699 }
 0x44a   :  { %v708_v38 = vsub.f32 %v692_v6, %v700_v37 }
 0x44b   :  { %v697_v39 = vpop.xlane.xlu0 %696 }
 0x44c   :  { %v713_v40 = vmul.f32 1.442695, %v708_v38  ;;  %v707_v41 = vsub.f32 %v691_v11, %v697_v39  ;;  %v6408_v11 = vld [vmem:[%s9714_s3 + $0x20] sm:$0xff] }
 0x44d   :  { %v706_v42 = vpop.xlane.xlu1 %705 }
 0x44e   :  { %7970 = vpow2.f32 %v713_v40  ;;  %v711_v43 = vmul.f32 1.442695, %v707_v41  ;;  %v710_v44 = vsub.f32 %v694_v17, %v706_v42  ;;  %v6428_v17 = vld [vmem:[%s9715_s5 + $0x20] sm:$0xff] }
 0x44f   :  { %v703_v45 = vpop.xlane.xlu0 %702  ;;  %v6433_v42 = vld [vmem:[%s9681_s12 + $0x1] ss:$0 sm:$0xff] }
 0x450   :  { %7972 = vpow2.f32 %v711_v43  ;;  %v717_v46 = vmul.f32 1.442695, %v710_v44  ;;  %v709_v47 = vsub.f32 %v693_v22, %v703_v45 }
 0x452   :  { %7974 = vpow2.f32 %v717_v46  ;;  %v715_v48 = vmul.f32 1.442695, %v709_v47  ;;  %v6471_v46 = vld [vmem:[%s9716_s29 + $0x50] sm:$0xff] }
 0x454   :  { %7976 = vpow2.f32 %v715_v48  ;;  %v6470_v48 = vld [vmem:[%s9716_s29 + $0x48] sm:$0xff] }
 0x45b   :  { %v7971_v49 = vpop.eup %7970 }
 0x45c   :  { %v722_v50 = vsel %vm203_vm1, %v7971_v49, 0.0 }
 0x45d   :  { %v7973_v51 = vpop.eup %7972  ;;  %723 = vadd.xlane.f32.xlu1 %v722_v50  ;;  %v6469_v50 = vld [vmem:[%s9716_s29 + $0x40] sm:$0xff] }
 0x45e   :  { %v719_v52 = vsel %vm203_vm1, %v7973_v51, 0.0 }
 0x45f   :  { %v7975_v53 = vpop.eup %7974  ;;  %720 = vadd.xlane.f32.xlu0 %v719_v52 }
 0x460   :  { %v728_v54 = vsel %vm203_vm1, %v7975_v53, 0.0 }
 0x461   :  { %v7977_v55 = vpop.eup %7976  ;;  %729 = vadd.xlane.f32.xlu1 %v728_v54 }
 0x462   :  { %v725_v56 = vsel %vm203_vm1, %v7977_v55, 0.0 }
 0x463   :  { %726 = vadd.xlane.f32.xlu0 %v725_v56 }
 0x4e6   :  { %v724_v58 = vpop.xlane.xlu1 %723 }
 0x4e7   :  { %7978 = vrcp.f32 %v724_v58 }
 0x4e8   :  { %v721_v59 = vpop.xlane.xlu0 %720 }
 0x4e9   :  { %7980 = vrcp.f32 %v721_v59 }
 0x4ea   :  { %v730_v60 = vpop.xlane.xlu1 %729 }
 0x4eb   :  { %7982 = vrcp.f32 %v730_v60 }
 0x4ec   :  { %v727_v61 = vpop.xlane.xlu0 %726 }
 0x4ed   :  { %7984 = vrcp.f32 %v727_v61 }
 0x4f4   :  { %v7979_v62 = vpop.eup %7978 }
 0x4f5   :  { %v736_v2 = vmul.f32 %v7979_v62, %v7971_v49 }
 0x4f6   :  { %v7981_v63 = vpop.eup %7980 }
 0x4f7   :  { %v735_v0 = vmul.f32 %v7981_v63, %v7973_v51 }
 0x4f8   :  { %v7983_v3 = vpop.eup %7982 }
 0x4f9   :  { %7298 = vmatprep.mubr.msk.f32.mxu0 %vm203_vm1, %v735_v0  ;;  %v738_v10 = vmul.f32 %v7983_v3, %v7975_v53 }
 0x4fa   :  { %v7985_v6 = vpop.eup %7984  ;;  %7299 = vmatmul.mubr.msk.f32.vlgmr.msra.gmra.mxu0 %vm203_vm1, %v736_v2 }
 0x4fb   :  { %7305 = vmatpush3.msra.mxu0 %v6411_v57  ;;  %v737_v7 = vmul.f32 %v7985_v6, %v7977_v55 }
 0x4fc   :  { %7306 = vmatprep.subr.mxu0 %v6410_v5 }
 0x4fd   :  { %7307 = vmatpush3.msra.mxu0 %v6410_v5  ;;  %7301 = vmatprep.mubr.msk.f32.mxu0 %vm203_vm1, %v737_v7 }
 0x4fe   :  { %7308 = vmatprep.subr.mxu0 %v6409_v9  ;;  %7302 = vmatmul.mubr.msk.f32.gmra.mxu0 %vm203_vm1, %v738_v10 }
 0x4ff   :  { %7309 = vmatpush3.msra.mxu0 %v6409_v9  ;;  %7312 = vmatprep.mubr.msk.f32.mxu0 %vm203_vm1, %v8397_v15 }
 0x500   :  { %7310 = vmatprep.subr.mxu0 %v6408_v11 }
 0x501   :  { %7311 = vmatpush3.msra.mxu0 %v6408_v11 }
 0x502   :  { %7313 = vmatmul.mubr.msk.f32.vlgmr.msra.gmra.mxu0 %vm203_vm1, %v8405_v23  ;;  %7332 = vmatprep.subr.mxu0 %v6431_v12 }
 0x503   :  { %7315 = vmatprep.mubr.msk.f32.mxu0 %vm203_vm1, %v8408_v25  ;;  %7333 = vmatpush3.msra.mxu0 %v6431_v12 }
 0x504   :  { %7334 = vmatprep.subr.mxu0 %v6430_v14 }
 0x505   :  { %7335 = vmatpush3.msra.mxu0 %v6430_v14  ;;  %v6474_v14 = vld [vmem:[%s9682_s10 + $0x2] ss:$0 sm:$0xff] }
 0x506   :  { %7316 = vmatmul.mubr.msk.f32.gmra.mxu0 %vm203_vm1, %v8422_v31  ;;  %7336 = vmatprep.subr.mxu0 %v6429_v16 }
 0x507   :  { %7337 = vmatpush3.msra.mxu0 %v6429_v16  ;;  %7340 = vmatprep.mubr.msk.f32.mxu0 %vm203_vm1, %v8397_v15 }
 0x508   :  { %7338 = vmatprep.subr.mxu0 %v6428_v17 }
 0x509   :  { %7339 = vmatpush3.msra.mxu0 %v6428_v17 }
 0x50a   :  { %7341 = vmatmul.mubr.msk.f32.vlgmr.msra.gmra.mxu0 %vm203_vm1, %v8405_v23 }
 0x50b   :  { %7343 = vmatprep.mubr.msk.f32.mxu0 %vm203_vm1, %v8408_v25 }
 0x50e   :  { %7344 = vmatmul.mubr.msk.f32.gmra.mxu0 %vm203_vm1, %v8422_v31 }
 0x5ba   :  { %v7300_v20 = vpop.f32.mrf.mxu0 }
 0x5bc   :  { %v817_v22 = vpop.f32.mrf.mxu0 }
 0x5be   :  { %v7303_v24 = vpop.f32.mrf.mxu0 }
 0x5c0   :  { %v827_v28 = vpop.f32.mrf.mxu0 }
 0x5c2   :  { %v7314_v29 = vpop.f32.mrf.mxu0 }
 0x5c3   :  { %v922_v34 = vadd.f32 %v7314_v29, %v6413_v30 }
 0x5c4   :  { %v916_v32 = vpop.f32.mrf.mxu0 }
 0x5c5   :  { %v917_v33 = vadd.f32 %v6413_v30, %v916_v32 }
 0x5c6   :  { %v7317_v35 = vpop.f32.mrf.mxu0 }
 0x5c7   :  { %7354 = vmatprep.mubr.msk.f32.mxu1 %vm577_vm2, %v917_v33  ;;  %v932_v39 = vadd.f32 %v7317_v35, %v6413_v30 }
 0x5c8   :  { %v926_v37 = vpop.f32.mrf.mxu0  ;;  %7355 = vmatmul.mubr.msk.f32.vlgmr.msra.gmra.mxu1 %vm577_vm2, %v922_v34 }
 0x5c9   :  { %v927_v38 = vadd.f32 %v6413_v30, %v926_v37  ;;  %7383 = vmatpush3.msra.mxu1 %v836_v19 }
 0x5ca   :  { %v7342_v40 = vpop.f32.mrf.mxu0  ;;  %7404 = vmatprep.subr.mxu1 %v6472_v36 }
 0x5cb   :  { %7357 = vmatprep.mubr.msk.f32.mxu1 %vm577_vm2, %v927_v38  ;;  %v1118_v49 = vadd.f32 %v7342_v40, %v6433_v42 }
 0x5cc   :  { %v1112_v41 = vpop.f32.mrf.mxu0  ;;  %7358 = vmatmul.mubr.msk.f32.gmra.mxu1 %vm577_vm2, %v932_v39 }
 0x5cd   :  { %7384 = vmatprep.mubr.msk.f32.mxu1 %vm577_vm2, %v817_v22  ;;  %v1113_v51 = vadd.f32 %v6433_v42, %v1112_v41 }
 0x5ce   :  { %v7345_v43 = vpop.f32.mrf.mxu0 }
 0x5cf   :  { %v1128_v44 = vadd.f32 %v7345_v43, %v6433_v42 }
 0x5d0   :  { %v1122_v45 = vpop.f32.mrf.mxu0  ;;  %7385 = vmatmul.mubr.msk.f32.vlgmr.msra.gmra.mxu1 %vm577_vm2, %v7300_v20 }
 0x5d1   :  { %v1123_v47 = vadd.f32 %v6433_v42, %v1122_v45  ;;  %7360 = vmatprep.subr.mxu0 %v1128_v44  ;;  %7387 = vmatprep.mubr.msk.f32.mxu1 %vm577_vm2, %v827_v28 }
 0x5d2   :  { %7405 = vmatpush3.msra.mxu1 %v6472_v36  ;;  %7361 = vmatpush3.msra.mxu0 %v1128_v44 }
 0x5d3   :  { %7406 = vmatprep.subr.mxu1 %v6471_v46  ;;  %7362 = vmatprep.subr.mxu0 %v1123_v47 }
 0x5d4   :  { %7407 = vmatpush3.msra.mxu1 %v6471_v46  ;;  %7363 = vmatpush3.msra.mxu0 %v1123_v47 }
 0x5d5   :  { %7388 = vmatmul.mubr.msk.f32.gmra.mxu1 %vm577_vm2, %v7303_v24  ;;  %7408 = vmatprep.subr.mxu1 %v6470_v48 }
 0x5d6   :  { %7364 = vmatprep.subr.mxu0 %v1118_v49  ;;  %7409 = vmatpush3.msra.mxu1 %v6470_v48 }
 0x5d7   :  { %7412 = vmatprep.mubr.msk.f32.mxu1 %vm203_vm1, %v8397_v15  ;;  %7365 = vmatpush3.msra.mxu0 %v1118_v49  ;;  %v6450_v49 = vld [vmem:[%s9684_s13 + $0x8] sm:$0xff] }
 0x5d8   :  { %7410 = vmatprep.subr.mxu1 %v6469_v50  ;;  %7366 = vmatprep.subr.mxu0 %v1113_v51 }
 0x5d9   :  { %7411 = vmatpush3.msra.mxu1 %v6469_v50  ;;  %7367 = vmatpush3.msra.mxu0 %v1113_v51 }
 0x5da   :  { %7413 = vmatmul.mubr.msk.f32.vlgmr.msra.gmra.mxu1 %vm203_vm1, %v8405_v23  ;;  %7374 = vmatprep.subr.mxu0 %v6450_v49 }
 0x5db   :  { %7415 = vmatprep.mubr.msk.f32.mxu1 %vm203_vm1, %v8408_v25 }
 0x5de   :  { %7416 = vmatmul.mubr.msk.f32.gmra.mxu1 %vm203_vm1, %v8422_v31 }
 0x688   :  { %v7356_v52 = vpop.f32.mrf.mxu1 }
 0x689   :  { %v1241_v53 = vmul.f32 0.35355338, %v7356_v52 }
 0x68a   :  { %v1221_v54 = vpop.f32.mrf.mxu1 }
 0x68b   :  { %v1240_v55 = vmul.f32 0.35355338, %v1221_v54  ;;  %v1245_v56 = vadd.f32 %v1241_v53, %v8485_v1 }
 0x68c   :  { %v7359_v57 = vpop.f32.mrf.mxu1 }
 0x68d   :  { %v1243_v58 = vmul.f32 0.35355338, %v7359_v57  ;;  %v1251_v59 = vsel %vm203_vm1, %v1245_v56, -inf  ;;  %v1244_v60 = vadd.f32 %v1240_v55, %v8490_v4 }
 0x68e   :  { %1252 = vmax.xlane.f32.xlu1 %v1251_v59  ;;  %v1231_v61 = vpop.f32.mrf.mxu1 }
 0x68f   :  { %v1242_v62 = vmul.f32 0.35355338, %v1231_v61  ;;  %v1248_v63 = vsel %vm203_vm1, %v1244_v60, -inf  ;;  %v1247_v0 = vadd.f32 %v1243_v58, %v8496_v8 }
 0x690   :  { %1249 = vmax.xlane.f32.xlu0 %v1248_v63  ;;  %v8611_v2 = vpop.f32.mrf.mxu1 }
 0x691   :  { %v1257_v3 = vsel %vm203_vm1, %v1247_v0, -inf  ;;  %v1246_v5 = vadd.f32 %v1242_v62, %v8503_v13  ;;  %v6462_v62 = vld [vmem:[%s9714_s3 + $0x58] sm:$0xff] }
 0x692   :  { %1258 = vmax.xlane.f32.xlu1 %v1257_v3  ;;  %v8615_v6 = vpop.f32.mrf.mxu1  ;;  %v6461_v3 = vld [vmem:[%s9714_s3 + $0x50] sm:$0xff] }
 0x693   :  { %v1254_v7 = vsel %vm203_vm1, %v1246_v5, -inf }
 0x694   :  { %1255 = vmax.xlane.f32.xlu0 %v1254_v7  ;;  %v6460_v7 = vld [vmem:[%s9714_s3 + $0x48] sm:$0xff] }
 0x695   :  { %v8618_v9 = vpop.f32.mrf.mxu1 }
 0x697   :  { %v8620_v10 = vpop.f32.mrf.mxu1 }
 0x69a   :  { %v7414_v11 = vpop.f32.mrf.mxu1 }
 0x69b   :  { %v1768_v22 = vadd.f32 %v7414_v11, %v6474_v14 }
 0x69c   :  { %v1762_v12 = vpop.f32.mrf.mxu1 }
 0x69d   :  { %v1763_v24 = vadd.f32 %v6474_v14, %v1762_v12  ;;  %v6459_v12 = vld [vmem:[%s9714_s3 + $0x40] sm:$0xff] }
 0x69e   :  { %v7417_v16 = vpop.f32.mrf.mxu1 }
 0x69f   :  { %v1778_v17 = vadd.f32 %v7417_v16, %v6474_v14  ;;  %v6481_v16 = vld [vmem:[%s9715_s5 + $0x50] sm:$0xff] }
 0x6a0   :  { %v1772_v19 = vpop.f32.mrf.mxu1 }
 0x6a1   :  { %v1773_v20 = vadd.f32 %v6474_v14, %v1772_v19  ;;  %7432 = vmatprep.subr.msk.mxu1 %vm577_vm2, %v1778_v17  ;;  %v6482_v14 = vld [vmem:[%s9715_s5 + $0x58] sm:$0xff]  ;;  %v6479_v19 = vld [vmem:[%s9715_s5 + $0x40] sm:$0xff] }
 0x6a2   :  { %7433 = vmatpush3.xpose.msk.msra.mxu1 %vm577_vm2, %v1778_v17  ;;  %v6480_v17 = vld [vmem:[%s9715_s5 + $0x48] sm:$0xff] }
 0x6a3   :  { %7434 = vmatprep.subr.msk.mxu1 %vm577_vm2, %v1773_v20 }
 0x6a6   :  { %7435 = vmatpush3.xpose.msk.msra.mxu1 %vm577_vm2, %v1773_v20  ;;  %v6509_v20 = vld [vmem:[%s9714_s3 + $0x78] sm:$0xff] }
 0x6a7   :  { %7436 = vmatprep.subr.msk.mxu1 %vm577_vm2, %v1768_v22 }
 0x6aa   :  { %7437 = vmatpush3.xpose.msk.msra.mxu1 %vm577_vm2, %v1768_v22 }
 0x6ab   :  { %7438 = vmatprep.subr.msk.mxu1 %vm577_vm2, %v1763_v24 }
 0x6ae   :  { %7439 = vmatpush3.xpose.msk.msra.mxu1 %vm577_vm2, %v1763_v24 }
 0x6af   :  { %7468 = vmatprep.subr.mxu1 %v6509_v20 }
 0x717   :  { %v1253_v28 = vpop.xlane.xlu1 %1252 }
 0x718   :  { %v1261_v29 = vsub.f32 %v1245_v56, %v1253_v28 }
 0x719   :  { %v1250_v30 = vpop.xlane.xlu0 %1249 }
 0x71a   :  { %v1266_v32 = vmul.f32 1.442695, %v1261_v29  ;;  %v1260_v33 = vsub.f32 %v1244_v60, %v1250_v30 }
 0x71b   :  { %v1259_v34 = vpop.xlane.xlu1 %1258 }
 0x71c   :  { %7986 = vpow2.f32 %v1266_v32  ;;  %v1264_v35 = vmul.f32 1.442695, %v1260_v33  ;;  %v1263_v36 = vsub.f32 %v1247_v0, %v1259_v34  ;;  %v6464_v32 = vld [vmem:[%s9680_s8 + $0x2] ss:$0 sm:$0xff] }
 0x71d   :  { %v1256_v37 = vpop.xlane.xlu0 %1255 }
 0x71e   :  { %7988 = vpow2.f32 %v1264_v35  ;;  %v1270_v38 = vmul.f32 1.442695, %v1263_v36  ;;  %v1262_v39 = vsub.f32 %v1246_v5, %v1256_v37  ;;  %v6508_v37 = vld [vmem:[%s9714_s3 + $0x70] sm:$0xff] }
 0x720   :  { %7990 = vpow2.f32 %v1270_v38  ;;  %v1268_v40 = vmul.f32 1.442695, %v1262_v39 }
 0x722   :  { %7992 = vpow2.f32 %v1268_v40  ;;  %v6507_v40 = vld [vmem:[%s9714_s3 + $0x68] sm:$0xff] }
 0x729   :  { %v7987_v41 = vpop.eup %7986 }
 0x72a   :  { %v1275_v42 = vsel %vm203_vm1, %v7987_v41, 0.0 }
 0x72b   :  { %v7989_v43 = vpop.eup %7988  ;;  %1276 = vadd.xlane.f32.xlu1 %v1275_v42 }
 0x72c   :  { %v1272_v44 = vsel %vm203_vm1, %v7989_v43, 0.0 }
 0x72d   :  { %v7991_v45 = vpop.eup %7990  ;;  %1273 = vadd.xlane.f32.xlu0 %v1272_v44 }
 0x72e   :  { %v1281_v46 = vsel %vm203_vm1, %v7991_v45, 0.0 }
 0x72f   :  { %v7993_v47 = vpop.eup %7992  ;;  %1282 = vadd.xlane.f32.xlu1 %v1281_v46  ;;  %v6484_v46 = vld [vmem:[%s9681_s12 + $0x2] ss:$0 sm:$0xff] }
 0x730   :  { %v1278_v48 = vsel %vm203_vm1, %v7993_v47, 0.0 }
 0x731   :  { %1279 = vadd.xlane.f32.xlu0 %v1278_v48 }
 0x7b4   :  { %v1277_v50 = vpop.xlane.xlu1 %1276 }
 0x7b5   :  { %7994 = vrcp.f32 %v1277_v50  ;;  %v6528_v50 = vld [vmem:[%s9715_s5 + $0x70] sm:$0xff] }
 0x7b6   :  { %v1274_v51 = vpop.xlane.xlu0 %1273 }
 0x7b7   :  { %7996 = vrcp.f32 %v1274_v51 }
 0x7b8   :  { %v1283_v52 = vpop.xlane.xlu1 %1282 }
 0x7b9   :  { %7998 = vrcp.f32 %v1283_v52  ;;  %v6527_v52 = vld [vmem:[%s9715_s5 + $0x68] sm:$0xff] }
 0x7ba   :  { %v1280_v53 = vpop.xlane.xlu0 %1279 }
 0x7bb   :  { %8000 = vrcp.f32 %v1280_v53 }
 0x7c2   :  { %v7995_v54 = vpop.eup %7994 }
 0x7c3   :  { %v1289_v57 = vmul.f32 %v7995_v54, %v7987_v41  ;;  %v6526_v54 = vld [vmem:[%s9715_s5 + $0x60] sm:$0xff] }
 0x7c4   :  { %v7997_v55 = vpop.eup %7996 }
 0x7c5   :  { %v1288_v56 = vmul.f32 %v7997_v55, %v7989_v43  ;;  %v6506_v43 = vld [vmem:[%s9714_s3 + $0x60] sm:$0xff] }
 0x7c6   :  { %v7999_v58 = vpop.eup %7998 }
 0x7c7   :  { %7368 = vmatprep.mubr.msk.f32.mxu0 %vm203_vm1, %v1288_v56  ;;  %v1291_v61 = vmul.f32 %v7999_v58, %v7991_v45  ;;  %v6529_v45 = vld [vmem:[%s9715_s5 + $0x78] sm:$0xff] }
 0x7c8   :  { %v8001_v59 = vpop.eup %8000  ;;  %7369 = vmatmul.mubr.msk.f32.vlgmr.msra.gmra.mxu0 %vm203_vm1, %v1289_v57 }
 0x7c9   :  { %v1290_v60 = vmul.f32 %v8001_v59, %v7993_v47  ;;  %7375 = vmatpush3.msra.mxu0 %v6450_v49 }
 0x7ca   :  { %7390 = vmatprep.subr.mxu0 %v6462_v62 }
 0x7cb   :  { %7371 = vmatprep.mubr.msk.f32.mxu0 %vm203_vm1, %v1290_v60 }
 0x7cc   :  { %7372 = vmatmul.mubr.msk.f32.gmra.mxu0 %vm203_vm1, %v1291_v61 }
 0x888   :  { %v7370_v63 = vpop.f32.mrf.mxu0 }
 0x88a   :  { %v1370_v0 = vpop.f32.mrf.mxu0 }
 0x88b   :  { %7376 = vmatprep.mubr.msk.f32.mxu0 %vm577_vm2, %v1370_v0 }
 0x88c   :  { %v7373_v5 = vpop.f32.mrf.mxu0  ;;  %7377 = vmatmul.mubr.msk.f32.vlgmr.msra.gmra.mxu0 %vm577_vm2, %v7370_v63 }
 0x88d   :  { %7391 = vmatpush3.msra.mxu0 %v6462_v62 }
 0x88e   :  { %7392 = vmatprep.subr.mxu0 %v6461_v3  ;;  %v1380_v11 = vpop.f32.mrf.mxu0 }
 0x88f   :  { %7393 = vmatpush3.msra.mxu0 %v6461_v3  ;;  %7379 = vmatprep.mubr.msk.f32.mxu0 %vm577_vm2, %v1380_v11 }
 0x890   :  { %7394 = vmatprep.subr.mxu0 %v6460_v7  ;;  %7380 = vmatmul.mubr.msk.f32.gmra.mxu0 %vm577_vm2, %v7373_v5  ;;  %v8752_v5 = vld [vmem:[%s9680_s8 + $0x3] ss:$0 sm:$0xff] }
 0x891   :  { %7395 = vmatpush3.msra.mxu0 %v6460_v7  ;;  %7398 = vmatprep.mubr.msk.f32.mxu0 %vm203_vm1, %v8397_v15 }
 0x892   :  { %7396 = vmatprep.subr.mxu0 %v6459_v12 }
 0x893   :  { %7397 = vmatpush3.msra.mxu0 %v6459_v12 }
 0x894   :  { %7399 = vmatmul.mubr.msk.f32.vlgmr.msra.gmra.mxu0 %vm203_vm1, %v8405_v23  ;;  %7418 = vmatprep.subr.mxu0 %v6482_v14 }
 0x895   :  { %7401 = vmatprep.mubr.msk.f32.mxu0 %vm203_vm1, %v8408_v25  ;;  %7419 = vmatpush3.msra.mxu0 %v6482_v14 }
 0x896   :  { %7420 = vmatprep.subr.mxu0 %v6481_v16 }
 0x897   :  { %7421 = vmatpush3.msra.mxu0 %v6481_v16 }
 0x898   :  { %7402 = vmatmul.mubr.msk.f32.gmra.mxu0 %vm203_vm1, %v8422_v31  ;;  %7422 = vmatprep.subr.mxu0 %v6480_v17 }
 0x899   :  { %7423 = vmatpush3.msra.mxu0 %v6480_v17  ;;  %7426 = vmatprep.mubr.msk.f32.mxu0 %vm203_vm1, %v8397_v15 }
 0x89a   :  { %7424 = vmatprep.subr.mxu0 %v6479_v19 }
 0x89b   :  { %7425 = vmatpush3.msra.mxu0 %v6479_v19 }
 0x89c   :  { %7427 = vmatmul.mubr.msk.f32.vlgmr.msra.gmra.mxu0 %vm203_vm1, %v8405_v23 }
 0x89d   :  { %7429 = vmatprep.mubr.msk.f32.mxu0 %vm203_vm1, %v8408_v25 }
 0x8a0   :  { %7430 = vmatmul.mubr.msk.f32.gmra.mxu0 %vm203_vm1, %v8422_v31 }
 0x94c   :  { %v8691_v22 = vpop.f32.mrf.mxu0 }
 0x94e   :  { %v8693_v24 = vpop.f32.mrf.mxu0 }
 0x950   :  { %v8695_v28 = vpop.f32.mrf.mxu0 }
 0x952   :  { %v8697_v29 = vpop.f32.mrf.mxu0 }
 0x954   :  { %v7400_v30 = vpop.f32.mrf.mxu0 }
 0x955   :  { %v1670_v35 = vadd.f32 %v7400_v30, %v6464_v32 }
 0x956   :  { %v1664_v33 = vpop.f32.mrf.mxu0 }
 0x957   :  { %v1665_v34 = vadd.f32 %v6464_v32, %v1664_v33 }
 0x958   :  { %v7403_v36 = vpop.f32.mrf.mxu0 }
 0x959   :  { %7440 = vmatprep.mubr.msk.f32.mxu1 %vm577_vm2, %v1665_v34  ;;  %v1680_v41 = vadd.f32 %v7403_v36, %v6464_v32 }
 0x95a   :  { %v1674_v38 = vpop.f32.mrf.mxu0  ;;  %7441 = vmatmul.mubr.msk.f32.vlgmr.msra.gmra.mxu1 %vm577_vm2, %v1670_v35 }
 0x95b   :  { %v1675_v39 = vadd.f32 %v6464_v32, %v1674_v38  ;;  %7469 = vmatpush3.msra.mxu1 %v6509_v20 }
 0x95c   :  { %v7428_v42 = vpop.f32.mrf.mxu0  ;;  %7470 = vmatprep.subr.mxu1 %v6508_v37 }
 0x95d   :  { %7443 = vmatprep.mubr.msk.f32.mxu1 %vm577_vm2, %v1675_v39  ;;  %7471 = vmatpush3.msra.mxu1 %v6508_v37  ;;  %v1866_v53 = vadd.f32 %v7428_v42, %v6484_v46 }
 0x95e   :  { %v1860_v44 = vpop.f32.mrf.mxu0  ;;  %7444 = vmatmul.mubr.msk.f32.gmra.mxu1 %vm577_vm2, %v1680_v41  ;;  %7472 = vmatprep.subr.mxu1 %v6507_v40 }
 0x95f   :  { %7473 = vmatpush3.msra.mxu1 %v6507_v40  ;;  %7476 = vmatprep.mubr.msk.f32.mxu1 %vm203_vm1, %v8397_v15  ;;  %v1861_v55 = vadd.f32 %v6484_v46, %v1860_v44 }
 0x960   :  { %v7431_v47 = vpop.f32.mrf.mxu0  ;;  %7474 = vmatprep.subr.mxu1 %v6506_v43 }
 0x961   :  { %v1876_v48 = vadd.f32 %v7431_v47, %v6484_v46  ;;  %7475 = vmatpush3.msra.mxu1 %v6506_v43 }
 0x962   :  { %v1870_v49 = vpop.f32.mrf.mxu0  ;;  %7477 = vmatmul.mubr.msk.f32.vlgmr.msra.gmra.mxu1 %vm203_vm1, %v8405_v23  ;;  %7496 = vmatprep.subr.mxu1 %v6529_v45 }
 0x963   :  { %v1871_v51 = vadd.f32 %v6484_v46, %v1870_v49  ;;  %7446 = vmatprep.subr.mxu0 %v1876_v48  ;;  %7479 = vmatprep.mubr.msk.f32.mxu1 %vm203_vm1, %v8408_v25 }
 0x964   :  { %7497 = vmatpush3.msra.mxu1 %v6529_v45  ;;  %7447 = vmatpush3.msra.mxu0 %v1876_v48 }
 0x965   :  { %7498 = vmatprep.subr.mxu1 %v6528_v50  ;;  %7448 = vmatprep.subr.mxu0 %v1871_v51 }
 0x966   :  { %7499 = vmatpush3.msra.mxu1 %v6528_v50  ;;  %7449 = vmatpush3.msra.mxu0 %v1871_v51 }
 0x967   :  { %7480 = vmatmul.mubr.msk.f32.gmra.mxu1 %vm203_vm1, %v8422_v31  ;;  %7500 = vmatprep.subr.mxu1 %v6527_v52 }
 0x968   :  { %7450 = vmatprep.subr.mxu0 %v1866_v53  ;;  %7501 = vmatpush3.msra.mxu1 %v6527_v52 }
 0x969   :  { %7504 = vmatprep.mubr.msk.f32.mxu1 %vm203_vm1, %v8397_v15  ;;  %7451 = vmatpush3.msra.mxu0 %v1866_v53 }
 0x96a   :  { %7502 = vmatprep.subr.mxu1 %v6526_v54  ;;  %7452 = vmatprep.subr.mxu0 %v1861_v55 }
 0x96b   :  { %7503 = vmatpush3.msra.mxu1 %v6526_v54  ;;  %7453 = vmatpush3.msra.mxu0 %v1861_v55 }
 0x96c   :  { %7505 = vmatmul.mubr.msk.f32.vlgmr.msra.gmra.mxu1 %vm203_vm1, %v8405_v23 }
 0x96d   :  { %7507 = vmatprep.mubr.msk.f32.mxu1 %vm203_vm1, %v8408_v25 }
 0x970   :  { %7508 = vmatmul.mubr.msk.f32.gmra.mxu1 %vm203_vm1, %v8422_v31 }
 0xa1a   :  { %v7442_v56 = vpop.f32.mrf.mxu1 }
 0xa1b   :  { %v1989_v57 = vmul.f32 0.35355338, %v7442_v56 }
 0xa1c   :  { %v1969_v58 = vpop.f32.mrf.mxu1 }
 0xa1d   :  { %v1988_v59 = vmul.f32 0.35355338, %v1969_v58  ;;  %v1993_v60 = vadd.f32 %v1989_v57, %v8485_v1 }
 0xa1e   :  { %v7445_v61 = vpop.f32.mrf.mxu1 }
 0xa1f   :  { %v1991_v62 = vmul.f32 0.35355338, %v7445_v61  ;;  %v1999_v63 = vsel %vm203_vm1, %v1993_v60, -inf  ;;  %v1992_v0 = vadd.f32 %v1988_v59, %v8490_v4  ;;  %v6501_v61 = vld [vmem:[%s9684_s13 + $0x10] sm:$0xff] }
 0xa20   :  { %2000 = vmax.xlane.f32.xlu1 %v1999_v63  ;;  %v1979_v3 = vpop.f32.mrf.mxu1  ;;  %7460 = vmatprep.subr.mxu0 %v6501_v61 }
 0xa21   :  { %v1990_v7 = vmul.f32 0.35355338, %v1979_v3  ;;  %v1996_v11 = vsel %vm203_vm1, %v1992_v0, -inf  ;;  %v1995_v12 = vadd.f32 %v1991_v62, %v8496_v8 }
 0xa22   :  { %1997 = vmax.xlane.f32.xlu0 %v1996_v11  ;;  %v7478_v1 = vpop.f32.mrf.mxu1 }
 0xa23   :  { %v8757_v14 = vadd.f32 %v7478_v1, %v8752_v5  ;;  %v2005_v16 = vsel %vm203_vm1, %v1995_v12, -inf  ;;  %v1994_v4 = vadd.f32 %v1990_v7, %v8503_v13  ;;  %v6531_v13 = vld [vmem:[%s9681_s12 + $0x3] ss:$0 sm:$0xff] }
 0xa24   :  { %2006 = vmax.xlane.f32.xlu1 %v2005_v16  ;;  %v8761_v17 = vpop.f32.mrf.mxu1 }
 0xa25   :  { %v2002_v19 = vsel %vm203_vm1, %v1994_v4, -inf }
 0xa26   :  { %2003 = vmax.xlane.f32.xlu0 %v2002_v19 }
 0xa27   :  { %v7481_v20 = vpop.f32.mrf.mxu1 }
 0xa28   :  { %v8765_v30 = vadd.f32 %v7481_v20, %v8752_v5 }
 0xa29   :  { %v2329_v8 = vpop.f32.mrf.mxu1 }
 0xa2a   :  { %v8768_v32 = vadd.f32 %v8752_v5, %v2329_v8  ;;  %v6519_v8 = vld [vmem:[%s9716_s29 + $0x78] sm:$0xff] }
 0xa2c   :  { %v7506_v33 = vpop.f32.mrf.mxu1 }
 0xa2d   :  { %v2521_v39 = vadd.f32 %v7506_v33, %v6531_v13 }
 0xa2e   :  { %v2515_v34 = vpop.f32.mrf.mxu1 }
 0xa2f   :  { %v2516_v40 = vadd.f32 %v6531_v13, %v2515_v34 }
 0xa30   :  { %v7509_v35 = vpop.f32.mrf.mxu1 }
 0xa31   :  { %v2531_v36 = vadd.f32 %v7509_v35, %v6531_v13 }
 0xa32   :  { %v2525_v37 = vpop.f32.mrf.mxu1 }
 0xa33   :  { %v2526_v38 = vadd.f32 %v6531_v13, %v2525_v37  ;;  %7524 = vmatprep.subr.mxu1 %v2531_v36  ;;  %v6518_v13 = vld [vmem:[%s9716_s29 + $0x70] sm:$0xff] }
 0xa34   :  { %7525 = vmatpush3.msra.mxu1 %v2531_v36  ;;  %v6517_v36 = vld [vmem:[%s9716_s29 + $0x68] sm:$0xff] }
 0xa35   :  { %7526 = vmatprep.subr.mxu1 %v2526_v38 }
 0xa36   :  { %7527 = vmatpush3.msra.mxu1 %v2526_v38  ;;  %v6516_v38 = vld [vmem:[%s9716_s29 + $0x60] sm:$0xff] }
 0xa37   :  { %7528 = vmatprep.subr.mxu1 %v2521_v39 }
 0xa38   :  { %7529 = vmatpush3.msra.mxu1 %v2521_v39  ;;  %v2320_v39 = vadd.f32 %v8752_v5, %v8761_v17 }
 0xa39   :  { %7530 = vmatprep.subr.mxu1 %v2516_v40 }
 0xa3a   :  { %7531 = vmatpush3.msra.mxu1 %v2516_v40  ;;  %v1572_v40 = vadd.f32 %v8611_v2, %v8691_v22 }
 0xaa9   :  { %v2001_v41 = vpop.xlane.xlu1 %2000 }
 0xaaa   :  { %v2009_v42 = vsub.f32 %v1993_v60, %v2001_v41  ;;  %v1567_v41 = vadd.f32 %v8615_v6, %v8693_v24  ;;  %v6521_v6 = vld [vmem:[%s9682_s10 + $0x3] ss:$0 sm:$0xff] }
 0xaab   :  { %v1998_v43 = vpop.xlane.xlu0 %1997 }
 0xaac   :  { %v2014_v44 = vmul.f32 1.442695, %v2009_v42  ;;  %v2008_v45 = vsub.f32 %v1992_v0, %v1998_v43 }
 0xaad   :  { %v2007_v46 = vpop.xlane.xlu1 %2006 }
 0xaae   :  { %8002 = vpow2.f32 %v2014_v44  ;;  %v2012_v47 = vmul.f32 1.442695, %v2008_v45  ;;  %v2011_v48 = vsub.f32 %v1995_v12, %v2007_v46 }
 0xaaf   :  { %v2004_v49 = vpop.xlane.xlu0 %2003 }
 0xab0   :  { %8004 = vpow2.f32 %v2012_v47  ;;  %v2018_v50 = vmul.f32 1.442695, %v2011_v48  ;;  %v2010_v51 = vsub.f32 %v1994_v4, %v2004_v49 }
 0xab2   :  { %8006 = vpow2.f32 %v2018_v50  ;;  %v2016_v52 = vmul.f32 1.442695, %v2010_v51  ;;  %v8847_v51 = vld [vmem:[%s9683_s1 + $0x8] sm:$0xff] }
 0xab4   :  { %8008 = vpow2.f32 %v2016_v52 }
 0xabb   :  { %v8003_v53 = vpop.eup %8002 }
 0xabc   :  { %v2023_v54 = vsel %vm203_vm1, %v8003_v53, 0.0 }
 0xabd   :  { %v8005_v55 = vpop.eup %8004  ;;  %2024 = vadd.xlane.f32.xlu1 %v2023_v54 }
 0xabe   :  { %v2020_v56 = vsel %vm203_vm1, %v8005_v55, 0.0 }
 0xabf   :  { %v8007_v57 = vpop.eup %8006  ;;  %2021 = vadd.xlane.f32.xlu0 %v2020_v56 }
 0xac0   :  { %v2029_v58 = vsel %vm203_vm1, %v8007_v57, 0.0 }
 0xac1   :  { %v8009_v59 = vpop.eup %8008  ;;  %2030 = vadd.xlane.f32.xlu1 %v2029_v58  ;;  %v8861_v58 = vld [vmem:[%s9683_s1 + $0x18] sm:$0xff] }
 0xac2   :  { %v2026_v60 = vsel %vm203_vm1, %v8009_v59, 0.0 }
 0xac3   :  { %2027 = vadd.xlane.f32.xlu0 %v2026_v60 }
 0xb46   :  { %v2025_v62 = vpop.xlane.xlu1 %2024 }
 0xb47   :  { %8010 = vrcp.f32 %v2025_v62 }
 0xb48   :  { %v2022_v63 = vpop.xlane.xlu0 %2021 }
 0xb49   :  { %8012 = vrcp.f32 %v2022_v63 }
 0xb4a   :  { %v2031_v0 = vpop.xlane.xlu1 %2030 }
 0xb4b   :  { %8014 = vrcp.f32 %v2031_v0 }
 0xb4c   :  { %v2028_v3 = vpop.xlane.xlu0 %2027 }
 0xb4d   :  { %8016 = vrcp.f32 %v2028_v3 }
 0xb54   :  { %v8011_v7 = vpop.eup %8010 }
 0xb55   :  { %v2037_v1 = vmul.f32 %v8011_v7, %v8003_v53 }
 0xb56   :  { %v8013_v11 = vpop.eup %8012 }
 0xb57   :  { %v2036_v12 = vmul.f32 %v8013_v11, %v8005_v55 }
 0xb58   :  { %v8015_v16 = vpop.eup %8014 }
 0xb59   :  { %7454 = vmatprep.mubr.msk.f32.mxu0 %vm203_vm1, %v2036_v12  ;;  %v2039_v20 = vmul.f32 %v8015_v16, %v8007_v57 }
 0xb5a   :  { %v8017_v4 = vpop.eup %8016  ;;  %7455 = vmatmul.mubr.msk.f32.vlgmr.msra.gmra.mxu0 %vm203_vm1, %v2037_v1 }
 0xb5b   :  { %v2038_v19 = vmul.f32 %v8017_v4, %v8009_v59  ;;  %7461 = vmatpush3.msra.mxu0 %v6501_v61  ;;  %v8868_v61 = vld [vmem:[%s9683_s1 + $0x10] sm:$0xff] }
 0xb5c   :  { %7482 = vmatprep.subr.mxu0 %v6519_v8 }
 0xb5d   :  { %7457 = vmatprep.mubr.msk.f32.mxu0 %vm203_vm1, %v2038_v19 }
 0xb5e   :  { %7458 = vmatmul.mubr.msk.f32.gmra.mxu0 %vm203_vm1, %v2039_v20 }
 0xc1a   :  { %v7456_v33 = vpop.f32.mrf.mxu0 }
 0xc1c   :  { %v2118_v34 = vpop.f32.mrf.mxu0 }
 0xc1d   :  { %7462 = vmatprep.mubr.msk.f32.mxu0 %vm577_vm2, %v2118_v34 }
 0xc1e   :  { %v7459_v35 = vpop.f32.mrf.mxu0  ;;  %7463 = vmatmul.mubr.msk.f32.vlgmr.msra.gmra.mxu0 %vm577_vm2, %v7456_v33 }
 0xc1f   :  { %7483 = vmatpush3.msra.mxu0 %v6519_v8 }
 0xc20   :  { %7484 = vmatprep.subr.mxu0 %v6518_v13  ;;  %v2128_v37 = vpop.f32.mrf.mxu0 }
 0xc21   :  { %7485 = vmatpush3.msra.mxu0 %v6518_v13  ;;  %7465 = vmatprep.mubr.msk.f32.mxu0 %vm577_vm2, %v2128_v37 }
 0xc22   :  { %7486 = vmatprep.subr.mxu0 %v6517_v36  ;;  %7466 = vmatmul.mubr.msk.f32.gmra.mxu0 %vm577_vm2, %v7459_v35 }
 0xc23   :  { %7487 = vmatpush3.msra.mxu0 %v6517_v36  ;;  %7490 = vmatprep.mubr.msk.f32.mxu0 %vm203_vm1, %v8397_v15 }
 0xc24   :  { %7488 = vmatprep.subr.mxu0 %v6516_v38 }
 0xc25   :  { %7489 = vmatpush3.msra.mxu0 %v6516_v38 }
 0xc26   :  { %7491 = vmatmul.mubr.msk.f32.vlgmr.msra.gmra.mxu0 %vm203_vm1, %v8405_v23 }
 0xc27   :  { %7493 = vmatprep.mubr.msk.f32.mxu0 %vm203_vm1, %v8408_v25  ;;  %v1582_v25 = vadd.f32 %v8618_v9, %v8695_v28 }
 0xc2a   :  { %7494 = vmatmul.mubr.msk.f32.gmra.mxu0 %vm203_vm1, %v8422_v31  ;;  %v1577_v31 = vadd.f32 %v8620_v10, %v8697_v29 }
 0xc2b   :  { %7518 = vmatprep.mubr.msk.f32.mxu0 %vm577_vm2, %v2320_v39 }
 0xcde   :  { %v7464_v15 = vpop.f32.mrf.mxu0 }
 0xcdf   :  { %v8815_v42 = vadd.f32 %v7464_v15, %v1572_v40  ;;  %v6548_v15 = vld [vmem:[%s9684_s13 + $0x18] sm:$0xff] }
 0xce0   :  { %v2217_v23 = vpop.f32.mrf.mxu0  ;;  %7538 = vmatprep.subr.mxu1 %v6548_v15 }
 0xce1   :  { %v8819_v43 = vadd.f32 %v2217_v23, %v1567_v41 }
 0xce2   :  { %v7467_v5 = vpop.f32.mrf.mxu0 }
 0xce3   :  { %v8823_v17 = vadd.f32 %v7467_v5, %v1582_v25 }
 0xce4   :  { %v2227_v44 = vpop.f32.mrf.mxu0 }
 0xce5   :  { %v8825_v2 = vadd.f32 %v2227_v44, %v1577_v31 }
 0xce6   :  { %v7492_v22 = vpop.f32.mrf.mxu0 }
 0xce7   :  { %v2423_v10 = vadd.f32 %v7492_v22, %v6521_v6 }
 0xce8   :  { %v2417_v45 = vpop.f32.mrf.mxu0 }
 0xce9   :  { %v2418_v29 = vadd.f32 %v6521_v6, %v2417_v45 }
 0xcea   :  { %v7495_v24 = vpop.f32.mrf.mxu0 }
 0xceb   :  { %v2433_v46 = vadd.f32 %v7495_v24, %v6521_v6 }
 0xcec   :  { %v2427_v9 = vpop.f32.mrf.mxu0 }
 0xced   :  { %v2428_v28 = vadd.f32 %v6521_v6, %v2427_v9  ;;  %7510 = vmatprep.subr.msk.mxu0 %vm577_vm2, %v2433_v46 }
 0xcee   :  { %7511 = vmatpush3.xpose.msk.msra.mxu0 %vm577_vm2, %v2433_v46 }
 0xcef   :  { %7512 = vmatprep.subr.msk.mxu0 %vm577_vm2, %v2428_v28 }
 0xcf2   :  { %7513 = vmatpush3.xpose.msk.msra.mxu0 %vm577_vm2, %v2428_v28 }
 0xcf3   :  { %7514 = vmatprep.subr.msk.mxu0 %vm577_vm2, %v2423_v10 }
 0xcf6   :  { %7515 = vmatpush3.xpose.msk.msra.mxu0 %vm577_vm2, %v2423_v10 }
 0xcf7   :  { %7516 = vmatprep.subr.msk.mxu0 %vm577_vm2, %v2418_v29 }
 0xcfa   :  { %7517 = vmatpush3.xpose.msk.msra.mxu0 %vm577_vm2, %v2418_v29 }
 0xcfd   :  { %7519 = vmatmul.mubr.msk.f32.vlgmr.msra.gmra.mxu0 %vm577_vm2, %v8757_v14 }
 0xcfe   :  { %7521 = vmatprep.mubr.msk.f32.mxu0 %vm577_vm2, %v8768_v32  ;;  %v8854_v32 = vld [vmem:[%s9683_s1] sm:$0xff] }
 0xd01   :  { %7522 = vmatmul.mubr.msk.f32.gmra.mxu0 %vm577_vm2, %v8765_v30 }
 0xdbd   :  { %v7520_v47 = vpop.f32.mrf.mxu0 }
 0xdbe   :  { %v2644_v48 = vmul.f32 0.35355338, %v7520_v47 }
 0xdbf   :  { %v2624_v49 = vpop.f32.mrf.mxu0 }
 0xdc0   :  { %v2643_v50 = vmul.f32 0.35355338, %v2624_v49  ;;  %v2648_v52 = vadd.f32 %v8847_v51, %v2644_v48 }
 0xdc1   :  { %v7523_v53 = vpop.f32.mrf.mxu0 }
 0xdc2   :  { %v2646_v54 = vmul.f32 0.35355338, %v7523_v53  ;;  %v2654_v14 = vsel %vm203_vm1, %v2648_v52, -inf  ;;  %v2647_v30 = vadd.f32 %v8854_v32, %v2643_v50  ;;  %v6553_v50 = vld [vmem:[%s9685_s14] ss:$0 sm:$0xff] }
 0xdc3   :  { %2655 = vmax.xlane.f32.xlu1 %v2654_v14  ;;  %v2634_v55 = vpop.f32.mrf.mxu0 }
 0xdc4   :  { %v2645_v56 = vmul.f32 0.35355338, %v2634_v55  ;;  %v2651_v57 = vsel %vm203_vm1, %v2647_v30, -inf  ;;  %v2650_v59 = vadd.f32 %v8861_v58, %v2646_v54 }
 0xdc5   :  { %2652 = vmax.xlane.f32.xlu0 %v2651_v57 }
 0xdc6   :  { %v2660_v60 = vsel %vm203_vm1, %v2650_v59, -inf  ;;  %v2649_v62 = vadd.f32 %v8868_v61, %v2645_v56 }
 0xdc7   :  { %2661 = vmax.xlane.f32.xlu1 %v2660_v60 }
 0xdc8   :  { %v2657_v63 = vsel %vm203_vm1, %v2649_v62, -inf }
 0xdc9   :  { %2658 = vmax.xlane.f32.xlu0 %v2657_v63 }
 0xe4c   :  { %v2656_v0 = vpop.xlane.xlu1 %2655 }
 0xe4d   :  { %v2664_v3 = vsub.f32 %v2648_v52, %v2656_v0 }
 0xe4e   :  { %v2653_v7 = vpop.xlane.xlu0 %2652 }
 0xe4f   :  { %v2669_v11 = vmul.f32 1.442695, %v2664_v3  ;;  %v2663_v12 = vsub.f32 %v2647_v30, %v2653_v7 }
 0xe50   :  { %v2662_v1 = vpop.xlane.xlu1 %2661 }
 0xe51   :  { %8018 = vpow2.f32 %v2669_v11  ;;  %v2667_v16 = vmul.f32 1.442695, %v2663_v12  ;;  %v2666_v4 = vsub.f32 %v2650_v59, %v2662_v1 }
 0xe52   :  { %v2659_v19 = vpop.xlane.xlu0 %2658 }
 0xe53   :  { %8020 = vpow2.f32 %v2667_v16  ;;  %v2673_v20 = vmul.f32 1.442695, %v2666_v4  ;;  %v2665_v8 = vsub.f32 %v2649_v62, %v2659_v19 }
 0xe55   :  { %8022 = vpow2.f32 %v2673_v20  ;;  %v2671_v33 = vmul.f32 1.442695, %v2665_v8 }
 0xe57   :  { %8024 = vpow2.f32 %v2671_v33 }
 0xe5e   :  { %v8019_v34 = vpop.eup %8018 }
 0xe5f   :  { %v2678_v13 = vsel %vm203_vm1, %v8019_v34, 0.0 }
 0xe60   :  { %v8021_v35 = vpop.eup %8020  ;;  %2679 = vadd.xlane.f32.xlu1 %v2678_v13 }
 0xe61   :  { %v2675_v36 = vsel %vm203_vm1, %v8021_v35, 0.0 }
 0xe62   :  { %v8023_v37 = vpop.eup %8022  ;;  %2676 = vadd.xlane.f32.xlu0 %v2675_v36 }
 0xe63   :  { %v2684_v38 = vsel %vm203_vm1, %v8023_v37, 0.0 }
 0xe64   :  { %v8025_v39 = vpop.eup %8024  ;;  %2685 = vadd.xlane.f32.xlu1 %v2684_v38 }
 0xe65   :  { %v2681_v40 = vsel %vm203_vm1, %v8025_v39, 0.0 }
 0xe66   :  { %2682 = vadd.xlane.f32.xlu0 %v2681_v40  ;;  %v2986_v40 = vld [vmem:[%s9686_s17 + $0x10] sm:$0xff] }
 0xee9   :  { %v2680_v41 = vpop.xlane.xlu1 %2679 }
 0xeea   :  { %8026 = vrcp.f32 %v2680_v41  ;;  %v2984_v41 = vld [vmem:[%s9686_s17] sm:$0xff] }
 0xeeb   :  { %v2677_v23 = vpop.xlane.xlu0 %2676 }
 0xeec   :  { %8028 = vrcp.f32 %v2677_v23 }
 0xeed   :  { %v2686_v25 = vpop.xlane.xlu1 %2685 }
 0xeee   :  { %8030 = vrcp.f32 %v2686_v25 }
 0xeef   :  { %v2683_v5 = vpop.xlane.xlu0 %2682 }
 0xef0   :  { %8032 = vrcp.f32 %v2683_v5 }
 0xef7   :  { %v8027_v31 = vpop.eup %8026 }
 0xef8   :  { %v2692_v45 = vmul.f32 %v8027_v31, %v8019_v34 }
 0xef9   :  { %v8029_v44 = vpop.eup %8028 }
 0xefa   :  { %v2691_v22 = vmul.f32 %v8029_v44, %v8021_v35 }
 0xefb   :  { %v8031_v6 = vpop.eup %8030 }
 0xefc   :  { %7532 = vmatprep.mubr.msk.f32.mxu1 %vm203_vm1, %v2691_v22  ;;  %v2694_v9 = vmul.f32 %v8031_v6, %v8023_v37 }
 0xefd   :  { %v8033_v24 = vpop.eup %8032  ;;  %7533 = vmatmul.mubr.msk.f32.vlgmr.msra.gmra.mxu1 %vm203_vm1, %v2692_v45 }
 0xefe   :  { %v2693_v46 = vmul.f32 %v8033_v24, %v8025_v39  ;;  %7539 = vmatpush3.msra.mxu1 %v6548_v15  ;;  %v2987_v39 = vld [vmem:[%s9686_s17 + $0x18] sm:$0xff]  ;;  %v2985_v15 = vld [vmem:[%s9686_s17 + $0x8] sm:$0xff] }
 0xeff   :  { %7546 = vmatprep.subr.mxu0 %v2987_v39 }
 0xf00   :  { %7535 = vmatprep.mubr.msk.f32.mxu1 %vm203_vm1, %v2693_v46  ;;  %7547 = vmatpush3.msra.mxu0 %v2987_v39 }
 0xf01   :  { %7536 = vmatmul.mubr.msk.f32.gmra.mxu1 %vm203_vm1, %v2694_v9  ;;  %7548 = vmatprep.subr.mxu0 %v2986_v40 }
 0xf02   :  { %7549 = vmatpush3.msra.mxu0 %v2986_v40 }
 0xf03   :  { %7550 = vmatprep.subr.mxu0 %v2985_v15 }
 0xf04   :  { %7551 = vmatpush3.msra.mxu0 %v2985_v15 }
 0xf05   :  { %7552 = vmatprep.subr.mxu0 %v2984_v41 }
 0xf06   :  { %7553 = vmatpush3.msra.mxu0 %v2984_v41 }
 0xfbd   :  { %v7534_v28 = vpop.f32.mrf.mxu1 }
 0xfbf   :  { %v2773_v10 = vpop.f32.mrf.mxu1 }
 0xfc0   :  { %7540 = vmatprep.mubr.msk.f32.mxu1 %vm577_vm2, %v2773_v10 }
 0xfc1   :  { %v7537_v29 = vpop.f32.mrf.mxu1  ;;  %7541 = vmatmul.mubr.msk.f32.vlgmr.msra.gmra.mxu1 %vm577_vm2, %v7534_v28 }
 0xfc3   :  { %v2783_v47 = vpop.f32.mrf.mxu1 }
 0xfc4   :  { %7543 = vmatprep.mubr.msk.f32.mxu1 %vm577_vm2, %v2783_v47  ;;  %v6554_v47 = vld [vmem:[%s9687_s15] ss:$0 sm:$0xff] }
 0xfc5   :  { %7544 = vmatmul.mubr.msk.f32.gmra.mxu1 %vm577_vm2, %v7537_v29 }
0x1081   :  { %v7542_v48 = vpop.f32.mrf.mxu1 }
0x1082   :  { %v2892_v49 = vadd.f32 %v7542_v48, %v8815_v42 }
0x1083   :  { %v2872_v52 = vpop.f32.mrf.mxu1 }
0x1084   :  { %v2896_v53 = vadd.f32 %v2892_v49, %v8322_v21  ;;  %v2891_v54 = vadd.f32 %v2872_v52, %v8819_v43 }
0x1085   :  { %v7545_v14 = vpop.f32.mrf.mxu1 }
0x1086   :  { %v8893_v30 = vadd.f32 %v6553_v50, %v2896_v53  ;;  %v2895_v55 = vadd.f32 %v2891_v54, %v8317_v18  ;;  %v2894_v56 = vadd.f32 %v7545_v14, %v8823_v17  ;;  %v6555_v53 = vld [vmem:[%s9688_s16] ss:$0 sm:$0xff] }
0x1087   :  { %v2882_v57 = vpop.f32.mrf.mxu1 }
0x1088   :  { %v8897_v59 = vadd.f32 %v6553_v50, %v2895_v55  ;;  %v2898_v42 = vadd.f32 %v2894_v56, %v8331_v27  ;;  %v2893_v60 = vadd.f32 %v2882_v57, %v8825_v2  ;;  %v2915_v62 = vsel %vm203_vm1, %v8893_v30, 0.0 }
0x1089   :  { %2916 = vadd.xlane.f32.xlu1 %v2915_v62 }
0x108a   :  { %v8903_v21 = vadd.f32 %v6553_v50, %v2898_v42  ;;  %v2897_v43 = vadd.f32 %v2893_v60, %v8329_v26  ;;  %v2912_v18 = vsel %vm203_vm1, %v8897_v59, 0.0 }
0x108b   :  { %2913 = vadd.xlane.f32.xlu0 %v2912_v18 }
0x108c   :  { %v8908_v17 = vadd.f32 %v6553_v50, %v2897_v43  ;;  %v2921_v63 = vsel %vm203_vm1, %v8903_v21, 0.0 }
0x108d   :  { %2922 = vadd.xlane.f32.xlu1 %v2921_v63  ;;  %v3143_v63 = vld [vmem:[%s9689_s19 + $0x78] sm:$0xff] }
0x108e   :  { %v2918_v27 = vsel %vm203_vm1, %v8908_v17, 0.0  ;;  %7560 = vmatprep.subr.mxu1 %v3143_v63 }
0x108f   :  { %2919 = vadd.xlane.f32.xlu0 %v2918_v27  ;;  %7561 = vmatpush3.msra.mxu1 %v3143_v63  ;;  %v3142_v27 = vld [vmem:[%s9689_s19 + $0x70] sm:$0xff] }
0x1090   :  { %7562 = vmatprep.subr.mxu1 %v3142_v27 }
0x1091   :  { %7563 = vmatpush3.msra.mxu1 %v3142_v27 }
0x1112   :  { %v2917_v2 = vpop.xlane.xlu1 %2916 }
0x1113   :  { %v2925_v0 = vmul.f32 0.03125, %v2917_v2  ;;  %v3141_v2 = vld [vmem:[%s9689_s19 + $0x68] sm:$0xff] }
0x1114   :  { %v2914_v3 = vpop.xlane.xlu0 %2913  ;;  %7564 = vmatprep.subr.mxu1 %v3141_v2 }
0x1115   :  { %v2929_v7 = vsub.f32 %v8893_v30, %v2925_v0  ;;  %v2924_v26 = vmul.f32 0.03125, %v2914_v3  ;;  %7565 = vmatpush3.msra.mxu1 %v3141_v2  ;;  %v3140_v0 = vld [vmem:[%s9689_s19 + $0x60] sm:$0xff]  ;;  %v3139_v3 = vld [vmem:[%s9689_s19 + $0x58] sm:$0xff] }
0x1116   :  { %v2923_v11 = vpop.xlane.xlu1 %2922  ;;  %7566 = vmatprep.subr.mxu1 %v3140_v0 }
0x1117   :  { %v2928_v12 = vsub.f32 %v8897_v59, %v2924_v26  ;;  %v2927_v1 = vmul.f32 0.03125, %v2923_v11  ;;  %v2933_v16 = vmul.f32 %v2929_v7, %v2929_v7  ;;  %7567 = vmatpush3.msra.mxu1 %v3140_v0  ;;  %v3137_v26 = vld [vmem:[%s9689_s19 + $0x48] sm:$0xff]  ;;  %v3136_v11 = vld [vmem:[%s9689_s19 + $0x40] sm:$0xff] }
0x1118   :  { %v2920_v4 = vpop.xlane.xlu0 %2919  ;;  %7568 = vmatprep.subr.mxu1 %v3139_v3 }
0x1119   :  { %v2931_v19 = vsub.f32 %v8903_v21, %v2927_v1  ;;  %v2926_v20 = vmul.f32 0.03125, %v2920_v4  ;;  %v2939_v8 = vsel %vm203_vm1, %v2933_v16, 0.0  ;;  %v2932_v33 = vmul.f32 %v2928_v12, %v2928_v12  ;;  %7569 = vmatpush3.msra.mxu1 %v3139_v3  ;;  %v3134_v1 = vld [vmem:[%s9689_s19 + $0x30] sm:$0xff]  ;;  %v3133_v16 = vld [vmem:[%s9689_s19 + $0x28] sm:$0xff]  ;;  %v3132_v4 = vld [vmem:[%s9689_s19 + $0x20] sm:$0xff] }
0x111a   :  { %2940 = vadd.xlane.f32.xlu1 %v2939_v8  ;;  %v3129_v8 = vld [vmem:[%s9689_s19 + $0x8] sm:$0xff] }
0x111b   :  { %v2930_v34 = vsub.f32 %v8908_v17, %v2926_v20  ;;  %v2936_v13 = vsel %vm203_vm1, %v2932_v33, 0.0  ;;  %v2935_v35 = vmul.f32 %v2931_v19, %v2931_v19  ;;  %v3130_v20 = vld [vmem:[%s9689_s19 + $0x10] sm:$0xff]  ;;  %v3128_v33 = vld [vmem:[%s9689_s19] sm:$0xff] }
0x111c   :  { %2937 = vadd.xlane.f32.xlu0 %v2936_v13 }
0x111d   :  { %v2945_v36 = vsel %vm203_vm1, %v2935_v35, 0.0  ;;  %v2934_v37 = vmul.f32 %v2930_v34, %v2930_v34 }
0x111e   :  { %2946 = vadd.xlane.f32.xlu1 %v2945_v36 }
0x111f   :  { %v2942_v38 = vsel %vm203_vm1, %v2934_v37, 0.0 }
0x1120   :  { %2943 = vadd.xlane.f32.xlu0 %v2942_v38 }
0x11a3   :  { %v2941_v23 = vpop.xlane.xlu1 %2940 }
0x11a4   :  { %v2949_v25 = vmul.f32 0.03125, %v2941_v23 }
0x11a5   :  { %v2938_v5 = vpop.xlane.xlu0 %2937 }
0x11a6   :  { %v2953_v31 = vadd.f32 1e-05, %v2949_v25  ;;  %v2948_v44 = vmul.f32 0.03125, %v2938_v5 }
0x11a7   :  { %v2947_v22 = vpop.xlane.xlu1 %2946 }
0x11a8   :  { %8034 = vrsqrt.f32 %v2953_v31  ;;  %v2952_v45 = vadd.f32 1e-05, %v2948_v44  ;;  %v2951_v6 = vmul.f32 0.03125, %v2947_v22 }
0x11a9   :  { %v2944_v24 = vpop.xlane.xlu0 %2943 }
0x11aa   :  { %8036 = vrsqrt.f32 %v2952_v45  ;;  %v2955_v46 = vadd.f32 1e-05, %v2951_v6  ;;  %v2950_v9 = vmul.f32 0.03125, %v2944_v24 }
0x11ac   :  { %8038 = vrsqrt.f32 %v2955_v46  ;;  %v2954_v28 = vadd.f32 1e-05, %v2950_v9 }
0x11ae   :  { %8040 = vrsqrt.f32 %v2954_v28 }
0x11b5   :  { %v8035_v10 = vpop.eup %8034 }
0x11b6   :  { %v2961_v29 = vmul.f32 %v8035_v10, %v2929_v7  ;;  %v3138_v7 = vld [vmem:[%s9689_s19 + $0x50] sm:$0xff] }
0x11b7   :  { %v8037_v48 = vpop.eup %8036  ;;  %7570 = vmatprep.subr.mxu1 %v3138_v7 }
0x11b8   :  { %v2960_v49 = vmul.f32 %v8037_v48, %v2928_v12  ;;  %v2971_v52 = vmul.f32 %v6554_v47, %v2961_v29  ;;  %7571 = vmatpush3.msra.mxu1 %v3138_v7  ;;  %v3135_v12 = vld [vmem:[%s9689_s19 + $0x38] sm:$0xff]  ;;  %v6561_v7 = vld [vmem:[%s9691_s20] ss:$0 sm:$0xff] }
0x11b9   :  { %v8039_v50 = vpop.eup %8038  ;;  %7572 = vmatprep.subr.mxu1 %v3137_v26 }
0x11ba   :  { %v2970_v54 = vmul.f32 %v6554_v47, %v2960_v49  ;;  %v2963_v14 = vmul.f32 %v8039_v50, %v2931_v19  ;;  %v2981_v42 = vadd.f32 %v6555_v53, %v2971_v52  ;;  %7573 = vmatpush3.msra.mxu1 %v3137_v26  ;;  %v3131_v19 = vld [vmem:[%s9689_s19 + $0x18] sm:$0xff] }
0x11bb   :  { %v8041_v55 = vpop.eup %8040  ;;  %7574 = vmatprep.subr.mxu1 %v3136_v11 }
0x11bc   :  { %v2980_v56 = vadd.f32 %v6555_v53, %v2970_v54  ;;  %v2962_v57 = vmul.f32 %v8041_v55, %v2930_v34  ;;  %v2973_v60 = vmul.f32 %v6554_v47, %v2963_v14  ;;  %7575 = vmatpush3.msra.mxu1 %v3136_v11  ;;  %v6556_v34 = vld [vmem:[%s9690_s18] ss:$0 sm:$0xff] }
0x11bd   :  { %7576 = vmatprep.subr.mxu1 %v3135_v12 }
0x11be   :  { %7554 = vmatprep.mubr.msk.f32.mxu0 %vm203_vm1, %v2980_v56  ;;  %v2972_v62 = vmul.f32 %v6554_v47, %v2962_v57  ;;  %v2983_v18 = vadd.f32 %v6555_v53, %v2973_v60  ;;  %7577 = vmatpush3.msra.mxu1 %v3135_v12 }
0x11bf   :  { %7555 = vmatmul.mubr.msk.f32.vlgmr.msra.gmra.mxu0 %vm203_vm1, %v2981_v42  ;;  %7578 = vmatprep.subr.mxu1 %v3134_v1 }
0x11c0   :  { %v2982_v43 = vadd.f32 %v6555_v53, %v2972_v62  ;;  %7579 = vmatpush3.msra.mxu1 %v3134_v1 }
0x11c1   :  { %7580 = vmatprep.subr.mxu1 %v3133_v16 }
0x11c2   :  { %7557 = vmatprep.mubr.msk.f32.mxu0 %vm203_vm1, %v2982_v43  ;;  %7581 = vmatpush3.msra.mxu1 %v3133_v16 }
0x11c3   :  { %7558 = vmatmul.mubr.msk.f32.gmra.mxu0 %vm203_vm1, %v2983_v18  ;;  %7582 = vmatprep.subr.mxu1 %v3132_v4 }
0x11c4   :  { %7583 = vmatpush3.msra.mxu1 %v3132_v4 }
0x11c5   :  { %7584 = vmatprep.subr.mxu1 %v3131_v19 }
0x11c6   :  { %7585 = vmatpush3.msra.mxu1 %v3131_v19 }
0x11c7   :  { %7586 = vmatprep.subr.mxu1 %v3130_v20 }
0x11c8   :  { %7587 = vmatpush3.msra.mxu1 %v3130_v20 }
0x11c9   :  { %7588 = vmatprep.subr.mxu1 %v3129_v8 }
0x11ca   :  { %7589 = vmatpush3.msra.mxu1 %v3129_v8 }
0x11cb   :  { %7590 = vmatprep.subr.mxu1 %v3128_v33 }
0x11cc   :  { %7591 = vmatpush3.msra.mxu1 %v3128_v33 }
0x127f   :  { %v7556_v13 = vpop.f32.mrf.mxu0 }
0x1280   :  { %v3079_v35 = vadd.f32 %v7556_v13, %v6556_v34 }
0x1281   :  { %v3073_v36 = vpop.f32.mrf.mxu0 }
0x1282   :  { %v3097_v37 = vmul.f32 0.044715, %v3079_v35  ;;  %v3074_v38 = vadd.f32 %v6556_v34, %v3073_v36  ;;  %v3093_v42 = vmul.f32 0.5, %v3079_v35 }
0x1283   :  { %v7559_v39 = vpop.f32.mrf.mxu0 }
0x1284   :  { %v3101_v40 = vmul.f32 %v3097_v37, %v3079_v35  ;;  %v3096_v15 = vmul.f32 0.044715, %v3074_v38  ;;  %v3089_v41 = vadd.f32 %v7559_v39, %v6556_v34  ;;  %v3092_v55 = vmul.f32 0.5, %v3074_v38 }
0x1285   :  { %v3083_v23 = vpop.f32.mrf.mxu0 }
0x1286   :  { %v3105_v25 = vmul.f32 %v3101_v40, %v3079_v35  ;;  %v3100_v5 = vmul.f32 %v3096_v15, %v3074_v38  ;;  %v3099_v31 = vmul.f32 0.044715, %v3089_v41  ;;  %v3084_v44 = vadd.f32 %v6556_v34, %v3083_v23 }
0x1287   :  { %v3095_v2 = vmul.f32 0.5, %v3089_v41 }
0x1288   :  { %v3109_v22 = vadd.f32 %v3105_v25, %v3079_v35  ;;  %v3103_v45 = vmul.f32 %v3099_v31, %v3089_v41  ;;  %v3098_v6 = vmul.f32 0.044715, %v3084_v44  ;;  %v3104_v24 = vmul.f32 %v3100_v5, %v3074_v38 }
0x1289   :  { %v3094_v63 = vmul.f32 0.5, %v3084_v44 }
0x128a   :  { %v3113_v46 = vmul.f32 0.7978846, %v3109_v22  ;;  %v3102_v9 = vmul.f32 %v3098_v6, %v3084_v44  ;;  %v3108_v28 = vadd.f32 %v3104_v24, %v3074_v38  ;;  %v3107_v10 = vmul.f32 %v3103_v45, %v3089_v41 }
0x128c   :  { %8042 = vtanh.f32 %v3113_v46  ;;  %v3112_v29 = vmul.f32 0.7978846, %v3108_v28  ;;  %v3106_v47 = vmul.f32 %v3102_v9, %v3084_v44  ;;  %v3111_v48 = vadd.f32 %v3107_v10, %v3089_v41  ;;  %v6569_v10 = vld [vmem:[%s9714_s3 + $0x98] sm:$0xff] }
0x128d   :  { %7598 = vmatprep.subr.mxu0 %v6569_v10 }
0x128e   :  { %8044 = vtanh.f32 %v3112_v29  ;;  %v3110_v49 = vadd.f32 %v3106_v47, %v3084_v44  ;;  %v3115_v50 = vmul.f32 0.7978846, %v3111_v48  ;;  %7599 = vmatpush3.msra.mxu0 %v6569_v10  ;;  %v6568_v29 = vld [vmem:[%s9714_s3 + $0x90] sm:$0xff]  ;;  %v6567_v47 = vld [vmem:[%s9714_s3 + $0x88] sm:$0xff]  ;;  %v6566_v48 = vld [vmem:[%s9714_s3 + $0x80] sm:$0xff] }
0x128f   :  { %7600 = vmatprep.subr.mxu0 %v6568_v29 }
0x1290   :  { %v3114_v52 = vmul.f32 0.7978846, %v3110_v49  ;;  %8046 = vtanh.f32 %v3115_v50  ;;  %7601 = vmatpush3.msra.mxu0 %v6568_v29  ;;  %v6579_v49 = vld [vmem:[%s9716_s29 + $0x98] sm:$0xff] }
0x1291   :  { %7602 = vmatprep.subr.mxu0 %v6567_v47 }
0x1292   :  { %8048 = vtanh.f32 %v3114_v52  ;;  %7603 = vmatpush3.msra.mxu0 %v6567_v47  ;;  %v6591_v47 = vld [vmem:[%s9681_s12 + $0x4] ss:$0 sm:$0xff] }
0x1293   :  { %7604 = vmatprep.subr.mxu0 %v6566_v48 }
0x1294   :  { %7605 = vmatpush3.msra.mxu0 %v6566_v48 }
0x1295   :  { %7612 = vmatprep.subr.mxu0 %v6579_v49 }
0x1299   :  { %v8043_v53 = vpop.eup %8042 }
0x129a   :  { %v3121_v14 = vadd.f32 1.0, %v8043_v53 }
0x129b   :  { %v8045_v54 = vpop.eup %8044 }
0x129c   :  { %v3120_v56 = vadd.f32 1.0, %v8045_v54  ;;  %v3125_v43 = vmul.f32 %v3121_v14, %v3093_v42 }
0x129d   :  { %v8047_v57 = vpop.eup %8046 }
0x129e   :  { %v3124_v60 = vmul.f32 %v3120_v56, %v3092_v55  ;;  %v3123_v18 = vadd.f32 1.0, %v8047_v57 }
0x129f   :  { %v8049_v62 = vpop.eup %8048 }
0x12a0   :  { %7592 = vmatprep.mubr.f32.mxu1 %v3124_v60  ;;  %v3122_v27 = vadd.f32 1.0, %v8049_v62  ;;  %v3127_v3 = vmul.f32 %v3123_v18, %v3095_v2 }
0x12a1   :  { %7593 = vmatmul.mubr.f32.vlgmr.msra.gmra.mxu1 %v3125_v43 }
0x12a2   :  { %v3126_v0 = vmul.f32 %v3122_v27, %v3094_v63  ;;  %v6564_v63 = vld [vmem:[%s9717_s7 + $0x1] ss:$0 sm:$0xff] }
0x12a4   :  { %7595 = vmatprep.mubr.f32.mxu1 %v3126_v0 }
0x12a5   :  { %7596 = vmatmul.mubr.f32.gmra.mxu1 %v3127_v3 }
0x1361   :  { %v7594_v26 = vpop.f32.mrf.mxu1 }
0x1362   :  { %v3223_v11 = vadd.f32 %v7594_v26, %v6561_v7  ;;  %v6565_v26 = vld [vmem:[%s9679_s6 + $0x1] ss:$0 sm:$0xff] }
0x1363   :  { %v3217_v12 = vpop.f32.mrf.mxu1 }
0x1364   :  { %v8999_v1 = vadd.f32 %v3223_v11, %v8893_v30  ;;  %v3218_v16 = vadd.f32 %v6561_v7, %v3217_v12 }
0x1365   :  { %v7597_v4 = vpop.f32.mrf.mxu1 }
0x1366   :  { %v9002_v19 = vadd.f32 %v3218_v16, %v8897_v59  ;;  %v3233_v20 = vadd.f32 %v7597_v4, %v6561_v7  ;;  %v3247_v8 = vsel %vm203_vm1, %v8999_v1, 0.0 }
0x1367   :  { %3248 = vadd.xlane.f32.xlu1 %v3247_v8  ;;  %v3227_v33 = vpop.f32.mrf.mxu1 }
0x1368   :  { %v9007_v34 = vadd.f32 %v3233_v20, %v8903_v21  ;;  %v3228_v13 = vadd.f32 %v6561_v7, %v3227_v33  ;;  %v3244_v35 = vsel %vm203_vm1, %v9002_v19, 0.0 }
0x1369   :  { %3245 = vadd.xlane.f32.xlu0 %v3244_v35  ;;  %v6578_v35 = vld [vmem:[%s9716_s29 + $0x90] sm:$0xff] }
0x136a   :  { %v9012_v30 = vadd.f32 %v3228_v13, %v8908_v17  ;;  %v3253_v59 = vsel %vm203_vm1, %v9007_v34, 0.0 }
0x136b   :  { %3254 = vadd.xlane.f32.xlu1 %v3253_v59 }
0x136c   :  { %v3250_v36 = vsel %vm203_vm1, %v9012_v30, 0.0 }
0x136d   :  { %3251 = vadd.xlane.f32.xlu0 %v3250_v36  ;;  %v6577_v36 = vld [vmem:[%s9716_s29 + $0x88] sm:$0xff] }
0x13f0   :  { %v3249_v37 = vpop.xlane.xlu1 %3248 }
0x13f1   :  { %v3257_v38 = vmul.f32 0.03125, %v3249_v37 }
0x13f2   :  { %v3246_v21 = vpop.xlane.xlu0 %3245 }
0x13f3   :  { %v3261_v39 = vsub.f32 %v8999_v1, %v3257_v38  ;;  %v3256_v40 = vmul.f32 0.03125, %v3246_v21  ;;  %v6576_v38 = vld [vmem:[%s9716_s29 + $0x80] sm:$0xff]  ;;  %v6589_v21 = vld [vmem:[%s9715_s5 + $0x98] sm:$0xff] }
0x13f4   :  { %v3255_v15 = vpop.xlane.xlu1 %3254 }
0x13f5   :  { %v3260_v41 = vsub.f32 %v9002_v19, %v3256_v40  ;;  %v3259_v23 = vmul.f32 0.03125, %v3255_v15  ;;  %v3265_v17 = vmul.f32 %v3261_v39, %v3261_v39  ;;  %v6587_v40 = vld [vmem:[%s9715_s5 + $0x88] sm:$0xff]  ;;  %v6586_v15 = vld [vmem:[%s9715_s5 + $0x80] sm:$0xff] }
0x13f6   :  { %v3252_v25 = vpop.xlane.xlu0 %3251 }
0x13f7   :  { %v3263_v5 = vsub.f32 %v9007_v34, %v3259_v23  ;;  %v3258_v31 = vmul.f32 0.03125, %v3252_v25  ;;  %v3271_v44 = vsel %vm203_vm1, %v3265_v17, 0.0  ;;  %v3264_v22 = vmul.f32 %v3260_v41, %v3260_v41  ;;  %v6571_v23 = vld [vmem:[%s9680_s8 + $0x4] ss:$0 sm:$0xff] }
0x13f8   :  { %3272 = vadd.xlane.f32.xlu1 %v3271_v44 }
0x13f9   :  { %v3262_v45 = vsub.f32 %v9012_v30, %v3258_v31  ;;  %v3268_v6 = vsel %vm203_vm1, %v3264_v22, 0.0  ;;  %v3267_v24 = vmul.f32 %v3263_v5, %v3263_v5 }
0x13fa   :  { %3269 = vadd.xlane.f32.xlu0 %v3268_v6 }
0x13fb   :  { %v3277_v46 = vsel %vm203_vm1, %v3267_v24, 0.0  ;;  %v3266_v9 = vmul.f32 %v3262_v45, %v3262_v45 }
0x13fc   :  { %3278 = vadd.xlane.f32.xlu1 %v3277_v46 }
0x13fd   :  { %v3274_v28 = vsel %vm203_vm1, %v3266_v9, 0.0 }
0x13fe   :  { %3275 = vadd.xlane.f32.xlu0 %v3274_v28 }
0x1481   :  { %v3273_v50 = vpop.xlane.xlu1 %3272 }
0x1482   :  { %v3281_v52 = vmul.f32 0.03125, %v3273_v50 }
0x1483   :  { %v3270_v53 = vpop.xlane.xlu0 %3269 }
0x1484   :  { %v3285_v54 = vadd.f32 1e-05, %v3281_v52  ;;  %v3280_v14 = vmul.f32 0.03125, %v3270_v53 }
0x1485   :  { %v3279_v55 = vpop.xlane.xlu1 %3278 }
0x1486   :  { %8050 = vrsqrt.f32 %v3285_v54  ;;  %v3284_v56 = vadd.f32 1e-05, %v3280_v14  ;;  %v3283_v57 = vmul.f32 0.03125, %v3279_v55  ;;  %v6622_v14 = vld [vmem:[%s9716_s29 + $0xb8] sm:$0xff] }
0x1487   :  { %v3276_v42 = vpop.xlane.xlu0 %3275 }
0x1488   :  { %8052 = vrsqrt.f32 %v3284_v56  ;;  %v3287_v60 = vadd.f32 1e-05, %v3283_v57  ;;  %v3282_v62 = vmul.f32 0.03125, %v3276_v42  ;;  %v6621_v42 = vld [vmem:[%s9716_s29 + $0xb0] sm:$0xff] }
0x148a   :  { %8054 = vrsqrt.f32 %v3287_v60  ;;  %v3286_v43 = vadd.f32 1e-05, %v3282_v62  ;;  %v6620_v60 = vld [vmem:[%s9716_s29 + $0xa8] sm:$0xff] }
0x148c   :  { %8056 = vrsqrt.f32 %v3286_v43  ;;  %v6619_v43 = vld [vmem:[%s9716_s29 + $0xa0] sm:$0xff] }
0x1493   :  { %v8051_v18 = vpop.eup %8050 }
0x1494   :  { %v3293_v27 = vmul.f32 %v8051_v18, %v3261_v39  ;;  %v6588_v39 = vld [vmem:[%s9715_s5 + $0x90] sm:$0xff] }
0x1495   :  { %v8053_v2 = vpop.eup %8052 }
0x1496   :  { %v3292_v0 = vmul.f32 %v8053_v2, %v3260_v41  ;;  %v3303_v7 = vmul.f32 %v6564_v63, %v3293_v27 }
0x1497   :  { %v8055_v3 = vpop.eup %8054 }
0x1498   :  { %v3302_v11 = vmul.f32 %v6564_v63, %v3292_v0  ;;  %v3295_v12 = vmul.f32 %v8055_v3, %v3263_v5  ;;  %v9049_v8 = vadd.f32 %v6565_v26, %v3303_v7 }
0x1499   :  { %v8057_v16 = vpop.eup %8056 }
0x149a   :  { %v9047_v4 = vadd.f32 %v6565_v26, %v3302_v11  ;;  %v3294_v20 = vmul.f32 %v8057_v16, %v3262_v45  ;;  %v3305_v33 = vmul.f32 %v6564_v63, %v3295_v12  ;;  %v6581_v45 = vld [vmem:[%s9682_s10 + $0x4] ss:$0 sm:$0xff] }
0x149c   :  { %v3304_v13 = vmul.f32 %v6564_v63, %v3294_v20  ;;  %7606 = vmatprep.mubr.msk.f32.mxu0 %vm203_vm1, %v9047_v4  ;;  %v9063_v37 = vadd.f32 %v6565_v26, %v3305_v33 }
0x149d   :  { %7607 = vmatmul.mubr.msk.f32.vlgmr.msra.gmra.mxu0 %vm203_vm1, %v9049_v8 }
0x149e   :  { %v9058_v59 = vadd.f32 %v6565_v26, %v3304_v13  ;;  %7613 = vmatpush3.msra.mxu0 %v6579_v49 }
0x149f   :  { %7614 = vmatprep.subr.mxu0 %v6578_v35 }
0x14a0   :  { %7615 = vmatpush3.msra.mxu0 %v6578_v35  ;;  %7609 = vmatprep.mubr.msk.f32.mxu0 %vm203_vm1, %v9058_v59 }
0x14a1   :  { %7616 = vmatprep.subr.mxu0 %v6577_v36  ;;  %7610 = vmatmul.mubr.msk.f32.gmra.mxu0 %vm203_vm1, %v9063_v37 }
0x14a2   :  { %7617 = vmatpush3.msra.mxu0 %v6577_v36  ;;  %7620 = vmatprep.mubr.msk.f32.mxu0 %vm203_vm1, %v9047_v4 }
0x14a3   :  { %7618 = vmatprep.subr.mxu0 %v6576_v38 }
0x14a4   :  { %7619 = vmatpush3.msra.mxu0 %v6576_v38 }
0x14a5   :  { %7621 = vmatmul.mubr.msk.f32.vlgmr.msra.gmra.mxu0 %vm203_vm1, %v9049_v8  ;;  %7626 = vmatprep.subr.mxu0 %v6589_v21 }
0x14a6   :  { %7623 = vmatprep.mubr.msk.f32.mxu0 %vm203_vm1, %v9058_v59  ;;  %7627 = vmatpush3.msra.mxu0 %v6589_v21 }
0x14a7   :  { %7628 = vmatprep.subr.mxu0 %v6588_v39 }
0x14a8   :  { %7629 = vmatpush3.msra.mxu0 %v6588_v39 }
0x14a9   :  { %7624 = vmatmul.mubr.msk.f32.gmra.mxu0 %vm203_vm1, %v9063_v37  ;;  %7630 = vmatprep.subr.mxu0 %v6587_v40 }
0x14aa   :  { %7631 = vmatpush3.msra.mxu0 %v6587_v40  ;;  %7634 = vmatprep.mubr.msk.f32.mxu0 %vm203_vm1, %v9047_v4 }
0x14ab   :  { %7632 = vmatprep.subr.mxu0 %v6586_v15 }
0x14ac   :  { %7633 = vmatpush3.msra.mxu0 %v6586_v15 }
0x14ad   :  { %7635 = vmatmul.mubr.msk.f32.vlgmr.msra.gmra.mxu0 %vm203_vm1, %v9049_v8 }
0x14ae   :  { %7637 = vmatprep.mubr.msk.f32.mxu0 %vm203_vm1, %v9058_v59 }
0x14b1   :  { %7638 = vmatmul.mubr.msk.f32.gmra.mxu0 %vm203_vm1, %v9063_v37 }
0x155d   :  { %v7608_v41 = vpop.f32.mrf.mxu0 }
0x155e   :  { %v3413_v56 = vadd.f32 %v7608_v41, %v6571_v23 }
0x155f   :  { %v3407_v17 = vpop.f32.mrf.mxu0 }
0x1560   :  { %v3408_v25 = vadd.f32 %v6571_v23, %v3407_v17 }
0x1561   :  { %v7611_v5 = vpop.f32.mrf.mxu0 }
0x1562   :  { %7648 = vmatprep.mubr.msk.f32.mxu0 %vm577_vm2, %v3408_v25  ;;  %v3423_v62 = vadd.f32 %v7611_v5, %v6571_v23 }
0x1563   :  { %v3417_v31 = vpop.f32.mrf.mxu0 }
0x1564   :  { %v3418_v57 = vadd.f32 %v6571_v23, %v3417_v31 }
0x1565   :  { %v7622_v44 = vpop.f32.mrf.mxu0 }
0x1566   :  { %v3511_v29 = vadd.f32 %v7622_v44, %v6581_v45 }
0x1567   :  { %v3505_v22 = vpop.f32.mrf.mxu0 }
0x1568   :  { %v3506_v52 = vadd.f32 %v6581_v45, %v3505_v22 }
0x1569   :  { %v7625_v6 = vpop.f32.mrf.mxu0 }
0x156a   :  { %v3521_v24 = vadd.f32 %v7625_v6, %v6581_v45 }
0x156b   :  { %v3515_v46 = vpop.f32.mrf.mxu0 }
0x156c   :  { %v3516_v9 = vadd.f32 %v6581_v45, %v3515_v46  ;;  %7640 = vmatprep.subr.msk.mxu0 %vm577_vm2, %v3521_v24 }
0x156d   :  { %v7636_v28 = vpop.f32.mrf.mxu0  ;;  %7641 = vmatpush3.xpose.msk.msra.mxu0 %vm577_vm2, %v3521_v24 }
0x156e   :  { %7642 = vmatprep.subr.msk.mxu0 %vm577_vm2, %v3516_v9  ;;  %v3609_v54 = vadd.f32 %v7636_v28, %v6591_v47 }
0x156f   :  { %v3603_v10 = vpop.f32.mrf.mxu0 }
0x1570   :  { %v3604_v55 = vadd.f32 %v6591_v47, %v3603_v10 }
0x1571   :  { %v7639_v48 = vpop.f32.mrf.mxu0  ;;  %7643 = vmatpush3.xpose.msk.msra.mxu0 %vm577_vm2, %v3516_v9 }
0x1572   :  { %v3619_v49 = vadd.f32 %v7639_v48, %v6591_v47  ;;  %7644 = vmatprep.subr.msk.mxu0 %vm577_vm2, %v3511_v29 }
0x1573   :  { %v3613_v50 = vpop.f32.mrf.mxu0 }
0x1574   :  { %v3614_v53 = vadd.f32 %v6591_v47, %v3613_v50  ;;  %7654 = vmatprep.subr.mxu1 %v3619_v49 }
0x1575   :  { %7645 = vmatpush3.xpose.msk.msra.mxu0 %vm577_vm2, %v3511_v29  ;;  %7655 = vmatpush3.msra.mxu1 %v3619_v49 }
0x1576   :  { %7646 = vmatprep.subr.msk.mxu0 %vm577_vm2, %v3506_v52  ;;  %7656 = vmatprep.subr.mxu1 %v3614_v53 }
0x1577   :  { %7657 = vmatpush3.msra.mxu1 %v3614_v53 }
0x1578   :  { %7658 = vmatprep.subr.mxu1 %v3609_v54 }
0x1579   :  { %7647 = vmatpush3.xpose.msk.msra.mxu0 %vm577_vm2, %v3506_v52  ;;  %7659 = vmatpush3.msra.mxu1 %v3609_v54  ;;  %v6612_v52 = vld [vmem:[%s9714_s3 + $0xb8] sm:$0xff] }
0x157a   :  { %7660 = vmatprep.subr.mxu1 %v3604_v55  ;;  %7682 = vmatprep.subr.mxu0 %v6622_v14 }
0x157b   :  { %7661 = vmatpush3.msra.mxu1 %v3604_v55 }
0x157c   :  { %7649 = vmatmul.mubr.msk.f32.vlgmr.msra.gmra.mxu0 %vm577_vm2, %v3413_v56  ;;  %7668 = vmatprep.subr.mxu1 %v6612_v52 }
0x157d   :  { %7651 = vmatprep.mubr.msk.f32.mxu0 %vm577_vm2, %v3418_v57  ;;  %7683 = vmatpush3.msra.mxu0 %v6622_v14 }
0x157e   :  { %7684 = vmatprep.subr.mxu0 %v6621_v42 }
0x157f   :  { %7685 = vmatpush3.msra.mxu0 %v6621_v42 }
0x1580   :  { %7652 = vmatmul.mubr.msk.f32.gmra.mxu0 %vm577_vm2, %v3423_v62  ;;  %7686 = vmatprep.subr.mxu0 %v6620_v60 }
0x1581   :  { %7687 = vmatpush3.msra.mxu0 %v6620_v60  ;;  %7690 = vmatprep.mubr.msk.f32.mxu0 %vm203_vm1, %v9047_v4 }
0x1582   :  { %7688 = vmatprep.subr.mxu0 %v6619_v43 }
0x1583   :  { %7689 = vmatpush3.msra.mxu0 %v6619_v43  ;;  %v6611_v43 = vld [vmem:[%s9714_s3 + $0xb0] sm:$0xff] }
0x1584   :  { %7691 = vmatmul.mubr.msk.f32.vlgmr.msra.gmra.mxu0 %vm203_vm1, %v9049_v8 }
0x1585   :  { %7693 = vmatprep.mubr.msk.f32.mxu0 %vm203_vm1, %v9058_v59 }
0x1588   :  { %7694 = vmatmul.mubr.msk.f32.gmra.mxu0 %vm203_vm1, %v9063_v37 }
0x163c   :  { %v7650_v18 = vpop.f32.mrf.mxu0 }
0x163d   :  { %v3732_v63 = vmul.f32 0.35355338, %v7650_v18 }
0x163e   :  { %v3712_v27 = vpop.f32.mrf.mxu0 }
0x163f   :  { %v3731_v2 = vmul.f32 0.35355338, %v3712_v27  ;;  %v3736_v0 = vadd.f32 %v8847_v51, %v3732_v63  ;;  %v6610_v27 = vld [vmem:[%s9714_s3 + $0xa8] sm:$0xff] }
0x1640   :  { %v7653_v3 = vpop.f32.mrf.mxu0 }
0x1641   :  { %v3734_v7 = vmul.f32 0.35355338, %v7653_v3  ;;  %v3742_v26 = vsel %vm203_vm1, %v3736_v0, -inf  ;;  %v3735_v11 = vadd.f32 %v8854_v32, %v3731_v2  ;;  %v6624_v32 = vld [vmem:[%s9682_s10 + $0x5] ss:$0 sm:$0xff]  ;;  %v6632_v3 = vld [vmem:[%s9715_s5 + $0xb8] sm:$0xff] }
0x1642   :  { %3743 = vmax.xlane.f32.xlu1 %v3742_v26  ;;  %v3722_v12 = vpop.f32.mrf.mxu0  ;;  %v6630_v26 = vld [vmem:[%s9715_s5 + $0xa8] sm:$0xff] }
0x1643   :  { %v3733_v16 = vmul.f32 0.35355338, %v3722_v12  ;;  %v3739_v20 = vsel %vm203_vm1, %v3735_v11, -inf  ;;  %v3738_v33 = vadd.f32 %v8861_v58, %v3734_v7  ;;  %v6631_v7 = vld [vmem:[%s9715_s5 + $0xb0] sm:$0xff]  ;;  %v6608_v12 = vld [vmem:[%s9684_s13 + $0x20] sm:$0xff] }
0x1644   :  { %3740 = vmax.xlane.f32.xlu0 %v3739_v20  ;;  %v7692_v13 = vpop.f32.mrf.mxu0 }
0x1645   :  { %v3748_v35 = vsel %vm203_vm1, %v3738_v33, -inf  ;;  %v3737_v36 = vadd.f32 %v8868_v61, %v3733_v16  ;;  %v4065_v58 = vadd.f32 %v7692_v13, %v6624_v32 }
0x1646   :  { %3749 = vmax.xlane.f32.xlu1 %v3748_v35  ;;  %v4059_v51 = vpop.f32.mrf.mxu0 }
0x1647   :  { %v3745_v38 = vsel %vm203_vm1, %v3737_v36, -inf  ;;  %v4060_v61 = vadd.f32 %v6624_v32, %v4059_v51 }
0x1648   :  { %v7695_v21 = vpop.f32.mrf.mxu0  ;;  %3746 = vmax.xlane.f32.xlu0 %v3745_v38 }
0x1649   :  { %v4075_v39 = vadd.f32 %v7695_v21, %v6624_v32 }
0x164a   :  { %v4069_v40 = vpop.f32.mrf.mxu0 }
0x164b   :  { %v4070_v15 = vadd.f32 %v6624_v32, %v4069_v40  ;;  %7710 = vmatprep.subr.msk.mxu0 %vm577_vm2, %v4075_v39 }
0x164c   :  { %7711 = vmatpush3.xpose.msk.msra.mxu0 %vm577_vm2, %v4075_v39  ;;  %v6673_v39 = vld [vmem:[%s9716_s29 + $0xd8] sm:$0xff] }
0x164d   :  { %7712 = vmatprep.subr.msk.mxu0 %vm577_vm2, %v4070_v15 }
0x1650   :  { %7713 = vmatpush3.xpose.msk.msra.mxu0 %vm577_vm2, %v4070_v15 }
0x1651   :  { %7714 = vmatprep.subr.msk.mxu0 %vm577_vm2, %v4065_v58 }
0x1654   :  { %7715 = vmatpush3.xpose.msk.msra.mxu0 %vm577_vm2, %v4065_v58 }
0x1655   :  { %7716 = vmatprep.subr.msk.mxu0 %vm577_vm2, %v4060_v61 }
0x1658   :  { %7717 = vmatpush3.xpose.msk.msra.mxu0 %vm577_vm2, %v4060_v61 }
0x1659   :  { %7746 = vmatprep.subr.mxu0 %v6608_v12 }
0x16cb   :  { %v3744_v41 = vpop.xlane.xlu1 %3743 }
0x16cc   :  { %v3752_v23 = vsub.f32 %v3736_v0, %v3744_v41  ;;  %v6609_v0 = vld [vmem:[%s9714_s3 + $0xa0] sm:$0xff] }
0x16cd   :  { %v3741_v17 = vpop.xlane.xlu0 %3740 }
0x16ce   :  { %v3757_v25 = vmul.f32 1.442695, %v3752_v23  ;;  %v3751_v5 = vsub.f32 %v3735_v11, %v3741_v17  ;;  %v6629_v11 = vld [vmem:[%s9715_s5 + $0xa0] sm:$0xff] }
0x16cf   :  { %v3750_v31 = vpop.xlane.xlu1 %3749  ;;  %v6634_v23 = vld [vmem:[%s9681_s12 + $0x5] ss:$0 sm:$0xff] }
0x16d0   :  { %8058 = vpow2.f32 %v3757_v25  ;;  %v3755_v44 = vmul.f32 1.442695, %v3751_v5  ;;  %v3754_v22 = vsub.f32 %v3738_v33, %v3750_v31  ;;  %v6672_v31 = vld [vmem:[%s9716_s29 + $0xd0] sm:$0xff] }
0x16d1   :  { %v3747_v45 = vpop.xlane.xlu0 %3746 }
0x16d2   :  { %8060 = vpow2.f32 %v3755_v44  ;;  %v3761_v6 = vmul.f32 1.442695, %v3754_v22  ;;  %v3753_v24 = vsub.f32 %v3737_v36, %v3747_v45  ;;  %v6614_v36 = vld [vmem:[%s9680_s8 + $0x5] ss:$0 sm:$0xff]  ;;  %v6671_v22 = vld [vmem:[%s9716_s29 + $0xc8] sm:$0xff] }
0x16d4   :  { %8062 = vpow2.f32 %v3761_v6  ;;  %v3759_v46 = vmul.f32 1.442695, %v3753_v24  ;;  %v6670_v6 = vld [vmem:[%s9716_s29 + $0xc0] sm:$0xff] }
0x16d6   :  { %8064 = vpow2.f32 %v3759_v46 }
0x16dd   :  { %v8059_v9 = vpop.eup %8058 }
0x16de   :  { %v3766_v28 = vsel %vm203_vm1, %v8059_v9, 0.0 }
0x16df   :  { %v8061_v10 = vpop.eup %8060  ;;  %3767 = vadd.xlane.f32.xlu1 %v3766_v28 }
0x16e0   :  { %v3763_v29 = vsel %vm203_vm1, %v8061_v10, 0.0 }
0x16e1   :  { %v8063_v47 = vpop.eup %8062  ;;  %3764 = vadd.xlane.f32.xlu0 %v3763_v29  ;;  %v9248_v29 = vld [vmem:[%s9683_s1 + $0x8] sm:$0xff] }
0x16e2   :  { %v3772_v48 = vsel %vm203_vm1, %v8063_v47, 0.0 }
0x16e3   :  { %v8065_v49 = vpop.eup %8064  ;;  %3773 = vadd.xlane.f32.xlu1 %v3772_v48 }
0x16e4   :  { %v3769_v50 = vsel %vm203_vm1, %v8065_v49, 0.0 }
0x16e5   :  { %3770 = vadd.xlane.f32.xlu0 %v3769_v50 }
0x1768   :  { %v3768_v53 = vpop.xlane.xlu1 %3767 }
0x1769   :  { %8066 = vrcp.f32 %v3768_v53 }
0x176a   :  { %v3765_v54 = vpop.xlane.xlu0 %3764 }
0x176b   :  { %8068 = vrcp.f32 %v3765_v54 }
0x176c   :  { %v3774_v14 = vpop.xlane.xlu1 %3773 }
0x176d   :  { %8070 = vrcp.f32 %v3774_v14 }
0x176e   :  { %v3771_v55 = vpop.xlane.xlu0 %3770 }
0x176f   :  { %8072 = vrcp.f32 %v3771_v55 }
0x1776   :  { %v8067_v56 = vpop.eup %8066 }
0x1777   :  { %v3780_v60 = vmul.f32 %v8067_v56, %v8059_v9  ;;  %v9262_v56 = vld [vmem:[%s9683_s1 + $0x18] sm:$0xff] }
0x1778   :  { %v8069_v57 = vpop.eup %8068 }
0x1779   :  { %v3779_v42 = vmul.f32 %v8069_v57, %v8061_v10 }
0x177a   :  { %v8071_v62 = vpop.eup %8070 }
0x177b   :  { %7662 = vmatprep.mubr.msk.f32.mxu1 %vm203_vm1, %v3779_v42  ;;  %v3782_v2 = vmul.f32 %v8071_v62, %v8063_v47  ;;  %v9271_v62 = vld [vmem:[%s9683_s1 + $0x10] sm:$0xff] }
0x177c   :  { %v8073_v18 = vpop.eup %8072  ;;  %7663 = vmatmul.mubr.msk.f32.vlgmr.msra.gmra.mxu1 %vm203_vm1, %v3780_v60 }
0x177d   :  { %7669 = vmatpush3.msra.mxu1 %v6612_v52  ;;  %v3781_v63 = vmul.f32 %v8073_v18, %v8065_v49  ;;  %v9255_v52 = vld [vmem:[%s9683_s1] sm:$0xff] }
0x177e   :  { %7670 = vmatprep.subr.mxu1 %v6611_v43 }
0x177f   :  { %7671 = vmatpush3.msra.mxu1 %v6611_v43  ;;  %7665 = vmatprep.mubr.msk.f32.mxu1 %vm203_vm1, %v3781_v63 }
0x1780   :  { %7672 = vmatprep.subr.mxu1 %v6610_v27  ;;  %7666 = vmatmul.mubr.msk.f32.gmra.mxu1 %vm203_vm1, %v3782_v2 }
0x1781   :  { %7673 = vmatpush3.msra.mxu1 %v6610_v27  ;;  %7676 = vmatprep.mubr.msk.f32.mxu1 %vm203_vm1, %v9047_v4 }
0x1782   :  { %7674 = vmatprep.subr.mxu1 %v6609_v0 }
0x1783   :  { %7675 = vmatpush3.msra.mxu1 %v6609_v0 }
0x1784   :  { %7677 = vmatmul.mubr.msk.f32.vlgmr.msra.gmra.mxu1 %vm203_vm1, %v9049_v8  ;;  %7696 = vmatprep.subr.mxu1 %v6632_v3 }
0x1785   :  { %7679 = vmatprep.mubr.msk.f32.mxu1 %vm203_vm1, %v9058_v59  ;;  %7697 = vmatpush3.msra.mxu1 %v6632_v3 }
0x1786   :  { %7698 = vmatprep.subr.mxu1 %v6631_v7 }
0x1787   :  { %7699 = vmatpush3.msra.mxu1 %v6631_v7  ;;  %v6675_v7 = vld [vmem:[%s9682_s10 + $0x6] ss:$0 sm:$0xff] }
0x1788   :  { %7680 = vmatmul.mubr.msk.f32.gmra.mxu1 %vm203_vm1, %v9063_v37  ;;  %7700 = vmatprep.subr.mxu1 %v6630_v26 }
0x1789   :  { %7701 = vmatpush3.msra.mxu1 %v6630_v26  ;;  %7704 = vmatprep.mubr.msk.f32.mxu1 %vm203_vm1, %v9047_v4 }
0x178a   :  { %7702 = vmatprep.subr.mxu1 %v6629_v11 }
0x178b   :  { %7703 = vmatpush3.msra.mxu1 %v6629_v11 }
0x178c   :  { %7705 = vmatmul.mubr.msk.f32.vlgmr.msra.gmra.mxu1 %vm203_vm1, %v9049_v8 }
0x178d   :  { %7707 = vmatprep.mubr.msk.f32.mxu1 %vm203_vm1, %v9058_v59 }
0x1790   :  { %7708 = vmatmul.mubr.msk.f32.gmra.mxu1 %vm203_vm1, %v9063_v37 }
0x183c   :  { %v7664_v16 = vpop.f32.mrf.mxu1 }
0x183e   :  { %v3861_v20 = vpop.f32.mrf.mxu1 }
0x1840   :  { %v7667_v33 = vpop.f32.mrf.mxu1 }
0x1842   :  { %v3871_v13 = vpop.f32.mrf.mxu1 }
0x1844   :  { %v7678_v35 = vpop.f32.mrf.mxu1 }
0x1845   :  { %v3967_v32 = vadd.f32 %v7678_v35, %v6614_v36 }
0x1846   :  { %v3961_v51 = vpop.f32.mrf.mxu1 }
0x1847   :  { %v3962_v38 = vadd.f32 %v6614_v36, %v3961_v51 }
0x1848   :  { %v7681_v21 = vpop.f32.mrf.mxu1 }
0x1849   :  { %7718 = vmatprep.mubr.msk.f32.mxu0 %vm577_vm2, %v3962_v38  ;;  %v3977_v58 = vadd.f32 %v7681_v21, %v6614_v36 }
0x184a   :  { %v3971_v40 = vpop.f32.mrf.mxu1  ;;  %7719 = vmatmul.mubr.msk.f32.vlgmr.msra.gmra.mxu0 %vm577_vm2, %v3967_v32 }
0x184b   :  { %v3972_v15 = vadd.f32 %v6614_v36, %v3971_v40  ;;  %7747 = vmatpush3.msra.mxu0 %v6608_v12 }
0x184c   :  { %v7706_v61 = vpop.f32.mrf.mxu1  ;;  %7768 = vmatprep.subr.mxu0 %v6673_v39 }
0x184d   :  { %7721 = vmatprep.mubr.msk.f32.mxu0 %vm577_vm2, %v3972_v15  ;;  %v4163_v45 = vadd.f32 %v7706_v61, %v6634_v23 }
0x184e   :  { %v4157_v41 = vpop.f32.mrf.mxu1  ;;  %7722 = vmatmul.mubr.msk.f32.gmra.mxu0 %vm577_vm2, %v3977_v58 }
0x184f   :  { %7748 = vmatprep.mubr.msk.f32.mxu0 %vm577_vm2, %v3861_v20  ;;  %v4158_v24 = vadd.f32 %v6634_v23, %v4157_v41 }
0x1850   :  { %v7709_v17 = vpop.f32.mrf.mxu1 }
0x1851   :  { %v4173_v25 = vadd.f32 %v7709_v17, %v6634_v23 }
0x1852   :  { %v4167_v5 = vpop.f32.mrf.mxu1  ;;  %7749 = vmatmul.mubr.msk.f32.vlgmr.msra.gmra.mxu0 %vm577_vm2, %v7664_v16 }
0x1853   :  { %v4168_v44 = vadd.f32 %v6634_v23, %v4167_v5  ;;  %7724 = vmatprep.subr.mxu1 %v4173_v25  ;;  %7751 = vmatprep.mubr.msk.f32.mxu0 %vm577_vm2, %v3871_v13 }
0x1854   :  { %7769 = vmatpush3.msra.mxu0 %v6673_v39  ;;  %7725 = vmatpush3.msra.mxu1 %v4173_v25 }
0x1855   :  { %7770 = vmatprep.subr.mxu0 %v6672_v31  ;;  %7726 = vmatprep.subr.mxu1 %v4168_v44 }
0x1856   :  { %7771 = vmatpush3.msra.mxu0 %v6672_v31  ;;  %7727 = vmatpush3.msra.mxu1 %v4168_v44 }
0x1857   :  { %7752 = vmatmul.mubr.msk.f32.gmra.mxu0 %vm577_vm2, %v7667_v33  ;;  %7772 = vmatprep.subr.mxu0 %v6671_v22 }
0x1858   :  { %7728 = vmatprep.subr.mxu1 %v4163_v45  ;;  %7773 = vmatpush3.msra.mxu0 %v6671_v22 }
0x1859   :  { %7776 = vmatprep.mubr.msk.f32.mxu0 %vm203_vm1, %v9047_v4  ;;  %7729 = vmatpush3.msra.mxu1 %v4163_v45  ;;  %v6651_v45 = vld [vmem:[%s9684_s13 + $0x28] sm:$0xff] }
0x185a   :  { %7774 = vmatprep.subr.mxu0 %v6670_v6  ;;  %7730 = vmatprep.subr.mxu1 %v4158_v24 }
0x185b   :  { %7775 = vmatpush3.msra.mxu0 %v6670_v6  ;;  %7731 = vmatpush3.msra.mxu1 %v4158_v24 }
0x185c   :  { %7777 = vmatmul.mubr.msk.f32.vlgmr.msra.gmra.mxu0 %vm203_vm1, %v9049_v8  ;;  %7738 = vmatprep.subr.mxu1 %v6651_v45 }
0x185d   :  { %7779 = vmatprep.mubr.msk.f32.mxu0 %vm203_vm1, %v9058_v59 }
0x1860   :  { %7780 = vmatmul.mubr.msk.f32.gmra.mxu0 %vm203_vm1, %v9063_v37 }
0x190a   :  { %v7720_v46 = vpop.f32.mrf.mxu0 }
0x190b   :  { %v4286_v9 = vmul.f32 0.35355338, %v7720_v46 }
0x190c   :  { %v4266_v28 = vpop.f32.mrf.mxu0 }
0x190d   :  { %v4285_v10 = vmul.f32 0.35355338, %v4266_v28  ;;  %v4290_v47 = vadd.f32 %v9248_v29, %v4286_v9 }
0x190e   :  { %v7723_v48 = vpop.f32.mrf.mxu0 }
0x190f   :  { %v4288_v49 = vmul.f32 0.35355338, %v7723_v48  ;;  %v4296_v50 = vsel %vm203_vm1, %v4290_v47, -inf  ;;  %v4289_v53 = vadd.f32 %v9255_v52, %v4285_v10 }
0x1910   :  { %4297 = vmax.xlane.f32.xlu1 %v4296_v50  ;;  %v4276_v54 = vpop.f32.mrf.mxu0 }
0x1911   :  { %v4287_v14 = vmul.f32 0.35355338, %v4276_v54  ;;  %v4293_v55 = vsel %vm203_vm1, %v4289_v53, -inf  ;;  %v4292_v57 = vadd.f32 %v9262_v56, %v4288_v49 }
0x1912   :  { %4294 = vmax.xlane.f32.xlu0 %v4293_v55  ;;  %v9265_v42 = vpop.f32.mrf.mxu0 }
0x1913   :  { %v4302_v60 = vsel %vm203_vm1, %v4292_v57, -inf  ;;  %v4291_v43 = vadd.f32 %v9271_v62, %v4287_v14  ;;  %v6663_v14 = vld [vmem:[%s9714_s3 + $0xd8] sm:$0xff] }
0x1914   :  { %4303 = vmax.xlane.f32.xlu1 %v4302_v60  ;;  %v9274_v18 = vpop.f32.mrf.mxu0  ;;  %v6662_v60 = vld [vmem:[%s9714_s3 + $0xd0] sm:$0xff] }
0x1915   :  { %v4299_v63 = vsel %vm203_vm1, %v4291_v43, -inf }
0x1916   :  { %4300 = vmax.xlane.f32.xlu0 %v4299_v63  ;;  %v6661_v63 = vld [vmem:[%s9714_s3 + $0xc8] sm:$0xff] }
0x1917   :  { %v9277_v27 = vpop.f32.mrf.mxu0 }
0x1919   :  { %v9279_v2 = vpop.f32.mrf.mxu0 }
0x191c   :  { %v7778_v0 = vpop.f32.mrf.mxu0 }
0x191d   :  { %v4813_v20 = vadd.f32 %v7778_v0, %v6675_v7 }
0x191e   :  { %v4807_v3 = vpop.f32.mrf.mxu0 }
0x191f   :  { %v4808_v33 = vadd.f32 %v6675_v7, %v4807_v3  ;;  %v6660_v3 = vld [vmem:[%s9714_s3 + $0xc0] sm:$0xff] }
0x1920   :  { %v7781_v26 = vpop.f32.mrf.mxu0 }
0x1921   :  { %v4823_v11 = vadd.f32 %v7781_v26, %v6675_v7  ;;  %v6682_v26 = vld [vmem:[%s9715_s5 + $0xd0] sm:$0xff] }
0x1922   :  { %v4817_v12 = vpop.f32.mrf.mxu0 }
0x1923   :  { %v4818_v16 = vadd.f32 %v6675_v7, %v4817_v12  ;;  %7796 = vmatprep.subr.msk.mxu0 %vm577_vm2, %v4823_v11  ;;  %v6683_v7 = vld [vmem:[%s9715_s5 + $0xd8] sm:$0xff]  ;;  %v6680_v12 = vld [vmem:[%s9715_s5 + $0xc0] sm:$0xff] }
0x1924   :  { %7797 = vmatpush3.xpose.msk.msra.mxu0 %vm577_vm2, %v4823_v11  ;;  %v6681_v11 = vld [vmem:[%s9715_s5 + $0xc8] sm:$0xff] }
0x1925   :  { %7798 = vmatprep.subr.msk.mxu0 %vm577_vm2, %v4818_v16 }
0x1928   :  { %7799 = vmatpush3.xpose.msk.msra.mxu0 %vm577_vm2, %v4818_v16  ;;  %v6710_v16 = vld [vmem:[%s9714_s3 + $0xf8] sm:$0xff] }
0x1929   :  { %7800 = vmatprep.subr.msk.mxu0 %vm577_vm2, %v4813_v20 }
0x192c   :  { %7801 = vmatpush3.xpose.msk.msra.mxu0 %vm577_vm2, %v4813_v20 }
0x192d   :  { %7802 = vmatprep.subr.msk.mxu0 %vm577_vm2, %v4808_v33 }
0x1930   :  { %7803 = vmatpush3.xpose.msk.msra.mxu0 %vm577_vm2, %v4808_v33 }
0x1931   :  { %7832 = vmatprep.subr.mxu0 %v6710_v16 }
0x1999   :  { %v4298_v13 = vpop.xlane.xlu1 %4297 }
0x199a   :  { %v4306_v35 = vsub.f32 %v4290_v47, %v4298_v13 }
0x199b   :  { %v4295_v36 = vpop.xlane.xlu0 %4294 }
0x199c   :  { %v4311_v51 = vmul.f32 1.442695, %v4306_v35  ;;  %v4305_v38 = vsub.f32 %v4289_v53, %v4295_v36 }
0x199d   :  { %v4304_v32 = vpop.xlane.xlu1 %4303 }
0x199e   :  { %8074 = vpow2.f32 %v4311_v51  ;;  %v4309_v21 = vmul.f32 1.442695, %v4305_v38  ;;  %v4308_v39 = vsub.f32 %v4292_v57, %v4304_v32  ;;  %v6665_v51 = vld [vmem:[%s9680_s8 + $0x6] ss:$0 sm:$0xff] }
0x199f   :  { %v4301_v40 = vpop.xlane.xlu0 %4300 }
0x19a0   :  { %8076 = vpow2.f32 %v4309_v21  ;;  %v4315_v15 = vmul.f32 1.442695, %v4308_v39  ;;  %v4307_v58 = vsub.f32 %v4291_v43, %v4301_v40  ;;  %v6709_v40 = vld [vmem:[%s9714_s3 + $0xf0] sm:$0xff] }
0x19a2   :  { %8078 = vpow2.f32 %v4315_v15  ;;  %v4313_v61 = vmul.f32 1.442695, %v4307_v58 }
0x19a4   :  { %8080 = vpow2.f32 %v4313_v61  ;;  %v6708_v61 = vld [vmem:[%s9714_s3 + $0xe8] sm:$0xff] }
0x19ab   :  { %v8075_v41 = vpop.eup %8074 }
0x19ac   :  { %v4320_v23 = vsel %vm203_vm1, %v8075_v41, 0.0 }
0x19ad   :  { %v8077_v17 = vpop.eup %8076  ;;  %4321 = vadd.xlane.f32.xlu1 %v4320_v23 }
0x19ae   :  { %v4317_v25 = vsel %vm203_vm1, %v8077_v17, 0.0 }
0x19af   :  { %v8079_v5 = vpop.eup %8078  ;;  %4318 = vadd.xlane.f32.xlu0 %v4317_v25 }
0x19b0   :  { %v4326_v31 = vsel %vm203_vm1, %v8079_v5, 0.0 }
0x19b1   :  { %v8081_v44 = vpop.eup %8080  ;;  %4327 = vadd.xlane.f32.xlu1 %v4326_v31  ;;  %v6685_v31 = vld [vmem:[%s9681_s12 + $0x6] ss:$0 sm:$0xff] }
0x19b2   :  { %v4323_v22 = vsel %vm203_vm1, %v8081_v44, 0.0 }
0x19b3   :  { %4324 = vadd.xlane.f32.xlu0 %v4323_v22 }
0x1a36   :  { %v4322_v6 = vpop.xlane.xlu1 %4321 }
0x1a37   :  { %8082 = vrcp.f32 %v4322_v6  ;;  %v6729_v6 = vld [vmem:[%s9715_s5 + $0xf0] sm:$0xff] }
0x1a38   :  { %v4319_v24 = vpop.xlane.xlu0 %4318 }
0x1a39   :  { %8084 = vrcp.f32 %v4319_v24 }
0x1a3a   :  { %v4328_v46 = vpop.xlane.xlu1 %4327 }
0x1a3b   :  { %8086 = vrcp.f32 %v4328_v46  ;;  %v6728_v46 = vld [vmem:[%s9715_s5 + $0xe8] sm:$0xff] }
0x1a3c   :  { %v4325_v9 = vpop.xlane.xlu0 %4324 }
0x1a3d   :  { %8088 = vrcp.f32 %v4325_v9 }
0x1a44   :  { %v8083_v28 = vpop.eup %8082 }
0x1a45   :  { %v4334_v48 = vmul.f32 %v8083_v28, %v8075_v41  ;;  %v6727_v28 = vld [vmem:[%s9715_s5 + $0xe0] sm:$0xff] }
0x1a46   :  { %v8085_v10 = vpop.eup %8084 }
0x1a47   :  { %v4333_v47 = vmul.f32 %v8085_v10, %v8077_v17  ;;  %v6707_v17 = vld [vmem:[%s9714_s3 + $0xe0] sm:$0xff] }
0x1a48   :  { %v8087_v49 = vpop.eup %8086 }
0x1a49   :  { %7732 = vmatprep.mubr.msk.f32.mxu1 %vm203_vm1, %v4333_v47  ;;  %v4336_v54 = vmul.f32 %v8087_v49, %v8079_v5  ;;  %v6730_v5 = vld [vmem:[%s9715_s5 + $0xf8] sm:$0xff] }
0x1a4a   :  { %v8089_v50 = vpop.eup %8088  ;;  %7733 = vmatmul.mubr.msk.f32.vlgmr.msra.gmra.mxu1 %vm203_vm1, %v4334_v48 }
0x1a4b   :  { %v4335_v53 = vmul.f32 %v8089_v50, %v8081_v44  ;;  %7739 = vmatpush3.msra.mxu1 %v6651_v45 }
0x1a4c   :  { %7754 = vmatprep.subr.mxu1 %v6663_v14 }
0x1a4d   :  { %7735 = vmatprep.mubr.msk.f32.mxu1 %vm203_vm1, %v4335_v53 }
0x1a4e   :  { %7736 = vmatmul.mubr.msk.f32.gmra.mxu1 %vm203_vm1, %v4336_v54 }
0x1b0a   :  { %v7734_v55 = vpop.f32.mrf.mxu1 }
0x1b0c   :  { %v4415_v57 = vpop.f32.mrf.mxu1 }
0x1b0d   :  { %7740 = vmatprep.mubr.msk.f32.mxu1 %vm577_vm2, %v4415_v57 }
0x1b0e   :  { %v7737_v43 = vpop.f32.mrf.mxu1  ;;  %7741 = vmatmul.mubr.msk.f32.vlgmr.msra.gmra.mxu1 %vm577_vm2, %v7734_v55 }
0x1b0f   :  { %7755 = vmatpush3.msra.mxu1 %v6663_v14 }
0x1b10   :  { %7756 = vmatprep.subr.mxu1 %v6662_v60  ;;  %v4425_v0 = vpop.f32.mrf.mxu1 }
0x1b11   :  { %7757 = vmatpush3.msra.mxu1 %v6662_v60  ;;  %7743 = vmatprep.mubr.msk.f32.mxu1 %vm577_vm2, %v4425_v0 }
0x1b12   :  { %7758 = vmatprep.subr.mxu1 %v6661_v63  ;;  %7744 = vmatmul.mubr.msk.f32.gmra.mxu1 %vm577_vm2, %v7737_v43  ;;  %v9411_v43 = vld [vmem:[%s9680_s8 + $0x7] ss:$0 sm:$0xff] }
0x1b13   :  { %7759 = vmatpush3.msra.mxu1 %v6661_v63  ;;  %7762 = vmatprep.mubr.msk.f32.mxu1 %vm203_vm1, %v9047_v4 }
0x1b14   :  { %7760 = vmatprep.subr.mxu1 %v6660_v3 }
0x1b15   :  { %7761 = vmatpush3.msra.mxu1 %v6660_v3 }
0x1b16   :  { %7763 = vmatmul.mubr.msk.f32.vlgmr.msra.gmra.mxu1 %vm203_vm1, %v9049_v8  ;;  %7782 = vmatprep.subr.mxu1 %v6683_v7 }
0x1b17   :  { %7765 = vmatprep.mubr.msk.f32.mxu1 %vm203_vm1, %v9058_v59  ;;  %7783 = vmatpush3.msra.mxu1 %v6683_v7 }
0x1b18   :  { %7784 = vmatprep.subr.mxu1 %v6682_v26 }
0x1b19   :  { %7785 = vmatpush3.msra.mxu1 %v6682_v26 }
0x1b1a   :  { %7766 = vmatmul.mubr.msk.f32.gmra.mxu1 %vm203_vm1, %v9063_v37  ;;  %7786 = vmatprep.subr.mxu1 %v6681_v11 }
0x1b1b   :  { %7787 = vmatpush3.msra.mxu1 %v6681_v11  ;;  %7790 = vmatprep.mubr.msk.f32.mxu1 %vm203_vm1, %v9047_v4 }
0x1b1c   :  { %7788 = vmatprep.subr.mxu1 %v6680_v12 }
0x1b1d   :  { %7789 = vmatpush3.msra.mxu1 %v6680_v12 }
0x1b1e   :  { %7791 = vmatmul.mubr.msk.f32.vlgmr.msra.gmra.mxu1 %vm203_vm1, %v9049_v8 }
0x1b1f   :  { %7793 = vmatprep.mubr.msk.f32.mxu1 %vm203_vm1, %v9058_v59 }
0x1b22   :  { %7794 = vmatmul.mubr.msk.f32.gmra.mxu1 %vm203_vm1, %v9063_v37 }
0x1bce   :  { %v9350_v20 = vpop.f32.mrf.mxu1 }
0x1bd0   :  { %v9352_v33 = vpop.f32.mrf.mxu1 }
0x1bd2   :  { %v9354_v13 = vpop.f32.mrf.mxu1 }
0x1bd4   :  { %v9356_v35 = vpop.f32.mrf.mxu1 }
0x1bd6   :  { %v7764_v36 = vpop.f32.mrf.mxu1 }
0x1bd7   :  { %v4715_v21 = vadd.f32 %v7764_v36, %v6665_v51 }
0x1bd8   :  { %v4709_v38 = vpop.f32.mrf.mxu1 }
0x1bd9   :  { %v4710_v32 = vadd.f32 %v6665_v51, %v4709_v38 }
0x1bda   :  { %v7767_v39 = vpop.f32.mrf.mxu1 }
0x1bdb   :  { %7804 = vmatprep.mubr.msk.f32.mxu0 %vm577_vm2, %v4710_v32  ;;  %v4725_v41 = vadd.f32 %v7767_v39, %v6665_v51 }
0x1bdc   :  { %v4719_v15 = vpop.f32.mrf.mxu1  ;;  %7805 = vmatmul.mubr.msk.f32.vlgmr.msra.gmra.mxu0 %vm577_vm2, %v4715_v21 }
0x1bdd   :  { %v4720_v58 = vadd.f32 %v6665_v51, %v4719_v15  ;;  %7833 = vmatpush3.msra.mxu0 %v6710_v16  ;;  %v6732_v15 = vld [vmem:[%s9681_s12 + $0x7] ss:$0 sm:$0xff] }
0x1bde   :  { %v7792_v23 = vpop.f32.mrf.mxu1  ;;  %7834 = vmatprep.subr.mxu0 %v6709_v40 }
0x1bdf   :  { %7807 = vmatprep.mubr.msk.f32.mxu0 %vm577_vm2, %v4720_v58  ;;  %7835 = vmatpush3.msra.mxu0 %v6709_v40  ;;  %v4911_v9 = vadd.f32 %v7792_v23, %v6685_v31 }
0x1be0   :  { %v4905_v25 = vpop.f32.mrf.mxu1  ;;  %7808 = vmatmul.mubr.msk.f32.gmra.mxu0 %vm577_vm2, %v4725_v41  ;;  %7836 = vmatprep.subr.mxu0 %v6708_v61 }
0x1be1   :  { %7837 = vmatpush3.msra.mxu0 %v6708_v61  ;;  %7840 = vmatprep.mubr.msk.f32.mxu0 %vm203_vm1, %v9047_v4  ;;  %v4906_v10 = vadd.f32 %v6685_v31, %v4905_v25 }
0x1be2   :  { %v7795_v44 = vpop.f32.mrf.mxu1  ;;  %7838 = vmatprep.subr.mxu0 %v6707_v17 }
0x1be3   :  { %v4921_v22 = vadd.f32 %v7795_v44, %v6685_v31  ;;  %7839 = vmatpush3.msra.mxu0 %v6707_v17 }
0x1be4   :  { %v4915_v45 = vpop.f32.mrf.mxu1  ;;  %7841 = vmatmul.mubr.msk.f32.vlgmr.msra.gmra.mxu0 %vm203_vm1, %v9049_v8  ;;  %7860 = vmatprep.subr.mxu0 %v6730_v5 }
0x1be5   :  { %v4916_v24 = vadd.f32 %v6685_v31, %v4915_v45  ;;  %7810 = vmatprep.subr.mxu1 %v4921_v22  ;;  %7843 = vmatprep.mubr.msk.f32.mxu0 %vm203_vm1, %v9058_v59 }
0x1be6   :  { %7861 = vmatpush3.msra.mxu0 %v6730_v5  ;;  %7811 = vmatpush3.msra.mxu1 %v4921_v22 }
0x1be7   :  { %7862 = vmatprep.subr.mxu0 %v6729_v6  ;;  %7812 = vmatprep.subr.mxu1 %v4916_v24 }
0x1be8   :  { %7863 = vmatpush3.msra.mxu0 %v6729_v6  ;;  %7813 = vmatpush3.msra.mxu1 %v4916_v24 }
0x1be9   :  { %7844 = vmatmul.mubr.msk.f32.gmra.mxu0 %vm203_vm1, %v9063_v37  ;;  %7864 = vmatprep.subr.mxu0 %v6728_v46 }
0x1bea   :  { %7814 = vmatprep.subr.mxu1 %v4911_v9  ;;  %7865 = vmatpush3.msra.mxu0 %v6728_v46 }
0x1beb   :  { %7868 = vmatprep.mubr.msk.f32.mxu0 %vm203_vm1, %v9047_v4  ;;  %7815 = vmatpush3.msra.mxu1 %v4911_v9 }
0x1bec   :  { %7866 = vmatprep.subr.mxu0 %v6727_v28  ;;  %7816 = vmatprep.subr.mxu1 %v4906_v10 }
0x1bed   :  { %7867 = vmatpush3.msra.mxu0 %v6727_v28  ;;  %7817 = vmatpush3.msra.mxu1 %v4906_v10 }
0x1bee   :  { %7869 = vmatmul.mubr.msk.f32.vlgmr.msra.gmra.mxu0 %vm203_vm1, %v9049_v8 }
0x1bef   :  { %7871 = vmatprep.mubr.msk.f32.mxu0 %vm203_vm1, %v9058_v59 }
0x1bf2   :  { %7872 = vmatmul.mubr.msk.f32.gmra.mxu0 %vm203_vm1, %v9063_v37 }
0x1c9c   :  { %v7806_v47 = vpop.f32.mrf.mxu0 }
0x1c9d   :  { %v5034_v48 = vmul.f32 0.35355338, %v7806_v47 }
0x1c9e   :  { %v5014_v49 = vpop.f32.mrf.mxu0 }
0x1c9f   :  { %v5033_v50 = vmul.f32 0.35355338, %v5014_v49  ;;  %v5038_v53 = vadd.f32 %v9248_v29, %v5034_v48 }
0x1ca0   :  { %v7809_v54 = vpop.f32.mrf.mxu0 }
0x1ca1   :  { %v5036_v14 = vmul.f32 0.35355338, %v7809_v54  ;;  %v5044_v55 = vsel %vm203_vm1, %v5038_v53, -inf  ;;  %v5037_v57 = vadd.f32 %v9255_v52, %v5033_v50 }
0x1ca2   :  { %5045 = vmax.xlane.f32.xlu1 %v5044_v55  ;;  %v5024_v60 = vpop.f32.mrf.mxu0 }
0x1ca3   :  { %v5035_v63 = vmul.f32 0.35355338, %v5024_v60  ;;  %v5041_v0 = vsel %vm203_vm1, %v5037_v57, -inf  ;;  %v5040_v3 = vadd.f32 %v9262_v56, %v5036_v14  ;;  %v6702_v60 = vld [vmem:[%s9684_s13 + $0x30] sm:$0xff] }
0x1ca4   :  { %5042 = vmax.xlane.f32.xlu0 %v5041_v0  ;;  %v7842_v7 = vpop.f32.mrf.mxu0  ;;  %7824 = vmatprep.subr.mxu1 %v6702_v60 }
0x1ca5   :  { %v9416_v26 = vadd.f32 %v7842_v7, %v9411_v43  ;;  %v5050_v11 = vsel %vm203_vm1, %v5040_v3, -inf  ;;  %v5039_v12 = vadd.f32 %v9271_v62, %v5035_v63 }
0x1ca6   :  { %5051 = vmax.xlane.f32.xlu1 %v5050_v11  ;;  %v9420_v16 = vpop.f32.mrf.mxu0 }
0x1ca7   :  { %v5047_v36 = vsel %vm203_vm1, %v5039_v12, -inf }
0x1ca8   :  { %5048 = vmax.xlane.f32.xlu0 %v5047_v36 }
0x1ca9   :  { %v7845_v51 = vpop.f32.mrf.mxu0 }
0x1caa   :  { %v9424_v38 = vadd.f32 %v7845_v51, %v9411_v43 }
0x1cab   :  { %v5374_v32 = vpop.f32.mrf.mxu0 }
0x1cac   :  { %v9427_v21 = vadd.f32 %v9411_v43, %v5374_v32 }
0x1cae   :  { %v7870_v39 = vpop.f32.mrf.mxu0 }
0x1caf   :  { %v5566_v17 = vadd.f32 %v7870_v39, %v6732_v15 }
0x1cb0   :  { %v5560_v40 = vpop.f32.mrf.mxu0 }
0x1cb1   :  { %v5561_v25 = vadd.f32 %v6732_v15, %v5560_v40 }
0x1cb2   :  { %v7873_v58 = vpop.f32.mrf.mxu0 }
0x1cb3   :  { %v5576_v61 = vadd.f32 %v7873_v58, %v6732_v15  ;;  %v6720_v58 = vld [vmem:[%s9716_s29 + $0xf8] sm:$0xff] }
0x1cb4   :  { %v5570_v41 = vpop.f32.mrf.mxu0 }
0x1cb5   :  { %v5571_v23 = vadd.f32 %v6732_v15, %v5570_v41  ;;  %7888 = vmatprep.subr.mxu0 %v5576_v61 }
0x1cb6   :  { %7889 = vmatpush3.msra.mxu0 %v5576_v61 }
0x1cb7   :  { %7890 = vmatprep.subr.mxu0 %v5571_v23 }
0x1cb8   :  { %7891 = vmatpush3.msra.mxu0 %v5571_v23  ;;  %v6719_v23 = vld [vmem:[%s9716_s29 + $0xf0] sm:$0xff] }
0x1cb9   :  { %7892 = vmatprep.subr.mxu0 %v5566_v17 }
0x1cba   :  { %7893 = vmatpush3.msra.mxu0 %v5566_v17 }
0x1cbb   :  { %7894 = vmatprep.subr.mxu0 %v5561_v25 }
0x1cbc   :  { %7895 = vmatpush3.msra.mxu0 %v5561_v25  ;;  %v6718_v25 = vld [vmem:[%s9716_s29 + $0xe8] sm:$0xff] }
0x1d2b   :  { %v5046_v5 = vpop.xlane.xlu1 %5045 }
0x1d2c   :  { %v5054_v31 = vsub.f32 %v5038_v53, %v5046_v5 }
0x1d2d   :  { %v5043_v44 = vpop.xlane.xlu0 %5042 }
0x1d2e   :  { %v5059_v22 = vmul.f32 1.442695, %v5054_v31  ;;  %v5053_v45 = vsub.f32 %v5037_v57, %v5043_v44  ;;  %v6717_v31 = vld [vmem:[%s9716_s29 + $0xe0] sm:$0xff]  ;;  %v5365_v44 = vadd.f32 %v9411_v43, %v9420_v16 }
0x1d2f   :  { %v5052_v6 = vpop.xlane.xlu1 %5051 }
0x1d30   :  { %8090 = vpow2.f32 %v5059_v22  ;;  %v5057_v24 = vmul.f32 1.442695, %v5053_v45  ;;  %v5056_v46 = vsub.f32 %v5040_v3, %v5052_v6  ;;  %v4617_v22 = vadd.f32 %v9265_v42, %v9350_v20 }
0x1d31   :  { %v5049_v9 = vpop.xlane.xlu0 %5048  ;;  %v4612_v45 = vadd.f32 %v9274_v18, %v9352_v33  ;;  %v6722_v18 = vld [vmem:[%s9682_s10 + $0x7] ss:$0 sm:$0xff] }
0x1d32   :  { %8092 = vpow2.f32 %v5057_v24  ;;  %v5063_v28 = vmul.f32 1.442695, %v5056_v46  ;;  %v5055_v10 = vsub.f32 %v5039_v12, %v5049_v9 }
0x1d34   :  { %8094 = vpow2.f32 %v5063_v28  ;;  %v5061_v47 = vmul.f32 1.442695, %v5055_v10 }
0x1d36   :  { %8096 = vpow2.f32 %v5061_v47 }
0x1d3d   :  { %v8091_v48 = vpop.eup %8090 }
0x1d3e   :  { %v5068_v49 = vsel %vm203_vm1, %v8091_v48, 0.0 }
0x1d3f   :  { %v8093_v50 = vpop.eup %8092  ;;  %5069 = vadd.xlane.f32.xlu1 %v5068_v49 }
0x1d40   :  { %v5065_v53 = vsel %vm203_vm1, %v8093_v50, 0.0 }
0x1d41   :  { %v8095_v54 = vpop.eup %8094  ;;  %5066 = vadd.xlane.f32.xlu0 %v5065_v53 }
0x1d42   :  { %v5074_v14 = vsel %vm203_vm1, %v8095_v54, 0.0 }
0x1d43   :  { %v8097_v55 = vpop.eup %8096  ;;  %5075 = vadd.xlane.f32.xlu1 %v5074_v14 }
0x1d44   :  { %v5071_v57 = vsel %vm203_vm1, %v8097_v55, 0.0 }
0x1d45   :  { %5072 = vadd.xlane.f32.xlu0 %v5071_v57 }
0x1dc8   :  { %v5070_v63 = vpop.xlane.xlu1 %5069 }
0x1dc9   :  { %8098 = vrcp.f32 %v5070_v63 }
0x1dca   :  { %v5067_v0 = vpop.xlane.xlu0 %5066 }
0x1dcb   :  { %8100 = vrcp.f32 %v5067_v0 }
0x1dcc   :  { %v5076_v3 = vpop.xlane.xlu1 %5075 }
0x1dcd   :  { %8102 = vrcp.f32 %v5076_v3 }
0x1dce   :  { %v5073_v7 = vpop.xlane.xlu0 %5072 }
0x1dcf   :  { %8104 = vrcp.f32 %v5073_v7 }
0x1dd6   :  { %v8099_v11 = vpop.eup %8098 }
0x1dd7   :  { %v5082_v51 = vmul.f32 %v8099_v11, %v8091_v48 }
0x1dd8   :  { %v8101_v12 = vpop.eup %8100 }
0x1dd9   :  { %v5081_v36 = vmul.f32 %v8101_v12, %v8093_v50 }
0x1dda   :  { %v8103_v32 = vpop.eup %8102 }
0x1ddb   :  { %7818 = vmatprep.mubr.msk.f32.mxu1 %vm203_vm1, %v5081_v36  ;;  %v5084_v15 = vmul.f32 %v8103_v32, %v8095_v54 }
0x1ddc   :  { %v8105_v39 = vpop.eup %8104  ;;  %7819 = vmatmul.mubr.msk.f32.vlgmr.msra.gmra.mxu1 %vm203_vm1, %v5082_v51 }
0x1ddd   :  { %v5083_v40 = vmul.f32 %v8105_v39, %v8097_v55  ;;  %7825 = vmatpush3.msra.mxu1 %v6702_v60 }
0x1dde   :  { %7846 = vmatprep.subr.mxu1 %v6720_v58 }
0x1ddf   :  { %7821 = vmatprep.mubr.msk.f32.mxu1 %vm203_vm1, %v5083_v40 }
0x1de0   :  { %7822 = vmatmul.mubr.msk.f32.gmra.mxu1 %vm203_vm1, %v5084_v15 }
0x1e9c   :  { %v7820_v61 = vpop.f32.mrf.mxu1 }
0x1e9e   :  { %v5163_v41 = vpop.f32.mrf.mxu1 }
0x1e9f   :  { %7826 = vmatprep.mubr.msk.f32.mxu1 %vm577_vm2, %v5163_v41 }
0x1ea0   :  { %v7823_v17 = vpop.f32.mrf.mxu1  ;;  %7827 = vmatmul.mubr.msk.f32.vlgmr.msra.gmra.mxu1 %vm577_vm2, %v7820_v61 }
0x1ea1   :  { %7847 = vmatpush3.msra.mxu1 %v6720_v58 }
0x1ea2   :  { %7848 = vmatprep.subr.mxu1 %v6719_v23  ;;  %v5173_v5 = vpop.f32.mrf.mxu1 }
0x1ea3   :  { %7849 = vmatpush3.msra.mxu1 %v6719_v23  ;;  %7829 = vmatprep.mubr.msk.f32.mxu1 %vm577_vm2, %v5173_v5  ;;  %v6749_v5 = vld [vmem:[%s9684_s13 + $0x38] sm:$0xff] }
0x1ea4   :  { %7850 = vmatprep.subr.mxu1 %v6718_v25  ;;  %7830 = vmatmul.mubr.msk.f32.gmra.mxu1 %vm577_vm2, %v7823_v17 }
0x1ea5   :  { %7851 = vmatpush3.msra.mxu1 %v6718_v25  ;;  %7854 = vmatprep.mubr.msk.f32.mxu1 %vm203_vm1, %v9047_v4 }
0x1ea6   :  { %7852 = vmatprep.subr.mxu1 %v6717_v31  ;;  %7902 = vmatprep.subr.mxu0 %v6749_v5 }
0x1ea7   :  { %7853 = vmatpush3.msra.mxu1 %v6717_v31 }
0x1ea8   :  { %7855 = vmatmul.mubr.msk.f32.vlgmr.msra.gmra.mxu1 %vm203_vm1, %v9049_v8 }
0x1ea9   :  { %7857 = vmatprep.mubr.msk.f32.mxu1 %vm203_vm1, %v9058_v59  ;;  %v4627_v59 = vadd.f32 %v9277_v27, %v9354_v13 }
0x1eac   :  { %7858 = vmatmul.mubr.msk.f32.gmra.mxu1 %vm203_vm1, %v9063_v37  ;;  %v4622_v37 = vadd.f32 %v9279_v2, %v9356_v35 }
0x1ead   :  { %7882 = vmatprep.mubr.msk.f32.mxu1 %vm577_vm2, %v5365_v44 }
0x1f60   :  { %v7828_v4 = vpop.f32.mrf.mxu1 }
0x1f61   :  { %v9474_v6 = vadd.f32 %v7828_v4, %v4617_v22 }
0x1f62   :  { %v5262_v8 = vpop.f32.mrf.mxu1 }
0x1f63   :  { %v9478_v24 = vadd.f32 %v5262_v8, %v4612_v45 }
0x1f64   :  { %v7831_v43 = vpop.f32.mrf.mxu1 }
0x1f65   :  { %v9482_v16 = vadd.f32 %v7831_v43, %v4627_v59 }
0x1f66   :  { %v5272_v46 = vpop.f32.mrf.mxu1 }
0x1f67   :  { %v9484_v42 = vadd.f32 %v5272_v46, %v4622_v37 }
0x1f68   :  { %v7856_v20 = vpop.f32.mrf.mxu1 }
0x1f69   :  { %v5468_v2 = vadd.f32 %v7856_v20, %v6722_v18 }
0x1f6a   :  { %v5462_v9 = vpop.f32.mrf.mxu1 }
0x1f6b   :  { %v5463_v35 = vadd.f32 %v6722_v18, %v5462_v9 }
0x1f6c   :  { %v7859_v33 = vpop.f32.mrf.mxu1 }
0x1f6d   :  { %v5478_v28 = vadd.f32 %v7859_v33, %v6722_v18 }
0x1f6e   :  { %v5472_v27 = vpop.f32.mrf.mxu1 }
0x1f6f   :  { %v5473_v13 = vadd.f32 %v6722_v18, %v5472_v27  ;;  %7874 = vmatprep.subr.msk.mxu1 %vm577_vm2, %v5478_v28 }
0x1f70   :  { %7875 = vmatpush3.xpose.msk.msra.mxu1 %vm577_vm2, %v5478_v28 }
0x1f71   :  { %7876 = vmatprep.subr.msk.mxu1 %vm577_vm2, %v5473_v13 }
0x1f74   :  { %7877 = vmatpush3.xpose.msk.msra.mxu1 %vm577_vm2, %v5473_v13 }
0x1f75   :  { %7878 = vmatprep.subr.msk.mxu1 %vm577_vm2, %v5468_v2 }
0x1f78   :  { %7879 = vmatpush3.xpose.msk.msra.mxu1 %vm577_vm2, %v5468_v2 }
0x1f79   :  { %7880 = vmatprep.subr.msk.mxu1 %vm577_vm2, %v5463_v35 }
0x1f7c   :  { %7881 = vmatpush3.xpose.msk.msra.mxu1 %vm577_vm2, %v5463_v35  ;;  %v6755_v35 = vld [vmem:[%s9685_s14 + $0x1] ss:$0 sm:$0xff] }
0x1f7f   :  { %7883 = vmatmul.mubr.msk.f32.vlgmr.msra.gmra.mxu1 %vm577_vm2, %v9416_v26 }
0x1f80   :  { %7885 = vmatprep.mubr.msk.f32.mxu1 %vm577_vm2, %v9427_v21 }
0x1f83   :  { %7886 = vmatmul.mubr.msk.f32.gmra.mxu1 %vm577_vm2, %v9424_v38 }
0x203f   :  { %v7884_v10 = vpop.f32.mrf.mxu1 }
0x2040   :  { %v5689_v47 = vmul.f32 0.35355338, %v7884_v10 }
0x2041   :  { %v5669_v48 = vpop.f32.mrf.mxu1 }
0x2042   :  { %v5688_v49 = vmul.f32 0.35355338, %v5669_v48  ;;  %v5693_v50 = vadd.f32 %v9248_v29, %v5689_v47 }
0x2043   :  { %v7887_v53 = vpop.f32.mrf.mxu1 }
0x2044   :  { %v5691_v54 = vmul.f32 0.35355338, %v7887_v53  ;;  %v5699_v14 = vsel %vm203_vm1, %v5693_v50, -inf  ;;  %v5692_v55 = vadd.f32 %v9255_v52, %v5688_v49 }
0x2045   :  { %5700 = vmax.xlane.f32.xlu1 %v5699_v14  ;;  %v5679_v26 = vpop.f32.mrf.mxu1 }
0x2046   :  { %v5690_v57 = vmul.f32 0.35355338, %v5679_v26  ;;  %v5696_v21 = vsel %vm203_vm1, %v5692_v55, -inf  ;;  %v5695_v60 = vadd.f32 %v9262_v56, %v5691_v54 }
0x2047   :  { %5697 = vmax.xlane.f32.xlu0 %v5696_v21 }
0x2048   :  { %v5705_v38 = vsel %vm203_vm1, %v5695_v60, -inf  ;;  %v5694_v63 = vadd.f32 %v9271_v62, %v5690_v57 }
0x2049   :  { %5706 = vmax.xlane.f32.xlu1 %v5705_v38 }
0x204a   :  { %v5702_v29 = vsel %vm203_vm1, %v5694_v63, -inf }
0x204b   :  { %5703 = vmax.xlane.f32.xlu0 %v5702_v29 }
0x20ce   :  { %v5701_v0 = vpop.xlane.xlu1 %5700 }
0x20cf   :  { %v5709_v3 = vsub.f32 %v5693_v50, %v5701_v0 }
0x20d0   :  { %v5698_v7 = vpop.xlane.xlu0 %5697 }
0x20d1   :  { %v5714_v52 = vmul.f32 1.442695, %v5709_v3  ;;  %v5708_v11 = vsub.f32 %v5692_v55, %v5698_v7 }
0x20d2   :  { %v5707_v12 = vpop.xlane.xlu1 %5706 }
0x20d3   :  { %8106 = vpow2.f32 %v5714_v52  ;;  %v5712_v36 = vmul.f32 1.442695, %v5708_v11  ;;  %v5711_v51 = vsub.f32 %v5695_v60, %v5707_v12 }
0x20d4   :  { %v5704_v32 = vpop.xlane.xlu0 %5703 }
0x20d5   :  { %8108 = vpow2.f32 %v5712_v36  ;;  %v5718_v56 = vmul.f32 1.442695, %v5711_v51  ;;  %v5710_v39 = vsub.f32 %v5694_v63, %v5704_v32 }
0x20d7   :  { %8110 = vpow2.f32 %v5718_v56  ;;  %v5716_v40 = vmul.f32 1.442695, %v5710_v39 }
0x20d9   :  { %8112 = vpow2.f32 %v5716_v40 }
0x20e0   :  { %v8107_v62 = vpop.eup %8106 }
0x20e1   :  { %v5723_v15 = vsel %vm203_vm1, %v8107_v62, 0.0 }
0x20e2   :  { %v8109_v58 = vpop.eup %8108  ;;  %5724 = vadd.xlane.f32.xlu1 %v5723_v15 }
0x20e3   :  { %v5720_v61 = vsel %vm203_vm1, %v8109_v58, 0.0 }
0x20e4   :  { %v8111_v41 = vpop.eup %8110  ;;  %5721 = vadd.xlane.f32.xlu0 %v5720_v61  ;;  %v6762_v61 = vld [vmem:[%s9686_s17 + $0x30] sm:$0xff] }
0x20e5   :  { %v5729_v23 = vsel %vm203_vm1, %v8111_v41, 0.0 }
0x20e6   :  { %v8113_v17 = vpop.eup %8112  ;;  %5730 = vadd.xlane.f32.xlu1 %v5729_v23  ;;  %v6760_v23 = vld [vmem:[%s9686_s17 + $0x20] sm:$0xff] }
0x20e7   :  { %v5726_v25 = vsel %vm203_vm1, %v8113_v17, 0.0 }
0x20e8   :  { %5727 = vadd.xlane.f32.xlu0 %v5726_v25 }
0x216b   :  { %v5725_v31 = vpop.xlane.xlu1 %5724 }
0x216c   :  { %8114 = vrcp.f32 %v5725_v31 }
0x216d   :  { %v5722_v44 = vpop.xlane.xlu0 %5721 }
0x216e   :  { %8116 = vrcp.f32 %v5722_v44 }
0x216f   :  { %v5731_v22 = vpop.xlane.xlu1 %5730 }
0x2170   :  { %8118 = vrcp.f32 %v5731_v22 }
0x2171   :  { %v5728_v4 = vpop.xlane.xlu0 %5727 }
0x2172   :  { %8120 = vrcp.f32 %v5728_v4 }
0x2179   :  { %v8115_v45 = vpop.eup %8114 }
0x217a   :  { %v5737_v43 = vmul.f32 %v8115_v45, %v8107_v62 }
0x217b   :  { %v8117_v8 = vpop.eup %8116 }
0x217c   :  { %v5736_v59 = vmul.f32 %v8117_v8, %v8109_v58  ;;  %v6763_v58 = vld [vmem:[%s9686_s17 + $0x38] sm:$0xff] }
0x217d   :  { %v8119_v37 = vpop.eup %8118  ;;  %7910 = vmatprep.subr.mxu1 %v6763_v58 }
0x217e   :  { %7896 = vmatprep.mubr.msk.f32.mxu0 %vm203_vm1, %v5736_v59  ;;  %v5739_v9 = vmul.f32 %v8119_v37, %v8111_v41  ;;  %7911 = vmatpush3.msra.mxu1 %v6763_v58  ;;  %v6761_v41 = vld [vmem:[%s9686_s17 + $0x28] sm:$0xff] }
0x217f   :  { %v8121_v46 = vpop.eup %8120  ;;  %7897 = vmatmul.mubr.msk.f32.vlgmr.msra.gmra.mxu0 %vm203_vm1, %v5737_v43  ;;  %7912 = vmatprep.subr.mxu1 %v6762_v61 }
0x2180   :  { %v5738_v20 = vmul.f32 %v8121_v46, %v8113_v17  ;;  %7903 = vmatpush3.msra.mxu0 %v6749_v5  ;;  %7913 = vmatpush3.msra.mxu1 %v6762_v61 }
0x2181   :  { %7914 = vmatprep.subr.mxu1 %v6761_v41 }
0x2182   :  { %7899 = vmatprep.mubr.msk.f32.mxu0 %vm203_vm1, %v5738_v20  ;;  %7915 = vmatpush3.msra.mxu1 %v6761_v41 }
0x2183   :  { %7900 = vmatmul.mubr.msk.f32.gmra.mxu0 %vm203_vm1, %v5739_v9  ;;  %7916 = vmatprep.subr.mxu1 %v6760_v23  ;;  %v6758_v9 = vld [vmem:[%s9687_s15 + $0x1] ss:$0 sm:$0xff] }
0x2184   :  { %7917 = vmatpush3.msra.mxu1 %v6760_v23 }
0x223f   :  { %v7898_v18 = vpop.f32.mrf.mxu0 }
0x2241   :  { %v5818_v33 = vpop.f32.mrf.mxu0 }
0x2242   :  { %7904 = vmatprep.mubr.msk.f32.mxu0 %vm577_vm2, %v5818_v33 }
0x2243   :  { %v7901_v28 = vpop.f32.mrf.mxu0  ;;  %7905 = vmatmul.mubr.msk.f32.vlgmr.msra.gmra.mxu0 %vm577_vm2, %v7898_v18 }
0x2245   :  { %v5828_v27 = vpop.f32.mrf.mxu0 }
0x2246   :  { %7907 = vmatprep.mubr.msk.f32.mxu0 %vm577_vm2, %v5828_v27 }
0x2247   :  { %7908 = vmatmul.mubr.msk.f32.gmra.mxu0 %vm577_vm2, %v7901_v28 }
0x2303   :  { %v7906_v13 = vpop.f32.mrf.mxu0 }
0x2304   :  { %v5937_v2 = vadd.f32 %v7906_v13, %v9474_v6  ;;  %v6759_v13 = vld [vmem:[%s9688_s16 + $0x1] ss:$0 sm:$0xff] }
0x2305   :  { %v5917_v10 = vpop.f32.mrf.mxu0 }
0x2306   :  { %v5941_v47 = vadd.f32 %v5937_v2, %v8999_v1  ;;  %v5936_v48 = vadd.f32 %v5917_v10, %v9478_v24 }
0x2307   :  { %v7909_v49 = vpop.f32.mrf.mxu0 }
0x2308   :  { %v9532_v50 = vadd.f32 %v6755_v35, %v5941_v47  ;;  %v5940_v53 = vadd.f32 %v5936_v48, %v9002_v19  ;;  %v5939_v54 = vadd.f32 %v7909_v49, %v9482_v16 }
0x2309   :  { %v5927_v14 = vpop.f32.mrf.mxu0 }
0x230a   :  { %v9536_v55 = vadd.f32 %v6755_v35, %v5940_v53  ;;  %v5943_v6 = vadd.f32 %v5939_v54, %v9007_v34  ;;  %v5938_v26 = vadd.f32 %v5927_v14, %v9484_v42  ;;  %v5963_v57 = vsel %vm203_vm1, %v9532_v50, 0.0 }
0x230b   :  { %5964 = vadd.xlane.f32.xlu1 %v5963_v57  ;;  %v6784_v57 = vld [vmem:[%s9689_s19 + $0xf0] sm:$0xff] }
0x230c   :  { %v9542_v1 = vadd.f32 %v6755_v35, %v5943_v6  ;;  %v5942_v24 = vadd.f32 %v5938_v26, %v9012_v30  ;;  %v5960_v19 = vsel %vm203_vm1, %v9536_v55, 0.0  ;;  %v6785_v26 = vld [vmem:[%s9689_s19 + $0xf8] sm:$0xff] }
0x230d   :  { %5961 = vadd.xlane.f32.xlu0 %v5960_v19  ;;  %7924 = vmatprep.subr.mxu0 %v6785_v26  ;;  %v6782_v19 = vld [vmem:[%s9689_s19 + $0xe0] sm:$0xff] }
0x230e   :  { %v9547_v16 = vadd.f32 %v6755_v35, %v5942_v24  ;;  %v5969_v21 = vsel %vm203_vm1, %v9542_v1, 0.0  ;;  %7925 = vmatpush3.msra.mxu0 %v6785_v26  ;;  %v6783_v24 = vld [vmem:[%s9689_s19 + $0xe8] sm:$0xff] }
0x230f   :  { %5970 = vadd.xlane.f32.xlu1 %v5969_v21  ;;  %7926 = vmatprep.subr.mxu0 %v6784_v57  ;;  %v6781_v21 = vld [vmem:[%s9689_s19 + $0xd8] sm:$0xff] }
0x2310   :  { %v5966_v34 = vsel %vm203_vm1, %v9547_v16, 0.0  ;;  %7927 = vmatpush3.msra.mxu0 %v6784_v57  ;;  %v6787_v57 = vld [vmem:[%s9691_s20 + $0x1] ss:$0 sm:$0xff] }
0x2311   :  { %5967 = vadd.xlane.f32.xlu0 %v5966_v34  ;;  %7928 = vmatprep.subr.mxu0 %v6783_v24  ;;  %v6780_v34 = vld [vmem:[%s9689_s19 + $0xd0] sm:$0xff] }
0x2312   :  { %7929 = vmatpush3.msra.mxu0 %v6783_v24 }
0x2313   :  { %7930 = vmatprep.subr.mxu0 %v6782_v19 }
0x2314   :  { %7931 = vmatpush3.msra.mxu0 %v6782_v19 }
0x2315   :  { %7932 = vmatprep.subr.mxu0 %v6781_v21 }
0x2316   :  { %7933 = vmatpush3.msra.mxu0 %v6781_v21 }
0x2317   :  { %7934 = vmatprep.subr.mxu0 %v6780_v34 }
0x2318   :  { %7935 = vmatpush3.msra.mxu0 %v6780_v34 }
0x2394   :  { %v5965_v42 = vpop.xlane.xlu1 %5964 }
0x2395   :  { %v5973_v60 = vmul.f32 0.03125, %v5965_v42  ;;  %v6779_v42 = vld [vmem:[%s9689_s19 + $0xc8] sm:$0xff] }
0x2396   :  { %v5962_v38 = vpop.xlane.xlu0 %5961  ;;  %7936 = vmatprep.subr.mxu0 %v6779_v42 }
0x2397   :  { %v5977_v63 = vsub.f32 %v9532_v50, %v5973_v60  ;;  %v5972_v30 = vmul.f32 0.03125, %v5962_v38  ;;  %v6778_v60 = vld [vmem:[%s9689_s19 + $0xc0] sm:$0xff]  ;;  %7937 = vmatpush3.msra.mxu0 %v6779_v42  ;;  %v6777_v38 = vld [vmem:[%s9689_s19 + $0xb8] sm:$0xff] }
0x2398   :  { %v5971_v29 = vpop.xlane.xlu1 %5970  ;;  %7938 = vmatprep.subr.mxu0 %v6778_v60 }
0x2399   :  { %v5976_v0 = vsub.f32 %v9536_v55, %v5972_v30  ;;  %v5975_v3 = vmul.f32 0.03125, %v5971_v29  ;;  %v5981_v7 = vmul.f32 %v5977_v63, %v5977_v63  ;;  %7939 = vmatpush3.msra.mxu0 %v6778_v60  ;;  %v6775_v30 = vld [vmem:[%s9689_s19 + $0xa8] sm:$0xff]  ;;  %v6774_v29 = vld [vmem:[%s9689_s19 + $0xa0] sm:$0xff] }
0x239a   :  { %v5968_v52 = vpop.xlane.xlu0 %5967  ;;  %7940 = vmatprep.subr.mxu0 %v6777_v38 }
0x239b   :  { %v5979_v11 = vsub.f32 %v9542_v1, %v5975_v3  ;;  %v5974_v12 = vmul.f32 0.03125, %v5968_v52  ;;  %v5987_v36 = vsel %vm203_vm1, %v5981_v7, 0.0  ;;  %v5980_v51 = vmul.f32 %v5976_v0, %v5976_v0  ;;  %7941 = vmatpush3.msra.mxu0 %v6777_v38  ;;  %v6772_v3 = vld [vmem:[%s9689_s19 + $0x90] sm:$0xff]  ;;  %v6771_v7 = vld [vmem:[%s9689_s19 + $0x88] sm:$0xff]  ;;  %v6770_v52 = vld [vmem:[%s9689_s19 + $0x80] sm:$0xff] }
0x239c   :  { %5988 = vadd.xlane.f32.xlu1 %v5987_v36 }
0x239d   :  { %v5978_v32 = vsub.f32 %v9547_v16, %v5974_v12  ;;  %v5984_v56 = vsel %vm203_vm1, %v5980_v51, 0.0  ;;  %v5983_v39 = vmul.f32 %v5979_v11, %v5979_v11 }
0x239e   :  { %5985 = vadd.xlane.f32.xlu0 %v5984_v56 }
0x239f   :  { %v5993_v40 = vsel %vm203_vm1, %v5983_v39, 0.0  ;;  %v5982_v62 = vmul.f32 %v5978_v32, %v5978_v32 }
0x23a0   :  { %5994 = vadd.xlane.f32.xlu1 %v5993_v40 }
0x23a1   :  { %v5990_v15 = vsel %vm203_vm1, %v5982_v62, 0.0 }
0x23a2   :  { %5991 = vadd.xlane.f32.xlu0 %v5990_v15 }
0x2425   :  { %v5989_v17 = vpop.xlane.xlu1 %5988 }
0x2426   :  { %v5997_v25 = vmul.f32 0.03125, %v5989_v17 }
0x2427   :  { %v5986_v5 = vpop.xlane.xlu0 %5985 }
0x2428   :  { %v6001_v31 = vadd.f32 1e-05, %v5997_v25  ;;  %v5996_v44 = vmul.f32 0.03125, %v5986_v5 }
0x2429   :  { %v5995_v22 = vpop.xlane.xlu1 %5994 }
0x242a   :  { %8122 = vrsqrt.f32 %v6001_v31  ;;  %v6000_v4 = vadd.f32 1e-05, %v5996_v44  ;;  %v5999_v45 = vmul.f32 0.03125, %v5995_v22 }
0x242b   :  { %v5992_v8 = vpop.xlane.xlu0 %5991 }
0x242c   :  { %8124 = vrsqrt.f32 %v6000_v4  ;;  %v6003_v59 = vadd.f32 1e-05, %v5999_v45  ;;  %v5998_v43 = vmul.f32 0.03125, %v5992_v8 }
0x242e   :  { %8126 = vrsqrt.f32 %v6003_v59  ;;  %v6002_v37 = vadd.f32 1e-05, %v5998_v43 }
0x2430   :  { %8128 = vrsqrt.f32 %v6002_v37 }
0x2437   :  { %v8123_v46 = vpop.eup %8122 }
0x2438   :  { %v6009_v20 = vmul.f32 %v8123_v46, %v5977_v63  ;;  %v6776_v63 = vld [vmem:[%s9689_s19 + $0xb0] sm:$0xff] }
0x2439   :  { %v8125_v18 = vpop.eup %8124  ;;  %7942 = vmatprep.subr.mxu0 %v6776_v63 }
0x243a   :  { %v6008_v33 = vmul.f32 %v8125_v18, %v5976_v0  ;;  %v6019_v27 = vmul.f32 %v6758_v9, %v6009_v20  ;;  %7943 = vmatpush3.msra.mxu0 %v6776_v63  ;;  %v6773_v0 = vld [vmem:[%s9689_s19 + $0x98] sm:$0xff] }
0x243b   :  { %v8127_v28 = vpop.eup %8126  ;;  %7944 = vmatprep.subr.mxu0 %v6775_v30 }
0x243c   :  { %v6018_v2 = vmul.f32 %v6758_v9, %v6008_v33  ;;  %v6011_v35 = vmul.f32 %v8127_v28, %v5979_v11  ;;  %v6029_v49 = vadd.f32 %v6759_v13, %v6019_v27  ;;  %7945 = vmatpush3.msra.mxu0 %v6775_v30  ;;  %v6765_v11 = vld [vmem:[%s9690_s18 + $0x1] ss:$0 sm:$0xff] }
0x243d   :  { %v8129_v10 = vpop.eup %8128  ;;  %7946 = vmatprep.subr.mxu0 %v6774_v29 }
0x243e   :  { %v6028_v47 = vadd.f32 %v6759_v13, %v6018_v2  ;;  %v6010_v48 = vmul.f32 %v8129_v10, %v5978_v32  ;;  %v6021_v53 = vmul.f32 %v6758_v9, %v6011_v35  ;;  %7947 = vmatpush3.msra.mxu0 %v6774_v29 }
0x243f   :  { %7948 = vmatprep.subr.mxu0 %v6773_v0 }
0x2440   :  { %7918 = vmatprep.mubr.msk.f32.mxu1 %vm203_vm1, %v6028_v47  ;;  %v6020_v54 = vmul.f32 %v6758_v9, %v6010_v48  ;;  %v6031_v6 = vadd.f32 %v6759_v13, %v6021_v53  ;;  %7949 = vmatpush3.msra.mxu0 %v6773_v0 }
0x2441   :  { %7919 = vmatmul.mubr.msk.f32.vlgmr.msra.gmra.mxu1 %vm203_vm1, %v6029_v49  ;;  %7950 = vmatprep.subr.mxu0 %v6772_v3 }
0x2442   :  { %v6030_v14 = vadd.f32 %v6759_v13, %v6020_v54  ;;  %7951 = vmatpush3.msra.mxu0 %v6772_v3 }
0x2443   :  { %7952 = vmatprep.subr.mxu0 %v6771_v7 }
0x2444   :  { %7921 = vmatprep.mubr.msk.f32.mxu1 %vm203_vm1, %v6030_v14  ;;  %7953 = vmatpush3.msra.mxu0 %v6771_v7 }
0x2445   :  { %7922 = vmatmul.mubr.msk.f32.gmra.mxu1 %vm203_vm1, %v6031_v6  ;;  %7954 = vmatprep.subr.mxu0 %v6770_v52 }
0x2446   :  { %7955 = vmatpush3.msra.mxu0 %v6770_v52 }
0x2501   :  { %v7920_v12 = vpop.f32.mrf.mxu1 }
0x2502   :  { %v6129_v36 = vadd.f32 %v7920_v12, %v6765_v11 }
0x2503   :  { %v6123_v51 = vpop.f32.mrf.mxu1 }
0x2504   :  { %v6147_v32 = vmul.f32 0.044715, %v6129_v36  ;;  %v6124_v56 = vadd.f32 %v6765_v11, %v6123_v51  ;;  %v6143_v35 = vmul.f32 0.5, %v6129_v36 }
0x2505   :  { %v7923_v39 = vpop.f32.mrf.mxu1 }
0x2506   :  { %v6151_v40 = vmul.f32 %v6147_v32, %v6129_v36  ;;  %v6146_v62 = vmul.f32 0.044715, %v6124_v56  ;;  %v6139_v15 = vadd.f32 %v7923_v39, %v6765_v11  ;;  %v6142_v27 = vmul.f32 0.5, %v6124_v56 }
0x2507   :  { %v6133_v58 = vpop.f32.mrf.mxu1 }
0x2508   :  { %v6155_v61 = vmul.f32 %v6151_v40, %v6129_v36  ;;  %v6150_v41 = vmul.f32 %v6146_v62, %v6124_v56  ;;  %v6149_v23 = vmul.f32 0.044715, %v6139_v15  ;;  %v6134_v17 = vadd.f32 %v6765_v11, %v6133_v58 }
0x2509   :  { %v6145_v14 = vmul.f32 0.5, %v6139_v15 }
0x250a   :  { %v6159_v25 = vadd.f32 %v6155_v61, %v6129_v36  ;;  %v6153_v5 = vmul.f32 %v6149_v23, %v6139_v15  ;;  %v6148_v31 = vmul.f32 0.044715, %v6134_v17  ;;  %v6154_v44 = vmul.f32 %v6150_v41, %v6124_v56 }
0x250b   :  { %v6144_v53 = vmul.f32 0.5, %v6134_v17 }
0x250c   :  { %v6163_v22 = vmul.f32 0.7978846, %v6159_v25  ;;  %v6152_v4 = vmul.f32 %v6148_v31, %v6134_v17  ;;  %v6158_v45 = vadd.f32 %v6154_v44, %v6124_v56  ;;  %v6157_v8 = vmul.f32 %v6153_v5, %v6139_v15 }
0x250e   :  { %8130 = vtanh.f32 %v6163_v22  ;;  %v6162_v59 = vmul.f32 0.7978846, %v6158_v45  ;;  %v6156_v43 = vmul.f32 %v6152_v4, %v6134_v17  ;;  %v6161_v37 = vadd.f32 %v6157_v8, %v6139_v15 }
0x2510   :  { %8132 = vtanh.f32 %v6162_v59  ;;  %v6160_v46 = vadd.f32 %v6156_v43, %v6134_v17  ;;  %v6165_v20 = vmul.f32 0.7978846, %v6161_v37 }
0x2512   :  { %v6164_v9 = vmul.f32 0.7978846, %v6160_v46  ;;  %8134 = vtanh.f32 %v6165_v20 }
0x2514   :  { %8136 = vtanh.f32 %v6164_v9 }
0x251b   :  { %v8131_v18 = vpop.eup %8130 }
0x251c   :  { %v6171_v28 = vadd.f32 1.0, %v8131_v18 }
0x251d   :  { %v8133_v33 = vpop.eup %8132 }
0x251e   :  { %v6170_v13 = vadd.f32 1.0, %v8133_v33  ;;  %v6175_v48 = vmul.f32 %v6171_v28, %v6143_v35  ;;  %v6788_v28 = vld [vmem:[%s9692_s21] ss:$0 sm:$0xff] }
0x251f   :  { %v8135_v2 = vpop.eup %8134 }
0x2520   :  { %v6174_v10 = vmul.f32 %v6170_v13, %v6142_v27  ;;  %v6173_v49 = vadd.f32 1.0, %v8135_v2  ;;  %v6789_v2 = vld [vmem:[%s9693_s22] ss:$0 sm:$0xff] }
0x2521   :  { %v8137_v47 = vpop.eup %8136 }
0x2522   :  { %7956 = vmatprep.mubr.f32.mxu0 %v6174_v10  ;;  %v6172_v54 = vadd.f32 1.0, %v8137_v47  ;;  %v6177_v26 = vmul.f32 %v6173_v49, %v6145_v14 }
0x2523   :  { %7957 = vmatmul.mubr.f32.vlgmr.msra.gmra.mxu0 %v6175_v48 }
0x2524   :  { %v6176_v6 = vmul.f32 %v6172_v54, %v6144_v53 }
0x2526   :  { %7959 = vmatprep.mubr.f32.mxu0 %v6176_v6 }
0x2527   :  { %7960 = vmatmul.mubr.f32.gmra.mxu0 %v6177_v26 }
0x25e3   :  { %v7958_v24 = vpop.f32.mrf.mxu0 }
0x25e4   :  { %v6275_v19 = vadd.f32 %v7958_v24, %v6787_v57 }
0x25e5   :  { %v6269_v21 = vpop.f32.mrf.mxu0 }
0x25e6   :  { %v6270_v34 = vadd.f32 %v6787_v57, %v6269_v21  ;;  %v6289_v42 = vadd.f32 %v6275_v19, %v9532_v50 }
0x25e7   :  { %v7961_v60 = vpop.f32.mrf.mxu0 }
0x25e8   :  { %v6285_v38 = vadd.f32 %v7961_v60, %v6787_v57  ;;  %v6297_v63 = vsel %vm203_vm1, %v6289_v42, 0.0  ;;  %v6288_v30 = vadd.f32 %v6270_v34, %v9536_v55 }
0x25e9   :  { %6298 = vadd.xlane.f32.xlu1 %v6297_v63  ;;  %v6279_v29 = vpop.f32.mrf.mxu0 }
0x25ea   :  { %v6291_v0 = vadd.f32 %v6285_v38, %v9542_v1  ;;  %v6280_v3 = vadd.f32 %v6787_v57, %v6279_v29  ;;  %v6294_v7 = vsel %vm203_vm1, %v6288_v30, 0.0 }
0x25eb   :  { %6295 = vadd.xlane.f32.xlu0 %v6294_v7 }
0x25ec   :  { %v6290_v52 = vadd.f32 %v6280_v3, %v9547_v16  ;;  %v6303_v11 = vsel %vm203_vm1, %v6291_v0, 0.0 }
0x25ed   :  { %6304 = vadd.xlane.f32.xlu1 %v6303_v11 }
0x25ee   :  { %v6300_v50 = vsel %vm203_vm1, %v6290_v52, 0.0 }
0x25ef   :  { %6301 = vadd.xlane.f32.xlu0 %v6300_v50 }
0x2672   :  { %v6299_v12 = vpop.xlane.xlu1 %6298 }
0x2673   :  { %v6307_v36 = vmul.f32 0.03125, %v6299_v12 }
0x2674   :  { %v6296_v51 = vpop.xlane.xlu0 %6295 }
0x2675   :  { %v6311_v55 = vsub.f32 %v6289_v42, %v6307_v36  ;;  %v6306_v32 = vmul.f32 0.03125, %v6296_v51 }
0x2676   :  { %v6305_v56 = vpop.xlane.xlu1 %6304 }
0x2677   :  { %v6310_v39 = vsub.f32 %v6288_v30, %v6306_v32  ;;  %v6309_v1 = vmul.f32 0.03125, %v6305_v56  ;;  %v6315_v40 = vmul.f32 %v6311_v55, %v6311_v55 }
0x2678   :  { %v6302_v62 = vpop.xlane.xlu0 %6301 }
0x2679   :  { %v6313_v15 = vsub.f32 %v6291_v0, %v6309_v1  ;;  %v6308_v58 = vmul.f32 0.03125, %v6302_v62  ;;  %v6321_v16 = vsel %vm203_vm1, %v6315_v40, 0.0  ;;  %v6314_v61 = vmul.f32 %v6310_v39, %v6310_v39 }
0x267a   :  { %6322 = vadd.xlane.f32.xlu1 %v6321_v16 }
0x267b   :  { %v6312_v41 = vsub.f32 %v6290_v52, %v6308_v58  ;;  %v6318_v23 = vsel %vm203_vm1, %v6314_v61, 0.0  ;;  %v6317_v17 = vmul.f32 %v6313_v15, %v6313_v15 }
0x267c   :  { %6319 = vadd.xlane.f32.xlu0 %v6318_v23 }
0x267d   :  { %v6327_v25 = vsel %vm203_vm1, %v6317_v17, 0.0  ;;  %v6316_v5 = vmul.f32 %v6312_v41, %v6312_v41 }
0x267e   :  { %6328 = vadd.xlane.f32.xlu1 %v6327_v25 }
0x267f   :  { %v6324_v31 = vsel %vm203_vm1, %v6316_v5, 0.0 }
0x2680   :  { %6325 = vadd.xlane.f32.xlu0 %v6324_v31 }
0x2703   :  { %v6323_v44 = vpop.xlane.xlu1 %6322 }
0x2704   :  { %v6331_v22 = vmul.f32 0.03125, %v6323_v44 }
0x2705   :  { %v6320_v4 = vpop.xlane.xlu0 %6319 }
0x2706   :  { %v6335_v45 = vadd.f32 1e-05, %v6331_v22  ;;  %v6330_v8 = vmul.f32 0.03125, %v6320_v4 }
0x2707   :  { %v6329_v59 = vpop.xlane.xlu1 %6328 }
0x2708   :  { %8138 = vrsqrt.f32 %v6335_v45  ;;  %v6334_v43 = vadd.f32 1e-05, %v6330_v8  ;;  %v6333_v37 = vmul.f32 0.03125, %v6329_v59 }
0x2709   :  { %v6326_v46 = vpop.xlane.xlu0 %6325 }
0x270a   :  { %8140 = vrsqrt.f32 %v6334_v43  ;;  %v6337_v20 = vadd.f32 1e-05, %v6333_v37  ;;  %v6332_v9 = vmul.f32 0.03125, %v6326_v46 }
0x270c   :  { %8142 = vrsqrt.f32 %v6337_v20  ;;  %v6336_v18 = vadd.f32 1e-05, %v6332_v9 }
0x270e   :  { %8144 = vrsqrt.f32 %v6336_v18 }
0x2715   :  { %v8139_v33 = vpop.eup %8138 }
0x2716   :  { %v6343_v27 = vmul.f32 %v8139_v33, %v6311_v55 }
0x2717   :  { %v8141_v13 = vpop.eup %8140 }
0x2718   :  { %v6353_v35 = vmul.f32 %v6788_v28, %v6343_v27  ;;  %v6342_v10 = vmul.f32 %v8141_v13, %v6310_v39 }
0x2719   :  { %v8143_v47 = vpop.eup %8142 }
0x271a   :  { %v6363_v48 = vadd.f32 %v6789_v2, %v6353_v35  ;;  %v6352_v49 = vmul.f32 %v6788_v28, %v6342_v10  ;;  %v6345_v53 = vmul.f32 %v8143_v47, %v6313_v15 }
0x271b   :  { %v8145_v54 = vpop.eup %8144 }
0x271c   :  { %6367 = vst.msk [vmem:[%s9694_s23 + $0x8] sm:$0xff] %vm203_vm1, %v6363_v48  ;;  %v6362_v14 = vadd.f32 %v6789_v2, %v6352_v49  ;;  %v6355_v6 = vmul.f32 %v6788_v28, %v6345_v53  ;;  %v6344_v26 = vmul.f32 %v8145_v54, %v6312_v41 }
0x271e   :  { %6366 = vst.msk [vmem:[%s9694_s23] sm:$0xff] %vm203_vm1, %v6362_v14  ;;  %v6365_v57 = vadd.f32 %v6789_v2, %v6355_v6  ;;  %v6354_v24 = vmul.f32 %v6788_v28, %v6344_v26 }
0x2720   :  { %6369 = vst.msk [vmem:[%s9694_s23 + $0x18] sm:$0xff] %vm203_vm1, %v6365_v57  ;;  %v6364_v19 = vadd.f32 %v6789_v2, %v6354_v24 }
0x2722   :  { %6368 = vst.msk [vmem:[%s9694_s23 + $0x10] sm:$0xff] %vm203_vm1, %v6364_v19 }

// kernel: forward.5
= control target key start
LH: loop header
LB: loop body
LE: loop exit
PB: predicated region body
PF: predicated region fallthrough
CT: control target
= control target key end

     0   :  { %vm95_vm0 = vcmask 261120   ;;  %vm580_vm1 = vcmask 64512   ;;  %vm3425_vm2 = vcmask 392192   ;;  %s5230_s2 = inlined_call_operand.vmem [shape: f32[32,32], index: 2, kind: input, shape index: {}]   ;;  %s5231_s0 = inlined_call_operand.vmem [shape: f32[32,32], index: 0, kind: input, shape index: {}]   ;;  %s5232_s3 = inlined_call_operand.vmem [shape: f32[1,32], index: 3, kind: input, shape index: {}]   ;;  %s5233_s4 = inlined_call_operand.vmem [shape: f32[32,32], index: 4, kind: input, shape index: {}]   ;;  %s5234_s7 = inlined_call_operand.vmem [shape: f32[4,32,8], index: 7, kind: input, shape index: {}]   ;;  %s5235_s9 = inlined_call_operand.vmem [shape: f32[4,32,8], index: 9, kind: input, shape index: {}]   ;;  %s5236_s11 = inlined_call_operand.vmem [shape: f32[4,32,8], index: 11, kind: input, shape index: {}]   ;;  %s5237_s5 = inlined_call_operand.vmem [shape: f32[1,1,32], index: 5, kind: input, shape index: {}]   ;;  %s5238_s6 = inlined_call_operand.vmem [shape: f32[1,1,32], index: 6, kind: input, shape index: {}]   ;;  %s5239_s8 = inlined_call_operand.vmem [shape: f32[4,1,8], index: 8, kind: input, shape index: {}]   ;;  %s5240_s10 = inlined_call_operand.vmem [shape: f32[4,1,8], index: 10, kind: input, shape index: {}]   ;;  %s5241_s12 = inlined_call_operand.vmem [shape: f32[4,1,8], index: 12, kind: input, shape index: {}]   ;;  %s5242_s1 = inlined_call_operand.vmem [shape: f32[32,32], index: 1, kind: input, shape index: {}]   ;;  %s5243_s13 = inlined_call_operand.vmem [shape: f32[4,8,32], index: 13, kind: input, shape index: {}]   ;;  %s5244_s14 = inlined_call_operand.vmem [shape: f32[1,1,32], index: 14, kind: input, shape index: {}]   ;;  %s5245_s17 = inlined_call_operand.vmem [shape: f32[1,32,128], index: 17, kind: input, shape index: {}]   ;;  %s5246_s15 = inlined_call_operand.vmem [shape: f32[1,1,32], index: 15, kind: input, shape index: {}]   ;;  %s5247_s16 = inlined_call_operand.vmem [shape: f32[1,1,32], index: 16, kind: input, shape index: {}]   ;;  %s5248_s19 = inlined_call_operand.vmem [shape: f32[1,128,32], index: 19, kind: input, shape index: {}]   ;;  %s5249_s18 = inlined_call_operand.vmem [shape: f32[1,1,128], index: 18, kind: input, shape index: {}]   ;;  %s5250_s20 = inlined_call_operand.vmem [shape: f32[1,1,32], index: 20, kind: input, shape index: {}]   ;;  %s5251_s23 = inlined_call_operand.vmem [shape: f32[32,48], index: 23, kind: input, shape index: {}]   ;;  %s5252_s21 = inlined_call_operand.vmem [shape: f32[1,32], index: 21, kind: input, shape index: {}]   ;;  %s5253_s22 = inlined_call_operand.vmem [shape: f32[1,32], index: 22, kind: input, shape index: {}]   ;;  %s5254_s24 = inlined_call_operand.vmem [shape: f32[1,48], index: 24, kind: input, shape index: {}]   ;;  %s5255_s25 = inlined_call_operand.vmem [shape: f32[32,48], index: 25, kind: output, shape index: {}]  }
   0x1   :  { %5263 = sst [smem:[#allocation2_spill]] %s5230_s2 }
   0x2   :  { %5264 = sst [smem:[#allocation3_spill]] %s5231_s0 }
   0x3   :  { %5265 = sst [smem:[#allocation4_spill]] %s5232_s3 }
   0x4   :  { %5266 = sst [smem:[#allocation5_spill]] %s5233_s4 }
   0x5   :  { %5267 = sst [smem:[#allocation6_spill]] %s5234_s7 }
   0x6   :  { %5268 = sst [smem:[#allocation7_spill]] %s5235_s9 }
   0x7   :  { %5269 = sst [smem:[#allocation8_spill]] %s5236_s11 }
   0x8   :  { %5270 = sst [smem:[#allocation9_spill]] %s5237_s5 }
   0x9   :  { %5271 = sst [smem:[#allocation10_spill]] %s5238_s6 }
   0xa   :  { %5272 = sst [smem:[#allocation11_spill]] %s5239_s8 }
   0xb   :  { %s5273_s11 = sld [smem:[#allocation2_spill]] }
   0xc   :  { %s5274_s0 = sld [smem:[#allocation3_spill]] }
   0xd   :  { %s5275_s4 = sld [smem:[#allocation4_spill]] }
   0xe   :  { %s5276_s27 = sld [smem:[#allocation5_spill]] }
   0xf   :  { %s5277_s30 = sld [smem:[#allocation6_spill]] }
  0x10   :  { %s5279_s6 = sld [smem:[#allocation8_spill]] }
  0x11   :  { %v87_v0 = vld [vmem:[%s5273_s11 + $0x18] sm:$0xff]  ;;  %v86_v1 = vld [vmem:[%s5273_s11 + $0x10] sm:$0xff]  ;;  %v85_v3 = vld [vmem:[%s5273_s11 + $0x8] sm:$0xff]  ;;  %s5280_s28 = sld [smem:[#allocation9_spill]] }
  0x12   :  { %3853 = vmatprep.subr.mxu1 %v87_v0  ;;  %v80_v2 = vld [vmem:[%s5274_s0] sm:$0xff]  ;;  %v81_v5 = vld [vmem:[%s5274_s0 + $0x8] sm:$0xff]  ;;  %v82_v6 = vld [vmem:[%s5274_s0 + $0x10] sm:$0xff]  ;;  %s5281_s9 = sld [smem:[#allocation10_spill]] }
  0x13   :  { %3854 = vmatpush3.msra.mxu1 %v87_v0  ;;  %3861 = vmatprep.mubr.msk.f32.mxu1 %vm95_vm0, %v80_v2  ;;  %v84_v4 = vld [vmem:[%s5273_s11] sm:$0xff]  ;;  %v83_v7 = vld [vmem:[%s5274_s0 + $0x18] sm:$0xff] }
  0x14   :  { %3855 = vmatprep.subr.mxu1 %v86_v1  ;;  %v3434_v9 = vld [vmem:[%s5275_s4] ss:$0 sm:$0xff]  ;;  %v194_v14 = vld [vmem:[%s5276_s27 + $0x8] sm:$0xff]  ;;  %v195_v18 = vld [vmem:[%s5276_s27 + $0x10] sm:$0xff]  ;;  %s5278_s4 = sld [smem:[#allocation7_spill]] }
  0x15   :  { %3856 = vmatpush3.msra.mxu1 %v86_v1  ;;  %v193_v11 = vld [vmem:[%s5276_s27] sm:$0xff]  ;;  %v196_v23 = vld [vmem:[%s5276_s27 + $0x18] sm:$0xff]  ;;  %v282_v51 = vld [vmem:[%s5277_s30 + $0x10] sm:$0xff] }
  0x16   :  { %3857 = vmatprep.subr.mxu1 %v85_v3  ;;  %v283_v49 = vld [vmem:[%s5277_s30 + $0x18] sm:$0xff]  ;;  %v281_v53 = vld [vmem:[%s5277_s30 + $0x8] sm:$0xff]  ;;  %v280_v55 = vld [vmem:[%s5277_s30] sm:$0xff] }
  0x17   :  { %3858 = vmatpush3.msra.mxu1 %v85_v3  ;;  %v487_v57 = vld [vmem:[%s5279_s6 + $0x18] sm:$0xff] }
  0x18   :  { %3859 = vmatprep.subr.mxu1 %v84_v4 }
  0x19   :  { %3860 = vmatpush3.msra.mxu1 %v84_v4 }
  0x1a   :  { %3862 = vmatmul.mubr.msk.f32.vlgmr.msra.gmra.mxu1 %vm95_vm0, %v81_v5  ;;  %v391_v50 = vld [vmem:[%s5278_s4 + $0x18] sm:$0xff]  ;;  %3867 = vmatprep.subr.mxu1 %v283_v49  ;;  %v390_v52 = vld [vmem:[%s5278_s4 + $0x10] sm:$0xff]  ;;  %v389_v54 = vld [vmem:[%s5278_s4 + $0x8] sm:$0xff] }
  0x1b   :  { %3864 = vmatprep.mubr.msk.f32.mxu1 %vm95_vm0, %v82_v6  ;;  %3881 = vmatprep.subr.mxu0 %v391_v50  ;;  %v388_v56 = vld [vmem:[%s5278_s4] sm:$0xff] }
  0x1c   :  { %3868 = vmatpush3.msra.mxu1 %v283_v49  ;;  %3882 = vmatpush3.msra.mxu0 %v391_v50 }
  0x1d   :  { %3869 = vmatprep.subr.mxu1 %v282_v51  ;;  %3883 = vmatprep.subr.mxu0 %v390_v52 }
  0x1e   :  { %3865 = vmatmul.mubr.msk.f32.gmra.mxu1 %vm95_vm0, %v83_v7  ;;  %3884 = vmatpush3.msra.mxu0 %v390_v52  ;;  %v3439_v7 = vld [vmem:[%s5280_s28] ss:$0 sm:$0xff]  ;;  %s5282_s28 = sld [smem:[#allocation11_spill]] }
  0x1f   :  { %3870 = vmatpush3.msra.mxu1 %v282_v51  ;;  %3885 = vmatprep.subr.mxu0 %v389_v54 }
  0x20   :  { %3871 = vmatprep.subr.mxu1 %v281_v53  ;;  %3886 = vmatpush3.msra.mxu0 %v389_v54  ;;  %v3481_v54 = vld [vmem:[%s5278_s4 + $0x38] sm:$0xff] }
  0x21   :  { %3872 = vmatpush3.msra.mxu1 %v281_v53  ;;  %3887 = vmatprep.subr.mxu0 %v388_v56 }
  0x22   :  { %3873 = vmatprep.subr.mxu1 %v280_v55  ;;  %3888 = vmatpush3.msra.mxu0 %v388_v56 }
  0x23   :  { %3874 = vmatpush3.msra.mxu1 %v280_v55 }
  0x24   :  { %3895 = vmatprep.subr.mxu1 %v487_v57 }
  0xda   :  { %v3863_v8 = vpop.f32.mrf.mxu1 }
  0xdb   :  { %v180_v12 = vadd.f32 %v3863_v8, %v3434_v9 }
  0xdc   :  { %v174_v10 = vpop.f32.mrf.mxu1 }
  0xdd   :  { %v175_v13 = vadd.f32 %v3434_v9, %v174_v10  ;;  %v4517_v19 = vadd.f32 %v194_v14, %v180_v12 }
  0xde   :  { %v3866_v15 = vpop.f32.mrf.mxu1 }
  0xdf   :  { %v4512_v16 = vadd.f32 %v193_v11, %v175_v13  ;;  %v190_v20 = vadd.f32 %v3866_v15, %v3434_v9  ;;  %v210_v27 = vsel %vm95_vm0, %v4517_v19, 0.0 }
  0xe0   :  { %v184_v17 = vpop.f32.mrf.mxu1 }
  0xe1   :  { %v185_v21 = vadd.f32 %v3434_v9, %v184_v17  ;;  %v207_v22 = vsel %vm95_vm0, %v4512_v16, 0.0  ;;  %v4526_v25 = vadd.f32 %v196_v23, %v190_v20  ;;  %v3440_v9 = vld [vmem:[%s5281_s9] ss:$0 sm:$0xff] }
  0xe2   :  { %208 = vadd.xlane.f32.xlu0 %v207_v22 }
  0xe3   :  { %v4524_v24 = vadd.f32 %v195_v18, %v185_v21  ;;  %v216_v28 = vsel %vm95_vm0, %v4526_v25, 0.0 }
  0xe5   :  { %v213_v26 = vsel %vm95_vm0, %v4524_v24, 0.0 }
  0xe6   :  { %214 = vadd.xlane.f32.xlu1 %v213_v26  ;;  %211 = vadd.xlane.f32.xlu0 %v210_v27  ;;  %v486_v27 = vld [vmem:[%s5279_s6 + $0x10] sm:$0xff] }
  0xea   :  { %217 = vadd.xlane.f32.xlu1 %v216_v28 }
 0x16b   :  { %v209_v29 = vpop.xlane.xlu0 %208 }
 0x16c   :  { %v220_v30 = vmul.f32 0.03125, %v209_v29  ;;  %v485_v29 = vld [vmem:[%s5279_s6 + $0x8] sm:$0xff] }
 0x16e   :  { %v4535_v31 = vsub.f32 %v4512_v16, %v220_v30  ;;  %v484_v30 = vld [vmem:[%s5279_s6] sm:$0xff] }
 0x16f   :  { %v215_v32 = vpop.xlane.xlu1 %214  ;;  %v212_v33 = vpop.xlane.xlu0 %211 }
 0x170   :  { %v222_v34 = vmul.f32 0.03125, %v215_v32  ;;  %v221_v35 = vmul.f32 0.03125, %v212_v33  ;;  %v228_v36 = vmul.f32 %v4535_v31, %v4535_v31  ;;  %v3441_v33 = vld [vmem:[%s5282_s28] ss:$0 sm:$0xff] }
 0x172   :  { %v4540_v37 = vsub.f32 %v4524_v24, %v222_v34  ;;  %v4543_v38 = vsub.f32 %v4517_v19, %v221_v35  ;;  %v232_v39 = vsel %vm95_vm0, %v228_v36, 0.0 }
 0x173   :  { %v218_v40 = vpop.xlane.xlu1 %217  ;;  %233 = vadd.xlane.f32.xlu0 %v232_v39 }
 0x174   :  { %v223_v41 = vmul.f32 0.03125, %v218_v40  ;;  %v230_v42 = vmul.f32 %v4540_v37, %v4540_v37  ;;  %v229_v43 = vmul.f32 %v4543_v38, %v4543_v38 }
 0x176   :  { %v4551_v44 = vsub.f32 %v4526_v25, %v223_v41  ;;  %v238_v45 = vsel %vm95_vm0, %v230_v42, 0.0  ;;  %v235_v46 = vsel %vm95_vm0, %v229_v43, 0.0 }
 0x177   :  { %239 = vadd.xlane.f32.xlu0 %v238_v45  ;;  %236 = vadd.xlane.f32.xlu1 %v235_v46 }
 0x178   :  { %v231_v47 = vmul.f32 %v4551_v44, %v4551_v44 }
 0x17a   :  { %v241_v48 = vsel %vm95_vm0, %v231_v47, 0.0  ;;  %v3451_v47 = vld [vmem:[%s5241_s12] ss:$0 sm:$0xff] }
 0x17b   :  { %242 = vadd.xlane.f32.xlu1 %v241_v48 }
 0x1fc   :  { %v234_v58 = vpop.xlane.xlu0 %233 }
 0x1fd   :  { %v244_v59 = vmul.f32 0.03125, %v234_v58  ;;  %v3480_v58 = vld [vmem:[%s5278_s4 + $0x30] sm:$0xff] }
 0x1ff   :  { %v248_v60 = vadd.f32 1e-05, %v244_v59  ;;  %v3479_v59 = vld [vmem:[%s5278_s4 + $0x28] sm:$0xff] }
 0x200   :  { %v237_v61 = vpop.xlane.xlu1 %236  ;;  %v240_v62 = vpop.xlane.xlu0 %239 }
 0x201   :  { %4245 = vrsqrt.f32 %v248_v60  ;;  %v245_v63 = vmul.f32 0.03125, %v237_v61  ;;  %v246_v0 = vmul.f32 0.03125, %v240_v62  ;;  %v3478_v61 = vld [vmem:[%s5278_s4 + $0x20] sm:$0xff] }
 0x203   :  { %v249_v1 = vadd.f32 1e-05, %v245_v63  ;;  %v250_v2 = vadd.f32 1e-05, %v246_v0  ;;  %v4680_v63 = vld [vmem:[%s5242_s1 + $0x8] sm:$0xff] }
 0x204   :  { %v243_v3 = vpop.xlane.xlu1 %242 }
 0x205   :  { %4247 = vrsqrt.f32 %v249_v1  ;;  %v247_v4 = vmul.f32 0.03125, %v243_v3 }
 0x206   :  { %4249 = vrsqrt.f32 %v250_v2  ;;  %v4685_v2 = vld [vmem:[%s5242_s1] sm:$0xff] }
 0x207   :  { %v251_v5 = vadd.f32 1e-05, %v247_v4 }
 0x209   :  { %4251 = vrsqrt.f32 %v251_v5 }
 0x20e   :  { %v4246_v6 = vpop.eup %4245 }
 0x20f   :  { %v256_v8 = vmul.f32 %v4246_v6, %v4535_v31  ;;  %v4691_v6 = vld [vmem:[%s5242_s1 + $0x18] sm:$0xff] }
 0x211   :  { %v266_v10 = vmul.f32 %v3439_v7, %v256_v8 }
 0x212   :  { %v4248_v11 = vpop.eup %4247 }
 0x213   :  { %v4250_v12 = vpop.eup %4249  ;;  %v4592_v13 = vadd.f32 %v3440_v9, %v266_v10  ;;  %v257_v14 = vmul.f32 %v4248_v11, %v4543_v38  ;;  %v4698_v11 = vld [vmem:[%s5242_s1 + $0x10] sm:$0xff] }
 0x214   :  { %v258_v15 = vmul.f32 %v4250_v12, %v4540_v37  ;;  %v3446_v37 = vld [vmem:[%s5240_s10] ss:$0 sm:$0xff] }
 0x215   :  { %v267_v17 = vmul.f32 %v3439_v7, %v257_v14  ;;  %3875 = vmatprep.mubr.msk.f32.mxu1 %vm95_vm0, %v4592_v13  ;;  %3889 = vmatprep.mubr.msk.f32.mxu0 %vm95_vm0, %v4592_v13 }
 0x216   :  { %v4252_v18 = vpop.eup %4251  ;;  %v268_v20 = vmul.f32 %v3439_v7, %v258_v15 }
 0x217   :  { %v4600_v21 = vadd.f32 %v3440_v9, %v267_v17  ;;  %v259_v22 = vmul.f32 %v4252_v18, %v4551_v44 }
 0x218   :  { %v4603_v23 = vadd.f32 %v3440_v9, %v268_v20 }
 0x219   :  { %v269_v26 = vmul.f32 %v3439_v7, %v259_v22  ;;  %3876 = vmatmul.mubr.msk.f32.vlgmr.msra.gmra.mxu1 %vm95_vm0, %v4600_v21  ;;  %3890 = vmatmul.mubr.msk.f32.vlgmr.msra.gmra.mxu0 %vm95_vm0, %v4600_v21 }
 0x21a   :  { %3878 = vmatprep.mubr.msk.f32.mxu1 %vm95_vm0, %v4603_v23  ;;  %3892 = vmatprep.mubr.msk.f32.mxu0 %vm95_vm0, %v4603_v23 }
 0x21b   :  { %v4616_v28 = vadd.f32 %v3440_v9, %v269_v26  ;;  %3896 = vmatpush3.msra.mxu1 %v487_v57 }
 0x21c   :  { %3897 = vmatprep.subr.mxu1 %v486_v27 }
 0x21d   :  { %3898 = vmatpush3.msra.mxu1 %v486_v27  ;;  %3893 = vmatmul.mubr.msk.f32.gmra.mxu0 %vm95_vm0, %v4616_v28  ;;  %v3483_v27 = vld [vmem:[%s5240_s10 + $0x1] ss:$0 sm:$0xff] }
 0x21e   :  { %3879 = vmatmul.mubr.msk.f32.gmra.mxu1 %vm95_vm0, %v4616_v28  ;;  %3899 = vmatprep.subr.mxu1 %v485_v29 }
 0x21f   :  { %3900 = vmatpush3.msra.mxu1 %v485_v29  ;;  %3903 = vmatprep.mubr.msk.f32.mxu1 %vm95_vm0, %v4592_v13 }
 0x220   :  { %3901 = vmatprep.subr.mxu1 %v484_v30 }
 0x221   :  { %3902 = vmatpush3.msra.mxu1 %v484_v30 }
 0x222   :  { %3904 = vmatmul.mubr.msk.f32.vlgmr.msra.gmra.mxu1 %vm95_vm0, %v4600_v21 }
 0x223   :  { %3906 = vmatprep.mubr.msk.f32.mxu1 %vm95_vm0, %v4603_v23 }
 0x226   :  { %3907 = vmatmul.mubr.msk.f32.gmra.mxu1 %vm95_vm0, %v4616_v28 }
 0x2d9   :  { %v3877_v31 = vpop.f32.mrf.mxu1  ;;  %v3891_v32 = vpop.f32.mrf.mxu0 }
 0x2da   :  { %v471_v45 = vadd.f32 %v3891_v32, %v3446_v37  ;;  %v375_v56 = vadd.f32 %v3877_v31, %v3441_v33 }
 0x2db   :  { %v369_v34 = vpop.f32.mrf.mxu1  ;;  %v465_v35 = vpop.f32.mrf.mxu0 }
 0x2dc   :  { %v370_v36 = vadd.f32 %v3441_v33, %v369_v34  ;;  %v466_v50 = vadd.f32 %v3446_v37, %v465_v35 }
 0x2dd   :  { %v3894_v38 = vpop.f32.mrf.mxu0 }
 0x2de   :  { %v3880_v39 = vpop.f32.mrf.mxu1  ;;  %v481_v40 = vadd.f32 %v3894_v38, %v3446_v37  ;;  %3917 = vmatprep.mubr.msk.f32.mxu0 %vm580_vm1, %v370_v36 }
 0x2df   :  { %v475_v41 = vpop.f32.mrf.mxu0  ;;  %v385_v60 = vadd.f32 %v3880_v39, %v3441_v33 }
 0x2e0   :  { %v379_v42 = vpop.f32.mrf.mxu1  ;;  %v476_v43 = vadd.f32 %v3446_v37, %v475_v41  ;;  %3909 = vmatprep.subr.msk.mxu0 %vm580_vm1, %v481_v40 }
 0x2e1   :  { %3910 = vmatpush3.xpose.msk.msra.mxu0 %vm580_vm1, %v481_v40  ;;  %v380_v57 = vadd.f32 %v3441_v33, %v379_v42 }
 0x2e2   :  { %v3905_v44 = vpop.f32.mrf.mxu1  ;;  %3911 = vmatprep.subr.msk.mxu0 %vm580_vm1, %v476_v43 }
 0x2e3   :  { %v567_v53 = vadd.f32 %v3905_v44, %v3451_v47 }
 0x2e4   :  { %v561_v46 = vpop.f32.mrf.mxu1 }
 0x2e5   :  { %3912 = vmatpush3.xpose.msk.msra.mxu0 %vm580_vm1, %v476_v43  ;;  %v562_v55 = vadd.f32 %v3451_v47, %v561_v46 }
 0x2e6   :  { %v3908_v48 = vpop.f32.mrf.mxu1  ;;  %3913 = vmatprep.subr.msk.mxu0 %vm580_vm1, %v471_v45 }
 0x2e7   :  { %v577_v49 = vadd.f32 %v3908_v48, %v3451_v47 }
 0x2e8   :  { %v571_v51 = vpop.f32.mrf.mxu1 }
 0x2e9   :  { %v572_v52 = vadd.f32 %v3451_v47, %v571_v51  ;;  %3923 = vmatprep.subr.mxu1 %v577_v49  ;;  %3914 = vmatpush3.xpose.msk.msra.mxu0 %vm580_vm1, %v471_v45 }
 0x2ea   :  { %3924 = vmatpush3.msra.mxu1 %v577_v49  ;;  %3915 = vmatprep.subr.msk.mxu0 %vm580_vm1, %v466_v50 }
 0x2eb   :  { %3925 = vmatprep.subr.mxu1 %v572_v52 }
 0x2ec   :  { %3926 = vmatpush3.msra.mxu1 %v572_v52 }
 0x2ed   :  { %3927 = vmatprep.subr.mxu1 %v567_v53  ;;  %3916 = vmatpush3.xpose.msk.msra.mxu0 %vm580_vm1, %v466_v50 }
 0x2ee   :  { %3928 = vmatpush3.msra.mxu1 %v567_v53  ;;  %3951 = vmatprep.subr.mxu0 %v3481_v54 }
 0x2ef   :  { %3929 = vmatprep.subr.mxu1 %v562_v55 }
 0x2f0   :  { %3930 = vmatpush3.msra.mxu1 %v562_v55  ;;  %3918 = vmatmul.mubr.msk.f32.vlgmr.msra.gmra.mxu0 %vm580_vm1, %v375_v56  ;;  %v3471_v55 = vld [vmem:[%s5277_s30 + $0x38] sm:$0xff] }
 0x2f1   :  { %3920 = vmatprep.mubr.msk.f32.mxu0 %vm580_vm1, %v380_v57  ;;  %3952 = vmatpush3.msra.mxu0 %v3481_v54 }
 0x2f2   :  { %3953 = vmatprep.subr.mxu0 %v3480_v58  ;;  %3937 = vmatprep.subr.mxu1 %v3471_v55 }
 0x2f3   :  { %3954 = vmatpush3.msra.mxu0 %v3480_v58 }
 0x2f4   :  { %3921 = vmatmul.mubr.msk.f32.gmra.mxu0 %vm580_vm1, %v385_v60  ;;  %3955 = vmatprep.subr.mxu0 %v3479_v59 }
 0x2f5   :  { %3956 = vmatpush3.msra.mxu0 %v3479_v59  ;;  %3959 = vmatprep.mubr.msk.f32.mxu0 %vm95_vm0, %v4592_v13 }
 0x2f6   :  { %3957 = vmatprep.subr.mxu0 %v3478_v61 }
 0x2f7   :  { %3958 = vmatpush3.msra.mxu0 %v3478_v61 }
 0x2f8   :  { %3960 = vmatmul.mubr.msk.f32.vlgmr.msra.gmra.mxu0 %vm95_vm0, %v4600_v21 }
 0x2f9   :  { %3962 = vmatprep.mubr.msk.f32.mxu0 %vm95_vm0, %v4603_v23 }
 0x2fc   :  { %3963 = vmatmul.mubr.msk.f32.gmra.mxu0 %vm95_vm0, %v4616_v28 }
 0x3b0   :  { %v3919_v62 = vpop.f32.mrf.mxu0 }
 0x3b1   :  { %v691_v0 = vmul.f32 0.35355338, %v3919_v62 }
 0x3b2   :  { %v671_v1 = vpop.f32.mrf.mxu0 }
 0x3b3   :  { %v690_v3 = vmul.f32 0.35355338, %v671_v1  ;;  %v695_v4 = vadd.f32 %v691_v0, %v4680_v63 }
 0x3b4   :  { %v3922_v5 = vpop.f32.mrf.mxu0 }
 0x3b5   :  { %v693_v7 = vmul.f32 0.35355338, %v3922_v5  ;;  %v701_v8 = vsel %vm95_vm0, %v695_v4, -inf  ;;  %v694_v9 = vadd.f32 %v690_v3, %v4685_v2  ;;  %v3470_v3 = vld [vmem:[%s5277_s30 + $0x30] sm:$0xff] }
 0x3b6   :  { %702 = vmax.xlane.f32.xlu1 %v701_v8  ;;  %v681_v10 = vpop.f32.mrf.mxu0 }
 0x3b7   :  { %v692_v12 = vmul.f32 0.35355338, %v681_v10  ;;  %v698_v14 = vsel %vm95_vm0, %v694_v9, -inf  ;;  %v697_v15 = vadd.f32 %v693_v7, %v4691_v6  ;;  %v3469_v7 = vld [vmem:[%s5277_s30 + $0x28] sm:$0xff]  ;;  %v3491_v10 = vld [vmem:[%s5279_s6 + $0x38] sm:$0xff] }
 0x3b8   :  { %699 = vmax.xlane.f32.xlu0 %v698_v14  ;;  %v3961_v17 = vpop.f32.mrf.mxu0  ;;  %v3489_v14 = vld [vmem:[%s5279_s6 + $0x28] sm:$0xff] }
 0x3b9   :  { %v707_v18 = vsel %vm95_vm0, %v697_v15, -inf  ;;  %v696_v20 = vadd.f32 %v692_v12, %v4698_v11  ;;  %v1023_v33 = vadd.f32 %v3961_v17, %v3483_v27  ;;  %v3490_v12 = vld [vmem:[%s5279_s6 + $0x30] sm:$0xff]  ;;  %v839_v17 = vld [vmem:[%s5243_s13] sm:$0xff] }
 0x3ba   :  { %708 = vmax.xlane.f32.xlu1 %v707_v18  ;;  %v1017_v22 = vpop.f32.mrf.mxu0 }
 0x3bb   :  { %v704_v26 = vsel %vm95_vm0, %v696_v20, -inf  ;;  %v1018_v34 = vadd.f32 %v3483_v27, %v1017_v22 }
 0x3bc   :  { %v3964_v29 = vpop.f32.mrf.mxu0  ;;  %705 = vmax.xlane.f32.xlu0 %v704_v26 }
 0x3bd   :  { %v1033_v30 = vadd.f32 %v3964_v29, %v3483_v27  ;;  %v3473_v29 = vld [vmem:[%s5282_s28 + $0x1] ss:$0 sm:$0xff] }
 0x3be   :  { %v1027_v31 = vpop.f32.mrf.mxu0 }
 0x3bf   :  { %v1028_v32 = vadd.f32 %v3483_v27, %v1027_v31  ;;  %3979 = vmatprep.subr.msk.mxu0 %vm580_vm1, %v1033_v30 }
 0x3c0   :  { %3980 = vmatpush3.xpose.msk.msra.mxu0 %vm580_vm1, %v1033_v30 }
 0x3c1   :  { %3981 = vmatprep.subr.msk.mxu0 %vm580_vm1, %v1028_v32 }
 0x3c4   :  { %3982 = vmatpush3.xpose.msk.msra.mxu0 %vm580_vm1, %v1028_v32 }
 0x3c5   :  { %3983 = vmatprep.subr.msk.mxu0 %vm580_vm1, %v1023_v33 }
 0x3c8   :  { %3984 = vmatpush3.xpose.msk.msra.mxu0 %vm580_vm1, %v1023_v33 }
 0x3c9   :  { %3985 = vmatprep.subr.msk.mxu0 %vm580_vm1, %v1018_v34 }
 0x3cc   :  { %3986 = vmatpush3.xpose.msk.msra.mxu0 %vm580_vm1, %v1018_v34  ;;  %v3532_v34 = vld [vmem:[%s5278_s4 + $0x58] sm:$0xff] }
 0x3cd   :  { %4015 = vmatprep.subr.mxu0 %v839_v17 }
 0x43f   :  { %v703_v35 = vpop.xlane.xlu1 %702 }
 0x440   :  { %v711_v36 = vsub.f32 %v695_v4, %v703_v35 }
 0x441   :  { %v700_v37 = vpop.xlane.xlu0 %699 }
 0x442   :  { %v716_v38 = vmul.f32 1.442695, %v711_v36  ;;  %v710_v39 = vsub.f32 %v694_v9, %v700_v37  ;;  %v3468_v9 = vld [vmem:[%s5277_s30 + $0x20] sm:$0xff] }
 0x443   :  { %v709_v40 = vpop.xlane.xlu1 %708 }
 0x444   :  { %4253 = vpow2.f32 %v716_v38  ;;  %v714_v41 = vmul.f32 1.442695, %v710_v39  ;;  %v713_v42 = vsub.f32 %v697_v15, %v709_v40  ;;  %v3488_v15 = vld [vmem:[%s5279_s6 + $0x20] sm:$0xff] }
 0x445   :  { %v706_v43 = vpop.xlane.xlu0 %705  ;;  %v3493_v40 = vld [vmem:[%s5241_s12 + $0x1] ss:$0 sm:$0xff] }
 0x446   :  { %4255 = vpow2.f32 %v714_v41  ;;  %v720_v44 = vmul.f32 1.442695, %v713_v42  ;;  %v712_v45 = vsub.f32 %v696_v20, %v706_v43 }
 0x448   :  { %4257 = vpow2.f32 %v720_v44  ;;  %v718_v46 = vmul.f32 1.442695, %v712_v45  ;;  %v3531_v44 = vld [vmem:[%s5278_s4 + $0x50] sm:$0xff] }
 0x44a   :  { %4259 = vpow2.f32 %v718_v46  ;;  %v3530_v46 = vld [vmem:[%s5278_s4 + $0x48] sm:$0xff] }
 0x451   :  { %v4254_v47 = vpop.eup %4253 }
 0x452   :  { %v725_v48 = vsel %vm95_vm0, %v4254_v47, 0.0 }
 0x453   :  { %v4256_v49 = vpop.eup %4255  ;;  %726 = vadd.xlane.f32.xlu1 %v725_v48  ;;  %v3529_v48 = vld [vmem:[%s5278_s4 + $0x40] sm:$0xff] }
 0x454   :  { %v722_v50 = vsel %vm95_vm0, %v4256_v49, 0.0 }
 0x455   :  { %v4258_v51 = vpop.eup %4257  ;;  %723 = vadd.xlane.f32.xlu0 %v722_v50 }
 0x456   :  { %v731_v52 = vsel %vm95_vm0, %v4258_v51, 0.0 }
 0x457   :  { %v4260_v53 = vpop.eup %4259  ;;  %732 = vadd.xlane.f32.xlu1 %v731_v52 }
 0x458   :  { %v728_v54 = vsel %vm95_vm0, %v4260_v53, 0.0 }
 0x459   :  { %729 = vadd.xlane.f32.xlu0 %v728_v54 }
 0x4dc   :  { %v727_v56 = vpop.xlane.xlu1 %726 }
 0x4dd   :  { %4261 = vrcp.f32 %v727_v56 }
 0x4de   :  { %v724_v57 = vpop.xlane.xlu0 %723 }
 0x4df   :  { %4263 = vrcp.f32 %v724_v57 }
 0x4e0   :  { %v733_v58 = vpop.xlane.xlu1 %732 }
 0x4e1   :  { %4265 = vrcp.f32 %v733_v58 }
 0x4e2   :  { %v730_v59 = vpop.xlane.xlu0 %729 }
 0x4e3   :  { %4267 = vrcp.f32 %v730_v59 }
 0x4ea   :  { %v4262_v60 = vpop.eup %4261 }
 0x4eb   :  { %v739_v0 = vmul.f32 %v4262_v60, %v4254_v47 }
 0x4ec   :  { %v4264_v61 = vpop.eup %4263 }
 0x4ed   :  { %v738_v62 = vmul.f32 %v4264_v61, %v4256_v49 }
 0x4ee   :  { %v4266_v1 = vpop.eup %4265 }
 0x4ef   :  { %3931 = vmatprep.mubr.msk.f32.mxu1 %vm95_vm0, %v738_v62  ;;  %v741_v8 = vmul.f32 %v4266_v1, %v4258_v51 }
 0x4f0   :  { %v4268_v4 = vpop.eup %4267  ;;  %3932 = vmatmul.mubr.msk.f32.vlgmr.msra.gmra.mxu1 %vm95_vm0, %v739_v0 }
 0x4f1   :  { %3938 = vmatpush3.msra.mxu1 %v3471_v55  ;;  %v740_v5 = vmul.f32 %v4268_v4, %v4260_v53 }
 0x4f2   :  { %3939 = vmatprep.subr.mxu1 %v3470_v3 }
 0x4f3   :  { %3940 = vmatpush3.msra.mxu1 %v3470_v3  ;;  %3934 = vmatprep.mubr.msk.f32.mxu1 %vm95_vm0, %v740_v5 }
 0x4f4   :  { %3941 = vmatprep.subr.mxu1 %v3469_v7  ;;  %3935 = vmatmul.mubr.msk.f32.gmra.mxu1 %vm95_vm0, %v741_v8 }
 0x4f5   :  { %3942 = vmatpush3.msra.mxu1 %v3469_v7  ;;  %3945 = vmatprep.mubr.msk.f32.mxu1 %vm95_vm0, %v4592_v13 }
 0x4f6   :  { %3943 = vmatprep.subr.mxu1 %v3468_v9 }
 0x4f7   :  { %3944 = vmatpush3.msra.mxu1 %v3468_v9 }
 0x4f8   :  { %3946 = vmatmul.mubr.msk.f32.vlgmr.msra.gmra.mxu1 %vm95_vm0, %v4600_v21  ;;  %3965 = vmatprep.subr.mxu1 %v3491_v10 }
 0x4f9   :  { %3948 = vmatprep.mubr.msk.f32.mxu1 %vm95_vm0, %v4603_v23  ;;  %3966 = vmatpush3.msra.mxu1 %v3491_v10 }
 0x4fa   :  { %3967 = vmatprep.subr.mxu1 %v3490_v12 }
 0x4fb   :  { %3968 = vmatpush3.msra.mxu1 %v3490_v12  ;;  %v3534_v12 = vld [vmem:[%s5240_s10 + $0x2] ss:$0 sm:$0xff] }
 0x4fc   :  { %3949 = vmatmul.mubr.msk.f32.gmra.mxu1 %vm95_vm0, %v4616_v28  ;;  %3969 = vmatprep.subr.mxu1 %v3489_v14 }
 0x4fd   :  { %3970 = vmatpush3.msra.mxu1 %v3489_v14  ;;  %3973 = vmatprep.mubr.msk.f32.mxu1 %vm95_vm0, %v4592_v13 }
 0x4fe   :  { %3971 = vmatprep.subr.mxu1 %v3488_v15 }
 0x4ff   :  { %3972 = vmatpush3.msra.mxu1 %v3488_v15 }
 0x500   :  { %3974 = vmatmul.mubr.msk.f32.vlgmr.msra.gmra.mxu1 %vm95_vm0, %v4600_v21 }
 0x501   :  { %3976 = vmatprep.mubr.msk.f32.mxu1 %vm95_vm0, %v4603_v23 }
 0x504   :  { %3977 = vmatmul.mubr.msk.f32.gmra.mxu1 %vm95_vm0, %v4616_v28 }
 0x5b0   :  { %v3933_v18 = vpop.f32.mrf.mxu1 }
 0x5b2   :  { %v820_v20 = vpop.f32.mrf.mxu1 }
 0x5b4   :  { %v3936_v22 = vpop.f32.mrf.mxu1 }
 0x5b6   :  { %v830_v26 = vpop.f32.mrf.mxu1 }
 0x5b8   :  { %v3947_v27 = vpop.f32.mrf.mxu1 }
 0x5b9   :  { %v925_v32 = vadd.f32 %v3947_v27, %v3473_v29 }
 0x5ba   :  { %v919_v30 = vpop.f32.mrf.mxu1 }
 0x5bb   :  { %v920_v31 = vadd.f32 %v3473_v29, %v919_v30 }
 0x5bc   :  { %v3950_v33 = vpop.f32.mrf.mxu1 }
 0x5bd   :  { %3987 = vmatprep.mubr.msk.f32.mxu0 %vm580_vm1, %v920_v31  ;;  %v935_v37 = vadd.f32 %v3950_v33, %v3473_v29 }
 0x5be   :  { %v929_v35 = vpop.f32.mrf.mxu1  ;;  %3988 = vmatmul.mubr.msk.f32.vlgmr.msra.gmra.mxu0 %vm580_vm1, %v925_v32 }
 0x5bf   :  { %v930_v36 = vadd.f32 %v3473_v29, %v929_v35  ;;  %4016 = vmatpush3.msra.mxu0 %v839_v17 }
 0x5c0   :  { %v3975_v38 = vpop.f32.mrf.mxu1  ;;  %4037 = vmatprep.subr.mxu0 %v3532_v34 }
 0x5c1   :  { %3990 = vmatprep.mubr.msk.f32.mxu0 %vm580_vm1, %v930_v36  ;;  %v1121_v47 = vadd.f32 %v3975_v38, %v3493_v40 }
 0x5c2   :  { %v1115_v39 = vpop.f32.mrf.mxu1  ;;  %3991 = vmatmul.mubr.msk.f32.gmra.mxu0 %vm580_vm1, %v935_v37 }
 0x5c3   :  { %4017 = vmatprep.mubr.msk.f32.mxu0 %vm580_vm1, %v820_v20  ;;  %v1116_v49 = vadd.f32 %v3493_v40, %v1115_v39 }
 0x5c4   :  { %v3978_v41 = vpop.f32.mrf.mxu1 }
 0x5c5   :  { %v1131_v42 = vadd.f32 %v3978_v41, %v3493_v40 }
 0x5c6   :  { %v1125_v43 = vpop.f32.mrf.mxu1  ;;  %4018 = vmatmul.mubr.msk.f32.vlgmr.msra.gmra.mxu0 %vm580_vm1, %v3933_v18 }
 0x5c7   :  { %v1126_v45 = vadd.f32 %v3493_v40, %v1125_v43  ;;  %3993 = vmatprep.subr.mxu1 %v1131_v42  ;;  %4020 = vmatprep.mubr.msk.f32.mxu0 %vm580_vm1, %v830_v26 }
 0x5c8   :  { %4038 = vmatpush3.msra.mxu0 %v3532_v34  ;;  %3994 = vmatpush3.msra.mxu1 %v1131_v42 }
 0x5c9   :  { %4039 = vmatprep.subr.mxu0 %v3531_v44  ;;  %3995 = vmatprep.subr.mxu1 %v1126_v45 }
 0x5ca   :  { %4040 = vmatpush3.msra.mxu0 %v3531_v44  ;;  %3996 = vmatpush3.msra.mxu1 %v1126_v45 }
 0x5cb   :  { %4021 = vmatmul.mubr.msk.f32.gmra.mxu0 %vm580_vm1, %v3936_v22  ;;  %4041 = vmatprep.subr.mxu0 %v3530_v46 }
 0x5cc   :  { %3997 = vmatprep.subr.mxu1 %v1121_v47  ;;  %4042 = vmatpush3.msra.mxu0 %v3530_v46 }
 0x5cd   :  { %4045 = vmatprep.mubr.msk.f32.mxu0 %vm95_vm0, %v4592_v13  ;;  %3998 = vmatpush3.msra.mxu1 %v1121_v47  ;;  %v3510_v47 = vld [vmem:[%s5243_s13 + $0x8] sm:$0xff] }
 0x5ce   :  { %4043 = vmatprep.subr.mxu0 %v3529_v48  ;;  %3999 = vmatprep.subr.mxu1 %v1116_v49 }
 0x5cf   :  { %4044 = vmatpush3.msra.mxu0 %v3529_v48  ;;  %4000 = vmatpush3.msra.mxu1 %v1116_v49 }
 0x5d0   :  { %4046 = vmatmul.mubr.msk.f32.vlgmr.msra.gmra.mxu0 %vm95_vm0, %v4600_v21  ;;  %4007 = vmatprep.subr.mxu1 %v3510_v47 }
 0x5d1   :  { %4048 = vmatprep.mubr.msk.f32.mxu0 %vm95_vm0, %v4603_v23 }
 0x5d4   :  { %4049 = vmatmul.mubr.msk.f32.gmra.mxu0 %vm95_vm0, %v4616_v28 }
 0x67e   :  { %v3989_v50 = vpop.f32.mrf.mxu0 }
 0x67f   :  { %v1244_v51 = vmul.f32 0.35355338, %v3989_v50 }
 0x680   :  { %v1224_v52 = vpop.f32.mrf.mxu0 }
 0x681   :  { %v1243_v53 = vmul.f32 0.35355338, %v1224_v52  ;;  %v1248_v54 = vadd.f32 %v1244_v51, %v4680_v63 }
 0x682   :  { %v3992_v55 = vpop.f32.mrf.mxu0 }
 0x683   :  { %v1246_v56 = vmul.f32 0.35355338, %v3992_v55  ;;  %v1254_v57 = vsel %vm95_vm0, %v1248_v54, -inf  ;;  %v1247_v58 = vadd.f32 %v1243_v53, %v4685_v2 }
 0x684   :  { %1255 = vmax.xlane.f32.xlu1 %v1254_v57  ;;  %v1234_v59 = vpop.f32.mrf.mxu0 }
 0x685   :  { %v1245_v60 = vmul.f32 0.35355338, %v1234_v59  ;;  %v1251_v61 = vsel %vm95_vm0, %v1247_v58, -inf  ;;  %v1250_v62 = vadd.f32 %v1246_v56, %v4691_v6 }
 0x686   :  { %1252 = vmax.xlane.f32.xlu0 %v1251_v61  ;;  %v4806_v0 = vpop.f32.mrf.mxu0 }
 0x687   :  { %v1260_v1 = vsel %vm95_vm0, %v1250_v62, -inf  ;;  %v1249_v3 = vadd.f32 %v1245_v60, %v4698_v11  ;;  %v3522_v60 = vld [vmem:[%s5277_s30 + $0x58] sm:$0xff] }
 0x688   :  { %1261 = vmax.xlane.f32.xlu1 %v1260_v1  ;;  %v4810_v4 = vpop.f32.mrf.mxu0  ;;  %v3521_v1 = vld [vmem:[%s5277_s30 + $0x50] sm:$0xff] }
 0x689   :  { %v1257_v5 = vsel %vm95_vm0, %v1249_v3, -inf }
 0x68a   :  { %1258 = vmax.xlane.f32.xlu0 %v1257_v5  ;;  %v3520_v5 = vld [vmem:[%s5277_s30 + $0x48] sm:$0xff] }
 0x68b   :  { %v4813_v7 = vpop.f32.mrf.mxu0 }
 0x68d   :  { %v4815_v8 = vpop.f32.mrf.mxu0 }
 0x690   :  { %v4047_v9 = vpop.f32.mrf.mxu0 }
 0x691   :  { %v1771_v20 = vadd.f32 %v4047_v9, %v3534_v12 }
 0x692   :  { %v1765_v10 = vpop.f32.mrf.mxu0 }
 0x693   :  { %v1766_v22 = vadd.f32 %v3534_v12, %v1765_v10  ;;  %v3519_v10 = vld [vmem:[%s5277_s30 + $0x40] sm:$0xff] }
 0x694   :  { %v4050_v14 = vpop.f32.mrf.mxu0 }
 0x695   :  { %v1781_v15 = vadd.f32 %v4050_v14, %v3534_v12  ;;  %v3541_v14 = vld [vmem:[%s5279_s6 + $0x50] sm:$0xff] }
 0x696   :  { %v1775_v17 = vpop.f32.mrf.mxu0 }
 0x697   :  { %v1776_v18 = vadd.f32 %v3534_v12, %v1775_v17  ;;  %4065 = vmatprep.subr.msk.mxu0 %vm580_vm1, %v1781_v15  ;;  %v3542_v12 = vld [vmem:[%s5279_s6 + $0x58] sm:$0xff]  ;;  %v3539_v17 = vld [vmem:[%s5279_s6 + $0x40] sm:$0xff] }
 0x698   :  { %4066 = vmatpush3.xpose.msk.msra.mxu0 %vm580_vm1, %v1781_v15  ;;  %v3540_v15 = vld [vmem:[%s5279_s6 + $0x48] sm:$0xff] }
 0x699   :  { %4067 = vmatprep.subr.msk.mxu0 %vm580_vm1, %v1776_v18 }
 0x69c   :  { %4068 = vmatpush3.xpose.msk.msra.mxu0 %vm580_vm1, %v1776_v18  ;;  %v3569_v18 = vld [vmem:[%s5277_s30 + $0x78] sm:$0xff] }
 0x69d   :  { %4069 = vmatprep.subr.msk.mxu0 %vm580_vm1, %v1771_v20 }
 0x6a0   :  { %4070 = vmatpush3.xpose.msk.msra.mxu0 %vm580_vm1, %v1771_v20 }
 0x6a1   :  { %4071 = vmatprep.subr.msk.mxu0 %vm580_vm1, %v1766_v22 }
 0x6a4   :  { %4072 = vmatpush3.xpose.msk.msra.mxu0 %vm580_vm1, %v1766_v22 }
 0x6a5   :  { %4101 = vmatprep.subr.mxu0 %v3569_v18 }
 0x70d   :  { %v1256_v26 = vpop.xlane.xlu1 %1255 }
 0x70e   :  { %v1264_v27 = vsub.f32 %v1248_v54, %v1256_v26 }
 0x70f   :  { %v1253_v29 = vpop.xlane.xlu0 %1252 }
 0x710   :  { %v1269_v30 = vmul.f32 1.442695, %v1264_v27  ;;  %v1263_v31 = vsub.f32 %v1247_v58, %v1253_v29 }
 0x711   :  { %v1262_v32 = vpop.xlane.xlu1 %1261 }
 0x712   :  { %4269 = vpow2.f32 %v1269_v30  ;;  %v1267_v33 = vmul.f32 1.442695, %v1263_v31  ;;  %v1266_v34 = vsub.f32 %v1250_v62, %v1262_v32  ;;  %v3524_v30 = vld [vmem:[%s5282_s28 + $0x2] ss:$0 sm:$0xff] }
 0x713   :  { %v1259_v35 = vpop.xlane.xlu0 %1258 }
 0x714   :  { %4271 = vpow2.f32 %v1267_v33  ;;  %v1273_v36 = vmul.f32 1.442695, %v1266_v34  ;;  %v1265_v37 = vsub.f32 %v1249_v3, %v1259_v35  ;;  %v3568_v35 = vld [vmem:[%s5277_s30 + $0x70] sm:$0xff] }
 0x716   :  { %4273 = vpow2.f32 %v1273_v36  ;;  %v1271_v38 = vmul.f32 1.442695, %v1265_v37 }
 0x718   :  { %4275 = vpow2.f32 %v1271_v38  ;;  %v3567_v38 = vld [vmem:[%s5277_s30 + $0x68] sm:$0xff] }
 0x71f   :  { %v4270_v39 = vpop.eup %4269 }
 0x720   :  { %v1278_v40 = vsel %vm95_vm0, %v4270_v39, 0.0 }
 0x721   :  { %v4272_v41 = vpop.eup %4271  ;;  %1279 = vadd.xlane.f32.xlu1 %v1278_v40 }
 0x722   :  { %v1275_v42 = vsel %vm95_vm0, %v4272_v41, 0.0 }
 0x723   :  { %v4274_v43 = vpop.eup %4273  ;;  %1276 = vadd.xlane.f32.xlu0 %v1275_v42 }
 0x724   :  { %v1284_v44 = vsel %vm95_vm0, %v4274_v43, 0.0 }
 0x725   :  { %v4276_v45 = vpop.eup %4275  ;;  %1285 = vadd.xlane.f32.xlu1 %v1284_v44  ;;  %v3544_v44 = vld [vmem:[%s5241_s12 + $0x2] ss:$0 sm:$0xff] }
 0x726   :  { %v1281_v46 = vsel %vm95_vm0, %v4276_v45, 0.0 }
 0x727   :  { %1282 = vadd.xlane.f32.xlu0 %v1281_v46 }
 0x7aa   :  { %v1280_v48 = vpop.xlane.xlu1 %1279 }
 0x7ab   :  { %4277 = vrcp.f32 %v1280_v48  ;;  %v3588_v48 = vld [vmem:[%s5279_s6 + $0x70] sm:$0xff] }
 0x7ac   :  { %v1277_v49 = vpop.xlane.xlu0 %1276 }
 0x7ad   :  { %4279 = vrcp.f32 %v1277_v49 }
 0x7ae   :  { %v1286_v50 = vpop.xlane.xlu1 %1285 }
 0x7af   :  { %4281 = vrcp.f32 %v1286_v50  ;;  %v3587_v50 = vld [vmem:[%s5279_s6 + $0x68] sm:$0xff] }
 0x7b0   :  { %v1283_v51 = vpop.xlane.xlu0 %1282 }
 0x7b1   :  { %4283 = vrcp.f32 %v1283_v51 }
 0x7b8   :  { %v4278_v52 = vpop.eup %4277 }
 0x7b9   :  { %v1292_v55 = vmul.f32 %v4278_v52, %v4270_v39  ;;  %v3586_v52 = vld [vmem:[%s5279_s6 + $0x60] sm:$0xff] }
 0x7ba   :  { %v4280_v53 = vpop.eup %4279 }
 0x7bb   :  { %v1291_v54 = vmul.f32 %v4280_v53, %v4272_v41  ;;  %v3566_v41 = vld [vmem:[%s5277_s30 + $0x60] sm:$0xff] }
 0x7bc   :  { %v4282_v56 = vpop.eup %4281 }
 0x7bd   :  { %4001 = vmatprep.mubr.msk.f32.mxu1 %vm95_vm0, %v1291_v54  ;;  %v1294_v59 = vmul.f32 %v4282_v56, %v4274_v43  ;;  %v3589_v43 = vld [vmem:[%s5279_s6 + $0x78] sm:$0xff] }
 0x7be   :  { %v4284_v57 = vpop.eup %4283  ;;  %4002 = vmatmul.mubr.msk.f32.vlgmr.msra.gmra.mxu1 %vm95_vm0, %v1292_v55 }
 0x7bf   :  { %v1293_v58 = vmul.f32 %v4284_v57, %v4276_v45  ;;  %4008 = vmatpush3.msra.mxu1 %v3510_v47 }
 0x7c0   :  { %4023 = vmatprep.subr.mxu1 %v3522_v60 }
 0x7c1   :  { %4004 = vmatprep.mubr.msk.f32.mxu1 %vm95_vm0, %v1293_v58 }
 0x7c2   :  { %4005 = vmatmul.mubr.msk.f32.gmra.mxu1 %vm95_vm0, %v1294_v59 }
 0x87e   :  { %v4003_v61 = vpop.f32.mrf.mxu1 }
 0x880   :  { %v1373_v62 = vpop.f32.mrf.mxu1 }
 0x881   :  { %4009 = vmatprep.mubr.msk.f32.mxu1 %vm580_vm1, %v1373_v62 }
 0x882   :  { %v4006_v3 = vpop.f32.mrf.mxu1  ;;  %4010 = vmatmul.mubr.msk.f32.vlgmr.msra.gmra.mxu1 %vm580_vm1, %v4003_v61 }
 0x883   :  { %4024 = vmatpush3.msra.mxu1 %v3522_v60 }
 0x884   :  { %4025 = vmatprep.subr.mxu1 %v3521_v1  ;;  %v1383_v9 = vpop.f32.mrf.mxu1 }
 0x885   :  { %4026 = vmatpush3.msra.mxu1 %v3521_v1  ;;  %4012 = vmatprep.mubr.msk.f32.mxu1 %vm580_vm1, %v1383_v9 }
 0x886   :  { %4027 = vmatprep.subr.mxu1 %v3520_v5  ;;  %4013 = vmatmul.mubr.msk.f32.gmra.mxu1 %vm580_vm1, %v4006_v3  ;;  %v4947_v3 = vld [vmem:[%s5282_s28 + $0x3] ss:$0 sm:$0xff] }
 0x887   :  { %4028 = vmatpush3.msra.mxu1 %v3520_v5  ;;  %4031 = vmatprep.mubr.msk.f32.mxu1 %vm95_vm0, %v4592_v13 }
 0x888   :  { %4029 = vmatprep.subr.mxu1 %v3519_v10 }
 0x889   :  { %4030 = vmatpush3.msra.mxu1 %v3519_v10 }
 0x88a   :  { %4032 = vmatmul.mubr.msk.f32.vlgmr.msra.gmra.mxu1 %vm95_vm0, %v4600_v21  ;;  %4051 = vmatprep.subr.mxu1 %v3542_v12 }
 0x88b   :  { %4034 = vmatprep.mubr.msk.f32.mxu1 %vm95_vm0, %v4603_v23  ;;  %4052 = vmatpush3.msra.mxu1 %v3542_v12 }
 0x88c   :  { %4053 = vmatprep.subr.mxu1 %v3541_v14 }
 0x88d   :  { %4054 = vmatpush3.msra.mxu1 %v3541_v14 }
 0x88e   :  { %4035 = vmatmul.mubr.msk.f32.gmra.mxu1 %vm95_vm0, %v4616_v28  ;;  %4055 = vmatprep.subr.mxu1 %v3540_v15 }
 0x88f   :  { %4056 = vmatpush3.msra.mxu1 %v3540_v15  ;;  %4059 = vmatprep.mubr.msk.f32.mxu1 %vm95_vm0, %v4592_v13 }
 0x890   :  { %4057 = vmatprep.subr.mxu1 %v3539_v17 }
 0x891   :  { %4058 = vmatpush3.msra.mxu1 %v3539_v17 }
 0x892   :  { %4060 = vmatmul.mubr.msk.f32.vlgmr.msra.gmra.mxu1 %vm95_vm0, %v4600_v21 }
 0x893   :  { %4062 = vmatprep.mubr.msk.f32.mxu1 %vm95_vm0, %v4603_v23 }
 0x896   :  { %4063 = vmatmul.mubr.msk.f32.gmra.mxu1 %vm95_vm0, %v4616_v28 }
 0x942   :  { %v4886_v20 = vpop.f32.mrf.mxu1 }
 0x944   :  { %v4888_v22 = vpop.f32.mrf.mxu1 }
 0x946   :  { %v4890_v26 = vpop.f32.mrf.mxu1 }
 0x948   :  { %v4892_v27 = vpop.f32.mrf.mxu1 }
 0x94a   :  { %v4033_v29 = vpop.f32.mrf.mxu1 }
 0x94b   :  { %v1673_v33 = vadd.f32 %v4033_v29, %v3524_v30 }
 0x94c   :  { %v1667_v31 = vpop.f32.mrf.mxu1 }
 0x94d   :  { %v1668_v32 = vadd.f32 %v3524_v30, %v1667_v31 }
 0x94e   :  { %v4036_v34 = vpop.f32.mrf.mxu1 }
 0x94f   :  { %4073 = vmatprep.mubr.msk.f32.mxu0 %vm580_vm1, %v1668_v32  ;;  %v1683_v39 = vadd.f32 %v4036_v34, %v3524_v30 }
 0x950   :  { %v1677_v36 = vpop.f32.mrf.mxu1  ;;  %4074 = vmatmul.mubr.msk.f32.vlgmr.msra.gmra.mxu0 %vm580_vm1, %v1673_v33 }
 0x951   :  { %v1678_v37 = vadd.f32 %v3524_v30, %v1677_v36  ;;  %4102 = vmatpush3.msra.mxu0 %v3569_v18 }
 0x952   :  { %v4061_v40 = vpop.f32.mrf.mxu1  ;;  %4103 = vmatprep.subr.mxu0 %v3568_v35 }
 0x953   :  { %4076 = vmatprep.mubr.msk.f32.mxu0 %vm580_vm1, %v1678_v37  ;;  %4104 = vmatpush3.msra.mxu0 %v3568_v35  ;;  %v1869_v51 = vadd.f32 %v4061_v40, %v3544_v44 }
 0x954   :  { %v1863_v42 = vpop.f32.mrf.mxu1  ;;  %4077 = vmatmul.mubr.msk.f32.gmra.mxu0 %vm580_vm1, %v1683_v39  ;;  %4105 = vmatprep.subr.mxu0 %v3567_v38 }
 0x955   :  { %4106 = vmatpush3.msra.mxu0 %v3567_v38  ;;  %4109 = vmatprep.mubr.msk.f32.mxu0 %vm95_vm0, %v4592_v13  ;;  %v1864_v53 = vadd.f32 %v3544_v44, %v1863_v42 }
 0x956   :  { %v4064_v45 = vpop.f32.mrf.mxu1  ;;  %4107 = vmatprep.subr.mxu0 %v3566_v41 }
 0x957   :  { %v1879_v46 = vadd.f32 %v4064_v45, %v3544_v44  ;;  %4108 = vmatpush3.msra.mxu0 %v3566_v41 }
 0x958   :  { %v1873_v47 = vpop.f32.mrf.mxu1  ;;  %4110 = vmatmul.mubr.msk.f32.vlgmr.msra.gmra.mxu0 %vm95_vm0, %v4600_v21  ;;  %4129 = vmatprep.subr.mxu0 %v3589_v43 }
 0x959   :  { %v1874_v49 = vadd.f32 %v3544_v44, %v1873_v47  ;;  %4079 = vmatprep.subr.mxu1 %v1879_v46  ;;  %4112 = vmatprep.mubr.msk.f32.mxu0 %vm95_vm0, %v4603_v23 }
 0x95a   :  { %4130 = vmatpush3.msra.mxu0 %v3589_v43  ;;  %4080 = vmatpush3.msra.mxu1 %v1879_v46 }
 0x95b   :  { %4131 = vmatprep.subr.mxu0 %v3588_v48  ;;  %4081 = vmatprep.subr.mxu1 %v1874_v49 }
 0x95c   :  { %4132 = vmatpush3.msra.mxu0 %v3588_v48  ;;  %4082 = vmatpush3.msra.mxu1 %v1874_v49 }
 0x95d   :  { %4113 = vmatmul.mubr.msk.f32.gmra.mxu0 %vm95_vm0, %v4616_v28  ;;  %4133 = vmatprep.subr.mxu0 %v3587_v50 }
 0x95e   :  { %4083 = vmatprep.subr.mxu1 %v1869_v51  ;;  %4134 = vmatpush3.msra.mxu0 %v3587_v50 }
 0x95f   :  { %4137 = vmatprep.mubr.msk.f32.mxu0 %vm95_vm0, %v4592_v13  ;;  %4084 = vmatpush3.msra.mxu1 %v1869_v51 }
 0x960   :  { %4135 = vmatprep.subr.mxu0 %v3586_v52  ;;  %4085 = vmatprep.subr.mxu1 %v1864_v53 }
 0x961   :  { %4136 = vmatpush3.msra.mxu0 %v3586_v52  ;;  %4086 = vmatpush3.msra.mxu1 %v1864_v53 }
 0x962   :  { %4138 = vmatmul.mubr.msk.f32.vlgmr.msra.gmra.mxu0 %vm95_vm0, %v4600_v21 }
 0x963   :  { %4140 = vmatprep.mubr.msk.f32.mxu0 %vm95_vm0, %v4603_v23 }
 0x966   :  { %4141 = vmatmul.mubr.msk.f32.gmra.mxu0 %vm95_vm0, %v4616_v28 }
 0xa10   :  { %v4075_v54 = vpop.f32.mrf.mxu0 }
 0xa11   :  { %v1992_v55 = vmul.f32 0.35355338, %v4075_v54 }
 0xa12   :  { %v1972_v56 = vpop.f32.mrf.mxu0 }
 0xa13   :  { %v1991_v57 = vmul.f32 0.35355338, %v1972_v56  ;;  %v1996_v58 = vadd.f32 %v1992_v55, %v4680_v63 }
 0xa14   :  { %v4078_v59 = vpop.f32.mrf.mxu0 }
 0xa15   :  { %v1994_v60 = vmul.f32 0.35355338, %v4078_v59  ;;  %v2002_v61 = vsel %vm95_vm0, %v1996_v58, -inf  ;;  %v1995_v62 = vadd.f32 %v1991_v57, %v4685_v2  ;;  %v3561_v59 = vld [vmem:[%s5243_s13 + $0x10] sm:$0xff] }
 0xa16   :  { %2003 = vmax.xlane.f32.xlu1 %v2002_v61  ;;  %v1982_v1 = vpop.f32.mrf.mxu0  ;;  %4093 = vmatprep.subr.mxu1 %v3561_v59 }
 0xa17   :  { %v1993_v5 = vmul.f32 0.35355338, %v1982_v1  ;;  %v1999_v9 = vsel %vm95_vm0, %v1995_v62, -inf  ;;  %v1998_v10 = vadd.f32 %v1994_v60, %v4691_v6 }
 0xa18   :  { %2000 = vmax.xlane.f32.xlu0 %v1999_v9  ;;  %v4111_v63 = vpop.f32.mrf.mxu0 }
 0xa19   :  { %v4952_v12 = vadd.f32 %v4111_v63, %v4947_v3  ;;  %v2008_v14 = vsel %vm95_vm0, %v1998_v10, -inf  ;;  %v1997_v2 = vadd.f32 %v1993_v5, %v4698_v11  ;;  %v3591_v11 = vld [vmem:[%s5241_s12 + $0x3] ss:$0 sm:$0xff] }
 0xa1a   :  { %2009 = vmax.xlane.f32.xlu1 %v2008_v14  ;;  %v4956_v15 = vpop.f32.mrf.mxu0 }
 0xa1b   :  { %v2005_v17 = vsel %vm95_vm0, %v1997_v2, -inf }
 0xa1c   :  { %2006 = vmax.xlane.f32.xlu0 %v2005_v17 }
 0xa1d   :  { %v4114_v18 = vpop.f32.mrf.mxu0 }
 0xa1e   :  { %v4960_v29 = vadd.f32 %v4114_v18, %v4947_v3 }
 0xa1f   :  { %v2332_v6 = vpop.f32.mrf.mxu0 }
 0xa20   :  { %v4963_v30 = vadd.f32 %v4947_v3, %v2332_v6  ;;  %v3579_v6 = vld [vmem:[%s5278_s4 + $0x78] sm:$0xff] }
 0xa22   :  { %v4139_v31 = vpop.f32.mrf.mxu0 }
 0xa23   :  { %v2524_v37 = vadd.f32 %v4139_v31, %v3591_v11 }
 0xa24   :  { %v2518_v32 = vpop.f32.mrf.mxu0 }
 0xa25   :  { %v2519_v38 = vadd.f32 %v3591_v11, %v2518_v32 }
 0xa26   :  { %v4142_v33 = vpop.f32.mrf.mxu0 }
 0xa27   :  { %v2534_v34 = vadd.f32 %v4142_v33, %v3591_v11 }
 0xa28   :  { %v2528_v35 = vpop.f32.mrf.mxu0 }
 0xa29   :  { %v2529_v36 = vadd.f32 %v3591_v11, %v2528_v35  ;;  %4157 = vmatprep.subr.mxu0 %v2534_v34  ;;  %v3578_v11 = vld [vmem:[%s5278_s4 + $0x70] sm:$0xff] }
 0xa2a   :  { %4158 = vmatpush3.msra.mxu0 %v2534_v34  ;;  %v3577_v34 = vld [vmem:[%s5278_s4 + $0x68] sm:$0xff] }
 0xa2b   :  { %4159 = vmatprep.subr.mxu0 %v2529_v36 }
 0xa2c   :  { %4160 = vmatpush3.msra.mxu0 %v2529_v36  ;;  %v3576_v36 = vld [vmem:[%s5278_s4 + $0x60] sm:$0xff] }
 0xa2d   :  { %4161 = vmatprep.subr.mxu0 %v2524_v37 }
 0xa2e   :  { %4162 = vmatpush3.msra.mxu0 %v2524_v37  ;;  %v2323_v37 = vadd.f32 %v4947_v3, %v4956_v15 }
 0xa2f   :  { %4163 = vmatprep.subr.mxu0 %v2519_v38 }
 0xa30   :  { %4164 = vmatpush3.msra.mxu0 %v2519_v38  ;;  %v1575_v38 = vadd.f32 %v4806_v0, %v4886_v20 }
 0xa9f   :  { %v2004_v39 = vpop.xlane.xlu1 %2003 }
 0xaa0   :  { %v2012_v40 = vsub.f32 %v1996_v58, %v2004_v39  ;;  %v1570_v39 = vadd.f32 %v4810_v4, %v4888_v22  ;;  %v3581_v4 = vld [vmem:[%s5240_s10 + $0x3] ss:$0 sm:$0xff] }
 0xaa1   :  { %v2001_v41 = vpop.xlane.xlu0 %2000 }
 0xaa2   :  { %v2017_v42 = vmul.f32 1.442695, %v2012_v40  ;;  %v2011_v43 = vsub.f32 %v1995_v62, %v2001_v41 }
 0xaa3   :  { %v2010_v44 = vpop.xlane.xlu1 %2009 }
 0xaa4   :  { %4285 = vpow2.f32 %v2017_v42  ;;  %v2015_v45 = vmul.f32 1.442695, %v2011_v43  ;;  %v2014_v46 = vsub.f32 %v1998_v10, %v2010_v44 }
 0xaa5   :  { %v2007_v47 = vpop.xlane.xlu0 %2006 }
 0xaa6   :  { %4287 = vpow2.f32 %v2015_v45  ;;  %v2021_v48 = vmul.f32 1.442695, %v2014_v46  ;;  %v2013_v49 = vsub.f32 %v1997_v2, %v2007_v47 }
 0xaa8   :  { %4289 = vpow2.f32 %v2021_v48  ;;  %v2019_v50 = vmul.f32 1.442695, %v2013_v49  ;;  %v4341_v49 = vld [vmem:[%s5242_s1 + $0x8] sm:$0xff] }
 0xaaa   :  { %4291 = vpow2.f32 %v2019_v50 }
 0xab1   :  { %v4286_v51 = vpop.eup %4285 }
 0xab2   :  { %v2026_v52 = vsel %vm95_vm0, %v4286_v51, 0.0 }
 0xab3   :  { %v4288_v53 = vpop.eup %4287  ;;  %2027 = vadd.xlane.f32.xlu1 %v2026_v52 }
 0xab4   :  { %v2023_v54 = vsel %vm95_vm0, %v4288_v53, 0.0 }
 0xab5   :  { %v4290_v55 = vpop.eup %4289  ;;  %2024 = vadd.xlane.f32.xlu0 %v2023_v54 }
 0xab6   :  { %v2032_v56 = vsel %vm95_vm0, %v4290_v55, 0.0 }
 0xab7   :  { %v4292_v57 = vpop.eup %4291  ;;  %2033 = vadd.xlane.f32.xlu1 %v2032_v56  ;;  %v4343_v56 = vld [vmem:[%s5242_s1 + $0x18] sm:$0xff] }
 0xab8   :  { %v2029_v58 = vsel %vm95_vm0, %v4292_v57, 0.0 }
 0xab9   :  { %2030 = vadd.xlane.f32.xlu0 %v2029_v58 }
 0xb3c   :  { %v2028_v60 = vpop.xlane.xlu1 %2027 }
 0xb3d   :  { %4293 = vrcp.f32 %v2028_v60 }
 0xb3e   :  { %v2025_v61 = vpop.xlane.xlu0 %2024 }
 0xb3f   :  { %4295 = vrcp.f32 %v2025_v61 }
 0xb40   :  { %v2034_v62 = vpop.xlane.xlu1 %2033 }
 0xb41   :  { %4297 = vrcp.f32 %v2034_v62 }
 0xb42   :  { %v2031_v1 = vpop.xlane.xlu0 %2030 }
 0xb43   :  { %4299 = vrcp.f32 %v2031_v1 }
 0xb4a   :  { %v4294_v5 = vpop.eup %4293 }
 0xb4b   :  { %v2040_v63 = vmul.f32 %v4294_v5, %v4286_v51 }
 0xb4c   :  { %v4296_v9 = vpop.eup %4295 }
 0xb4d   :  { %v2039_v10 = vmul.f32 %v4296_v9, %v4288_v53 }
 0xb4e   :  { %v4298_v14 = vpop.eup %4297 }
 0xb4f   :  { %4087 = vmatprep.mubr.msk.f32.mxu1 %vm95_vm0, %v2039_v10  ;;  %v2042_v18 = vmul.f32 %v4298_v14, %v4290_v55 }
 0xb50   :  { %v4300_v2 = vpop.eup %4299  ;;  %4088 = vmatmul.mubr.msk.f32.vlgmr.msra.gmra.mxu1 %vm95_vm0, %v2040_v63 }
 0xb51   :  { %v2041_v17 = vmul.f32 %v4300_v2, %v4292_v57  ;;  %4094 = vmatpush3.msra.mxu1 %v3561_v59  ;;  %v4344_v59 = vld [vmem:[%s5242_s1 + $0x10] sm:$0xff] }
 0xb52   :  { %4115 = vmatprep.subr.mxu1 %v3579_v6 }
 0xb53   :  { %4090 = vmatprep.mubr.msk.f32.mxu1 %vm95_vm0, %v2041_v17 }
 0xb54   :  { %4091 = vmatmul.mubr.msk.f32.gmra.mxu1 %vm95_vm0, %v2042_v18 }
 0xc10   :  { %v4089_v31 = vpop.f32.mrf.mxu1 }
 0xc12   :  { %v2121_v32 = vpop.f32.mrf.mxu1 }
 0xc13   :  { %4095 = vmatprep.mubr.msk.f32.mxu1 %vm580_vm1, %v2121_v32 }
 0xc14   :  { %v4092_v33 = vpop.f32.mrf.mxu1  ;;  %4096 = vmatmul.mubr.msk.f32.vlgmr.msra.gmra.mxu1 %vm580_vm1, %v4089_v31 }
 0xc15   :  { %4116 = vmatpush3.msra.mxu1 %v3579_v6 }
 0xc16   :  { %4117 = vmatprep.subr.mxu1 %v3578_v11  ;;  %v2131_v35 = vpop.f32.mrf.mxu1 }
 0xc17   :  { %4118 = vmatpush3.msra.mxu1 %v3578_v11  ;;  %4098 = vmatprep.mubr.msk.f32.mxu1 %vm580_vm1, %v2131_v35 }
 0xc18   :  { %4119 = vmatprep.subr.mxu1 %v3577_v34  ;;  %4099 = vmatmul.mubr.msk.f32.gmra.mxu1 %vm580_vm1, %v4092_v33 }
 0xc19   :  { %4120 = vmatpush3.msra.mxu1 %v3577_v34  ;;  %4123 = vmatprep.mubr.msk.f32.mxu1 %vm95_vm0, %v4592_v13 }
 0xc1a   :  { %4121 = vmatprep.subr.mxu1 %v3576_v36 }
 0xc1b   :  { %4122 = vmatpush3.msra.mxu1 %v3576_v36 }
 0xc1c   :  { %4124 = vmatmul.mubr.msk.f32.vlgmr.msra.gmra.mxu1 %vm95_vm0, %v4600_v21 }
 0xc1d   :  { %4126 = vmatprep.mubr.msk.f32.mxu1 %vm95_vm0, %v4603_v23  ;;  %v1585_v23 = vadd.f32 %v4813_v7, %v4890_v26 }
 0xc20   :  { %4127 = vmatmul.mubr.msk.f32.gmra.mxu1 %vm95_vm0, %v4616_v28  ;;  %v1580_v28 = vadd.f32 %v4815_v8, %v4892_v27 }
 0xc21   :  { %4151 = vmatprep.mubr.msk.f32.mxu1 %vm580_vm1, %v2323_v37 }
 0xcd4   :  { %v4097_v13 = vpop.f32.mrf.mxu1 }
 0xcd5   :  { %v5010_v40 = vadd.f32 %v4097_v13, %v1575_v38  ;;  %v3608_v13 = vld [vmem:[%s5243_s13 + $0x18] sm:$0xff] }
 0xcd6   :  { %v2220_v21 = vpop.f32.mrf.mxu1  ;;  %4171 = vmatprep.subr.mxu0 %v3608_v13 }
 0xcd7   :  { %v5014_v41 = vadd.f32 %v2220_v21, %v1570_v39 }
 0xcd8   :  { %v4100_v3 = vpop.f32.mrf.mxu1 }
 0xcd9   :  { %v5018_v15 = vadd.f32 %v4100_v3, %v1585_v23 }
 0xcda   :  { %v2230_v42 = vpop.f32.mrf.mxu1 }
 0xcdb   :  { %v5020_v0 = vadd.f32 %v2230_v42, %v1580_v28 }
 0xcdc   :  { %v4125_v20 = vpop.f32.mrf.mxu1 }
 0xcdd   :  { %v2426_v8 = vadd.f32 %v4125_v20, %v3581_v4 }
 0xcde   :  { %v2420_v43 = vpop.f32.mrf.mxu1 }
 0xcdf   :  { %v2421_v27 = vadd.f32 %v3581_v4, %v2420_v43 }
 0xce0   :  { %v4128_v22 = vpop.f32.mrf.mxu1 }
 0xce1   :  { %v2436_v44 = vadd.f32 %v4128_v22, %v3581_v4 }
 0xce2   :  { %v2430_v7 = vpop.f32.mrf.mxu1 }
 0xce3   :  { %v2431_v26 = vadd.f32 %v3581_v4, %v2430_v7  ;;  %4143 = vmatprep.subr.msk.mxu1 %vm580_vm1, %v2436_v44 }
 0xce4   :  { %4144 = vmatpush3.xpose.msk.msra.mxu1 %vm580_vm1, %v2436_v44 }
 0xce5   :  { %4145 = vmatprep.subr.msk.mxu1 %vm580_vm1, %v2431_v26 }
 0xce8   :  { %4146 = vmatpush3.xpose.msk.msra.mxu1 %vm580_vm1, %v2431_v26 }
 0xce9   :  { %4147 = vmatprep.subr.msk.mxu1 %vm580_vm1, %v2426_v8 }
 0xcec   :  { %4148 = vmatpush3.xpose.msk.msra.mxu1 %vm580_vm1, %v2426_v8 }
 0xced   :  { %4149 = vmatprep.subr.msk.mxu1 %vm580_vm1, %v2421_v27 }
 0xcf0   :  { %4150 = vmatpush3.xpose.msk.msra.mxu1 %vm580_vm1, %v2421_v27 }
 0xcf3   :  { %4152 = vmatmul.mubr.msk.f32.vlgmr.msra.gmra.mxu1 %vm580_vm1, %v4952_v12  ;;  %v4342_v12 = vld [vmem:[%s5242_s1] sm:$0xff] }
 0xcf4   :  { %4154 = vmatprep.mubr.msk.f32.mxu1 %vm580_vm1, %v4963_v30 }
 0xcf7   :  { %4155 = vmatmul.mubr.msk.f32.gmra.mxu1 %vm580_vm1, %v4960_v29 }
 0xdb3   :  { %v4153_v45 = vpop.f32.mrf.mxu1 }
 0xdb4   :  { %v2647_v46 = vmul.f32 0.35355338, %v4153_v45 }
 0xdb5   :  { %v2627_v47 = vpop.f32.mrf.mxu1 }
 0xdb6   :  { %v2646_v48 = vmul.f32 0.35355338, %v2627_v47  ;;  %v2651_v50 = vadd.f32 %v4341_v49, %v2647_v46 }
 0xdb7   :  { %v4156_v51 = vpop.f32.mrf.mxu1 }
 0xdb8   :  { %v2649_v52 = vmul.f32 0.35355338, %v4156_v51  ;;  %v2657_v53 = vsel %vm95_vm0, %v2651_v50, -inf  ;;  %v2650_v30 = vadd.f32 %v4342_v12, %v2646_v48  ;;  %v3613_v48 = vld [vmem:[%s5244_s14] ss:$0 sm:$0xff] }
 0xdb9   :  { %2658 = vmax.xlane.f32.xlu1 %v2657_v53  ;;  %v2637_v29 = vpop.f32.mrf.mxu1 }
 0xdba   :  { %v2648_v54 = vmul.f32 0.35355338, %v2637_v29  ;;  %v2654_v55 = vsel %vm95_vm0, %v2650_v30, -inf  ;;  %v2653_v57 = vadd.f32 %v4343_v56, %v2649_v52 }
 0xdbb   :  { %2655 = vmax.xlane.f32.xlu0 %v2654_v55 }
 0xdbc   :  { %v2663_v58 = vsel %vm95_vm0, %v2653_v57, -inf  ;;  %v2652_v60 = vadd.f32 %v4344_v59, %v2648_v54 }
 0xdbd   :  { %2664 = vmax.xlane.f32.xlu1 %v2663_v58 }
 0xdbe   :  { %v2660_v61 = vsel %vm95_vm0, %v2652_v60, -inf }
 0xdbf   :  { %2661 = vmax.xlane.f32.xlu0 %v2660_v61 }
 0xe42   :  { %v2659_v62 = vpop.xlane.xlu1 %2658 }
 0xe43   :  { %v2667_v1 = vsub.f32 %v2651_v50, %v2659_v62 }
 0xe44   :  { %v2656_v5 = vpop.xlane.xlu0 %2655 }
 0xe45   :  { %v2672_v9 = vmul.f32 1.442695, %v2667_v1  ;;  %v2666_v10 = vsub.f32 %v2650_v30, %v2656_v5 }
 0xe46   :  { %v2665_v63 = vpop.xlane.xlu1 %2664 }
 0xe47   :  { %4301 = vpow2.f32 %v2672_v9  ;;  %v2670_v14 = vmul.f32 1.442695, %v2666_v10  ;;  %v2669_v2 = vsub.f32 %v2653_v57, %v2665_v63 }
 0xe48   :  { %v2662_v17 = vpop.xlane.xlu0 %2661 }
 0xe49   :  { %4303 = vpow2.f32 %v2670_v14  ;;  %v2676_v18 = vmul.f32 1.442695, %v2669_v2  ;;  %v2668_v6 = vsub.f32 %v2652_v60, %v2662_v17 }
 0xe4b   :  { %4305 = vpow2.f32 %v2676_v18  ;;  %v2674_v31 = vmul.f32 1.442695, %v2668_v6 }
 0xe4d   :  { %4307 = vpow2.f32 %v2674_v31 }
 0xe54   :  { %v4302_v32 = vpop.eup %4301 }
 0xe55   :  { %v2681_v11 = vsel %vm95_vm0, %v4302_v32, 0.0 }
 0xe56   :  { %v4304_v33 = vpop.eup %4303  ;;  %2682 = vadd.xlane.f32.xlu1 %v2681_v11 }
 0xe57   :  { %v2678_v34 = vsel %vm95_vm0, %v4304_v33, 0.0 }
 0xe58   :  { %v4306_v35 = vpop.eup %4305  ;;  %2679 = vadd.xlane.f32.xlu0 %v2678_v34  ;;  %v2989_v34 = vld [vmem:[%s5245_s17 + $0x10] sm:$0xff] }
 0xe59   :  { %v2687_v36 = vsel %vm95_vm0, %v4306_v35, 0.0 }
 0xe5a   :  { %v4308_v37 = vpop.eup %4307  ;;  %2688 = vadd.xlane.f32.xlu1 %v2687_v36  ;;  %v2987_v36 = vld [vmem:[%s5245_s17] sm:$0xff] }
 0xe5b   :  { %v2684_v38 = vsel %vm95_vm0, %v4308_v37, 0.0 }
 0xe5c   :  { %2685 = vadd.xlane.f32.xlu0 %v2684_v38 }
 0xedf   :  { %v2683_v39 = vpop.xlane.xlu1 %2682 }
 0xee0   :  { %4309 = vrcp.f32 %v2683_v39 }
 0xee1   :  { %v2680_v21 = vpop.xlane.xlu0 %2679 }
 0xee2   :  { %4311 = vrcp.f32 %v2680_v21 }
 0xee3   :  { %v2689_v23 = vpop.xlane.xlu1 %2688 }
 0xee4   :  { %4313 = vrcp.f32 %v2689_v23 }
 0xee5   :  { %v2686_v3 = vpop.xlane.xlu0 %2685 }
 0xee6   :  { %4315 = vrcp.f32 %v2686_v3 }
 0xeed   :  { %v4310_v28 = vpop.eup %4309 }
 0xeee   :  { %v2695_v43 = vmul.f32 %v4310_v28, %v4302_v32 }
 0xeef   :  { %v4312_v42 = vpop.eup %4311 }
 0xef0   :  { %v2694_v20 = vmul.f32 %v4312_v42, %v4304_v33  ;;  %v2990_v33 = vld [vmem:[%s5245_s17 + $0x18] sm:$0xff] }
 0xef1   :  { %v4314_v4 = vpop.eup %4313  ;;  %4179 = vmatprep.subr.mxu1 %v2990_v33 }
 0xef2   :  { %4165 = vmatprep.mubr.msk.f32.mxu0 %vm95_vm0, %v2694_v20  ;;  %v2697_v7 = vmul.f32 %v4314_v4, %v4306_v35  ;;  %4180 = vmatpush3.msra.mxu1 %v2990_v33  ;;  %v2988_v35 = vld [vmem:[%s5245_s17 + $0x8] sm:$0xff] }
 0xef3   :  { %v4316_v22 = vpop.eup %4315  ;;  %4166 = vmatmul.mubr.msk.f32.vlgmr.msra.gmra.mxu0 %vm95_vm0, %v2695_v43  ;;  %4181 = vmatprep.subr.mxu1 %v2989_v34 }
 0xef4   :  { %v2696_v44 = vmul.f32 %v4316_v22, %v4308_v37  ;;  %4172 = vmatpush3.msra.mxu0 %v3608_v13  ;;  %4182 = vmatpush3.msra.mxu1 %v2989_v34 }
 0xef5   :  { %4183 = vmatprep.subr.mxu1 %v2988_v35 }
 0xef6   :  { %4168 = vmatprep.mubr.msk.f32.mxu0 %vm95_vm0, %v2696_v44  ;;  %4184 = vmatpush3.msra.mxu1 %v2988_v35 }
 0xef7   :  { %4169 = vmatmul.mubr.msk.f32.gmra.mxu0 %vm95_vm0, %v2697_v7  ;;  %4185 = vmatprep.subr.mxu1 %v2987_v36  ;;  %v3614_v7 = vld [vmem:[%s5246_s15] ss:$0 sm:$0xff] }
 0xef8   :  { %4186 = vmatpush3.msra.mxu1 %v2987_v36 }
 0xfb3   :  { %v4167_v26 = vpop.f32.mrf.mxu0 }
 0xfb5   :  { %v2776_v8 = vpop.f32.mrf.mxu0 }
 0xfb6   :  { %4173 = vmatprep.mubr.msk.f32.mxu0 %vm580_vm1, %v2776_v8 }
 0xfb7   :  { %v4170_v27 = vpop.f32.mrf.mxu0  ;;  %4174 = vmatmul.mubr.msk.f32.vlgmr.msra.gmra.mxu0 %vm580_vm1, %v4167_v26 }
 0xfb9   :  { %v2786_v45 = vpop.f32.mrf.mxu0 }
 0xfba   :  { %4176 = vmatprep.mubr.msk.f32.mxu0 %vm580_vm1, %v2786_v45 }
 0xfbb   :  { %4177 = vmatmul.mubr.msk.f32.gmra.mxu0 %vm580_vm1, %v4170_v27 }
0x1077   :  { %v4175_v46 = vpop.f32.mrf.mxu0 }
0x1078   :  { %v2895_v47 = vadd.f32 %v4175_v46, %v5010_v40  ;;  %v3615_v46 = vld [vmem:[%s5247_s16] ss:$0 sm:$0xff] }
0x1079   :  { %v2875_v49 = vpop.f32.mrf.mxu0 }
0x107a   :  { %v2899_v50 = vadd.f32 %v2895_v47, %v4517_v19  ;;  %v2894_v51 = vadd.f32 %v2875_v49, %v5014_v41 }
0x107b   :  { %v4178_v52 = vpop.f32.mrf.mxu0 }
0x107c   :  { %v5076_v53 = vadd.f32 %v3613_v48, %v2899_v50  ;;  %v2898_v12 = vadd.f32 %v2894_v51, %v4512_v16  ;;  %v2897_v30 = vadd.f32 %v4178_v52, %v5018_v15 }
0x107d   :  { %v2885_v29 = vpop.f32.mrf.mxu0 }
0x107e   :  { %v5080_v54 = vadd.f32 %v3613_v48, %v2898_v12  ;;  %v2901_v40 = vadd.f32 %v2897_v30, %v4526_v25  ;;  %v2896_v55 = vadd.f32 %v2885_v29, %v5020_v0  ;;  %v2918_v56 = vsel %vm95_vm0, %v5076_v53, 0.0 }
0x107f   :  { %2919 = vadd.xlane.f32.xlu1 %v2918_v56  ;;  %v3145_v56 = vld [vmem:[%s5248_s19 + $0x70] sm:$0xff] }
0x1080   :  { %v5086_v19 = vadd.f32 %v3613_v48, %v2901_v40  ;;  %v2900_v41 = vadd.f32 %v2896_v55, %v4524_v24  ;;  %v2915_v16 = vsel %vm95_vm0, %v5080_v54, 0.0  ;;  %v3146_v55 = vld [vmem:[%s5248_s19 + $0x78] sm:$0xff] }
0x1081   :  { %2916 = vadd.xlane.f32.xlu0 %v2915_v16  ;;  %4193 = vmatprep.subr.mxu0 %v3146_v55  ;;  %v3143_v16 = vld [vmem:[%s5248_s19 + $0x60] sm:$0xff] }
0x1082   :  { %v5091_v15 = vadd.f32 %v3613_v48, %v2900_v41  ;;  %v2924_v57 = vsel %vm95_vm0, %v5086_v19, 0.0  ;;  %4194 = vmatpush3.msra.mxu0 %v3146_v55  ;;  %v3144_v41 = vld [vmem:[%s5248_s19 + $0x68] sm:$0xff] }
0x1083   :  { %2925 = vadd.xlane.f32.xlu1 %v2924_v57  ;;  %4195 = vmatprep.subr.mxu0 %v3145_v56  ;;  %v3142_v57 = vld [vmem:[%s5248_s19 + $0x58] sm:$0xff] }
0x1084   :  { %v2921_v25 = vsel %vm95_vm0, %v5091_v15, 0.0  ;;  %4196 = vmatpush3.msra.mxu0 %v3145_v56  ;;  %v3621_v56 = vld [vmem:[%s5250_s20] ss:$0 sm:$0xff] }
0x1085   :  { %2922 = vadd.xlane.f32.xlu0 %v2921_v25  ;;  %4197 = vmatprep.subr.mxu0 %v3144_v41  ;;  %v3141_v25 = vld [vmem:[%s5248_s19 + $0x50] sm:$0xff] }
0x1086   :  { %4198 = vmatpush3.msra.mxu0 %v3144_v41 }
0x1087   :  { %4199 = vmatprep.subr.mxu0 %v3143_v16 }
0x1088   :  { %4200 = vmatpush3.msra.mxu0 %v3143_v16 }
0x1089   :  { %4201 = vmatprep.subr.mxu0 %v3142_v57 }
0x108a   :  { %4202 = vmatpush3.msra.mxu0 %v3142_v57 }
0x108b   :  { %4203 = vmatprep.subr.mxu0 %v3141_v25 }
0x108c   :  { %4204 = vmatpush3.msra.mxu0 %v3141_v25 }
0x1108   :  { %v2920_v0 = vpop.xlane.xlu1 %2919 }
0x1109   :  { %v2928_v58 = vmul.f32 0.03125, %v2920_v0  ;;  %v3140_v0 = vld [vmem:[%s5248_s19 + $0x48] sm:$0xff] }
0x110a   :  { %v2917_v59 = vpop.xlane.xlu0 %2916  ;;  %4205 = vmatprep.subr.mxu0 %v3140_v0 }
0x110b   :  { %v2932_v60 = vsub.f32 %v5076_v53, %v2928_v58  ;;  %v2927_v24 = vmul.f32 0.03125, %v2917_v59  ;;  %v3139_v58 = vld [vmem:[%s5248_s19 + $0x40] sm:$0xff]  ;;  %4206 = vmatpush3.msra.mxu0 %v3140_v0  ;;  %v3138_v59 = vld [vmem:[%s5248_s19 + $0x38] sm:$0xff] }
0x110c   :  { %v2926_v61 = vpop.xlane.xlu1 %2925  ;;  %4207 = vmatprep.subr.mxu0 %v3139_v58 }
0x110d   :  { %v2931_v62 = vsub.f32 %v5080_v54, %v2927_v24  ;;  %v2930_v1 = vmul.f32 0.03125, %v2926_v61  ;;  %v2936_v5 = vmul.f32 %v2932_v60, %v2932_v60  ;;  %4208 = vmatpush3.msra.mxu0 %v3139_v58  ;;  %v3136_v24 = vld [vmem:[%s5248_s19 + $0x28] sm:$0xff]  ;;  %v3135_v61 = vld [vmem:[%s5248_s19 + $0x20] sm:$0xff] }
0x110e   :  { %v2923_v9 = vpop.xlane.xlu0 %2922  ;;  %4209 = vmatprep.subr.mxu0 %v3138_v59 }
0x110f   :  { %v2934_v10 = vsub.f32 %v5086_v19, %v2930_v1  ;;  %v2929_v63 = vmul.f32 0.03125, %v2923_v9  ;;  %v2942_v14 = vsel %vm95_vm0, %v2936_v5, 0.0  ;;  %v2935_v2 = vmul.f32 %v2931_v62, %v2931_v62  ;;  %4210 = vmatpush3.msra.mxu0 %v3138_v59  ;;  %v3133_v1 = vld [vmem:[%s5248_s19 + $0x10] sm:$0xff]  ;;  %v3132_v5 = vld [vmem:[%s5248_s19 + $0x8] sm:$0xff]  ;;  %v3131_v9 = vld [vmem:[%s5248_s19] sm:$0xff] }
0x1110   :  { %2943 = vadd.xlane.f32.xlu1 %v2942_v14 }
0x1111   :  { %v2933_v17 = vsub.f32 %v5091_v15, %v2929_v63  ;;  %v2939_v18 = vsel %vm95_vm0, %v2935_v2, 0.0  ;;  %v2938_v6 = vmul.f32 %v2934_v10, %v2934_v10 }
0x1112   :  { %2940 = vadd.xlane.f32.xlu0 %v2939_v18 }
0x1113   :  { %v2948_v31 = vsel %vm95_vm0, %v2938_v6, 0.0  ;;  %v2937_v32 = vmul.f32 %v2933_v17, %v2933_v17 }
0x1114   :  { %2949 = vadd.xlane.f32.xlu1 %v2948_v31 }
0x1115   :  { %v2945_v11 = vsel %vm95_vm0, %v2937_v32, 0.0 }
0x1116   :  { %2946 = vadd.xlane.f32.xlu0 %v2945_v11 }
0x1199   :  { %v2944_v37 = vpop.xlane.xlu1 %2943 }
0x119a   :  { %v2952_v38 = vmul.f32 0.03125, %v2944_v37 }
0x119b   :  { %v2941_v13 = vpop.xlane.xlu0 %2940 }
0x119c   :  { %v2956_v39 = vadd.f32 1e-05, %v2952_v38  ;;  %v2951_v21 = vmul.f32 0.03125, %v2941_v13 }
0x119d   :  { %v2950_v23 = vpop.xlane.xlu1 %2949 }
0x119e   :  { %4317 = vrsqrt.f32 %v2956_v39  ;;  %v2955_v3 = vadd.f32 1e-05, %v2951_v21  ;;  %v2954_v28 = vmul.f32 0.03125, %v2950_v23 }
0x119f   :  { %v2947_v42 = vpop.xlane.xlu0 %2946 }
0x11a0   :  { %4319 = vrsqrt.f32 %v2955_v3  ;;  %v2958_v20 = vadd.f32 1e-05, %v2954_v28  ;;  %v2953_v43 = vmul.f32 0.03125, %v2947_v42 }
0x11a2   :  { %4321 = vrsqrt.f32 %v2958_v20  ;;  %v2957_v4 = vadd.f32 1e-05, %v2953_v43 }
0x11a4   :  { %4323 = vrsqrt.f32 %v2957_v4 }
0x11ab   :  { %v4318_v22 = vpop.eup %4317 }
0x11ac   :  { %v2964_v44 = vmul.f32 %v4318_v22, %v2932_v60  ;;  %v3137_v60 = vld [vmem:[%s5248_s19 + $0x30] sm:$0xff] }
0x11ad   :  { %v4320_v26 = vpop.eup %4319  ;;  %4211 = vmatprep.subr.mxu0 %v3137_v60 }
0x11ae   :  { %v2963_v8 = vmul.f32 %v4320_v26, %v2931_v62  ;;  %v2974_v45 = vmul.f32 %v3614_v7, %v2964_v44  ;;  %4212 = vmatpush3.msra.mxu0 %v3137_v60  ;;  %v3134_v62 = vld [vmem:[%s5248_s19 + $0x18] sm:$0xff] }
0x11af   :  { %v4322_v27 = vpop.eup %4321  ;;  %4213 = vmatprep.subr.mxu0 %v3136_v24 }
0x11b0   :  { %v2973_v47 = vmul.f32 %v3614_v7, %v2963_v8  ;;  %v2966_v48 = vmul.f32 %v4322_v27, %v2934_v10  ;;  %v2984_v52 = vadd.f32 %v3615_v46, %v2974_v45  ;;  %4214 = vmatpush3.msra.mxu0 %v3136_v24  ;;  %v3616_v10 = vld [vmem:[%s5249_s18] ss:$0 sm:$0xff] }
0x11b1   :  { %v4324_v49 = vpop.eup %4323  ;;  %4215 = vmatprep.subr.mxu0 %v3135_v61 }
0x11b2   :  { %v2983_v50 = vadd.f32 %v3615_v46, %v2973_v47  ;;  %v2965_v51 = vmul.f32 %v4324_v49, %v2933_v17  ;;  %v2976_v12 = vmul.f32 %v3614_v7, %v2966_v48  ;;  %4216 = vmatpush3.msra.mxu0 %v3135_v61 }
0x11b3   :  { %4217 = vmatprep.subr.mxu0 %v3134_v62 }
0x11b4   :  { %4187 = vmatprep.mubr.msk.f32.mxu1 %vm95_vm0, %v2983_v50  ;;  %v2975_v30 = vmul.f32 %v3614_v7, %v2965_v51  ;;  %v2986_v40 = vadd.f32 %v3615_v46, %v2976_v12  ;;  %4218 = vmatpush3.msra.mxu0 %v3134_v62 }
0x11b5   :  { %4188 = vmatmul.mubr.msk.f32.vlgmr.msra.gmra.mxu1 %vm95_vm0, %v2984_v52  ;;  %4219 = vmatprep.subr.mxu0 %v3133_v1 }
0x11b6   :  { %v2985_v29 = vadd.f32 %v3615_v46, %v2975_v30  ;;  %4220 = vmatpush3.msra.mxu0 %v3133_v1 }
0x11b7   :  { %4221 = vmatprep.subr.mxu0 %v3132_v5 }
0x11b8   :  { %4190 = vmatprep.mubr.msk.f32.mxu1 %vm95_vm0, %v2985_v29  ;;  %4222 = vmatpush3.msra.mxu0 %v3132_v5 }
0x11b9   :  { %4191 = vmatmul.mubr.msk.f32.gmra.mxu1 %vm95_vm0, %v2986_v40  ;;  %4223 = vmatprep.subr.mxu0 %v3131_v9 }
0x11ba   :  { %4224 = vmatpush3.msra.mxu0 %v3131_v9 }
0x1275   :  { %v4189_v63 = vpop.f32.mrf.mxu1 }
0x1276   :  { %v3082_v14 = vadd.f32 %v4189_v63, %v3616_v10 }
0x1277   :  { %v3076_v2 = vpop.f32.mrf.mxu1 }
0x1278   :  { %v3100_v17 = vmul.f32 0.044715, %v3082_v14  ;;  %v3077_v18 = vadd.f32 %v3616_v10, %v3076_v2  ;;  %v3096_v48 = vmul.f32 0.5, %v3082_v14 }
0x1279   :  { %v4192_v6 = vpop.f32.mrf.mxu1 }
0x127a   :  { %v3104_v31 = vmul.f32 %v3100_v17, %v3082_v14  ;;  %v3099_v32 = vmul.f32 0.044715, %v3077_v18  ;;  %v3092_v11 = vadd.f32 %v4192_v6, %v3616_v10  ;;  %v3095_v45 = vmul.f32 0.5, %v3077_v18 }
0x127b   :  { %v3086_v33 = vpop.f32.mrf.mxu1 }
0x127c   :  { %v3108_v34 = vmul.f32 %v3104_v31, %v3082_v14  ;;  %v3103_v35 = vmul.f32 %v3099_v32, %v3077_v18  ;;  %v3102_v36 = vmul.f32 0.044715, %v3092_v11  ;;  %v3087_v37 = vadd.f32 %v3616_v10, %v3086_v33 }
0x127d   :  { %v3098_v29 = vmul.f32 0.5, %v3092_v11 }
0x127e   :  { %v3112_v38 = vadd.f32 %v3108_v34, %v3082_v14  ;;  %v3106_v13 = vmul.f32 %v3102_v36, %v3092_v11  ;;  %v3101_v39 = vmul.f32 0.044715, %v3087_v37  ;;  %v3107_v21 = vmul.f32 %v3103_v35, %v3077_v18 }
0x127f   :  { %v3097_v12 = vmul.f32 0.5, %v3087_v37 }
0x1280   :  { %v3116_v23 = vmul.f32 0.7978846, %v3112_v38  ;;  %v3105_v3 = vmul.f32 %v3101_v39, %v3087_v37  ;;  %v3111_v28 = vadd.f32 %v3107_v21, %v3077_v18  ;;  %v3110_v42 = vmul.f32 %v3106_v13, %v3092_v11  ;;  %v3320_v21 = vld [vmem:[%s5251_s23 + $0x18] sm:$0xff] }
0x1281   :  { %4231 = vmatprep.subr.mxu1 %v3320_v21 }
0x1282   :  { %4325 = vtanh.f32 %v3116_v23  ;;  %v3115_v20 = vmul.f32 0.7978846, %v3111_v28  ;;  %v3109_v43 = vmul.f32 %v3105_v3, %v3087_v37  ;;  %v3114_v4 = vadd.f32 %v3110_v42, %v3092_v11  ;;  %v3319_v23 = vld [vmem:[%s5251_s23 + $0x10] sm:$0xff]  ;;  %4232 = vmatpush3.msra.mxu1 %v3320_v21  ;;  %v3318_v3 = vld [vmem:[%s5251_s23 + $0x8] sm:$0xff]  ;;  %v3317_v28 = vld [vmem:[%s5251_s23] sm:$0xff] }
0x1283   :  { %4233 = vmatprep.subr.mxu1 %v3319_v23 }
0x1284   :  { %4327 = vtanh.f32 %v3115_v20  ;;  %v3113_v22 = vadd.f32 %v3109_v43, %v3087_v37  ;;  %v3118_v44 = vmul.f32 0.7978846, %v3114_v4  ;;  %4234 = vmatpush3.msra.mxu1 %v3319_v23 }
0x1285   :  { %4235 = vmatprep.subr.mxu1 %v3318_v3 }
0x1286   :  { %v3117_v7 = vmul.f32 0.7978846, %v3113_v22  ;;  %4329 = vtanh.f32 %v3118_v44  ;;  %4236 = vmatpush3.msra.mxu1 %v3318_v3 }
0x1287   :  { %4237 = vmatprep.subr.mxu1 %v3317_v28 }
0x1288   :  { %4331 = vtanh.f32 %v3117_v7  ;;  %4238 = vmatpush3.msra.mxu1 %v3317_v28 }
0x128f   :  { %v4326_v26 = vpop.eup %4325 }
0x1290   :  { %v3124_v27 = vadd.f32 1.0, %v4326_v26 }
0x1291   :  { %v4328_v8 = vpop.eup %4327 }
0x1292   :  { %v3123_v46 = vadd.f32 1.0, %v4328_v8  ;;  %v3128_v51 = vmul.f32 %v3124_v27, %v3096_v48 }
0x1293   :  { %v4330_v47 = vpop.eup %4329 }
0x1294   :  { %v3127_v49 = vmul.f32 %v3123_v46, %v3095_v45  ;;  %v3126_v52 = vadd.f32 1.0, %v4330_v47 }
0x1295   :  { %v4332_v50 = vpop.eup %4331 }
0x1296   :  { %4225 = vmatprep.mubr.f32.mxu0 %v3127_v49  ;;  %v3125_v30 = vadd.f32 1.0, %v4332_v50  ;;  %v3130_v55 = vmul.f32 %v3126_v52, %v3098_v29  ;;  %v3622_v49 = vld [vmem:[%s5252_s21] ss:$0 sm:$0xff] }
0x1297   :  { %4226 = vmatmul.mubr.f32.vlgmr.msra.gmra.mxu0 %v3128_v51 }
0x1298   :  { %v3129_v40 = vmul.f32 %v3125_v30, %v3097_v12  ;;  %v3623_v30 = vld [vmem:[%s5253_s22] ss:$0 sm:$0xff] }
0x129a   :  { %4228 = vmatprep.mubr.f32.mxu0 %v3129_v40 }
0x129b   :  { %4229 = vmatmul.mubr.f32.gmra.mxu0 %v3130_v55 }
0x1357   :  { %v4227_v41 = vpop.f32.mrf.mxu0 }
0x1358   :  { %v3226_v16 = vadd.f32 %v4227_v41, %v3621_v56 }
0x1359   :  { %v3220_v57 = vpop.f32.mrf.mxu0 }
0x135a   :  { %v3221_v25 = vadd.f32 %v3621_v56, %v3220_v57  ;;  %v3240_v0 = vadd.f32 %v3226_v16, %v5076_v53 }
0x135b   :  { %v4230_v58 = vpop.f32.mrf.mxu0 }
0x135c   :  { %v3236_v59 = vadd.f32 %v4230_v58, %v3621_v56  ;;  %v3248_v60 = vsel %vm95_vm0, %v3240_v0, 0.0  ;;  %v3239_v24 = vadd.f32 %v3221_v25, %v5080_v54 }
0x135d   :  { %3249 = vadd.xlane.f32.xlu1 %v3248_v60  ;;  %v3230_v61 = vpop.f32.mrf.mxu0 }
0x135e   :  { %v3231_v62 = vadd.f32 %v3621_v56, %v3230_v61  ;;  %v3245_v1 = vsel %vm95_vm0, %v3239_v24, 0.0  ;;  %v3242_v5 = vadd.f32 %v3236_v59, %v5086_v19  ;;  %v3624_v59 = vld [vmem:[%s5254_s24] ss:$0 sm:$0xff] }
0x135f   :  { %3246 = vadd.xlane.f32.xlu0 %v3245_v1 }
0x1360   :  { %v3254_v9 = vsel %vm95_vm0, %v3242_v5, 0.0  ;;  %v3241_v10 = vadd.f32 %v3231_v62, %v5091_v15 }
0x1361   :  { %3255 = vadd.xlane.f32.xlu1 %v3254_v9 }
0x1362   :  { %v3251_v53 = vsel %vm95_vm0, %v3241_v10, 0.0 }
0x1363   :  { %3252 = vadd.xlane.f32.xlu0 %v3251_v53 }
0x13e6   :  { %v3250_v63 = vpop.xlane.xlu1 %3249 }
0x13e7   :  { %v3258_v14 = vmul.f32 0.03125, %v3250_v63 }
0x13e8   :  { %v3247_v2 = vpop.xlane.xlu0 %3246 }
0x13e9   :  { %v3262_v54 = vsub.f32 %v3240_v0, %v3258_v14  ;;  %v3257_v17 = vmul.f32 0.03125, %v3247_v2 }
0x13ea   :  { %v3256_v18 = vpop.xlane.xlu1 %3255 }
0x13eb   :  { %v3261_v6 = vsub.f32 %v3239_v24, %v3257_v17  ;;  %v3260_v31 = vmul.f32 0.03125, %v3256_v18  ;;  %v3266_v32 = vmul.f32 %v3262_v54, %v3262_v54 }
0x13ec   :  { %v3253_v11 = vpop.xlane.xlu0 %3252 }
0x13ed   :  { %v3264_v19 = vsub.f32 %v3242_v5, %v3260_v31  ;;  %v3259_v33 = vmul.f32 0.03125, %v3253_v11  ;;  %v3272_v34 = vsel %vm95_vm0, %v3266_v32, 0.0  ;;  %v3265_v35 = vmul.f32 %v3261_v6, %v3261_v6 }
0x13ee   :  { %3273 = vadd.xlane.f32.xlu1 %v3272_v34 }
0x13ef   :  { %v3263_v15 = vsub.f32 %v3241_v10, %v3259_v33  ;;  %v3269_v36 = vsel %vm95_vm0, %v3265_v35, 0.0  ;;  %v3268_v37 = vmul.f32 %v3264_v19, %v3264_v19 }
0x13f0   :  { %3270 = vadd.xlane.f32.xlu0 %v3269_v36 }
0x13f1   :  { %v3278_v38 = vsel %vm95_vm0, %v3268_v37, 0.0  ;;  %v3267_v13 = vmul.f32 %v3263_v15, %v3263_v15 }
0x13f2   :  { %3279 = vadd.xlane.f32.xlu1 %v3278_v38 }
0x13f3   :  { %v3275_v39 = vsel %vm95_vm0, %v3267_v13, 0.0 }
0x13f4   :  { %3276 = vadd.xlane.f32.xlu0 %v3275_v39 }
0x1477   :  { %v3274_v42 = vpop.xlane.xlu1 %3273 }
0x1478   :  { %v3282_v20 = vmul.f32 0.03125, %v3274_v42 }
0x1479   :  { %v3271_v43 = vpop.xlane.xlu0 %3270 }
0x147a   :  { %v3286_v4 = vadd.f32 1e-05, %v3282_v20  ;;  %v3281_v22 = vmul.f32 0.03125, %v3271_v43 }
0x147b   :  { %v3280_v44 = vpop.xlane.xlu1 %3279 }
0x147c   :  { %4333 = vrsqrt.f32 %v3286_v4  ;;  %v3285_v7 = vadd.f32 1e-05, %v3281_v22  ;;  %v3284_v26 = vmul.f32 0.03125, %v3280_v44 }
0x147d   :  { %v3277_v8 = vpop.xlane.xlu0 %3276 }
0x147e   :  { %4335 = vrsqrt.f32 %v3285_v7  ;;  %v3288_v27 = vadd.f32 1e-05, %v3284_v26  ;;  %v3283_v45 = vmul.f32 0.03125, %v3277_v8 }
0x1480   :  { %4337 = vrsqrt.f32 %v3288_v27  ;;  %v3287_v46 = vadd.f32 1e-05, %v3283_v45 }
0x1482   :  { %4339 = vrsqrt.f32 %v3287_v46 }
0x1489   :  { %v4334_v47 = vpop.eup %4333 }
0x148a   :  { %v3294_v48 = vmul.f32 %v4334_v47, %v3262_v54 }
0x148b   :  { %v4336_v50 = vpop.eup %4335 }
0x148c   :  { %v3293_v51 = vmul.f32 %v4336_v50, %v3261_v6  ;;  %v3304_v12 = vmul.f32 %v3622_v49, %v3294_v48 }
0x148d   :  { %v4338_v52 = vpop.eup %4337 }
0x148e   :  { %v3303_v29 = vmul.f32 %v3622_v49, %v3293_v51  ;;  %v3296_v40 = vmul.f32 %v4338_v52, %v3264_v19  ;;  %v3314_v16 = vadd.f32 %v3623_v30, %v3304_v12 }
0x148f   :  { %v4340_v55 = vpop.eup %4339 }
0x1490   :  { %v3313_v56 = vadd.f32 %v3623_v30, %v3303_v29  ;;  %v3295_v41 = vmul.f32 %v4340_v55, %v3263_v15  ;;  %v3306_v57 = vmul.f32 %v3622_v49, %v3296_v40 }
0x1492   :  { %4239 = vmatprep.mubr.msk.f32.mxu1 %vm95_vm0, %v3313_v56  ;;  %v3305_v25 = vmul.f32 %v3622_v49, %v3295_v41  ;;  %v3316_v58 = vadd.f32 %v3623_v30, %v3306_v57 }
0x1493   :  { %4240 = vmatmul.mubr.msk.f32.vlgmr.msra.gmra.mxu1 %vm95_vm0, %v3314_v16 }
0x1494   :  { %v3315_v0 = vadd.f32 %v3623_v30, %v3305_v25 }
0x1496   :  { %4242 = vmatprep.mubr.msk.f32.mxu1 %vm95_vm0, %v3315_v0 }
0x1497   :  { %4243 = vmatmul.mubr.msk.f32.gmra.mxu1 %vm95_vm0, %v3316_v58 }
0x1553   :  { %v4241_v60 = vpop.f32.mrf.mxu1 }
0x1554   :  { %v3412_v24 = vadd.f32 %v4241_v60, %v3624_v59 }
0x1555   :  { %v3406_v61 = vpop.f32.mrf.mxu1 }
0x1556   :  { %3427 = vst.msk [vmem:[%s5255_s25 + $0x8] sm:$0xff] %vm3425_vm2, %v3412_v24  ;;  %v3407_v62 = vadd.f32 %v3624_v59, %v3406_v61 }
0x1557   :  { %v4244_v1 = vpop.f32.mrf.mxu1 }
0x1558   :  { %3426 = vst.msk [vmem:[%s5255_s25] sm:$0xff] %vm3425_vm2, %v3407_v62  ;;  %v3422_v5 = vadd.f32 %v4244_v1, %v3624_v59 }
0x1559   :  { %v3416_v9 = vpop.f32.mrf.mxu1 }
0x155a   :  { %3429 = vst.msk [vmem:[%s5255_s25 + $0x18] sm:$0xff] %vm3425_vm2, %v3422_v5  ;;  %v3417_v10 = vadd.f32 %v3624_v59, %v3416_v9 }
0x155c   :  { %3428 = vst.msk [vmem:[%s5255_s25 + $0x10] sm:$0xff] %vm3425_vm2, %v3417_v10 }

</bundles_post_ra>
